<compile_context>
chip_gen: v7x
topology: tpu7x:2x2x1
jax: 0.10.0
libtpu: 0.0.40
codegen_flags: <defaults>
</compile_context>

<pallas_src>
from functools import partial

import numpy as np
import jax
import jax.numpy as jnp
from jax.experimental import pallas as pl
from jax.experimental.pallas import tpu as pltpu


BT = 8  # batch tile: 8 sequences per grid step (sublane multiple -> layout-free flatten)


def _layernorm_f32(x, g, b, eps=1e-5):
    # fp32 compute (matches the fp16-safe LayerNorm subclass); g/b are (1, D).
    xf = x.astype(jnp.float32)
    mu = jnp.mean(xf, axis=-1, keepdims=True)
    var = jnp.mean((xf - mu) ** 2, axis=-1, keepdims=True)
    return (xf - mu) * jax.lax.rsqrt(var + eps) * g + b


def residual_block_kernel(x_ref,
                          ln1_g_ref, ln1_b_ref,
                          wqkv_ref, bqkv_ref,
                          wo_ref, bo_ref,
                          ln2_g_ref, ln2_b_ref,
                          wfc_ref, bfc_ref,
                          wpr_ref, bpr_ref,
                          o_ref,
                          attn_scr,
                          *, n_head):
    S, bt, D = x_ref.shape
    N = S * bt
    hd = D // n_head
    scale = 1.0 / np.sqrt(hd)

    # (S, BT, D) -> (BT*S rows, D): BT == 8 (full sublane tile) so this is layout-free.
    x = x_ref[...].astype(jnp.float32).reshape(N, D)          # rows in (s, b) order

    # ---- ln_1 + fused QKV projection: one MXU call with M = BT*S ----
    xn = _layernorm_f32(x, ln1_g_ref[...], ln1_b_ref[...])
    qkv = jnp.dot(xn.astype(jnp.bfloat16), wqkv_ref[...],
                  preferred_element_type=jnp.float32) + bqkv_ref[...]   # (N, 3D) f32
    qkv = qkv.astype(jnp.bfloat16)

    # ---- put the batch-tile dim in front once (lane dim untouched), so attention is a
    #      leading-batch einsum per head and avoids sublane-strided per-sequence slices.
    qkv_b = pltpu.einshape("sbd->bsd", qkv.reshape(S, bt, 3 * D))       # (BT, S, 3D)

    # ---- multi-head attention; head h's P@V lands in lane slice [h*hd:(h+1)*hd] ----
    # TODO(synk): attn_mask support (module default attn_mask=None is what we implement).
    for h in range(n_head):
        q_h = qkv_b[:, :, h * hd:(h + 1) * hd]
        k_h = qkv_b[:, :, D + h * hd:D + (h + 1) * hd]
        v_h = qkv_b[:, :, 2 * D + h * hd:2 * D + (h + 1) * hd]
        s = jnp.einsum("bqd,bkd->bqk", q_h, k_h,
                       preferred_element_type=jnp.float32) * scale     # (BT, S, S) f32
        s = s - jnp.max(s, axis=-1, keepdims=True)                     # softmax in f32
        p = jnp.exp(s)
        p = p * pl.reciprocal(jnp.sum(p, axis=-1, keepdims=True), approx=True)
        attn_scr[:, :, h * hd:(h + 1) * hd] = jnp.einsum(
            "bqk,bkd->bqd", p.astype(jnp.bfloat16), v_h,
            preferred_element_type=jnp.float32).astype(jnp.bfloat16)

    # ---- single out-projection: full K = D contraction depth, M = BT*S ----
    a = pltpu.einshape("bsd->sbd", attn_scr[...]).reshape(N, D)   # back to (s, b) rows
    x = x + jnp.dot(a, wo_ref[...], preferred_element_type=jnp.float32) + bo_ref[...]

    # ---- ln_2 + MLP (QuickGELU); hidden dim processed in 4 chunks of D columns ----
    xn2 = _layernorm_f32(x, ln2_g_ref[...], ln2_b_ref[...]).astype(jnp.bfloat16)
    F = wfc_ref.shape[1]                 # 4*D
    ck = F // 4
    out = x + bpr_ref[...]               # fold residual + proj bias into the accumulator
    for c in range(4):
        lo, hi = c * ck, (c + 1) * ck
        hid = jnp.dot(xn2, wfc_ref[:, lo:hi],
                      preferred_element_type=jnp.float32) + bfc_ref[:, lo:hi]
        hid = hid.astype(jnp.bfloat16)    # bf16 QuickGELU (v6e/v7x bf16 VPU/EUP)
        act = hid * jax.nn.sigmoid(1.702 * hid)
        out = out + jnp.dot(act, wpr_ref[lo:hi, :],
                            preferred_element_type=jnp.float32)

    o_ref[...] = out.reshape(S, bt, D).astype(o_ref.dtype)


def _kernel_weights(p):
    """Fuse / transpose / bf16-cast the PyTorch-layout parameters for the kernel."""
    D = p["out_w"].shape[0]
    bf16 = jnp.bfloat16
    return (
        p["ln1_g"].reshape(1, D), p["ln1_b"].reshape(1, D),
        # Fused QKV: PyTorch in_proj computes x @ W.T with W = (3D, D) rows [Wq; Wk; Wv].
        p["in_proj_w"].T.astype(bf16),                  # (D, 3D)
        p["in_proj_b"].reshape(1, 3 * D),
        # Out-projection y = cat(heads) @ Wo.T; the attention scratch concatenates heads
        # in the same order along its lane dim, so a flat (D, D) matrix is used directly.
        p["out_w"].T.astype(bf16),                      # (D, D)
        p["out_b"].reshape(1, D),
        p["ln2_g"].reshape(1, D), p["ln2_b"].reshape(1, D),
        p["fc_w"].T.astype(bf16), p["fc_b"].reshape(1, 4 * D),
        p["pr_w"].T.astype(bf16), p["pr_b"].reshape(1, D),
    )


def _vmem_limit_bytes(S, D, weight_bytes):
    """Residency-based scoped-VMEM request, clamped to 3/4 of physical VMEM."""
    N = S * BT
    io_blocks = 2 * 2 * S * BT * D * 4          # x + out blocks, double-buffered, f32
    scratch = BT * S * D * 2                     # attention head-output scratch (bf16)
    acts = (4 * N * D * 4                        # x / xn / accumulator / misc (f32)
            + 2 * N * 3 * D * 2                  # qkv and its transposed copy (bf16)
            + 2 * BT * S * S * 4                 # one head's scores + probs (f32)
            + N * D * 4)                         # one MLP hidden chunk (f32)
    want = weight_bytes + io_blocks + scratch + acts + (16 << 20)   # + fixed margin
    try:
        cap = int(pltpu.get_tpu_info().vmem_capacity_bytes)
    except Exception:
        cap = 128 << 20
    return max(32 << 20, min(int(want), cap * 3 // 4))


def residual_attention_block(x_sbd, params, n_head):
    """x_sbd: (seq, batch, d_model), PyTorch layout.  Returns same shape/dtype."""
    S, B, D = x_sbd.shape
    kw = _kernel_weights(params)

    # Pad batch to a multiple of the batch tile; padded sequences are independent
    # (attention is per-sequence) and are sliced off below.
    B_pad = ((B + BT - 1) // BT) * BT
    x_in = x_sbd if B_pad == B else jnp.pad(x_sbd, ((0, 0), (0, B_pad - B), (0, 0)))

    weight_bytes = sum(int(w.size) * w.dtype.itemsize for w in kw)
    vmem_limit = _vmem_limit_bytes(S, D, weight_bytes)

    def build_and_run(single_buffer_weights):
        def wspec(arr):
            nd = arr.ndim
            kwargs = ({"pipeline_mode": pl.Buffered(1)}   # constant index_map: 1 buffer
                      if single_buffer_weights else {})
            return pl.BlockSpec(arr.shape, lambda g, _nd=nd: (0,) * _nd, **kwargs)

        io_spec = pl.BlockSpec((S, BT, D), lambda g: (0, g, 0))
        return pl.pallas_call(
            partial(residual_block_kernel, n_head=n_head),
            out_shape=jax.ShapeDtypeStruct((S, B_pad, D), x_sbd.dtype),
            grid=(B_pad // BT,),
            in_specs=[io_spec] + [wspec(w) for w in kw],
            out_specs=pl.BlockSpec((S, BT, D), lambda g: (0, g, 0)),
            scratch_shapes=[pltpu.VMEM((BT, S, D), jnp.bfloat16)],
            compiler_params=pltpu.CompilerParams(
                dimension_semantics=("parallel",),        # batch tiles are independent
                vmem_limit_bytes=vmem_limit),
        )(x_in, *kw)

    try:
        out = build_and_run(True)
    except Exception:
        # Fallback for jax builds without BlockSpec(pipeline_mode=...) / pl.Buffered.
        out = build_and_run(False)

    return out if B_pad == B else out[:, :B, :]


def make_params(key, d_model):
    """PyTorch-layout parameters for the block."""
    ks = jax.random.split(key, 12)
    D = d_model
    rnd = lambda k, shape: 0.02 * jax.random.normal(k, shape, jnp.float32)
    return {
        "ln1_g": 1.0 + 0.05 * jax.random.normal(ks[8], (D,), jnp.float32),
        "ln1_b": 0.05 * jax.random.normal(ks[9], (D,), jnp.float32),
        "ln2_g": 1.0 + 0.05 * jax.random.normal(ks[10], (D,), jnp.float32),
        "ln2_b": 0.05 * jax.random.normal(ks[11], (D,), jnp.float32),
        "in_proj_w": rnd(ks[0], (3 * D, D)),
        "in_proj_b": rnd(ks[1], (3 * D,)),
        "out_w": rnd(ks[2], (D, D)),
        "out_b": rnd(ks[3], (D,)),
        "fc_w": rnd(ks[4], (4 * D, D)),
        "fc_b": rnd(ks[5], (4 * D,)),
        "pr_w": rnd(ks[6], (D, 4 * D)),
        "pr_b": rnd(ks[7], (D,)),
    }


def reference(x, p, n_head):
    """Pure-JAX fp32 reference matching nn.MultiheadAttention / the block's forward."""
    S, B, D = x.shape
    hd = D // n_head
    hp = jax.lax.Precision.HIGHEST

    def ln(v, g, b):
        mu = v.mean(-1, keepdims=True)
        var = ((v - mu) ** 2).mean(-1, keepdims=True)
        return (v - mu) / jnp.sqrt(var + 1e-5) * g + b

    xn = ln(x, p["ln1_g"], p["ln1_b"])
    qkv = jnp.einsum("sbd,ed->sbe", xn, p["in_proj_w"], precision=hp) + p["in_proj_b"]
    q, k, v = qkv[..., :D], qkv[..., D:2 * D], qkv[..., 2 * D:]
    qh = q.reshape(S, B, n_head, hd)
    kh = k.reshape(S, B, n_head, hd)
    vh = v.reshape(S, B, n_head, hd)
    s = jnp.einsum("sbhd,tbhd->bhst", qh, kh, precision=hp) / np.sqrt(hd)
    a = jax.nn.softmax(s, axis=-1)
    o = jnp.einsum("bhst,tbhd->sbhd", a, vh, precision=hp).reshape(S, B, D)
    o = jnp.einsum("sbd,ed->sbe", o, p["out_w"], precision=hp) + p["out_b"]
    x = x + o

    xn2 = ln(x, p["ln2_g"], p["ln2_b"])
    h = jnp.einsum("sbd,fd->sbf", xn2, p["fc_w"], precision=hp) + p["fc_b"]
    h = h * jax.nn.sigmoid(1.702 * h)
    x = x + jnp.einsum("sbf,df->sbd", h, p["pr_w"], precision=hp) + p["pr_b"]
    return x


if __name__ == "__main__":
    d_model, n_head, seq, batch = 32, 4, 8, 2
    key = jax.random.PRNGKey(0)
    kx, kp = jax.random.split(key)

    x = jax.random.normal(kx, (seq, batch, d_model), jnp.float32)   # (L, N, E) like PyTorch
    params = make_params(kp, d_model)

    out = jax.block_until_ready(residual_attention_block(x, params, n_head))
    ref = jax.block_until_ready(reference(x, params, n_head))

    # bf16 matmul operands + bf16 QuickGELU + approx reciprocal -> loosened tolerance.
    np.testing.assert_allclose(np.asarray(out), np.asarray(ref), rtol=2e-2, atol=2e-2)

    print("KERNEL_OK")
</pallas_src>

<mosaic_0001>
module attributes {stable_mosaic.version = 11 : i64} {
  func.func @residual_block_kernel(%arg0: i32, %arg1: memref<8x8x32xf32, #tpu.memory_space<vmem>>, %arg2: memref<1x32xf32, #tpu.memory_space<vmem>>, %arg3: memref<1x32xf32, #tpu.memory_space<vmem>>, %arg4: memref<32x96xbf16, #tpu.memory_space<vmem>>, %arg5: memref<1x96xf32, #tpu.memory_space<vmem>>, %arg6: memref<32x32xbf16, #tpu.memory_space<vmem>>, %arg7: memref<1x32xf32, #tpu.memory_space<vmem>>, %arg8: memref<1x32xf32, #tpu.memory_space<vmem>>, %arg9: memref<1x32xf32, #tpu.memory_space<vmem>>, %arg10: memref<32x128xbf16, #tpu.memory_space<vmem>>, %arg11: memref<1x128xf32, #tpu.memory_space<vmem>>, %arg12: memref<128x32xbf16, #tpu.memory_space<vmem>>, %arg13: memref<1x32xf32, #tpu.memory_space<vmem>>, %arg14: memref<8x8x32xf32, #tpu.memory_space<vmem>>, %arg15: memref<8x8x32xbf16, #tpu.memory_space<vmem>>) attributes {dimension_semantics = [#tpu.dimension_semantics<parallel>], iteration_bounds = array<i64: 1>, scalar_prefetch = 0 : i64, scratch_operands = 1 : i64, tpu.core_type = #tpu.core_type<tc>, window_params = [{transform_indices = @transform_0, window_bounds = array<i64: 8, 8, 32>}, {pipeline_mode = #tpu.pipeline_mode<synchronous>, transform_indices = @transform_1, window_bounds = array<i64: 1, 32>}, {pipeline_mode = #tpu.pipeline_mode<synchronous>, transform_indices = @transform_2, window_bounds = array<i64: 1, 32>}, {pipeline_mode = #tpu.pipeline_mode<synchronous>, transform_indices = @transform_3, window_bounds = array<i64: 32, 96>}, {pipeline_mode = #tpu.pipeline_mode<synchronous>, transform_indices = @transform_4, window_bounds = array<i64: 1, 96>}, {pipeline_mode = #tpu.pipeline_mode<synchronous>, transform_indices = @transform_5, window_bounds = array<i64: 32, 32>}, {pipeline_mode = #tpu.pipeline_mode<synchronous>, transform_indices = @transform_6, window_bounds = array<i64: 1, 32>}, {pipeline_mode = #tpu.pipeline_mode<synchronous>, transform_indices = @transform_7, window_bounds = array<i64: 1, 32>}, {pipeline_mode = #tpu.pipeline_mode<synchronous>, transform_indices = @transform_8, window_bounds = array<i64: 1, 32>}, {pipeline_mode = #tpu.pipeline_mode<synchronous>, transform_indices = @transform_9, window_bounds = array<i64: 32, 128>}, {pipeline_mode = #tpu.pipeline_mode<synchronous>, transform_indices = @transform_10, window_bounds = array<i64: 1, 128>}, {pipeline_mode = #tpu.pipeline_mode<synchronous>, transform_indices = @transform_11, window_bounds = array<i64: 128, 32>}, {pipeline_mode = #tpu.pipeline_mode<synchronous>, transform_indices = @transform_12, window_bounds = array<i64: 1, 32>}, {transform_indices = @transform_13, window_bounds = array<i64: 8, 8, 32>}]} {
    %c0 = arith.constant 0 : index
    %c0_0 = arith.constant 0 : index
    %c0_1 = arith.constant 0 : index
    %0 = vector.load %arg1[%c0, %c0_0, %c0_1] : memref<8x8x32xf32, #tpu.memory_space<vmem>>, vector<8x8x32xf32>
    %1 = vector.shape_cast %0 : vector<8x8x32xf32> to vector<64x32xf32>
    %c0_2 = arith.constant 0 : index
    %c0_3 = arith.constant 0 : index
    %2 = vector.load %arg2[%c0_2, %c0_3] : memref<1x32xf32, #tpu.memory_space<vmem>>, vector<1x32xf32>
    %c0_4 = arith.constant 0 : index
    %c0_5 = arith.constant 0 : index
    %3 = vector.load %arg3[%c0_4, %c0_5] : memref<1x32xf32, #tpu.memory_space<vmem>>, vector<1x32xf32>
    %cst = arith.constant dense<0.000000e+00> : vector<64xf32>
    %4 = vector.multi_reduction <add>, %1, %cst [1] : vector<64x32xf32> to vector<64xf32>
    %5 = vector.shape_cast %4 : vector<64xf32> to vector<64x1xf32>
    %cst_6 = arith.constant 3.200000e+01 : f32
    %6 = vector.broadcast %cst_6 : f32 to vector<64x1xf32>
    %7 = arith.divf %5, %6 : vector<64x1xf32>
    %8 = vector.broadcast %7 : vector<64x1xf32> to vector<64x32xf32>
    %9 = arith.subf %1, %8 : vector<64x32xf32>
    %10 = arith.mulf %9, %9 : vector<64x32xf32>
    %cst_7 = arith.constant dense<0.000000e+00> : vector<64xf32>
    %11 = vector.multi_reduction <add>, %10, %cst_7 [1] : vector<64x32xf32> to vector<64xf32>
    %12 = vector.shape_cast %11 : vector<64xf32> to vector<64x1xf32>
    %cst_8 = arith.constant 3.200000e+01 : f32
    %13 = vector.broadcast %cst_8 : f32 to vector<64x1xf32>
    %14 = arith.divf %12, %13 : vector<64x1xf32>
    %15 = vector.broadcast %7 : vector<64x1xf32> to vector<64x32xf32>
    %16 = arith.subf %1, %15 : vector<64x32xf32>
    %cst_9 = arith.constant 9.99999974E-6 : f32
    %17 = vector.broadcast %cst_9 : f32 to vector<64x1xf32>
    %18 = arith.addf %14, %17 : vector<64x1xf32>
    %19 = math.rsqrt %18 : vector<64x1xf32>
    %20 = vector.broadcast %19 : vector<64x1xf32> to vector<64x32xf32>
    %21 = arith.mulf %16, %20 : vector<64x32xf32>
    %22 = vector.broadcast %2 : vector<1x32xf32> to vector<64x32xf32>
    %23 = arith.mulf %21, %22 : vector<64x32xf32>
    %24 = vector.broadcast %3 : vector<1x32xf32> to vector<64x32xf32>
    %25 = arith.addf %23, %24 : vector<64x32xf32>
    %26 = arith.truncf %25 : vector<64x32xf32> to vector<64x32xbf16>
    %c0_10 = arith.constant 0 : index
    %c0_11 = arith.constant 0 : index
    %27 = vector.load %arg4[%c0_10, %c0_11] : memref<32x96xbf16, #tpu.memory_space<vmem>>, vector<32x96xbf16>
    %cst_12 = arith.constant dense<0.000000e+00> : vector<64x96xf32>
    %28 = tpu.matmul %26, %27, %cst_12 {dimension_numbers = #tpu.dot_dimension_numbers<[1], [0], [0], [1], [0, 0, 1, 1], [], []>} : vector<64x32xbf16>, vector<32x96xbf16>, vector<64x96xf32> -> vector<64x96xf32>
    %c0_13 = arith.constant 0 : index
    %c0_14 = arith.constant 0 : index
    %29 = vector.load %arg5[%c0_13, %c0_14] : memref<1x96xf32, #tpu.memory_space<vmem>>, vector<1x96xf32>
    %30 = vector.broadcast %29 : vector<1x96xf32> to vector<64x96xf32>
    %31 = arith.addf %28, %30 : vector<64x96xf32>
    %32 = arith.truncf %31 : vector<64x96xf32> to vector<64x96xbf16>
    %33 = vector.shape_cast %32 : vector<64x96xbf16> to vector<8x8x96xbf16>
    %34 = tpu.transpose %33, [1, 0, 2] : vector<8x8x96xbf16> -> vector<8x8x96xbf16>
    %35 = vector.extract_strided_slice %34 {offsets = [0, 0, 0], sizes = [8, 8, 8], strides = [1, 1, 1]} : vector<8x8x96xbf16> to vector<8x8x8xbf16>
    %36 = vector.extract_strided_slice %34 {offsets = [0, 0, 32], sizes = [8, 8, 8], strides = [1, 1, 1]} : vector<8x8x96xbf16> to vector<8x8x8xbf16>
    %37 = vector.extract_strided_slice %34 {offsets = [0, 0, 64], sizes = [8, 8, 8], strides = [1, 1, 1]} : vector<8x8x96xbf16> to vector<8x8x8xbf16>
    "tpu.trace_start"() <{level = 10 : i32, message = "bqd,bkd->bqk"}> : () -> ()
    %cst_15 = arith.constant dense<0.000000e+00> : vector<8x8x8xf32>
    %38 = tpu.matmul %35, %36, %cst_15 {dimension_numbers = #tpu.dot_dimension_numbers<[2], [2], [1], [1], [0, 0, 0, 1, 1, 1], [0], [0]>} : vector<8x8x8xbf16>, vector<8x8x8xbf16>, vector<8x8x8xf32> -> vector<8x8x8xf32>
    "tpu.trace_stop"() : () -> ()
    %cst_16 = arith.constant 0.353553385 : f32
    %39 = vector.broadcast %cst_16 : f32 to vector<8x8x8xf32>
    %40 = arith.mulf %38, %39 : vector<8x8x8xf32>
    %cst_17 = arith.constant dense<0xFF800000> : vector<8x8xf32>
    %41 = vector.multi_reduction <maximumf>, %40, %cst_17 [2] : vector<8x8x8xf32> to vector<8x8xf32>
    %42 = vector.shape_cast %41 : vector<8x8xf32> to vector<8x8x1xf32>
    %43 = vector.broadcast %42 : vector<8x8x1xf32> to vector<8x8x8xf32>
    %44 = arith.subf %40, %43 : vector<8x8x8xf32>
    %45 = math.exp %44 : vector<8x8x8xf32>
    %cst_18 = arith.constant dense<0.000000e+00> : vector<8x8xf32>
    %46 = vector.multi_reduction <add>, %45, %cst_18 [2] : vector<8x8x8xf32> to vector<8x8xf32>
    %47 = vector.shape_cast %46 : vector<8x8xf32> to vector<8x8x1xf32>
    %48 = tpu.reciprocal %47 {approx = true} : vector<8x8x1xf32> -> vector<8x8x1xf32>
    %49 = vector.broadcast %48 : vector<8x8x1xf32> to vector<8x8x8xf32>
    %50 = arith.mulf %45, %49 : vector<8x8x8xf32>
    %51 = arith.truncf %50 : vector<8x8x8xf32> to vector<8x8x8xbf16>
    "tpu.trace_start"() <{level = 10 : i32, message = "bqk,bkd->bqd"}> : () -> ()
    %cst_19 = arith.constant dense<0.000000e+00> : vector<8x8x8xf32>
    %52 = tpu.matmul %51, %37, %cst_19 {dimension_numbers = #tpu.dot_dimension_numbers<[2], [1], [1], [2], [0, 0, 0, 1, 1, 2], [0], [0]>} : vector<8x8x8xbf16>, vector<8x8x8xbf16>, vector<8x8x8xf32> -> vector<8x8x8xf32>
    "tpu.trace_stop"() : () -> ()
    %53 = arith.truncf %52 : vector<8x8x8xf32> to vector<8x8x8xbf16>
    %c0_20 = arith.constant 0 : index
    %c0_21 = arith.constant 0 : index
    %c0_22 = arith.constant 0 : index
    %54 = vector.load %arg15[%c0_20, %c0_21, %c0_22] : memref<8x8x32xbf16, #tpu.memory_space<vmem>>, vector<8x8x8xbf16>
    tpu.vector_store %arg15[%c0_20, %c0_21, %c0_22], %53 {strides = array<i32>} : memref<8x8x32xbf16, #tpu.memory_space<vmem>>, vector<8x8x8xbf16>,
    %55 = vector.extract_strided_slice %34 {offsets = [0, 0, 8], sizes = [8, 8, 8], strides = [1, 1, 1]} : vector<8x8x96xbf16> to vector<8x8x8xbf16>
    %56 = vector.extract_strided_slice %34 {offsets = [0, 0, 40], sizes = [8, 8, 8], strides = [1, 1, 1]} : vector<8x8x96xbf16> to vector<8x8x8xbf16>
    %57 = vector.extract_strided_slice %34 {offsets = [0, 0, 72], sizes = [8, 8, 8], strides = [1, 1, 1]} : vector<8x8x96xbf16> to vector<8x8x8xbf16>
    "tpu.trace_start"() <{level = 10 : i32, message = "bqd,bkd->bqk"}> : () -> ()
    %cst_23 = arith.constant dense<0.000000e+00> : vector<8x8x8xf32>
    %58 = tpu.matmul %55, %56, %cst_23 {dimension_numbers = #tpu.dot_dimension_numbers<[2], [2], [1], [1], [0, 0, 0, 1, 1, 1], [0], [0]>} : vector<8x8x8xbf16>, vector<8x8x8xbf16>, vector<8x8x8xf32> -> vector<8x8x8xf32>
    "tpu.trace_stop"() : () -> ()
    %cst_24 = arith.constant 0.353553385 : f32
    %59 = vector.broadcast %cst_24 : f32 to vector<8x8x8xf32>
    %60 = arith.mulf %58, %59 : vector<8x8x8xf32>
    %cst_25 = arith.constant dense<0xFF800000> : vector<8x8xf32>
    %61 = vector.multi_reduction <maximumf>, %60, %cst_25 [2] : vector<8x8x8xf32> to vector<8x8xf32>
    %62 = vector.shape_cast %61 : vector<8x8xf32> to vector<8x8x1xf32>
    %63 = vector.broadcast %62 : vector<8x8x1xf32> to vector<8x8x8xf32>
    %64 = arith.subf %60, %63 : vector<8x8x8xf32>
    %65 = math.exp %64 : vector<8x8x8xf32>
    %cst_26 = arith.constant dense<0.000000e+00> : vector<8x8xf32>
    %66 = vector.multi_reduction <add>, %65, %cst_26 [2] : vector<8x8x8xf32> to vector<8x8xf32>
    %67 = vector.shape_cast %66 : vector<8x8xf32> to vector<8x8x1xf32>
    %68 = tpu.reciprocal %67 {approx = true} : vector<8x8x1xf32> -> vector<8x8x1xf32>
    %69 = vector.broadcast %68 : vector<8x8x1xf32> to vector<8x8x8xf32>
    %70 = arith.mulf %65, %69 : vector<8x8x8xf32>
    %71 = arith.truncf %70 : vector<8x8x8xf32> to vector<8x8x8xbf16>
    "tpu.trace_start"() <{level = 10 : i32, message = "bqk,bkd->bqd"}> : () -> ()
    %cst_27 = arith.constant dense<0.000000e+00> : vector<8x8x8xf32>
    %72 = tpu.matmul %71, %57, %cst_27 {dimension_numbers = #tpu.dot_dimension_numbers<[2], [1], [1], [2], [0, 0, 0, 1, 1, 2], [0], [0]>} : vector<8x8x8xbf16>, vector<8x8x8xbf16>, vector<8x8x8xf32> -> vector<8x8x8xf32>
    "tpu.trace_stop"() : () -> ()
    %73 = arith.truncf %72 : vector<8x8x8xf32> to vector<8x8x8xbf16>
    %c0_28 = arith.constant 0 : index
    %c0_29 = arith.constant 0 : index
    %c8 = arith.constant 8 : index
    %74 = vector.load %arg15[%c0_28, %c0_29, %c8] : memref<8x8x32xbf16, #tpu.memory_space<vmem>>, vector<8x8x8xbf16>
    tpu.vector_store %arg15[%c0_28, %c0_29, %c8], %73 {strides = array<i32>} : memref<8x8x32xbf16, #tpu.memory_space<vmem>>, vector<8x8x8xbf16>,
    %75 = vector.extract_strided_slice %34 {offsets = [0, 0, 16], sizes = [8, 8, 8], strides = [1, 1, 1]} : vector<8x8x96xbf16> to vector<8x8x8xbf16>
    %76 = vector.extract_strided_slice %34 {offsets = [0, 0, 48], sizes = [8, 8, 8], strides = [1, 1, 1]} : vector<8x8x96xbf16> to vector<8x8x8xbf16>
    %77 = vector.extract_strided_slice %34 {offsets = [0, 0, 80], sizes = [8, 8, 8], strides = [1, 1, 1]} : vector<8x8x96xbf16> to vector<8x8x8xbf16>
    "tpu.trace_start"() <{level = 10 : i32, message = "bqd,bkd->bqk"}> : () -> ()
    %cst_30 = arith.constant dense<0.000000e+00> : vector<8x8x8xf32>
    %78 = tpu.matmul %75, %76, %cst_30 {dimension_numbers = #tpu.dot_dimension_numbers<[2], [2], [1], [1], [0, 0, 0, 1, 1, 1], [0], [0]>} : vector<8x8x8xbf16>, vector<8x8x8xbf16>, vector<8x8x8xf32> -> vector<8x8x8xf32>
    "tpu.trace_stop"() : () -> ()
    %cst_31 = arith.constant 0.353553385 : f32
    %79 = vector.broadcast %cst_31 : f32 to vector<8x8x8xf32>
    %80 = arith.mulf %78, %79 : vector<8x8x8xf32>
    %cst_32 = arith.constant dense<0xFF800000> : vector<8x8xf32>
    %81 = vector.multi_reduction <maximumf>, %80, %cst_32 [2] : vector<8x8x8xf32> to vector<8x8xf32>
    %82 = vector.shape_cast %81 : vector<8x8xf32> to vector<8x8x1xf32>
    %83 = vector.broadcast %82 : vector<8x8x1xf32> to vector<8x8x8xf32>
    %84 = arith.subf %80, %83 : vector<8x8x8xf32>
    %85 = math.exp %84 : vector<8x8x8xf32>
    %cst_33 = arith.constant dense<0.000000e+00> : vector<8x8xf32>
    %86 = vector.multi_reduction <add>, %85, %cst_33 [2] : vector<8x8x8xf32> to vector<8x8xf32>
    %87 = vector.shape_cast %86 : vector<8x8xf32> to vector<8x8x1xf32>
    %88 = tpu.reciprocal %87 {approx = true} : vector<8x8x1xf32> -> vector<8x8x1xf32>
    %89 = vector.broadcast %88 : vector<8x8x1xf32> to vector<8x8x8xf32>
    %90 = arith.mulf %85, %89 : vector<8x8x8xf32>
    %91 = arith.truncf %90 : vector<8x8x8xf32> to vector<8x8x8xbf16>
    "tpu.trace_start"() <{level = 10 : i32, message = "bqk,bkd->bqd"}> : () -> ()
    %cst_34 = arith.constant dense<0.000000e+00> : vector<8x8x8xf32>
    %92 = tpu.matmul %91, %77, %cst_34 {dimension_numbers = #tpu.dot_dimension_numbers<[2], [1], [1], [2], [0, 0, 0, 1, 1, 2], [0], [0]>} : vector<8x8x8xbf16>, vector<8x8x8xbf16>, vector<8x8x8xf32> -> vector<8x8x8xf32>
    "tpu.trace_stop"() : () -> ()
    %93 = arith.truncf %92 : vector<8x8x8xf32> to vector<8x8x8xbf16>
    %c0_35 = arith.constant 0 : index
    %c0_36 = arith.constant 0 : index
    %c16 = arith.constant 16 : index
    %94 = vector.load %arg15[%c0_35, %c0_36, %c16] : memref<8x8x32xbf16, #tpu.memory_space<vmem>>, vector<8x8x8xbf16>
    tpu.vector_store %arg15[%c0_35, %c0_36, %c16], %93 {strides = array<i32>} : memref<8x8x32xbf16, #tpu.memory_space<vmem>>, vector<8x8x8xbf16>,
    %95 = vector.extract_strided_slice %34 {offsets = [0, 0, 24], sizes = [8, 8, 8], strides = [1, 1, 1]} : vector<8x8x96xbf16> to vector<8x8x8xbf16>
    %96 = vector.extract_strided_slice %34 {offsets = [0, 0, 56], sizes = [8, 8, 8], strides = [1, 1, 1]} : vector<8x8x96xbf16> to vector<8x8x8xbf16>
    %97 = vector.extract_strided_slice %34 {offsets = [0, 0, 88], sizes = [8, 8, 8], strides = [1, 1, 1]} : vector<8x8x96xbf16> to vector<8x8x8xbf16>
    "tpu.trace_start"() <{level = 10 : i32, message = "bqd,bkd->bqk"}> : () -> ()
    %cst_37 = arith.constant dense<0.000000e+00> : vector<8x8x8xf32>
    %98 = tpu.matmul %95, %96, %cst_37 {dimension_numbers = #tpu.dot_dimension_numbers<[2], [2], [1], [1], [0, 0, 0, 1, 1, 1], [0], [0]>} : vector<8x8x8xbf16>, vector<8x8x8xbf16>, vector<8x8x8xf32> -> vector<8x8x8xf32>
    "tpu.trace_stop"() : () -> ()
    %cst_38 = arith.constant 0.353553385 : f32
    %99 = vector.broadcast %cst_38 : f32 to vector<8x8x8xf32>
    %100 = arith.mulf %98, %99 : vector<8x8x8xf32>
    %cst_39 = arith.constant dense<0xFF800000> : vector<8x8xf32>
    %101 = vector.multi_reduction <maximumf>, %100, %cst_39 [2] : vector<8x8x8xf32> to vector<8x8xf32>
    %102 = vector.shape_cast %101 : vector<8x8xf32> to vector<8x8x1xf32>
    %103 = vector.broadcast %102 : vector<8x8x1xf32> to vector<8x8x8xf32>
    %104 = arith.subf %100, %103 : vector<8x8x8xf32>
    %105 = math.exp %104 : vector<8x8x8xf32>
    %cst_40 = arith.constant dense<0.000000e+00> : vector<8x8xf32>
    %106 = vector.multi_reduction <add>, %105, %cst_40 [2] : vector<8x8x8xf32> to vector<8x8xf32>
    %107 = vector.shape_cast %106 : vector<8x8xf32> to vector<8x8x1xf32>
    %108 = tpu.reciprocal %107 {approx = true} : vector<8x8x1xf32> -> vector<8x8x1xf32>
    %109 = vector.broadcast %108 : vector<8x8x1xf32> to vector<8x8x8xf32>
    %110 = arith.mulf %105, %109 : vector<8x8x8xf32>
    %111 = arith.truncf %110 : vector<8x8x8xf32> to vector<8x8x8xbf16>
    "tpu.trace_start"() <{level = 10 : i32, message = "bqk,bkd->bqd"}> : () -> ()
    %cst_41 = arith.constant dense<0.000000e+00> : vector<8x8x8xf32>
    %112 = tpu.matmul %111, %97, %cst_41 {dimension_numbers = #tpu.dot_dimension_numbers<[2], [1], [1], [2], [0, 0, 0, 1, 1, 2], [0], [0]>} : vector<8x8x8xbf16>, vector<8x8x8xbf16>, vector<8x8x8xf32> -> vector<8x8x8xf32>
    "tpu.trace_stop"() : () -> ()
    %113 = arith.truncf %112 : vector<8x8x8xf32> to vector<8x8x8xbf16>
    %c0_42 = arith.constant 0 : index
    %c0_43 = arith.constant 0 : index
    %c24 = arith.constant 24 : index
    %114 = vector.load %arg15[%c0_42, %c0_43, %c24] : memref<8x8x32xbf16, #tpu.memory_space<vmem>>, vector<8x8x8xbf16>
    tpu.vector_store %arg15[%c0_42, %c0_43, %c24], %113 {strides = array<i32>} : memref<8x8x32xbf16, #tpu.memory_space<vmem>>, vector<8x8x8xbf16>,
    %c0_44 = arith.constant 0 : index
    %c0_45 = arith.constant 0 : index
    %c0_46 = arith.constant 0 : index
    %115 = vector.load %arg15[%c0_44, %c0_45, %c0_46] : memref<8x8x32xbf16, #tpu.memory_space<vmem>>, vector<8x8x32xbf16>
    %116 = tpu.transpose %115, [1, 0, 2] : vector<8x8x32xbf16> -> vector<8x8x32xbf16>
    %117 = vector.shape_cast %116 : vector<8x8x32xbf16> to vector<64x32xbf16>
    %c0_47 = arith.constant 0 : index
    %c0_48 = arith.constant 0 : index
    %118 = vector.load %arg6[%c0_47, %c0_48] : memref<32x32xbf16, #tpu.memory_space<vmem>>, vector<32x32xbf16>
    %cst_49 = arith.constant dense<0.000000e+00> : vector<64x32xf32>
    %119 = tpu.matmul %117, %118, %cst_49 {dimension_numbers = #tpu.dot_dimension_numbers<[1], [0], [0], [1], [0, 0, 1, 1], [], []>} : vector<64x32xbf16>, vector<32x32xbf16>, vector<64x32xf32> -> vector<64x32xf32>
    %120 = arith.addf %1, %119 : vector<64x32xf32>
    %c0_50 = arith.constant 0 : index
    %c0_51 = arith.constant 0 : index
    %121 = vector.load %arg7[%c0_50, %c0_51] : memref<1x32xf32, #tpu.memory_space<vmem>>, vector<1x32xf32>
    %122 = vector.broadcast %121 : vector<1x32xf32> to vector<64x32xf32>
    %123 = arith.addf %120, %122 : vector<64x32xf32>
    %c0_52 = arith.constant 0 : index
    %c0_53 = arith.constant 0 : index
    %124 = vector.load %arg8[%c0_52, %c0_53] : memref<1x32xf32, #tpu.memory_space<vmem>>, vector<1x32xf32>
    %c0_54 = arith.constant 0 : index
    %c0_55 = arith.constant 0 : index
    %125 = vector.load %arg9[%c0_54, %c0_55] : memref<1x32xf32, #tpu.memory_space<vmem>>, vector<1x32xf32>
    %cst_56 = arith.constant dense<0.000000e+00> : vector<64xf32>
    %126 = vector.multi_reduction <add>, %123, %cst_56 [1] : vector<64x32xf32> to vector<64xf32>
    %127 = vector.shape_cast %126 : vector<64xf32> to vector<64x1xf32>
    %cst_57 = arith.constant 3.200000e+01 : f32
    %128 = vector.broadcast %cst_57 : f32 to vector<64x1xf32>
    %129 = arith.divf %127, %128 : vector<64x1xf32>
    %130 = vector.broadcast %129 : vector<64x1xf32> to vector<64x32xf32>
    %131 = arith.subf %123, %130 : vector<64x32xf32>
    %132 = arith.mulf %131, %131 : vector<64x32xf32>
    %cst_58 = arith.constant dense<0.000000e+00> : vector<64xf32>
    %133 = vector.multi_reduction <add>, %132, %cst_58 [1] : vector<64x32xf32> to vector<64xf32>
    %134 = vector.shape_cast %133 : vector<64xf32> to vector<64x1xf32>
    %cst_59 = arith.constant 3.200000e+01 : f32
    %135 = vector.broadcast %cst_59 : f32 to vector<64x1xf32>
    %136 = arith.divf %134, %135 : vector<64x1xf32>
    %137 = vector.broadcast %129 : vector<64x1xf32> to vector<64x32xf32>
    %138 = arith.subf %123, %137 : vector<64x32xf32>
    %cst_60 = arith.constant 9.99999974E-6 : f32
    %139 = vector.broadcast %cst_60 : f32 to vector<64x1xf32>
    %140 = arith.addf %136, %139 : vector<64x1xf32>
    %141 = math.rsqrt %140 : vector<64x1xf32>
    %142 = vector.broadcast %141 : vector<64x1xf32> to vector<64x32xf32>
    %143 = arith.mulf %138, %142 : vector<64x32xf32>
    %144 = vector.broadcast %124 : vector<1x32xf32> to vector<64x32xf32>
    %145 = arith.mulf %143, %144 : vector<64x32xf32>
    %146 = vector.broadcast %125 : vector<1x32xf32> to vector<64x32xf32>
    %147 = arith.addf %145, %146 : vector<64x32xf32>
    %148 = arith.truncf %147 : vector<64x32xf32> to vector<64x32xbf16>
    %c0_61 = arith.constant 0 : index
    %c0_62 = arith.constant 0 : index
    %149 = vector.load %arg13[%c0_61, %c0_62] : memref<1x32xf32, #tpu.memory_space<vmem>>, vector<1x32xf32>
    %150 = vector.broadcast %149 : vector<1x32xf32> to vector<64x32xf32>
    %151 = arith.addf %123, %150 : vector<64x32xf32>
    %c0_63 = arith.constant 0 : index
    %c0_64 = arith.constant 0 : index
    %152 = vector.load %arg10[%c0_63, %c0_64] : memref<32x128xbf16, #tpu.memory_space<vmem>>, vector<32x32xbf16>
    %cst_65 = arith.constant dense<0.000000e+00> : vector<64x32xf32>
    %153 = tpu.matmul %148, %152, %cst_65 {dimension_numbers = #tpu.dot_dimension_numbers<[1], [0], [0], [1], [0, 0, 1, 1], [], []>} : vector<64x32xbf16>, vector<32x32xbf16>, vector<64x32xf32> -> vector<64x32xf32>
    %c0_66 = arith.constant 0 : index
    %c0_67 = arith.constant 0 : index
    %154 = vector.load %arg11[%c0_66, %c0_67] : memref<1x128xf32, #tpu.memory_space<vmem>>, vector<1x32xf32>
    %155 = vector.broadcast %154 : vector<1x32xf32> to vector<64x32xf32>
    %156 = arith.addf %153, %155 : vector<64x32xf32>
    %157 = arith.truncf %156 : vector<64x32xf32> to vector<64x32xbf16>
    %cst_68 = arith.constant 1.703130e+00 : bf16
    %158 = vector.broadcast %cst_68 : bf16 to vector<64x32xbf16>
    %159 = arith.mulf %158, %157 : vector<64x32xbf16>
    %160 = arith.negf %159 : vector<64x32xbf16>
    %161 = math.exp %160 : vector<64x32xbf16>
    %cst_69 = arith.constant 1.000000e+00 : bf16
    %162 = vector.broadcast %cst_69 : bf16 to vector<64x32xbf16>
    %163 = arith.addf %162, %161 : vector<64x32xbf16>
    %164 = arith.divf %162, %163 : vector<64x32xbf16>
    %165 = arith.mulf %157, %164 : vector<64x32xbf16>
    %c0_70 = arith.constant 0 : index
    %c0_71 = arith.constant 0 : index
    %166 = vector.load %arg12[%c0_70, %c0_71] : memref<128x32xbf16, #tpu.memory_space<vmem>>, vector<32x32xbf16>
    %cst_72 = arith.constant dense<0.000000e+00> : vector<64x32xf32>
    %167 = tpu.matmul %165, %166, %cst_72 {dimension_numbers = #tpu.dot_dimension_numbers<[1], [0], [0], [1], [0, 0, 1, 1], [], []>} : vector<64x32xbf16>, vector<32x32xbf16>, vector<64x32xf32> -> vector<64x32xf32>
    %168 = arith.addf %151, %167 : vector<64x32xf32>
    %c0_73 = arith.constant 0 : index
    %c32 = arith.constant 32 : index
    %169 = vector.load %arg10[%c0_73, %c32] : memref<32x128xbf16, #tpu.memory_space<vmem>>, vector<32x32xbf16>
    %cst_74 = arith.constant dense<0.000000e+00> : vector<64x32xf32>
    %170 = tpu.matmul %148, %169, %cst_74 {dimension_numbers = #tpu.dot_dimension_numbers<[1], [0], [0], [1], [0, 0, 1, 1], [], []>} : vector<64x32xbf16>, vector<32x32xbf16>, vector<64x32xf32> -> vector<64x32xf32>
    %c0_75 = arith.constant 0 : index
    %c32_76 = arith.constant 32 : index
    %171 = vector.load %arg11[%c0_75, %c32_76] : memref<1x128xf32, #tpu.memory_space<vmem>>, vector<1x32xf32>
    %172 = vector.broadcast %171 : vector<1x32xf32> to vector<64x32xf32>
    %173 = arith.addf %170, %172 : vector<64x32xf32>
    %174 = arith.truncf %173 : vector<64x32xf32> to vector<64x32xbf16>
    %cst_77 = arith.constant 1.703130e+00 : bf16
    %175 = vector.broadcast %cst_77 : bf16 to vector<64x32xbf16>
    %176 = arith.mulf %175, %174 : vector<64x32xbf16>
    %177 = arith.negf %176 : vector<64x32xbf16>
    %178 = math.exp %177 : vector<64x32xbf16>
    %cst_78 = arith.constant 1.000000e+00 : bf16
    %179 = vector.broadcast %cst_78 : bf16 to vector<64x32xbf16>
    %180 = arith.addf %179, %178 : vector<64x32xbf16>
    %181 = arith.divf %179, %180 : vector<64x32xbf16>
    %182 = arith.mulf %174, %181 : vector<64x32xbf16>
    %c32_79 = arith.constant 32 : index
    %c0_80 = arith.constant 0 : index
    %183 = vector.load %arg12[%c32_79, %c0_80] : memref<128x32xbf16, #tpu.memory_space<vmem>>, vector<32x32xbf16>
    %cst_81 = arith.constant dense<0.000000e+00> : vector<64x32xf32>
    %184 = tpu.matmul %182, %183, %cst_81 {dimension_numbers = #tpu.dot_dimension_numbers<[1], [0], [0], [1], [0, 0, 1, 1], [], []>} : vector<64x32xbf16>, vector<32x32xbf16>, vector<64x32xf32> -> vector<64x32xf32>
    %185 = arith.addf %168, %184 : vector<64x32xf32>
    %c0_82 = arith.constant 0 : index
    %c64 = arith.constant 64 : index
    %186 = vector.load %arg10[%c0_82, %c64] : memref<32x128xbf16, #tpu.memory_space<vmem>>, vector<32x32xbf16>
    %cst_83 = arith.constant dense<0.000000e+00> : vector<64x32xf32>
    %187 = tpu.matmul %148, %186, %cst_83 {dimension_numbers = #tpu.dot_dimension_numbers<[1], [0], [0], [1], [0, 0, 1, 1], [], []>} : vector<64x32xbf16>, vector<32x32xbf16>, vector<64x32xf32> -> vector<64x32xf32>
    %c0_84 = arith.constant 0 : index
    %c64_85 = arith.constant 64 : index
    %188 = vector.load %arg11[%c0_84, %c64_85] : memref<1x128xf32, #tpu.memory_space<vmem>>, vector<1x32xf32>
    %189 = vector.broadcast %188 : vector<1x32xf32> to vector<64x32xf32>
    %190 = arith.addf %187, %189 : vector<64x32xf32>
    %191 = arith.truncf %190 : vector<64x32xf32> to vector<64x32xbf16>
    %cst_86 = arith.constant 1.703130e+00 : bf16
    %192 = vector.broadcast %cst_86 : bf16 to vector<64x32xbf16>
    %193 = arith.mulf %192, %191 : vector<64x32xbf16>
    %194 = arith.negf %193 : vector<64x32xbf16>
    %195 = math.exp %194 : vector<64x32xbf16>
    %cst_87 = arith.constant 1.000000e+00 : bf16
    %196 = vector.broadcast %cst_87 : bf16 to vector<64x32xbf16>
    %197 = arith.addf %196, %195 : vector<64x32xbf16>
    %198 = arith.divf %196, %197 : vector<64x32xbf16>
    %199 = arith.mulf %191, %198 : vector<64x32xbf16>
    %c64_88 = arith.constant 64 : index
    %c0_89 = arith.constant 0 : index
    %200 = vector.load %arg12[%c64_88, %c0_89] : memref<128x32xbf16, #tpu.memory_space<vmem>>, vector<32x32xbf16>
    %cst_90 = arith.constant dense<0.000000e+00> : vector<64x32xf32>
    %201 = tpu.matmul %199, %200, %cst_90 {dimension_numbers = #tpu.dot_dimension_numbers<[1], [0], [0], [1], [0, 0, 1, 1], [], []>} : vector<64x32xbf16>, vector<32x32xbf16>, vector<64x32xf32> -> vector<64x32xf32>
    %202 = arith.addf %185, %201 : vector<64x32xf32>
    %c0_91 = arith.constant 0 : index
    %c96 = arith.constant 96 : index
    %203 = vector.load %arg10[%c0_91, %c96] : memref<32x128xbf16, #tpu.memory_space<vmem>>, vector<32x32xbf16>
    %cst_92 = arith.constant dense<0.000000e+00> : vector<64x32xf32>
    %204 = tpu.matmul %148, %203, %cst_92 {dimension_numbers = #tpu.dot_dimension_numbers<[1], [0], [0], [1], [0, 0, 1, 1], [], []>} : vector<64x32xbf16>, vector<32x32xbf16>, vector<64x32xf32> -> vector<64x32xf32>
    %c0_93 = arith.constant 0 : index
    %c96_94 = arith.constant 96 : index
    %205 = vector.load %arg11[%c0_93, %c96_94] : memref<1x128xf32, #tpu.memory_space<vmem>>, vector<1x32xf32>
    %206 = vector.broadcast %205 : vector<1x32xf32> to vector<64x32xf32>
    %207 = arith.addf %204, %206 : vector<64x32xf32>
    %208 = arith.truncf %207 : vector<64x32xf32> to vector<64x32xbf16>
    %cst_95 = arith.constant 1.703130e+00 : bf16
    %209 = vector.broadcast %cst_95 : bf16 to vector<64x32xbf16>
    %210 = arith.mulf %209, %208 : vector<64x32xbf16>
    %211 = arith.negf %210 : vector<64x32xbf16>
    %212 = math.exp %211 : vector<64x32xbf16>
    %cst_96 = arith.constant 1.000000e+00 : bf16
    %213 = vector.broadcast %cst_96 : bf16 to vector<64x32xbf16>
    %214 = arith.addf %213, %212 : vector<64x32xbf16>
    %215 = arith.divf %213, %214 : vector<64x32xbf16>
    %216 = arith.mulf %208, %215 : vector<64x32xbf16>
    %c96_97 = arith.constant 96 : index
    %c0_98 = arith.constant 0 : index
    %217 = vector.load %arg12[%c96_97, %c0_98] : memref<128x32xbf16, #tpu.memory_space<vmem>>, vector<32x32xbf16>
    %cst_99 = arith.constant dense<0.000000e+00> : vector<64x32xf32>
    %218 = tpu.matmul %216, %217, %cst_99 {dimension_numbers = #tpu.dot_dimension_numbers<[1], [0], [0], [1], [0, 0, 1, 1], [], []>} : vector<64x32xbf16>, vector<32x32xbf16>, vector<64x32xf32> -> vector<64x32xf32>
    %219 = arith.addf %202, %218 : vector<64x32xf32>
    %220 = vector.shape_cast %219 : vector<64x32xf32> to vector<8x8x32xf32>
    %c0_100 = arith.constant 0 : index
    %c0_101 = arith.constant 0 : index
    %c0_102 = arith.constant 0 : index
    %221 = vector.load %arg14[%c0_100, %c0_101, %c0_102] : memref<8x8x32xf32, #tpu.memory_space<vmem>>, vector<8x8x32xf32>
    tpu.vector_store %arg14[%c0_100, %c0_101, %c0_102], %220 {strides = array<i32>} : memref<8x8x32xf32, #tpu.memory_space<vmem>>, vector<8x8x32xf32>,
    return
  }
  func.func @transform_0(%arg0: i32) -> (i32, i32, i32) {
    %c0_i32 = arith.constant 0 : i32
    %c0_i32_0 = arith.constant 0 : i32
    %c0_i32_1 = arith.constant 0 : i32
    return %c0_i32, %arg0, %c0_i32_0 : i32, i32, i32
  }
  func.func @transform_1(%arg0: i32) -> (i32, i32) {
    %c0_i32 = arith.constant 0 : i32
    %c0_i32_0 = arith.constant 0 : i32
    %c0_i32_1 = arith.constant 0 : i32
    return %c0_i32, %c0_i32_0 : i32, i32
  }
  func.func @transform_2(%arg0: i32) -> (i32, i32) {
    %c0_i32 = arith.constant 0 : i32
    %c0_i32_0 = arith.constant 0 : i32
    %c0_i32_1 = arith.constant 0 : i32
    return %c0_i32, %c0_i32_0 : i32, i32
  }
  func.func @transform_3(%arg0: i32) -> (i32, i32) {
    %c0_i32 = arith.constant 0 : i32
    %c0_i32_0 = arith.constant 0 : i32
    %c0_i32_1 = arith.constant 0 : i32
    return %c0_i32, %c0_i32_0 : i32, i32
  }
  func.func @transform_4(%arg0: i32) -> (i32, i32) {
    %c0_i32 = arith.constant 0 : i32
    %c0_i32_0 = arith.constant 0 : i32
    %c0_i32_1 = arith.constant 0 : i32
    return %c0_i32, %c0_i32_0 : i32, i32
  }
  func.func @transform_5(%arg0: i32) -> (i32, i32) {
    %c0_i32 = arith.constant 0 : i32
    %c0_i32_0 = arith.constant 0 : i32
    %c0_i32_1 = arith.constant 0 : i32
    return %c0_i32, %c0_i32_0 : i32, i32
  }
  func.func @transform_6(%arg0: i32) -> (i32, i32) {
    %c0_i32 = arith.constant 0 : i32
    %c0_i32_0 = arith.constant 0 : i32
    %c0_i32_1 = arith.constant 0 : i32
    return %c0_i32, %c0_i32_0 : i32, i32
  }
  func.func @transform_7(%arg0: i32) -> (i32, i32) {
    %c0_i32 = arith.constant 0 : i32
    %c0_i32_0 = arith.constant 0 : i32
    %c0_i32_1 = arith.constant 0 : i32
    return %c0_i32, %c0_i32_0 : i32, i32
  }
  func.func @transform_8(%arg0: i32) -> (i32, i32) {
    %c0_i32 = arith.constant 0 : i32
    %c0_i32_0 = arith.constant 0 : i32
    %c0_i32_1 = arith.constant 0 : i32
    return %c0_i32, %c0_i32_0 : i32, i32
  }
  func.func @transform_9(%arg0: i32) -> (i32, i32) {
    %c0_i32 = arith.constant 0 : i32
    %c0_i32_0 = arith.constant 0 : i32
    %c0_i32_1 = arith.constant 0 : i32
    return %c0_i32, %c0_i32_0 : i32, i32
  }
  func.func @transform_10(%arg0: i32) -> (i32, i32) {
    %c0_i32 = arith.constant 0 : i32
    %c0_i32_0 = arith.constant 0 : i32
    %c0_i32_1 = arith.constant 0 : i32
    return %c0_i32, %c0_i32_0 : i32, i32
  }
  func.func @transform_11(%arg0: i32) -> (i32, i32) {
    %c0_i32 = arith.constant 0 : i32
    %c0_i32_0 = arith.constant 0 : i32
    %c0_i32_1 = arith.constant 0 : i32
    return %c0_i32, %c0_i32_0 : i32, i32
  }
  func.func @transform_12(%arg0: i32) -> (i32, i32) {
    %c0_i32 = arith.constant 0 : i32
    %c0_i32_0 = arith.constant 0 : i32
    %c0_i32_1 = arith.constant 0 : i32
    return %c0_i32, %c0_i32_0 : i32, i32
  }
  func.func @transform_13(%arg0: i32) -> (i32, i32, i32) {
    %c0_i32 = arith.constant 0 : i32
    %c0_i32_0 = arith.constant 0 : i32
    %c0_i32_1 = arith.constant 0 : i32
    return %c0_i32, %arg0, %c0_i32_0 : i32, i32, i32
  }
}

module attributes {stable_mosaic.version = 11 : i64} {
  func.func @residual_block_kernel(%arg0: i32, %arg1: memref<8x8x32xf32, #tpu.memory_space<vmem>>, %arg2: memref<1x32xf32, #tpu.memory_space<vmem>>, %arg3: memref<1x32xf32, #tpu.memory_space<vmem>>, %arg4: memref<32x96xbf16, #tpu.memory_space<vmem>>, %arg5: memref<1x96xf32, #tpu.memory_space<vmem>>, %arg6: memref<32x32xbf16, #tpu.memory_space<vmem>>, %arg7: memref<1x32xf32, #tpu.memory_space<vmem>>, %arg8: memref<1x32xf32, #tpu.memory_space<vmem>>, %arg9: memref<1x32xf32, #tpu.memory_space<vmem>>, %arg10: memref<32x128xbf16, #tpu.memory_space<vmem>>, %arg11: memref<1x128xf32, #tpu.memory_space<vmem>>, %arg12: memref<128x32xbf16, #tpu.memory_space<vmem>>, %arg13: memref<1x32xf32, #tpu.memory_space<vmem>>, %arg14: memref<8x8x32xf32, #tpu.memory_space<vmem>>, %arg15: memref<8x8x32xbf16, #tpu.memory_space<vmem>>) attributes {dimension_semantics = [#tpu.dimension_semantics<parallel>], iteration_bounds = array<i64: 1>, scalar_prefetch = 0 : i64, scratch_operands = 1 : i64, tpu.core_type = #tpu.core_type<tc>, window_params = [{transform_indices = @transform_0, window_bounds = array<i64: 8, 8, 32>}, {pipeline_mode = #tpu.pipeline_mode<synchronous>, transform_indices = @transform_1, window_bounds = array<i64: 1, 32>}, {pipeline_mode = #tpu.pipeline_mode<synchronous>, transform_indices = @transform_2, window_bounds = array<i64: 1, 32>}, {pipeline_mode = #tpu.pipeline_mode<synchronous>, transform_indices = @transform_3, window_bounds = array<i64: 32, 96>}, {pipeline_mode = #tpu.pipeline_mode<synchronous>, transform_indices = @transform_4, window_bounds = array<i64: 1, 96>}, {pipeline_mode = #tpu.pipeline_mode<synchronous>, transform_indices = @transform_5, window_bounds = array<i64: 32, 32>}, {pipeline_mode = #tpu.pipeline_mode<synchronous>, transform_indices = @transform_6, window_bounds = array<i64: 1, 32>}, {pipeline_mode = #tpu.pipeline_mode<synchronous>, transform_indices = @transform_7, window_bounds = array<i64: 1, 32>}, {pipeline_mode = #tpu.pipeline_mode<synchronous>, transform_indices = @transform_8, window_bounds = array<i64: 1, 32>}, {pipeline_mode = #tpu.pipeline_mode<synchronous>, transform_indices = @transform_9, window_bounds = array<i64: 32, 128>}, {pipeline_mode = #tpu.pipeline_mode<synchronous>, transform_indices = @transform_10, window_bounds = array<i64: 1, 128>}, {pipeline_mode = #tpu.pipeline_mode<synchronous>, transform_indices = @transform_11, window_bounds = array<i64: 128, 32>}, {pipeline_mode = #tpu.pipeline_mode<synchronous>, transform_indices = @transform_12, window_bounds = array<i64: 1, 32>}, {transform_indices = @transform_13, window_bounds = array<i64: 8, 8, 32>}]} {
    %c0 = arith.constant 0 : index
    %c0_0 = arith.constant 0 : index
    %c0_1 = arith.constant 0 : index
    %0 = vector.load %arg1[%c0, %c0_0, %c0_1] : memref<8x8x32xf32, #tpu.memory_space<vmem>>, vector<8x8x32xf32>
    %1 = vector.shape_cast %0 : vector<8x8x32xf32> to vector<64x32xf32>
    %c0_2 = arith.constant 0 : index
    %c0_3 = arith.constant 0 : index
    %2 = vector.load %arg2[%c0_2, %c0_3] : memref<1x32xf32, #tpu.memory_space<vmem>>, vector<1x32xf32>
    %c0_4 = arith.constant 0 : index
    %c0_5 = arith.constant 0 : index
    %3 = vector.load %arg3[%c0_4, %c0_5] : memref<1x32xf32, #tpu.memory_space<vmem>>, vector<1x32xf32>
    %cst = arith.constant dense<0.000000e+00> : vector<64xf32>
    %4 = vector.multi_reduction <add>, %1, %cst [1] : vector<64x32xf32> to vector<64xf32>
    %5 = vector.shape_cast %4 : vector<64xf32> to vector<64x1xf32>
    %cst_6 = arith.constant 3.200000e+01 : f32
    %6 = vector.broadcast %cst_6 : f32 to vector<64x1xf32>
    %7 = arith.divf %5, %6 : vector<64x1xf32>
    %8 = vector.broadcast %7 : vector<64x1xf32> to vector<64x32xf32>
    %9 = arith.subf %1, %8 : vector<64x32xf32>
    %10 = arith.mulf %9, %9 : vector<64x32xf32>
    %cst_7 = arith.constant dense<0.000000e+00> : vector<64xf32>
    %11 = vector.multi_reduction <add>, %10, %cst_7 [1] : vector<64x32xf32> to vector<64xf32>
    %12 = vector.shape_cast %11 : vector<64xf32> to vector<64x1xf32>
    %cst_8 = arith.constant 3.200000e+01 : f32
    %13 = vector.broadcast %cst_8 : f32 to vector<64x1xf32>
    %14 = arith.divf %12, %13 : vector<64x1xf32>
    %15 = vector.broadcast %7 : vector<64x1xf32> to vector<64x32xf32>
    %16 = arith.subf %1, %15 : vector<64x32xf32>
    %cst_9 = arith.constant 9.99999974E-6 : f32
    %17 = vector.broadcast %cst_9 : f32 to vector<64x1xf32>
    %18 = arith.addf %14, %17 : vector<64x1xf32>
    %19 = math.rsqrt %18 : vector<64x1xf32>
    %20 = vector.broadcast %19 : vector<64x1xf32> to vector<64x32xf32>
    %21 = arith.mulf %16, %20 : vector<64x32xf32>
    %22 = vector.broadcast %2 : vector<1x32xf32> to vector<64x32xf32>
    %23 = arith.mulf %21, %22 : vector<64x32xf32>
    %24 = vector.broadcast %3 : vector<1x32xf32> to vector<64x32xf32>
    %25 = arith.addf %23, %24 : vector<64x32xf32>
    %26 = arith.truncf %25 : vector<64x32xf32> to vector<64x32xbf16>
    %c0_10 = arith.constant 0 : index
    %c0_11 = arith.constant 0 : index
    %27 = vector.load %arg4[%c0_10, %c0_11] : memref<32x96xbf16, #tpu.memory_space<vmem>>, vector<32x96xbf16>
    %cst_12 = arith.constant dense<0.000000e+00> : vector<64x96xf32>
    %28 = tpu.matmul %26, %27, %cst_12 {dimension_numbers = #tpu.dot_dimension_numbers<[1], [0], [0], [1], [0, 0, 1, 1], [], []>} : vector<64x32xbf16>, vector<32x96xbf16>, vector<64x96xf32> -> vector<64x96xf32>
    %c0_13 = arith.constant 0 : index
    %c0_14 = arith.constant 0 : index
    %29 = vector.load %arg5[%c0_13, %c0_14] : memref<1x96xf32, #tpu.memory_space<vmem>>, vector<1x96xf32>
    %30 = vector.broadcast %29 : vector<1x96xf32> to vector<64x96xf32>
    %31 = arith.addf %28, %30 : vector<64x96xf32>
    %32 = arith.truncf %31 : vector<64x96xf32> to vector<64x96xbf16>
    %33 = vector.shape_cast %32 : vector<64x96xbf16> to vector<8x8x96xbf16>
    %34 = tpu.transpose %33, [1, 0, 2] : vector<8x8x96xbf16> -> vector<8x8x96xbf16>
    %35 = vector.extract_strided_slice %34 {offsets = [0, 0, 0], sizes = [8, 8, 8], strides = [1, 1, 1]} : vector<8x8x96xbf16> to vector<8x8x8xbf16>
    %36 = vector.extract_strided_slice %34 {offsets = [0, 0, 32], sizes = [8, 8, 8], strides = [1, 1, 1]} : vector<8x8x96xbf16> to vector<8x8x8xbf16>
    %37 = vector.extract_strided_slice %34 {offsets = [0, 0, 64], sizes = [8, 8, 8], strides = [1, 1, 1]} : vector<8x8x96xbf16> to vector<8x8x8xbf16>
    "tpu.trace_start"() <{level = 10 : i32, message = "bqd,bkd->bqk"}> : () -> ()
    %cst_15 = arith.constant dense<0.000000e+00> : vector<8x8x8xf32>
    %38 = tpu.matmul %35, %36, %cst_15 {dimension_numbers = #tpu.dot_dimension_numbers<[2], [2], [1], [1], [0, 0, 0, 1, 1, 1], [0], [0]>} : vector<8x8x8xbf16>, vector<8x8x8xbf16>, vector<8x8x8xf32> -> vector<8x8x8xf32>
    "tpu.trace_stop"() : () -> ()
    %cst_16 = arith.constant 0.353553385 : f32
    %39 = vector.broadcast %cst_16 : f32 to vector<8x8x8xf32>
    %40 = arith.mulf %38, %39 : vector<8x8x8xf32>
    %cst_17 = arith.constant dense<0xFF800000> : vector<8x8xf32>
    %41 = vector.multi_reduction <maximumf>, %40, %cst_17 [2] : vector<8x8x8xf32> to vector<8x8xf32>
    %42 = vector.shape_cast %41 : vector<8x8xf32> to vector<8x8x1xf32>
    %43 = vector.broadcast %42 : vector<8x8x1xf32> to vector<8x8x8xf32>
    %44 = arith.subf %40, %43 : vector<8x8x8xf32>
    %45 = math.exp %44 : vector<8x8x8xf32>
    %cst_18 = arith.constant dense<0.000000e+00> : vector<8x8xf32>
    %46 = vector.multi_reduction <add>, %45, %cst_18 [2] : vector<8x8x8xf32> to vector<8x8xf32>
    %47 = vector.shape_cast %46 : vector<8x8xf32> to vector<8x8x1xf32>
    %48 = tpu.reciprocal %47 {approx = true} : vector<8x8x1xf32> -> vector<8x8x1xf32>
    %49 = vector.broadcast %48 : vector<8x8x1xf32> to vector<8x8x8xf32>
    %50 = arith.mulf %45, %49 : vector<8x8x8xf32>
    %51 = arith.truncf %50 : vector<8x8x8xf32> to vector<8x8x8xbf16>
    "tpu.trace_start"() <{level = 10 : i32, message = "bqk,bkd->bqd"}> : () -> ()
    %cst_19 = arith.constant dense<0.000000e+00> : vector<8x8x8xf32>
    %52 = tpu.matmul %51, %37, %cst_19 {dimension_numbers = #tpu.dot_dimension_numbers<[2], [1], [1], [2], [0, 0, 0, 1, 1, 2], [0], [0]>} : vector<8x8x8xbf16>, vector<8x8x8xbf16>, vector<8x8x8xf32> -> vector<8x8x8xf32>
    "tpu.trace_stop"() : () -> ()
    %53 = arith.truncf %52 : vector<8x8x8xf32> to vector<8x8x8xbf16>
    %c0_20 = arith.constant 0 : index
    %c0_21 = arith.constant 0 : index
    %c0_22 = arith.constant 0 : index
    %54 = vector.load %arg15[%c0_20, %c0_21, %c0_22] : memref<8x8x32xbf16, #tpu.memory_space<vmem>>, vector<8x8x8xbf16>
    tpu.vector_store %arg15[%c0_20, %c0_21, %c0_22], %53 {strides = array<i32>} : memref<8x8x32xbf16, #tpu.memory_space<vmem>>, vector<8x8x8xbf16>,
    %55 = vector.extract_strided_slice %34 {offsets = [0, 0, 8], sizes = [8, 8, 8], strides = [1, 1, 1]} : vector<8x8x96xbf16> to vector<8x8x8xbf16>
    %56 = vector.extract_strided_slice %34 {offsets = [0, 0, 40], sizes = [8, 8, 8], strides = [1, 1, 1]} : vector<8x8x96xbf16> to vector<8x8x8xbf16>
    %57 = vector.extract_strided_slice %34 {offsets = [0, 0, 72], sizes = [8, 8, 8], strides = [1, 1, 1]} : vector<8x8x96xbf16> to vector<8x8x8xbf16>
    "tpu.trace_start"() <{level = 10 : i32, message = "bqd,bkd->bqk"}> : () -> ()
    %cst_23 = arith.constant dense<0.000000e+00> : vector<8x8x8xf32>
    %58 = tpu.matmul %55, %56, %cst_23 {dimension_numbers = #tpu.dot_dimension_numbers<[2], [2], [1], [1], [0, 0, 0, 1, 1, 1], [0], [0]>} : vector<8x8x8xbf16>, vector<8x8x8xbf16>, vector<8x8x8xf32> -> vector<8x8x8xf32>
    "tpu.trace_stop"() : () -> ()
    %cst_24 = arith.constant 0.353553385 : f32
    %59 = vector.broadcast %cst_24 : f32 to vector<8x8x8xf32>
    %60 = arith.mulf %58, %59 : vector<8x8x8xf32>
    %cst_25 = arith.constant dense<0xFF800000> : vector<8x8xf32>
    %61 = vector.multi_reduction <maximumf>, %60, %cst_25 [2] : vector<8x8x8xf32> to vector<8x8xf32>
    %62 = vector.shape_cast %61 : vector<8x8xf32> to vector<8x8x1xf32>
    %63 = vector.broadcast %62 : vector<8x8x1xf32> to vector<8x8x8xf32>
    %64 = arith.subf %60, %63 : vector<8x8x8xf32>
    %65 = math.exp %64 : vector<8x8x8xf32>
    %cst_26 = arith.constant dense<0.000000e+00> : vector<8x8xf32>
    %66 = vector.multi_reduction <add>, %65, %cst_26 [2] : vector<8x8x8xf32> to vector<8x8xf32>
    %67 = vector.shape_cast %66 : vector<8x8xf32> to vector<8x8x1xf32>
    %68 = tpu.reciprocal %67 {approx = true} : vector<8x8x1xf32> -> vector<8x8x1xf32>
    %69 = vector.broadcast %68 : vector<8x8x1xf32> to vector<8x8x8xf32>
    %70 = arith.mulf %65, %69 : vector<8x8x8xf32>
    %71 = arith.truncf %70 : vector<8x8x8xf32> to vector<8x8x8xbf16>
    "tpu.trace_start"() <{level = 10 : i32, message = "bqk,bkd->bqd"}> : () -> ()
    %cst_27 = arith.constant dense<0.000000e+00> : vector<8x8x8xf32>
    %72 = tpu.matmul %71, %57, %cst_27 {dimension_numbers = #tpu.dot_dimension_numbers<[2], [1], [1], [2], [0, 0, 0, 1, 1, 2], [0], [0]>} : vector<8x8x8xbf16>, vector<8x8x8xbf16>, vector<8x8x8xf32> -> vector<8x8x8xf32>
    "tpu.trace_stop"() : () -> ()
    %73 = arith.truncf %72 : vector<8x8x8xf32> to vector<8x8x8xbf16>
    %c0_28 = arith.constant 0 : index
    %c0_29 = arith.constant 0 : index
    %c8 = arith.constant 8 : index
    %74 = vector.load %arg15[%c0_28, %c0_29, %c8] : memref<8x8x32xbf16, #tpu.memory_space<vmem>>, vector<8x8x8xbf16>
    tpu.vector_store %arg15[%c0_28, %c0_29, %c8], %73 {strides = array<i32>} : memref<8x8x32xbf16, #tpu.memory_space<vmem>>, vector<8x8x8xbf16>,
    %75 = vector.extract_strided_slice %34 {offsets = [0, 0, 16], sizes = [8, 8, 8], strides = [1, 1, 1]} : vector<8x8x96xbf16> to vector<8x8x8xbf16>
    %76 = vector.extract_strided_slice %34 {offsets = [0, 0, 48], sizes = [8, 8, 8], strides = [1, 1, 1]} : vector<8x8x96xbf16> to vector<8x8x8xbf16>
    %77 = vector.extract_strided_slice %34 {offsets = [0, 0, 80], sizes = [8, 8, 8], strides = [1, 1, 1]} : vector<8x8x96xbf16> to vector<8x8x8xbf16>
    "tpu.trace_start"() <{level = 10 : i32, message = "bqd,bkd->bqk"}> : () -> ()
    %cst_30 = arith.constant dense<0.000000e+00> : vector<8x8x8xf32>
    %78 = tpu.matmul %75, %76, %cst_30 {dimension_numbers = #tpu.dot_dimension_numbers<[2], [2], [1], [1], [0, 0, 0, 1, 1, 1], [0], [0]>} : vector<8x8x8xbf16>, vector<8x8x8xbf16>, vector<8x8x8xf32> -> vector<8x8x8xf32>
    "tpu.trace_stop"() : () -> ()
    %cst_31 = arith.constant 0.353553385 : f32
    %79 = vector.broadcast %cst_31 : f32 to vector<8x8x8xf32>
    %80 = arith.mulf %78, %79 : vector<8x8x8xf32>
    %cst_32 = arith.constant dense<0xFF800000> : vector<8x8xf32>
    %81 = vector.multi_reduction <maximumf>, %80, %cst_32 [2] : vector<8x8x8xf32> to vector<8x8xf32>
    %82 = vector.shape_cast %81 : vector<8x8xf32> to vector<8x8x1xf32>
    %83 = vector.broadcast %82 : vector<8x8x1xf32> to vector<8x8x8xf32>
    %84 = arith.subf %80, %83 : vector<8x8x8xf32>
    %85 = math.exp %84 : vector<8x8x8xf32>
    %cst_33 = arith.constant dense<0.000000e+00> : vector<8x8xf32>
    %86 = vector.multi_reduction <add>, %85, %cst_33 [2] : vector<8x8x8xf32> to vector<8x8xf32>
    %87 = vector.shape_cast %86 : vector<8x8xf32> to vector<8x8x1xf32>
    %88 = tpu.reciprocal %87 {approx = true} : vector<8x8x1xf32> -> vector<8x8x1xf32>
    %89 = vector.broadcast %88 : vector<8x8x1xf32> to vector<8x8x8xf32>
    %90 = arith.mulf %85, %89 : vector<8x8x8xf32>
    %91 = arith.truncf %90 : vector<8x8x8xf32> to vector<8x8x8xbf16>
    "tpu.trace_start"() <{level = 10 : i32, message = "bqk,bkd->bqd"}> : () -> ()
    %cst_34 = arith.constant dense<0.000000e+00> : vector<8x8x8xf32>
    %92 = tpu.matmul %91, %77, %cst_34 {dimension_numbers = #tpu.dot_dimension_numbers<[2], [1], [1], [2], [0, 0, 0, 1, 1, 2], [0], [0]>} : vector<8x8x8xbf16>, vector<8x8x8xbf16>, vector<8x8x8xf32> -> vector<8x8x8xf32>
    "tpu.trace_stop"() : () -> ()
    %93 = arith.truncf %92 : vector<8x8x8xf32> to vector<8x8x8xbf16>
    %c0_35 = arith.constant 0 : index
    %c0_36 = arith.constant 0 : index
    %c16 = arith.constant 16 : index
    %94 = vector.load %arg15[%c0_35, %c0_36, %c16] : memref<8x8x32xbf16, #tpu.memory_space<vmem>>, vector<8x8x8xbf16>
    tpu.vector_store %arg15[%c0_35, %c0_36, %c16], %93 {strides = array<i32>} : memref<8x8x32xbf16, #tpu.memory_space<vmem>>, vector<8x8x8xbf16>,
    %95 = vector.extract_strided_slice %34 {offsets = [0, 0, 24], sizes = [8, 8, 8], strides = [1, 1, 1]} : vector<8x8x96xbf16> to vector<8x8x8xbf16>
    %96 = vector.extract_strided_slice %34 {offsets = [0, 0, 56], sizes = [8, 8, 8], strides = [1, 1, 1]} : vector<8x8x96xbf16> to vector<8x8x8xbf16>
    %97 = vector.extract_strided_slice %34 {offsets = [0, 0, 88], sizes = [8, 8, 8], strides = [1, 1, 1]} : vector<8x8x96xbf16> to vector<8x8x8xbf16>
    "tpu.trace_start"() <{level = 10 : i32, message = "bqd,bkd->bqk"}> : () -> ()
    %cst_37 = arith.constant dense<0.000000e+00> : vector<8x8x8xf32>
    %98 = tpu.matmul %95, %96, %cst_37 {dimension_numbers = #tpu.dot_dimension_numbers<[2], [2], [1], [1], [0, 0, 0, 1, 1, 1], [0], [0]>} : vector<8x8x8xbf16>, vector<8x8x8xbf16>, vector<8x8x8xf32> -> vector<8x8x8xf32>
    "tpu.trace_stop"() : () -> ()
    %cst_38 = arith.constant 0.353553385 : f32
    %99 = vector.broadcast %cst_38 : f32 to vector<8x8x8xf32>
    %100 = arith.mulf %98, %99 : vector<8x8x8xf32>
    %cst_39 = arith.constant dense<0xFF800000> : vector<8x8xf32>
    %101 = vector.multi_reduction <maximumf>, %100, %cst_39 [2] : vector<8x8x8xf32> to vector<8x8xf32>
    %102 = vector.shape_cast %101 : vector<8x8xf32> to vector<8x8x1xf32>
    %103 = vector.broadcast %102 : vector<8x8x1xf32> to vector<8x8x8xf32>
    %104 = arith.subf %100, %103 : vector<8x8x8xf32>
    %105 = math.exp %104 : vector<8x8x8xf32>
    %cst_40 = arith.constant dense<0.000000e+00> : vector<8x8xf32>
    %106 = vector.multi_reduction <add>, %105, %cst_40 [2] : vector<8x8x8xf32> to vector<8x8xf32>
    %107 = vector.shape_cast %106 : vector<8x8xf32> to vector<8x8x1xf32>
    %108 = tpu.reciprocal %107 {approx = true} : vector<8x8x1xf32> -> vector<8x8x1xf32>
    %109 = vector.broadcast %108 : vector<8x8x1xf32> to vector<8x8x8xf32>
    %110 = arith.mulf %105, %109 : vector<8x8x8xf32>
    %111 = arith.truncf %110 : vector<8x8x8xf32> to vector<8x8x8xbf16>
    "tpu.trace_start"() <{level = 10 : i32, message = "bqk,bkd->bqd"}> : () -> ()
    %cst_41 = arith.constant dense<0.000000e+00> : vector<8x8x8xf32>
    %112 = tpu.matmul %111, %97, %cst_41 {dimension_numbers = #tpu.dot_dimension_numbers<[2], [1], [1], [2], [0, 0, 0, 1, 1, 2], [0], [0]>} : vector<8x8x8xbf16>, vector<8x8x8xbf16>, vector<8x8x8xf32> -> vector<8x8x8xf32>
    "tpu.trace_stop"() : () -> ()
    %113 = arith.truncf %112 : vector<8x8x8xf32> to vector<8x8x8xbf16>
    %c0_42 = arith.constant 0 : index
    %c0_43 = arith.constant 0 : index
    %c24 = arith.constant 24 : index
    %114 = vector.load %arg15[%c0_42, %c0_43, %c24] : memref<8x8x32xbf16, #tpu.memory_space<vmem>>, vector<8x8x8xbf16>
    tpu.vector_store %arg15[%c0_42, %c0_43, %c24], %113 {strides = array<i32>} : memref<8x8x32xbf16, #tpu.memory_space<vmem>>, vector<8x8x8xbf16>,
    %c0_44 = arith.constant 0 : index
    %c0_45 = arith.constant 0 : index
    %c0_46 = arith.constant 0 : index
    %115 = vector.load %arg15[%c0_44, %c0_45, %c0_46] : memref<8x8x32xbf16, #tpu.memory_space<vmem>>, vector<8x8x32xbf16>
    %116 = tpu.transpose %115, [1, 0, 2] : vector<8x8x32xbf16> -> vector<8x8x32xbf16>
    %117 = vector.shape_cast %116 : vector<8x8x32xbf16> to vector<64x32xbf16>
    %c0_47 = arith.constant 0 : index
    %c0_48 = arith.constant 0 : index
    %118 = vector.load %arg6[%c0_47, %c0_48] : memref<32x32xbf16, #tpu.memory_space<vmem>>, vector<32x32xbf16>
    %cst_49 = arith.constant dense<0.000000e+00> : vector<64x32xf32>
    %119 = tpu.matmul %117, %118, %cst_49 {dimension_numbers = #tpu.dot_dimension_numbers<[1], [0], [0], [1], [0, 0, 1, 1], [], []>} : vector<64x32xbf16>, vector<32x32xbf16>, vector<64x32xf32> -> vector<64x32xf32>
    %120 = arith.addf %1, %119 : vector<64x32xf32>
    %c0_50 = arith.constant 0 : index
    %c0_51 = arith.constant 0 : index
    %121 = vector.load %arg7[%c0_50, %c0_51] : memref<1x32xf32, #tpu.memory_space<vmem>>, vector<1x32xf32>
    %122 = vector.broadcast %121 : vector<1x32xf32> to vector<64x32xf32>
    %123 = arith.addf %120, %122 : vector<64x32xf32>
    %c0_52 = arith.constant 0 : index
    %c0_53 = arith.constant 0 : index
    %124 = vector.load %arg8[%c0_52, %c0_53] : memref<1x32xf32, #tpu.memory_space<vmem>>, vector<1x32xf32>
    %c0_54 = arith.constant 0 : index
    %c0_55 = arith.constant 0 : index
    %125 = vector.load %arg9[%c0_54, %c0_55] : memref<1x32xf32, #tpu.memory_space<vmem>>, vector<1x32xf32>
    %cst_56 = arith.constant dense<0.000000e+00> : vector<64xf32>
    %126 = vector.multi_reduction <add>, %123, %cst_56 [1] : vector<64x32xf32> to vector<64xf32>
    %127 = vector.shape_cast %126 : vector<64xf32> to vector<64x1xf32>
    %cst_57 = arith.constant 3.200000e+01 : f32
    %128 = vector.broadcast %cst_57 : f32 to vector<64x1xf32>
    %129 = arith.divf %127, %128 : vector<64x1xf32>
    %130 = vector.broadcast %129 : vector<64x1xf32> to vector<64x32xf32>
    %131 = arith.subf %123, %130 : vector<64x32xf32>
    %132 = arith.mulf %131, %131 : vector<64x32xf32>
    %cst_58 = arith.constant dense<0.000000e+00> : vector<64xf32>
    %133 = vector.multi_reduction <add>, %132, %cst_58 [1] : vector<64x32xf32> to vector<64xf32>
    %134 = vector.shape_cast %133 : vector<64xf32> to vector<64x1xf32>
    %cst_59 = arith.constant 3.200000e+01 : f32
    %135 = vector.broadcast %cst_59 : f32 to vector<64x1xf32>
    %136 = arith.divf %134, %135 : vector<64x1xf32>
    %137 = vector.broadcast %129 : vector<64x1xf32> to vector<64x32xf32>
    %138 = arith.subf %123, %137 : vector<64x32xf32>
    %cst_60 = arith.constant 9.99999974E-6 : f32
    %139 = vector.broadcast %cst_60 : f32 to vector<64x1xf32>
    %140 = arith.addf %136, %139 : vector<64x1xf32>
    %141 = math.rsqrt %140 : vector<64x1xf32>
    %142 = vector.broadcast %141 : vector<64x1xf32> to vector<64x32xf32>
    %143 = arith.mulf %138, %142 : vector<64x32xf32>
    %144 = vector.broadcast %124 : vector<1x32xf32> to vector<64x32xf32>
    %145 = arith.mulf %143, %144 : vector<64x32xf32>
    %146 = vector.broadcast %125 : vector<1x32xf32> to vector<64x32xf32>
    %147 = arith.addf %145, %146 : vector<64x32xf32>
    %148 = arith.truncf %147 : vector<64x32xf32> to vector<64x32xbf16>
    %c0_61 = arith.constant 0 : index
    %c0_62 = arith.constant 0 : index
    %149 = vector.load %arg13[%c0_61, %c0_62] : memref<1x32xf32, #tpu.memory_space<vmem>>, vector<1x32xf32>
    %150 = vector.broadcast %149 : vector<1x32xf32> to vector<64x32xf32>
    %151 = arith.addf %123, %150 : vector<64x32xf32>
    %c0_63 = arith.constant 0 : index
    %c0_64 = arith.constant 0 : index
    %152 = vector.load %arg10[%c0_63, %c0_64] : memref<32x128xbf16, #tpu.memory_space<vmem>>, vector<32x32xbf16>
    %cst_65 = arith.constant dense<0.000000e+00> : vector<64x32xf32>
    %153 = tpu.matmul %148, %152, %cst_65 {dimension_numbers = #tpu.dot_dimension_numbers<[1], [0], [0], [1], [0, 0, 1, 1], [], []>} : vector<64x32xbf16>, vector<32x32xbf16>, vector<64x32xf32> -> vector<64x32xf32>
    %c0_66 = arith.constant 0 : index
    %c0_67 = arith.constant 0 : index
    %154 = vector.load %arg11[%c0_66, %c0_67] : memref<1x128xf32, #tpu.memory_space<vmem>>, vector<1x32xf32>
    %155 = vector.broadcast %154 : vector<1x32xf32> to vector<64x32xf32>
    %156 = arith.addf %153, %155 : vector<64x32xf32>
    %157 = arith.truncf %156 : vector<64x32xf32> to vector<64x32xbf16>
    %cst_68 = arith.constant 1.703130e+00 : bf16
    %158 = vector.broadcast %cst_68 : bf16 to vector<64x32xbf16>
    %159 = arith.mulf %158, %157 : vector<64x32xbf16>
    %160 = arith.negf %159 : vector<64x32xbf16>
    %161 = math.exp %160 : vector<64x32xbf16>
    %cst_69 = arith.constant 1.000000e+00 : bf16
    %162 = vector.broadcast %cst_69 : bf16 to vector<64x32xbf16>
    %163 = arith.addf %162, %161 : vector<64x32xbf16>
    %164 = arith.divf %162, %163 : vector<64x32xbf16>
    %165 = arith.mulf %157, %164 : vector<64x32xbf16>
    %c0_70 = arith.constant 0 : index
    %c0_71 = arith.constant 0 : index
    %166 = vector.load %arg12[%c0_70, %c0_71] : memref<128x32xbf16, #tpu.memory_space<vmem>>, vector<32x32xbf16>
    %cst_72 = arith.constant dense<0.000000e+00> : vector<64x32xf32>
    %167 = tpu.matmul %165, %166, %cst_72 {dimension_numbers = #tpu.dot_dimension_numbers<[1], [0], [0], [1], [0, 0, 1, 1], [], []>} : vector<64x32xbf16>, vector<32x32xbf16>, vector<64x32xf32> -> vector<64x32xf32>
    %168 = arith.addf %151, %167 : vector<64x32xf32>
    %c0_73 = arith.constant 0 : index
    %c32 = arith.constant 32 : index
    %169 = vector.load %arg10[%c0_73, %c32] : memref<32x128xbf16, #tpu.memory_space<vmem>>, vector<32x32xbf16>
    %cst_74 = arith.constant dense<0.000000e+00> : vector<64x32xf32>
    %170 = tpu.matmul %148, %169, %cst_74 {dimension_numbers = #tpu.dot_dimension_numbers<[1], [0], [0], [1], [0, 0, 1, 1], [], []>} : vector<64x32xbf16>, vector<32x32xbf16>, vector<64x32xf32> -> vector<64x32xf32>
    %c0_75 = arith.constant 0 : index
    %c32_76 = arith.constant 32 : index
    %171 = vector.load %arg11[%c0_75, %c32_76] : memref<1x128xf32, #tpu.memory_space<vmem>>, vector<1x32xf32>
    %172 = vector.broadcast %171 : vector<1x32xf32> to vector<64x32xf32>
    %173 = arith.addf %170, %172 : vector<64x32xf32>
    %174 = arith.truncf %173 : vector<64x32xf32> to vector<64x32xbf16>
    %cst_77 = arith.constant 1.703130e+00 : bf16
    %175 = vector.broadcast %cst_77 : bf16 to vector<64x32xbf16>
    %176 = arith.mulf %175, %174 : vector<64x32xbf16>
    %177 = arith.negf %176 : vector<64x32xbf16>
    %178 = math.exp %177 : vector<64x32xbf16>
    %cst_78 = arith.constant 1.000000e+00 : bf16
    %179 = vector.broadcast %cst_78 : bf16 to vector<64x32xbf16>
    %180 = arith.addf %179, %178 : vector<64x32xbf16>
    %181 = arith.divf %179, %180 : vector<64x32xbf16>
    %182 = arith.mulf %174, %181 : vector<64x32xbf16>
    %c32_79 = arith.constant 32 : index
    %c0_80 = arith.constant 0 : index
    %183 = vector.load %arg12[%c32_79, %c0_80] : memref<128x32xbf16, #tpu.memory_space<vmem>>, vector<32x32xbf16>
    %cst_81 = arith.constant dense<0.000000e+00> : vector<64x32xf32>
    %184 = tpu.matmul %182, %183, %cst_81 {dimension_numbers = #tpu.dot_dimension_numbers<[1], [0], [0], [1], [0, 0, 1, 1], [], []>} : vector<64x32xbf16>, vector<32x32xbf16>, vector<64x32xf32> -> vector<64x32xf32>
    %185 = arith.addf %168, %184 : vector<64x32xf32>
    %c0_82 = arith.constant 0 : index
    %c64 = arith.constant 64 : index
    %186 = vector.load %arg10[%c0_82, %c64] : memref<32x128xbf16, #tpu.memory_space<vmem>>, vector<32x32xbf16>
    %cst_83 = arith.constant dense<0.000000e+00> : vector<64x32xf32>
    %187 = tpu.matmul %148, %186, %cst_83 {dimension_numbers = #tpu.dot_dimension_numbers<[1], [0], [0], [1], [0, 0, 1, 1], [], []>} : vector<64x32xbf16>, vector<32x32xbf16>, vector<64x32xf32> -> vector<64x32xf32>
    %c0_84 = arith.constant 0 : index
    %c64_85 = arith.constant 64 : index
    %188 = vector.load %arg11[%c0_84, %c64_85] : memref<1x128xf32, #tpu.memory_space<vmem>>, vector<1x32xf32>
    %189 = vector.broadcast %188 : vector<1x32xf32> to vector<64x32xf32>
    %190 = arith.addf %187, %189 : vector<64x32xf32>
    %191 = arith.truncf %190 : vector<64x32xf32> to vector<64x32xbf16>
    %cst_86 = arith.constant 1.703130e+00 : bf16
    %192 = vector.broadcast %cst_86 : bf16 to vector<64x32xbf16>
    %193 = arith.mulf %192, %191 : vector<64x32xbf16>
    %194 = arith.negf %193 : vector<64x32xbf16>
    %195 = math.exp %194 : vector<64x32xbf16>
    %cst_87 = arith.constant 1.000000e+00 : bf16
    %196 = vector.broadcast %cst_87 : bf16 to vector<64x32xbf16>
    %197 = arith.addf %196, %195 : vector<64x32xbf16>
    %198 = arith.divf %196, %197 : vector<64x32xbf16>
    %199 = arith.mulf %191, %198 : vector<64x32xbf16>
    %c64_88 = arith.constant 64 : index
    %c0_89 = arith.constant 0 : index
    %200 = vector.load %arg12[%c64_88, %c0_89] : memref<128x32xbf16, #tpu.memory_space<vmem>>, vector<32x32xbf16>
    %cst_90 = arith.constant dense<0.000000e+00> : vector<64x32xf32>
    %201 = tpu.matmul %199, %200, %cst_90 {dimension_numbers = #tpu.dot_dimension_numbers<[1], [0], [0], [1], [0, 0, 1, 1], [], []>} : vector<64x32xbf16>, vector<32x32xbf16>, vector<64x32xf32> -> vector<64x32xf32>
    %202 = arith.addf %185, %201 : vector<64x32xf32>
    %c0_91 = arith.constant 0 : index
    %c96 = arith.constant 96 : index
    %203 = vector.load %arg10[%c0_91, %c96] : memref<32x128xbf16, #tpu.memory_space<vmem>>, vector<32x32xbf16>
    %cst_92 = arith.constant dense<0.000000e+00> : vector<64x32xf32>
    %204 = tpu.matmul %148, %203, %cst_92 {dimension_numbers = #tpu.dot_dimension_numbers<[1], [0], [0], [1], [0, 0, 1, 1], [], []>} : vector<64x32xbf16>, vector<32x32xbf16>, vector<64x32xf32> -> vector<64x32xf32>
    %c0_93 = arith.constant 0 : index
    %c96_94 = arith.constant 96 : index
    %205 = vector.load %arg11[%c0_93, %c96_94] : memref<1x128xf32, #tpu.memory_space<vmem>>, vector<1x32xf32>
    %206 = vector.broadcast %205 : vector<1x32xf32> to vector<64x32xf32>
    %207 = arith.addf %204, %206 : vector<64x32xf32>
    %208 = arith.truncf %207 : vector<64x32xf32> to vector<64x32xbf16>
    %cst_95 = arith.constant 1.703130e+00 : bf16
    %209 = vector.broadcast %cst_95 : bf16 to vector<64x32xbf16>
    %210 = arith.mulf %209, %208 : vector<64x32xbf16>
    %211 = arith.negf %210 : vector<64x32xbf16>
    %212 = math.exp %211 : vector<64x32xbf16>
    %cst_96 = arith.constant 1.000000e+00 : bf16
    %213 = vector.broadcast %cst_96 : bf16 to vector<64x32xbf16>
    %214 = arith.addf %213, %212 : vector<64x32xbf16>
    %215 = arith.divf %213, %214 : vector<64x32xbf16>
    %216 = arith.mulf %208, %215 : vector<64x32xbf16>
    %c96_97 = arith.constant 96 : index
    %c0_98 = arith.constant 0 : index
    %217 = vector.load %arg12[%c96_97, %c0_98] : memref<128x32xbf16, #tpu.memory_space<vmem>>, vector<32x32xbf16>
    %cst_99 = arith.constant dense<0.000000e+00> : vector<64x32xf32>
    %218 = tpu.matmul %216, %217, %cst_99 {dimension_numbers = #tpu.dot_dimension_numbers<[1], [0], [0], [1], [0, 0, 1, 1], [], []>} : vector<64x32xbf16>, vector<32x32xbf16>, vector<64x32xf32> -> vector<64x32xf32>
    %219 = arith.addf %202, %218 : vector<64x32xf32>
    %220 = vector.shape_cast %219 : vector<64x32xf32> to vector<8x8x32xf32>
    %c0_100 = arith.constant 0 : index
    %c0_101 = arith.constant 0 : index
    %c0_102 = arith.constant 0 : index
    %221 = vector.load %arg14[%c0_100, %c0_101, %c0_102] : memref<8x8x32xf32, #tpu.memory_space<vmem>>, vector<8x8x32xf32>
    tpu.vector_store %arg14[%c0_100, %c0_101, %c0_102], %220 {strides = array<i32>} : memref<8x8x32xf32, #tpu.memory_space<vmem>>, vector<8x8x32xf32>,
    return
  }
  func.func @transform_0(%arg0: i32) -> (i32, i32, i32) {
    %c0_i32 = arith.constant 0 : i32
    %c0_i32_0 = arith.constant 0 : i32
    %c0_i32_1 = arith.constant 0 : i32
    return %c0_i32, %arg0, %c0_i32_0 : i32, i32, i32
  }
  func.func @transform_1(%arg0: i32) -> (i32, i32) {
    %c0_i32 = arith.constant 0 : i32
    %c0_i32_0 = arith.constant 0 : i32
    %c0_i32_1 = arith.constant 0 : i32
    return %c0_i32, %c0_i32_0 : i32, i32
  }
  func.func @transform_2(%arg0: i32) -> (i32, i32) {
    %c0_i32 = arith.constant 0 : i32
    %c0_i32_0 = arith.constant 0 : i32
    %c0_i32_1 = arith.constant 0 : i32
    return %c0_i32, %c0_i32_0 : i32, i32
  }
  func.func @transform_3(%arg0: i32) -> (i32, i32) {
    %c0_i32 = arith.constant 0 : i32
    %c0_i32_0 = arith.constant 0 : i32
    %c0_i32_1 = arith.constant 0 : i32
    return %c0_i32, %c0_i32_0 : i32, i32
  }
  func.func @transform_4(%arg0: i32) -> (i32, i32) {
    %c0_i32 = arith.constant 0 : i32
    %c0_i32_0 = arith.constant 0 : i32
    %c0_i32_1 = arith.constant 0 : i32
    return %c0_i32, %c0_i32_0 : i32, i32
  }
  func.func @transform_5(%arg0: i32) -> (i32, i32) {
    %c0_i32 = arith.constant 0 : i32
    %c0_i32_0 = arith.constant 0 : i32
    %c0_i32_1 = arith.constant 0 : i32
    return %c0_i32, %c0_i32_0 : i32, i32
  }
  func.func @transform_6(%arg0: i32) -> (i32, i32) {
    %c0_i32 = arith.constant 0 : i32
    %c0_i32_0 = arith.constant 0 : i32
    %c0_i32_1 = arith.constant 0 : i32
    return %c0_i32, %c0_i32_0 : i32, i32
  }
  func.func @transform_7(%arg0: i32) -> (i32, i32) {
    %c0_i32 = arith.constant 0 : i32
    %c0_i32_0 = arith.constant 0 : i32
    %c0_i32_1 = arith.constant 0 : i32
    return %c0_i32, %c0_i32_0 : i32, i32
  }
  func.func @transform_8(%arg0: i32) -> (i32, i32) {
    %c0_i32 = arith.constant 0 : i32
    %c0_i32_0 = arith.constant 0 : i32
    %c0_i32_1 = arith.constant 0 : i32
    return %c0_i32, %c0_i32_0 : i32, i32
  }
  func.func @transform_9(%arg0: i32) -> (i32, i32) {
    %c0_i32 = arith.constant 0 : i32
    %c0_i32_0 = arith.constant 0 : i32
    %c0_i32_1 = arith.constant 0 : i32
    return %c0_i32, %c0_i32_0 : i32, i32
  }
  func.func @transform_10(%arg0: i32) -> (i32, i32) {
    %c0_i32 = arith.constant 0 : i32
    %c0_i32_0 = arith.constant 0 : i32
    %c0_i32_1 = arith.constant 0 : i32
    return %c0_i32, %c0_i32_0 : i32, i32
  }
  func.func @transform_11(%arg0: i32) -> (i32, i32) {
    %c0_i32 = arith.constant 0 : i32
    %c0_i32_0 = arith.constant 0 : i32
    %c0_i32_1 = arith.constant 0 : i32
    return %c0_i32, %c0_i32_0 : i32, i32
  }
  func.func @transform_12(%arg0: i32) -> (i32, i32) {
    %c0_i32 = arith.constant 0 : i32
    %c0_i32_0 = arith.constant 0 : i32
    %c0_i32_1 = arith.constant 0 : i32
    return %c0_i32, %c0_i32_0 : i32, i32
  }
  func.func @transform_13(%arg0: i32) -> (i32, i32, i32) {
    %c0_i32 = arith.constant 0 : i32
    %c0_i32_0 = arith.constant 0 : i32
    %c0_i32_1 = arith.constant 0 : i32
    return %c0_i32, %arg0, %c0_i32_0 : i32, i32, i32
  }
}

</mosaic_0001>

<bundles_post_ra>
// kernel: tpu_custom_call.1
= control target key start
LH: loop header
LB: loop body
LE: loop exit
PB: predicated region body
PF: predicated region fallthrough
CT: control target
= control target key end

     0   :  { %18 = vsyncpa [#allocation4], 0  ;;  %s8408_s0 = inlined_call_operand.vmem [shape: f32[8,8,32], index: 0, kind: input, shape index: {}]   ;;  %s8409_s1 = inlined_call_operand.vmem [shape: f32[1,32], index: 1, kind: input, shape index: {}]   ;;  %s8410_s2 = inlined_call_operand.vmem [shape: f32[1,32], index: 2, kind: input, shape index: {}]   ;;  %s8411_s3 = inlined_call_operand.vmem [shape: bf16[32,96], index: 3, kind: input, shape index: {}]   ;;  %s8412_s4 = inlined_call_operand.hbm [shape: f32[1,96], index: 4, kind: input, shape index: {}]   ;;  %s8413_s5 = inlined_call_operand.hbm [shape: bf16[32,32], index: 5, kind: input, shape index: {}]   ;;  %s8414_s6 = inlined_call_operand.hbm [shape: f32[1,32], index: 6, kind: input, shape index: {}]   ;;  %s8415_s7 = inlined_call_operand.hbm [shape: f32[1,32], index: 7, kind: input, shape index: {}]   ;;  %s8416_s8 = inlined_call_operand.hbm [shape: f32[1,32], index: 8, kind: input, shape index: {}]   ;;  %s8417_s9 = inlined_call_operand.vmem [shape: bf16[32,128], index: 9, kind: input, shape index: {}]   ;;  %s8418_s10 = inlined_call_operand.vmem [shape: f32[1,128], index: 10, kind: input, shape index: {}]   ;;  %s8419_s11 = inlined_call_operand.vmem [shape: bf16[128,32], index: 11, kind: input, shape index: {}]   ;;  %s8420_s12 = inlined_call_operand.vmem [shape: f32[1,32], index: 12, kind: input, shape index: {}]   ;;  %s8421_s13 = inlined_call_operand.hbm [shape: f32[8,8,32], index: 13, kind: output, shape index: {}]  }
   0x1   :  { %19 = vsyncpa [#allocation7], 0 }
   0x2   :  { %20 = vsyncpa [#allocation10], 0 }
   0x3   :  { %21 = vsyncpa [#allocation5], 0  ;;  %s6908_s25 = smov [#allocation6]   ;;  %s6768_s29 = scalar_lea.hbm %s8413_s5, 256 }
   0x4   :  { %s45_s26 = sshll.u32 %s6908_s25, 4  ;;  %p6769_p0 = scmp.ne.s32.totalorder %s8413_s5, %s6768_s29  ;;  %s46_s26 = int_to_ptr.vmem [resolvable:$true] %s45_s26 }
   0x5   :  { %p6772_p1 = scmp.lt.u32.totalorder %s6768_s29, %s8413_s5 }
   0x7   :  { %p6774_p2 = pnand %p6772_p1, %p6769_p0 }
   0x9   :  { %6777 = shalt.err (!%p6774_p2)
}
   0xa   :  { %s6778_s17 = scalar_lea.vmem %s46_s26, 256  ;;  %p6783_p4 = scmp.lt.s32.totalorder %s46_s26, %s46_s26 }
   0xb   :  { %p6779_p3 = scmp.ne.s32.totalorder %s46_s26, %s6778_s17  ;;  %p6784_p5 = scmp.lt.s32.totalorder %s6778_s17, %s6778_s17 }
   0xd   :  { %p6785_p6 = por %p6784_p5, %p6783_p4 }
   0xf   :  { %p6786_p7 = pnand %p6785_p6, %p6779_p3 }
  0x11   :  { %6789 = shalt.err (!%p6786_p7)
}
  0x12   :  { %s6909_s18 = smov 64   ;;  %s6910_s19 = smov 4  }
  0x13   :  { %51 = dma.hbm_to_vmem [thread:$0]  %s8413_s5, 256, %s46_s26, [#allocation7], %s6909_s18, %s6909_s18, %s6910_s19  }
  0x14   :  { %s6911_s22 = smov [#allocation9]   ;;  %s6912_s24 = smov [#allocation3]  }
  0x15   :  { %s68_s23 = sshll.u32 %s6911_s22, 4  ;;  %s36_s25 = sshll.u32 %s6912_s24, 4  ;;  %s69_s23 = int_to_ptr.vmem [resolvable:$true] %s68_s23  ;;  %s37_s25 = int_to_ptr.vmem [resolvable:$true] %s36_s25 }
  0x16   :  { %s6790_s29 = scalar_lea.hbm %s8415_s7, 16 }
  0x17   :  { %p6791_p8 = scmp.ne.s32.totalorder %s8415_s7, %s6790_s29  ;;  %p6794_p9 = scmp.lt.u32.totalorder %s6790_s29, %s8415_s7 }
  0x19   :  { %p6796_p10 = pnand %p6794_p9, %p6791_p8 }
  0x1b   :  { %6799 = shalt.err (!%p6796_p10)
}
  0x1c   :  { %s6800_s5 = scalar_lea.vmem %s69_s23, 16  ;;  %s6804_s26 = scalar_lea.vmem %s69_s23, 32 }
  0x1d   :  { %p6801_p11 = scmp.ne.s32.totalorder %s69_s23, %s6800_s5  ;;  %p6805_p12 = scmp.lt.s32.totalorder %s69_s23, %s69_s23 }
  0x1e   :  { %p6806_p13 = scmp.lt.s32.totalorder %s6804_s26, %s6800_s5 }
  0x20   :  { %p6807_p0 = por %p6806_p13, %p6805_p12 }
  0x22   :  { %p6808_p1 = pnand %p6807_p0, %p6801_p11 }
  0x24   :  { %6811 = shalt.err (!%p6808_p1)
}
  0x25   :  { %71 = dma.hbm_to_vmem [thread:$0]  %s8415_s7, 16, %s69_s23, [#allocation10]  }
  0x26   :  { %s6812_s22 = scalar_lea.hbm %s8412_s4, 16 }
  0x27   :  { %p6813_p2 = scmp.ne.s32.totalorder %s8412_s4, %s6812_s22  ;;  %p6816_p3 = scmp.lt.u32.totalorder %s6812_s22, %s8412_s4 }
  0x29   :  { %p6818_p4 = pnand %p6816_p3, %p6813_p2 }
  0x2b   :  { %6821 = shalt.err (!%p6818_p4)
}
  0x2c   :  { %s6822_s30 = scalar_lea.vmem %s37_s25, 16  ;;  %s6826_s14 = scalar_lea.vmem %s37_s25, 32 }
  0x2d   :  { %p6823_p5 = scmp.ne.s32.totalorder %s37_s25, %s6822_s30  ;;  %p6827_p6 = scmp.lt.s32.totalorder %s37_s25, %s37_s25 }
  0x2e   :  { %p6828_p7 = scmp.lt.s32.totalorder %s6826_s14, %s6822_s30 }
  0x30   :  { %p6829_p8 = por %p6828_p7, %p6827_p6 }
  0x32   :  { %p6830_p9 = pnand %p6829_p8, %p6823_p5 }
  0x34   :  { %6833 = shalt.err (!%p6830_p9)
}
  0x35   :  { %39 = dma.hbm_to_vmem [thread:$0]  %s8412_s4, 16, %s37_s25, [#allocation4]  }
  0x36   :  { %s6913_s15 = smov [#allocation8]   ;;  %s6914_s5 = smov [#allocation11]  }
  0x37   :  { %s58_s16 = sshll.u32 %s6913_s15, 4  ;;  %s78_s26 = sshll.u32 %s6914_s5, 4  ;;  %s59_s16 = int_to_ptr.vmem [resolvable:$true] %s58_s16  ;;  %s79_s26 = int_to_ptr.vmem [resolvable:$true] %s78_s26 }
  0x38   :  { %s6834_s20 = scalar_lea.hbm %s8414_s6, 16 }
  0x39   :  { %p6835_p10 = scmp.ne.s32.totalorder %s8414_s6, %s6834_s20  ;;  %p6838_p11 = scmp.lt.u32.totalorder %s6834_s20, %s8414_s6 }
  0x3b   :  { %p6840_p12 = pnand %p6838_p11, %p6835_p10 }
  0x3d   :  { %6843 = shalt.err (!%p6840_p12)
}
  0x3e   :  { %s6844_s4 = scalar_lea.vmem %s59_s16, 16  ;;  %s6848_s25 = scalar_lea.vmem %s59_s16, 32 }
  0x3f   :  { %p6845_p13 = scmp.ne.s32.totalorder %s59_s16, %s6844_s4  ;;  %p6849_p0 = scmp.lt.s32.totalorder %s59_s16, %s59_s16 }
  0x40   :  { %p6850_p1 = scmp.lt.s32.totalorder %s6848_s25, %s6844_s4 }
  0x42   :  { %p6851_p2 = por %p6850_p1, %p6849_p0 }
  0x44   :  { %p6852_p3 = pnand %p6851_p2, %p6845_p13 }
  0x46   :  { %6855 = shalt.err (!%p6852_p3)
}
  0x47   :  { %61 = dma.hbm_to_vmem [thread:$0]  %s8414_s6, 16, %s59_s16, [#allocation7]  }
  0x48   :  { %s6856_s7 = scalar_lea.hbm %s8416_s8, 16 }
  0x49   :  { %p6857_p4 = scmp.ne.s32.totalorder %s8416_s8, %s6856_s7  ;;  %p6860_p5 = scmp.lt.u32.totalorder %s6856_s7, %s8416_s8 }
  0x4b   :  { %p6862_p6 = pnand %p6860_p5, %p6857_p4 }
  0x4d   :  { %6865 = shalt.err (!%p6862_p6)
}
  0x4e   :  { %s6866_s19 = scalar_lea.vmem %s79_s26, 16  ;;  %s6870_s20 = scalar_lea.vmem %s79_s26, 32 }
  0x4f   :  { %p6867_p7 = scmp.ne.s32.totalorder %s79_s26, %s6866_s19  ;;  %p6871_p8 = scmp.lt.s32.totalorder %s79_s26, %s79_s26 }
  0x50   :  { %p6872_p9 = scmp.lt.s32.totalorder %s6870_s20, %s6866_s19 }
  0x52   :  { %p6873_p10 = por %p6872_p9, %p6871_p8 }
  0x54   :  { %p6874_p11 = pnand %p6873_p10, %p6867_p7 }
  0x56   :  { %6877 = shalt.err (!%p6874_p11)
}
  0x57   :  { %81 = dma.hbm_to_vmem [thread:$0]  %s8416_s8, 16, %s79_s26, [#allocation10]  }
  0x58   :  { %6900 = dma.done.wait [#allocation4], 16  }
  0x59   :  { %6901 = vsyncadd [#allocation4], 4294967280 }
  0x5a   :  { %6902 = dma.done.wait [#allocation7], 272  }
  0x5b   :  { %6903 = vsyncadd [#allocation7], 4294967024 }
  0x5c   :  { %6904 = dma.done.wait [#allocation10], 32  }
  0x5d   :  { %6905 = vsyncadd [#allocation10], 4294967264  ;;  %vm118_vm0 = vcmask 261120   ;;  %v108_v0 = vld [vmem:[%s8408_s0] sm:$0xff]  ;;  %v109_v2 = vld [vmem:[%s8408_s0 + $0x8] sm:$0xff]  ;;  %vm6919_vm1 = vmmov 0  }
  0x5e   :  { %v112_v1 = vld [vmem:[%s8408_s0 + $0x20] sm:$0xff]  ;;  %v119_v3 = vsel %vm118_vm0, %v108_v0, 0.0  ;;  %v113_v5 = vld [vmem:[%s8408_s0 + $0x28] sm:$0xff]  ;;  %v110_v6 = vld [vmem:[%s8408_s0 + $0x10] sm:$0xff]  ;;  %v122_v8 = vsel %vm118_vm0, %v109_v2, 0.0  ;;  %vm484_vm2 = vcmask 64512  }
  0x5f   :  { %v131_v4 = vsel %vm118_vm0, %v112_v1, 0.0  ;;  %v111_v7 = vld [vmem:[%s8408_s0 + $0x18] sm:$0xff]  ;;  %120 = vadd.xlane.f32.xlu0 %v119_v3  ;;  %v134_v9 = vsel %vm118_vm0, %v113_v5, 0.0  ;;  %v125_v10 = vsel %vm118_vm0, %v110_v6, 0.0  ;;  %v114_v12 = vld [vmem:[%s8408_s0 + $0x30] sm:$0xff]  ;;  %v6518_v56 = vld [vmem:[%s8411_s3] sm:$0xff]  }
  0x60   :  { %132 = vadd.xlane.f32.xlu1 %v131_v4  ;;  %v128_v11 = vsel %vm118_vm0, %v111_v7, 0.0  ;;  %v115_v13 = vld [vmem:[%s8408_s0 + $0x38] sm:$0xff]  ;;  %v137_v14 = vsel %vm118_vm0, %v114_v12, 0.0  ;;  %5950 = vmatprep.subr.bf16.mxu0 %v6518_v56  ;;  %v6519_v57 = vld [vmem:[%s8411_s3 + $0x8] sm:$0xff]   ;;  %vm990_vm3 = vcmask 1043456   ;;  %s6922_s24 = smov 120  }
  0x61   :  { %v140_v15 = vsel %vm118_vm0, %v115_v13, 0.0  ;;  %6454 = vmatprep.subr.bf16.mxu1 %v6518_v56  ;;  %5951 = vmatpush3.bf16.msra.mxu0 %v6518_v56  ;;  %s6923_s27 = smov 56   ;;  %vm1378_vm4 = vcmask 60416   ;;  %s6924_s4 = smov 80   ;;  %vm2331_vm5 = vcmask 126016   ;;  %vm3284_vm6 = vcmask 191616  }
  0x62   :  { %6456 = vmatpush3.bf16.msra.mxu1 %v6518_v56  ;;  %5952 = vmatprep.subr.bf16.mxu0 %v6519_v57  ;;  %s6925_s25 = smov 112   ;;  %s6926_s8 = smov 48   ;;  %vm4237_vm7 = vcmask 257216  }
  0x63   :  { %123 = vadd.xlane.f32.xlu0 %v122_v8  ;;  %6455 = vmatprep.subr.bf16.mxu1 %v6519_v57  ;;  %s6927_s26 = smov 72   ;;  %s6928_s28 = smov 104  }
  0x64   :  { %135 = vadd.xlane.f32.xlu1 %v134_v9  ;;  %s6929_s29 = smov 40   ;;  %s6930_s30 = smov 8  }
  0x65   :  { %5953 = vmatpush3.bf16.msra.mxu0 %v6519_v57  ;;  %s6931_s14 = smov 16   ;;  %s6932_s7 = smov 24  }
  0x66   :  { %6457 = vmatpush3.bf16.msra.mxu1 %v6519_v57 }
  0x67   :  { %126 = vadd.xlane.f32.xlu0 %v125_v10 }
  0x68   :  { %129 = vadd.xlane.f32.xlu1 %v128_v11 }
  0x6b   :  { %138 = vadd.xlane.f32.xlu0 %v137_v14 }
  0x6c   :  { %141 = vadd.xlane.f32.xlu1 %v140_v15 }
  0xec   :  { %v121_v16 = vpop.xlane.xlu0 %120 }
  0xed   :  { %v133_v17 = vpop.xlane.xlu1 %132  ;;  %v144_v18 = vmul.f32 0.03125, %v121_v16 }
  0xee   :  { %v148_v19 = vmul.f32 0.03125, %v133_v17 }
  0xef   :  { %v7100_v20 = vsub.f32 %v108_v0, %v144_v18 }
  0xf0   :  { %v7102_v21 = vsub.f32 %v112_v1, %v148_v19  ;;  %v124_v22 = vpop.xlane.xlu0 %123  ;;  %v5540_v19 = vld [vmem:[%s8409_s1] ss:$0 sm:$0xff]  ;;  %s6920_s1 = smov 96  }
  0xf1   :  { %v136_v23 = vpop.xlane.xlu1 %135  ;;  %v145_v24 = vmul.f32 0.03125, %v124_v22  ;;  %v160_v26 = vmul.f32 %v7100_v20, %v7100_v20 }
  0xf2   :  { %v149_v25 = vmul.f32 0.03125, %v136_v23  ;;  %v164_v27 = vmul.f32 %v7102_v21, %v7102_v21 }
  0xf3   :  { %v7108_v28 = vsub.f32 %v109_v2, %v145_v24  ;;  %v168_v30 = vsel %vm118_vm0, %v160_v26, 0.0 }
  0xf4   :  { %v7110_v29 = vsub.f32 %v113_v5, %v149_v25  ;;  %169 = vadd.xlane.f32.xlu0 %v168_v30  ;;  %v127_v31 = vpop.xlane.xlu0 %126  ;;  %v180_v33 = vsel %vm118_vm0, %v164_v27, 0.0  ;;  %v5541_v27 = vld [vmem:[%s8410_s2] ss:$0 sm:$0xff]  ;;  %s6921_s2 = smov 88  }
  0xf5   :  { %v130_v32 = vpop.xlane.xlu1 %129  ;;  %v146_v34 = vmul.f32 0.03125, %v127_v31  ;;  %v161_v36 = vmul.f32 %v7108_v28, %v7108_v28 }
  0xf6   :  { %v147_v35 = vmul.f32 0.03125, %v130_v32  ;;  %v165_v37 = vmul.f32 %v7110_v29, %v7110_v29 }
  0xf7   :  { %v7118_v38 = vsub.f32 %v110_v6, %v146_v34  ;;  %v171_v40 = vsel %vm118_vm0, %v161_v36, 0.0 }
  0xf8   :  { %v7120_v39 = vsub.f32 %v111_v7, %v147_v35  ;;  %181 = vadd.xlane.f32.xlu0 %v180_v33  ;;  %172 = vadd.xlane.f32.xlu1 %v171_v40  ;;  %v139_v41 = vpop.xlane.xlu0 %138  ;;  %v183_v43 = vsel %vm118_vm0, %v165_v37, 0.0 }
  0xf9   :  { %v142_v42 = vpop.xlane.xlu1 %141  ;;  %v150_v44 = vmul.f32 0.03125, %v139_v41  ;;  %v162_v46 = vmul.f32 %v7118_v38, %v7118_v38 }
  0xfa   :  { %v151_v45 = vmul.f32 0.03125, %v142_v42  ;;  %v163_v47 = vmul.f32 %v7120_v39, %v7120_v39 }
  0xfb   :  { %v7128_v48 = vsub.f32 %v114_v12, %v150_v44  ;;  %v174_v50 = vsel %vm118_vm0, %v162_v46, 0.0 }
  0xfc   :  { %v7130_v49 = vsub.f32 %v115_v13, %v151_v45  ;;  %184 = vadd.xlane.f32.xlu1 %v183_v43  ;;  %175 = vadd.xlane.f32.xlu0 %v174_v50  ;;  %v177_v51 = vsel %vm118_vm0, %v163_v47, 0.0 }
  0xfd   :  { %v166_v52 = vmul.f32 %v7128_v48, %v7128_v48 }
  0xfe   :  { %v167_v53 = vmul.f32 %v7130_v49, %v7130_v49 }
  0xff   :  { %v186_v54 = vsel %vm118_vm0, %v166_v52, 0.0 }
 0x100   :  { %178 = vadd.xlane.f32.xlu1 %v177_v51  ;;  %187 = vadd.xlane.f32.xlu0 %v186_v54  ;;  %v189_v55 = vsel %vm118_vm0, %v167_v53, 0.0 }
 0x104   :  { %190 = vadd.xlane.f32.xlu1 %v189_v55 }
 0x181   :  { %v170_v58 = vpop.xlane.xlu0 %169 }
 0x182   :  { %v192_v59 = vmul.f32 0.03125, %v170_v58 }
 0x184   :  { %v200_v60 = vadd.f32 1e-05, %v192_v59  ;;  %v392_v59 = vlaneseq }
 0x185   :  { %v173_v61 = vpop.xlane.xlu1 %172  ;;  %v182_v62 = vpop.xlane.xlu0 %181 }
 0x186   :  { %6536 = vrsqrt.f32 %v200_v60  ;;  %v193_v63 = vmul.f32 0.03125, %v173_v61  ;;  %v196_v0 = vmul.f32 0.03125, %v182_v62 }
 0x188   :  { %v201_v1 = vadd.f32 1e-05, %v193_v63  ;;  %v204_v2 = vadd.f32 1e-05, %v196_v0  ;;  %v393_v63 = vshrl.u32 %v392_v59, 7 }
 0x189   :  { %v185_v3 = vpop.xlane.xlu1 %184  ;;  %v176_v4 = vpop.xlane.xlu0 %175  ;;  %v5542_v0 = vld [vmem:[#allocation3] ss:$0 sm:$0xff] }
 0x18a   :  { %6538 = vrsqrt.f32 %v201_v1  ;;  %v197_v5 = vmul.f32 0.03125, %v185_v3  ;;  %v194_v6 = vmul.f32 0.03125, %v176_v4 }
 0x18b   :  { %6540 = vrsqrt.f32 %v204_v2 }
 0x18c   :  { %v205_v7 = vadd.f32 1e-05, %v197_v5  ;;  %v202_v8 = vadd.f32 1e-05, %v194_v6 }
 0x18d   :  { %v179_v9 = vpop.xlane.xlu1 %178  ;;  %v188_v10 = vpop.xlane.xlu0 %187 }
 0x18e   :  { %6542 = vrsqrt.f32 %v205_v7  ;;  %v195_v11 = vmul.f32 0.03125, %v179_v9  ;;  %v198_v12 = vmul.f32 0.03125, %v188_v10 }
 0x18f   :  { %6544 = vrsqrt.f32 %v202_v8 }
 0x190   :  { %v6537_v13 = vpop.eup %6536  ;;  %v203_v14 = vadd.f32 1e-05, %v195_v11  ;;  %v206_v15 = vadd.f32 1e-05, %v198_v12 }
 0x191   :  { %v191_v16 = vpop.xlane.xlu1 %190  ;;  %v216_v17 = vmul.f32 %v6537_v13, %v7100_v20 }
 0x192   :  { %6546 = vrsqrt.f32 %v203_v14  ;;  %v199_v18 = vmul.f32 0.03125, %v191_v16 }
 0x193   :  { %6548 = vrsqrt.f32 %v206_v15  ;;  %v230_v26 = vmul.f32 %v5540_v19, %v216_v17 }
 0x194   :  { %v6539_v22 = vpop.eup %6538  ;;  %v207_v23 = vadd.f32 1e-05, %v199_v18 }
 0x195   :  { %v6541_v24 = vpop.eup %6540  ;;  %v217_v25 = vmul.f32 %v6539_v22, %v7108_v28  ;;  %v244_v33 = vadd.f32 %v5541_v27, %v230_v26 }
 0x196   :  { %6550 = vrsqrt.f32 %v207_v23  ;;  %v220_v20 = vmul.f32 %v6541_v24, %v7102_v21 }
 0x197   :  { %v231_v30 = vmul.f32 %v5540_v19, %v217_v25 }
 0x198   :  { %v6543_v31 = vpop.eup %6542  ;;  %v234_v36 = vmul.f32 %v5540_v19, %v220_v20  ;;  %v6917_v20 = vmov 0.0  }
 0x199   :  { %v6545_v32 = vpop.eup %6544  ;;  %v245_v34 = vadd.f32 %v5541_v27, %v231_v30  ;;  %v221_v35 = vmul.f32 %v6543_v31, %v7110_v29  ;;  %5962 = vmatprep.subr.bf16.mxu1 %v6917_v20  ;;  %5974 = vmatprep.subr.bf16.mxu0 %v6917_v20 }
 0x19a   :  { %v218_v37 = vmul.f32 %v6545_v32, %v7118_v38  ;;  %v248_v43 = vadd.f32 %v5541_v27, %v234_v36 }
 0x19b   :  { %v252_v40 = vpack.c.bf16 %v245_v34, %v244_v33  ;;  %v235_v28 = vmul.f32 %v5540_v19, %v221_v35 }
 0x19c   :  { %v6547_v41 = vpop.eup %6546  ;;  %v232_v45 = vmul.f32 %v5540_v19, %v218_v37  ;;  %v6918_v37 = vmov 0  }
 0x19d   :  { %v6549_v42 = vpop.eup %6548  ;;  %5954 = vmatprep.mubr.msk.bf16.mxu0 %vm118_vm0, %v252_v40  ;;  %v249_v44 = vadd.f32 %v5541_v27, %v235_v28  ;;  %v219_v21 = vmul.f32 %v6547_v41, %v7120_v39 }
 0x19e   :  { %v222_v46 = vmul.f32 %v6549_v42, %v7128_v48  ;;  %v246_v29 = vadd.f32 %v5541_v27, %v232_v45  ;;  %v6915_v48 = vmov 1983009808  }
 0x19f   :  { %v254_v47 = vpack.c.bf16 %v249_v44, %v248_v43  ;;  %v233_v50 = vmul.f32 %v5540_v19, %v219_v21  ;;  %v390_v58 = vunpack.c.l.s4 %v6915_v48 }
 0x1a0   :  { %v6551_v51 = vpop.eup %6550  ;;  %v236_v53 = vmul.f32 %v5540_v19, %v222_v46 }
 0x1a1   :  { %5958 = vmatprep.mubr.msk.bf16.mxu1 %vm118_vm0, %v254_v47  ;;  %v247_v38 = vadd.f32 %v5541_v27, %v233_v50  ;;  %v223_v52 = vmul.f32 %v6551_v51, %v7130_v49  ;;  %v391_v62 = vunpack.c.0.s8 %v390_v58  ;;  %v6916_v49 = vmov 1934713408  }
 0x1a2   :  { %v250_v56 = vadd.f32 %v5541_v27, %v236_v53  ;;  %v407_v2 = vunpack.c.l.s4 %v6916_v49 }
 0x1a3   :  { %v253_v54 = vpack.c.bf16 %v247_v38, %v246_v29  ;;  %v237_v55 = vmul.f32 %v5540_v19, %v223_v52  ;;  %v7164_v7 = vsub.s32 %v391_v62, %v393_v63 }
 0x1a4   :  { %v408_v11 = vunpack.c.0.s8 %v407_v2 }
 0x1a5   :  { %5955 = vmatmul.mubr.msk.bf16.vlgmr.msra.gmra.mrb[0].mxu0 %vm118_vm0, %v253_v54  ;;  %v251_v57 = vadd.f32 %v5541_v27, %v237_v55 }
 0x1a6   :  { %v7168_v25 = vsub.s32 %v408_v11, %v393_v63  ;;  %5976 = vmatprep.mubr.msk.bf16.mxu0 %vm6919_vm1, %v6917_v20 }
 0x1a7   :  { %v255_v39 = vpack.c.bf16 %v251_v57, %v250_v56 }
 0x1a9   :  { %5959 = vmatmul.mubr.msk.bf16.vlgmr.msra.gmra.mrb[0].mxu1 %vm118_vm0, %v255_v39 }
 0x1aa   :  { %5964 = vmatprep.mubr.msk.bf16.mxu1 %vm6919_vm1, %v6917_v20 }
 0x278   :  { %v5956_v60 = vpop.f32.mrb[0].mxu0 }
 0x279   :  { %v325_v61 = vpop.f32.mrb[1].mxu0  ;;  %v334_v5 = vadd.f32 %v5956_v60, %v5542_v0 }
 0x27a   :  { %v5957_v1 = vpop.f32.mrb[2].mxu0  ;;  %v326_v9 = vadd.f32 %v5542_v0, %v325_v61 }
 0x27b   :  { %v328_v3 = vpop.f32.mrb[3].mxu0  ;;  %v337_v13 = vadd.f32 %v5957_v1, %v5542_v0 }
 0x27c   :  { %v5960_v4 = vpop.f32.mrb[0].mxu1  ;;  %v329_v17 = vadd.f32 %v5542_v0, %v328_v3 }
 0x27d   :  { %v350_v6 = vadd.f32 %v5960_v4, %v5542_v0  ;;  %v341_v8 = vpop.f32.mrb[1].mxu1 }
 0x27e   :  { %v342_v10 = vadd.f32 %v5542_v0, %v341_v8  ;;  %v5961_v12 = vpop.f32.mrb[2].mxu1 }
 0x27f   :  { %v5558_v14 = vpack.c.bf16 %v350_v6, %v334_v5  ;;  %v353_v15 = vadd.f32 %v5961_v12, %v5542_v0  ;;  %v344_v16 = vpop.f32.mrb[3].mxu1 }
 0x280   :  { %v5557_v18 = vpack.c.bf16 %v342_v10, %v326_v9  ;;  %v345_v19 = vadd.f32 %v5542_v0, %v344_v16 }
 0x281   :  { %v403_v22 = vrot.slane %v5558_v14, %v7164_v7  ;;  %v5560_v23 = vpack.c.bf16 %v353_v15, %v337_v13 }
 0x282   :  { %v395_v24 = vrot.slane %v5557_v18, %v7164_v7  ;;  %v5559_v26 = vpack.c.bf16 %v345_v19, %v329_v17 }
 0x283   :  { %v437_v27 = vrot.slane %v5560_v23, %v7164_v7 }
 0x284   :  { %v404_v30 = vcombine.low %v395_v24, %v403_v22  ;;  %v405_v31 = vcombine.high %v395_v24, %v403_v22  ;;  %v429_v32 = vrot.slane %v5559_v26, %v7164_v7 }
 0x286   :  { %v412_v33 = vrot.slane %v404_v30, %v7168_v25  ;;  %v419_v34 = vrot.slane %v405_v31, %v7168_v25  ;;  %v438_v35 = vcombine.low %v429_v32, %v437_v27  ;;  %v439_v36 = vcombine.high %v429_v32, %v437_v27 }
 0x288   :  { %v420_v40 = vcombine.high %v412_v33, %v6918_v37  ;;  %v446_v28 = vrot.slane %v438_v35, %v7168_v25  ;;  %v453_v41 = vrot.slane %v439_v36, %v7168_v25  ;;  %v421_v42 = vcombine.high %v419_v34, %v6918_v37 }
 0x289   :  { %v459_v43 = vshrl.u32 %v412_v33, 16  ;;  %v471_v50 = vshrl.u32 %v419_v34, 16 }
 0x28a   :  { %v454_v44 = vcombine.high %v446_v28, %v6918_v37  ;;  %v455_v21 = vcombine.high %v453_v41, %v6918_v37  ;;  %v458_v45 = vpack.i.b16 %v446_v28, %v412_v33  ;;  %v460_v46 = vshrl.u32 %v446_v28, 16 }
 0x28b   :  { %v465_v47 = vshrl.u32 %v420_v40, 16  ;;  %v470_v51 = vpack.i.b16 %v453_v41, %v419_v34  ;;  %v472_v29 = vshrl.u32 %v453_v41, 16  ;;  %v477_v55 = vshrl.u32 %v421_v42, 16 }
 0x28c   :  { %v461_v38 = vpack.i.b16 %v460_v46, %v459_v43  ;;  %v464_v52 = vpack.i.b16 %v454_v44, %v420_v40  ;;  %v466_v53 = vshrl.u32 %v454_v44, 16  ;;  %v7186_v54 = vpack.i.b16 %v455_v21, %v421_v42 }
 0x28d   :  { %v7188_v56 = vpack.i.b16 %v472_v29, %v471_v50  ;;  %v478_v57 = vshrl.u32 %v455_v21, 16  ;;  %v7190_v39 = vcombine.low %v458_v45, %v458_v45  ;;  %v7200_v60 = vcombine.low %v470_v51, %v470_v51 }
 0x28e   :  { %v467_v48 = vpack.i.b16 %v466_v53, %v465_v47  ;;  %v7192_v58 = vcombine.low %v461_v38, %v461_v38  ;;  %v7202_v61 = vcombine.low %v464_v52, %v464_v52  ;;  %v7210_v62 = vcombine.low %v7186_v54, %v7186_v54 }
 0x28f   :  { %v7194_v59 = vpack.i.b16 %v478_v57, %v477_v55  ;;  %482 = vrot.lane.b32.xlu0 %v7190_v39, %s6920_s1  ;;  %v7220_v0 = vcombine.low %v7188_v56, %v7188_v56 }
 0x290   :  { %533 = vrot.lane.b32.xlu1 %v7192_v58, %s6920_s1  ;;  %v7212_v63 = vcombine.low %v467_v48, %v467_v48 }
 0x291   :  { %v7228_v1 = vcombine.low %v7194_v59, %v7194_v59 }
 0x293   :  { %683 = vrot.lane.b32.xlu0 %v7200_v60, %s6920_s1 }
 0x294   :  { %583 = vrot.lane.b32.xlu1 %v7202_v61, %s6920_s1 }
 0x297   :  { %783 = vrot.lane.b32.xlu0 %v7210_v62, %s6920_s1 }
 0x298   :  { %633 = vrot.lane.b32.xlu1 %v7212_v63, %s6920_s1 }
 0x29b   :  { %985 = vrot.lane.b32.xlu0 %v7190_v39, %s6909_s18 }
 0x29c   :  { %733 = vrot.lane.b32.xlu1 %v7220_v0, %s6920_s1 }
 0x2a0   :  { %833 = vrot.lane.b32.xlu1 %v7228_v1, %s6920_s1 }
 0x2a4   :  { %1034 = vrot.lane.b32.xlu1 %v7192_v58, %s6909_s18 }
 0x2a8   :  { %1082 = vrot.lane.b32.xlu1 %v7202_v61, %s6909_s18 }
 0x2ac   :  { %1130 = vrot.lane.b32.xlu1 %v7212_v63, %s6909_s18 }
 0x301   :  { %v483_v49 = vpop.permute.xlu0 %482 }
 0x302   :  { %v489_v2 = vsel %vm484_vm2, %v483_v49, 0  ;;  %v534_v3 = vpop.permute.xlu1 %533 }
 0x303   :  { %5963 = vmatpush3.bf16.xpose.msra.mxu1 %v489_v2  ;;  %v539_v6 = vsel %vm484_vm2, %v534_v3, 0 }
 0x304   :  { %5968 = vmatprep.subr.bf16.mxu1 %v6917_v20 }
 0x305   :  { %v684_v8 = vpop.permute.xlu0 %683 }
 0x306   :  { %v584_v4 = vpop.permute.xlu1 %583  ;;  %v689_v9 = vsel %vm484_vm2, %v684_v8, 0 }
 0x307   :  { %v589_v5 = vsel %vm484_vm2, %v584_v4, 0 }
 0x308   :  { %5975 = vmatpush3.bf16.xpose.msra.mxu0 %v589_v5 }
 0x309   :  { %5986 = vmatprep.subr.bf16.mxu0 %v6917_v20  ;;  %v784_v12 = vpop.permute.xlu0 %783 }
 0x30a   :  { %5965 = vmatmul.mubr.msk.bf16.vlgmr.msra.gmra.mrb[4].mxu1 %vm484_vm2, %v458_v45  ;;  %v634_v10 = vpop.permute.xlu1 %633  ;;  %v789_v13 = vsel %vm484_vm2, %v784_v12, 0 }
 0x30b   :  { %5969 = vmatpush3.bf16.xpose.msra.mxu1 %v539_v6  ;;  %5970 = vmatprep.mubr.msk.bf16.mxu1 %vm6919_vm1, %v6917_v20  ;;  %v639_v11 = vsel %vm484_vm2, %v634_v10, 0 }
 0x30c   :  { %5980 = vmatprep.subr.bf16.mxu1 %v6917_v20 }
 0x30d   :  { %v986_v16 = vpop.permute.xlu0 %985 }
 0x30e   :  { %v734_v14 = vpop.permute.xlu1 %733  ;;  %v992_v17 = vsel %vm990_vm3, %v986_v16, 0 }
 0x30f   :  { %5977 = vmatmul.mubr.msk.bf16.vlgmr.msra.gmra.mrb[4].mxu0 %vm484_vm2, %v464_v52  ;;  %v739_v15 = vsel %vm484_vm2, %v734_v14, 0 }
 0x310   :  { %5987 = vmatpush3.bf16.xpose.msra.mxu0 %v689_v9  ;;  %5988 = vmatprep.mubr.msk.bf16.mxu0 %vm6919_vm1, %v6917_v20 }
 0x311   :  { %5998 = vmatprep.subr.bf16.mxu0 %v6917_v20 }
 0x312   :  { %5971 = vmatmul.mubr.msk.bf16.vlgmr.msra.gmra.mrb[8].mxu1 %vm484_vm2, %v461_v38  ;;  %v834_v18 = vpop.permute.xlu1 %833 }
 0x313   :  { %5981 = vmatpush3.bf16.xpose.msra.mxu1 %v639_v11  ;;  %5982 = vmatprep.mubr.msk.bf16.mxu1 %vm6919_vm1, %v6917_v20  ;;  %v839_v19 = vsel %vm484_vm2, %v834_v18, 0 }
 0x314   :  { %5992 = vmatprep.subr.bf16.mxu1 %v6917_v20 }
 0x316   :  { %v1035_v22 = vpop.permute.xlu1 %1034 }
 0x317   :  { %5989 = vmatmul.mubr.msk.bf16.vlgmr.msra.gmra.mrb[8].mxu0 %vm484_vm2, %v470_v51  ;;  %v1040_v23 = vsel %vm990_vm3, %v1035_v22, 0 }
 0x318   :  { %5999 = vmatpush3.bf16.xpose.msra.mxu0 %v789_v13  ;;  %6000 = vmatprep.mubr.msk.bf16.mxu0 %vm6919_vm1, %v6917_v20 }
 0x319   :  { %6010 = vmatprep.subr.bf16.mxu0 %v6917_v20 }
 0x31a   :  { %5983 = vmatmul.mubr.msk.bf16.vlgmr.msra.gmra.mrb[12].mxu1 %vm484_vm2, %v467_v48  ;;  %v7306_v18 = vpop.permute.xlu1 %1082 }
 0x31b   :  { %5993 = vmatpush3.bf16.xpose.msra.mxu1 %v739_v15  ;;  %5994 = vmatprep.mubr.msk.bf16.mxu1 %vm6919_vm1, %v6917_v20 }
 0x31c   :  { %6004 = vmatprep.subr.bf16.mxu1 %v6917_v20 }
 0x31f   :  { %6001 = vmatmul.mubr.msk.bf16.vlgmr.msra.gmra.mrb[12].mxu0 %vm484_vm2, %v7186_v54 }
 0x320   :  { %6011 = vmatpush3.bf16.msra.mxu0 %v992_v17  ;;  %6012 = vmatprep.mubr.msk.bf16.mxu0 %vm6919_vm1, %v6917_v20 }
 0x321   :  { %6022 = vmatprep.subr.bf16.mxu0 %v6917_v20 }
 0x322   :  { %5995 = vmatmul.mubr.msk.bf16.vlgmr.msra.gmra.mrb[16].mxu1 %vm484_vm2, %v7188_v56 }
 0x323   :  { %6005 = vmatpush3.bf16.xpose.msra.mxu1 %v839_v19  ;;  %6006 = vmatprep.mubr.msk.bf16.mxu1 %vm6919_vm1, %v6917_v20 }
 0x324   :  { %6016 = vmatprep.subr.bf16.mxu1 %v6917_v20 }
 0x32a   :  { %6007 = vmatmul.mubr.msk.bf16.vlgmr.msra.gmra.mrb[20].mxu1 %vm484_vm2, %v7194_v59 }
 0x32b   :  { %6017 = vmatpush3.bf16.msra.mxu1 %v1040_v23  ;;  %6018 = vmatprep.mubr.msk.bf16.mxu1 %vm6919_vm1, %v6917_v20 }
 0x32c   :  { %6028 = vmatprep.subr.bf16.mxu1 %v6917_v20 }
 0x3dd   :  { %v525_v24 = vpop.f32.mrb[4].mxu1 }
 0x3de   :  { %v881_v26 = vmul.f32 0.35355338, %v525_v24  ;;  %v5966_v27 = vpop.f32.mrb[5].mxu1  ;;  %v7308_v24 = vpop.permute.xlu1 %1130 }
 0x3df   :  { %v528_v30 = vpop.f32.mrb[6].mxu1 }
 0x3e0   :  { %v5967_v31 = vpop.f32.mrb[7].mxu1  ;;  %v889_v32 = vsel %vm484_vm2, %v881_v26, -inf }
 0x3e1   :  { %890 = vmax.xlane.f32.xlu0 %v889_v32 }
 0x3e2   :  { %v625_v33 = vpop.f32.mrb[4].mxu0 }
 0x3e3   :  { %v883_v34 = vmul.f32 0.35355338, %v625_v33  ;;  %v5978_v35 = vpop.f32.mrb[5].mxu0 }
 0x3e4   :  { %v628_v36 = vpop.f32.mrb[6].mxu0 }
 0x3e5   :  { %v575_v40 = vpop.f32.mrb[8].mxu1  ;;  %v5979_v28 = vpop.f32.mrb[7].mxu0  ;;  %v895_v41 = vsel %vm484_vm2, %v883_v34, -inf }
 0x3e6   :  { %v882_v42 = vmul.f32 0.35355338, %v575_v40  ;;  %v5972_v43 = vpop.f32.mrb[9].mxu1  ;;  %896 = vmax.xlane.f32.xlu0 %v895_v41 }
 0x3e7   :  { %v578_v44 = vpop.f32.mrb[10].mxu1 }
 0x3e8   :  { %v5973_v21 = vpop.f32.mrb[11].mxu1  ;;  %v892_v45 = vsel %vm484_vm2, %v882_v42, -inf }
 0x3e9   :  { %893 = vmax.xlane.f32.xlu1 %v892_v45 }
 0x3ea   :  { %v725_v46 = vpop.f32.mrb[8].mxu0 }
 0x3eb   :  { %v885_v47 = vmul.f32 0.35355338, %v725_v46  ;;  %v5990_v50 = vpop.f32.mrb[9].mxu0 }
 0x3ec   :  { %v728_v51 = vpop.f32.mrb[10].mxu0 }
 0x3ed   :  { %v675_v29 = vpop.f32.mrb[12].mxu1  ;;  %v5991_v38 = vpop.f32.mrb[11].mxu0  ;;  %v901_v52 = vsel %vm484_vm2, %v885_v47, -inf }
 0x3ee   :  { %v7289_v53 = vmul.f32 0.35355338, %v675_v29  ;;  %v5984_v54 = vpop.f32.mrb[13].mxu1  ;;  %902 = vmax.xlane.f32.xlu0 %v901_v52 }
 0x3ef   :  { %v678_v55 = vpop.f32.mrb[14].mxu1 }
 0x3f0   :  { %v5985_v56 = vpop.f32.mrb[15].mxu1  ;;  %v898_v57 = vsel %vm484_vm2, %v7289_v53, -inf }
 0x3f2   :  { %v825_v48 = vpop.f32.mrb[12].mxu0  ;;  %899 = vmax.xlane.f32.xlu0 %v898_v57 }
 0x3f3   :  { %v7293_v59 = vmul.f32 0.35355338, %v825_v48  ;;  %v6002_v49 = vpop.f32.mrb[13].mxu0 }
 0x3f4   :  { %v828_v2 = vpop.f32.mrb[14].mxu0 }
 0x3f5   :  { %v775_v3 = vpop.f32.mrb[16].mxu1  ;;  %v6003_v4 = vpop.f32.mrb[15].mxu0  ;;  %v907_v5 = vsel %vm484_vm2, %v7293_v59, -inf }
 0x3f6   :  { %v5996_v6 = vpop.f32.mrb[17].mxu1  ;;  %908 = vmax.xlane.f32.xlu0 %v907_v5  ;;  %v886_v14 = vmul.f32 0.35355338, %v775_v3 }
 0x3f7   :  { %v778_v8 = vpop.f32.mrb[18].mxu1 }
 0x3f8   :  { %v5997_v9 = vpop.f32.mrb[19].mxu1  ;;  %v904_v16 = vsel %vm484_vm2, %v886_v14, -inf }
 0x3fa   :  { %1226 = vrot.lane.b32.xlu1 %v7220_v0, %s6909_s18 }
 0x3fd   :  { %v875_v10 = vpop.f32.mrb[20].mxu1 }
 0x3fe   :  { %v6008_v11 = vpop.f32.mrb[21].mxu1  ;;  %v7301_v15 = vmul.f32 0.35355338, %v875_v10 }
 0x3ff   :  { %v878_v12 = vpop.f32.mrb[22].mxu1 }
 0x400   :  { %v6009_v13 = vpop.f32.mrb[23].mxu1  ;;  %v910_v17 = vsel %vm484_vm2, %v7301_v15, -inf }
 0x40c   :  { %1178 = vrot.lane.b32.xlu0 %v7200_v60, %s6909_s18 }
 0x41e   :  { %905 = vmax.xlane.f32.xlu1 %v904_v16 }
 0x422   :  { %911 = vmax.xlane.f32.xlu1 %v910_v17 }
 0x46e   :  { %v891_v19 = vpop.xlane.xlu0 %890 }
 0x46f   :  { %v913_v22 = vsub.f32 %v881_v26, %v891_v19  ;;  %v1088_v19 = vsel %vm990_vm3, %v7306_v18, 0 }
 0x471   :  { %v921_v23 = vmul.f32 1.442695, %v913_v22 }
 0x473   :  { %6552 = vpow2.f32 %v921_v23  ;;  %v897_v27 = vpop.xlane.xlu0 %896 }
 0x474   :  { %v915_v30 = vsub.f32 %v883_v34, %v897_v27 }
 0x476   :  { %v925_v31 = vmul.f32 1.442695, %v915_v30  ;;  %v894_v32 = vpop.xlane.xlu1 %893 }
 0x477   :  { %v914_v33 = vsub.f32 %v882_v42, %v894_v32  ;;  %v1136_v32 = vsel %vm990_vm3, %v7308_v24, 0 }
 0x478   :  { %6554 = vpow2.f32 %v925_v31 }
 0x479   :  { %v923_v35 = vmul.f32 1.442695, %v914_v33 }
 0x47a   :  { %v7331_v50 = vpop.permute.xlu1 %1226 }
 0x47b   :  { %6556 = vpow2.f32 %v923_v35  ;;  %v903_v36 = vpop.xlane.xlu0 %902 }
 0x47c   :  { %v917_v40 = vsub.f32 %v885_v47, %v903_v36 }
 0x47d   :  { %v7310_v28 = vpop.eup %6552 }
 0x47e   :  { %v929_v41 = vmul.f32 1.442695, %v917_v40  ;;  %v937_v26 = vsel %vm484_vm2, %v7310_v28, 0.0 }
 0x47f   :  { %938 = vadd.xlane.f32.xlu0 %v937_v26  ;;  %v900_v46 = vpop.xlane.xlu0 %899 }
 0x480   :  { %6558 = vpow2.f32 %v929_v41  ;;  %v916_v47 = vsub.f32 %v7289_v53, %v900_v46 }
 0x482   :  { %v7314_v43 = vpop.eup %6554  ;;  %v927_v29 = vmul.f32 1.442695, %v916_v47 }
 0x483   :  { %v943_v34 = vsel %vm484_vm2, %v7314_v43, 0.0  ;;  %v909_v51 = vpop.xlane.xlu0 %908 }
 0x484   :  { %944 = vadd.xlane.f32.xlu0 %v943_v34  ;;  %v919_v38 = vsub.f32 %v7293_v59, %v909_v51  ;;  %6560 = vpow2.f32 %v927_v29  ;;  %v1232_v51 = vsel %vm990_vm3, %v7331_v50, 0 }
 0x485   :  { %v7318_v42 = vpop.eup %6556 }
 0x486   :  { %v940_v44 = vsel %vm484_vm2, %v7318_v42, 0.0  ;;  %v933_v56 = vmul.f32 1.442695, %v919_v38 }
 0x487   :  { %941 = vadd.xlane.f32.xlu1 %v940_v44  ;;  %v1179_v9 = vpop.permute.xlu0 %1178 }
 0x488   :  { %v1184_v33 = vsel %vm990_vm3, %v1179_v9, 0 }
 0x48a   :  { %v7322_v21 = vpop.eup %6558 }
 0x48b   :  { %v949_v45 = vsel %vm484_vm2, %v7322_v21, 0.0 }
 0x48c   :  { %950 = vadd.xlane.f32.xlu0 %v949_v45 }
 0x48e   :  { %v7334_v57 = vpop.eup %6560 }
 0x48f   :  { %v946_v48 = vsel %vm484_vm2, %v7334_v57, 0.0 }
 0x498   :  { %1322 = vrot.lane.b32.xlu1 %v7228_v1, %s6909_s18 }
 0x4a2   :  { %1274 = vrot.lane.b32.xlu0 %v7210_v62, %s6909_s18 }
 0x4ab   :  { %v906_v52 = vpop.xlane.xlu1 %905 }
 0x4ac   :  { %v918_v54 = vsub.f32 %v886_v14, %v906_v52 }
 0x4ae   :  { %v931_v55 = vmul.f32 1.442695, %v918_v54 }
 0x4af   :  { %v912_v3 = vpop.xlane.xlu1 %911 }
 0x4b0   :  { %6562 = vpow2.f32 %v931_v55  ;;  %v920_v4 = vsub.f32 %v7301_v15, %v912_v3 }
 0x4b1   :  { %6564 = vpow2.f32 %v933_v56 }
 0x4b2   :  { %v935_v5 = vmul.f32 1.442695, %v920_v4 }
 0x4b4   :  { %6566 = vpow2.f32 %v935_v5 }
 0x4ba   :  { %v7338_v49 = vpop.eup %6562 }
 0x4bb   :  { %v7340_v53 = vpop.eup %6564  ;;  %v952_v59 = vsel %vm484_vm2, %v7338_v49, 0.0 }
 0x4bc   :  { %947 = vadd.xlane.f32.xlu1 %v946_v48  ;;  %v955_v2 = vsel %vm484_vm2, %v7340_v53, 0.0 }
 0x4be   :  { %v7363_v6 = vpop.eup %6566 }
 0x4bf   :  { %v958_v8 = vsel %vm484_vm2, %v7363_v6, 0.0 }
 0x4c0   :  { %953 = vadd.xlane.f32.xlu1 %v952_v59 }
 0x4c1   :  { %956 = vadd.xlane.f32.xlu0 %v955_v2 }
 0x4d1   :  { %1439 = vrot.lane.b32.xlu1 %v7192_v58, %s6921_s2 }
 0x4d7   :  { %1389 = vrot.lane.b32.xlu0 %v7190_v39, %s6921_s2 }
 0x4db   :  { %1387 = vrot.lane.b32.xlu0 %v7190_v39, %s6922_s24 }
 0x4df   :  { %1489 = vrot.lane.b32.xlu0 %v7202_v61, %s6921_s2 }
 0x4e3   :  { %1487 = vrot.lane.b32.xlu0 %v7202_v61, %s6922_s24 }
 0x4e7   :  { %1589 = vrot.lane.b32.xlu0 %v7200_v60, %s6921_s2 }
 0x4eb   :  { %1587 = vrot.lane.b32.xlu0 %v7200_v60, %s6922_s24 }
 0x4ef   :  { %1689 = vrot.lane.b32.xlu0 %v7210_v62, %s6921_s2 }
 0x4f3   :  { %1687 = vrot.lane.b32.xlu0 %v7210_v62, %s6922_s24 }
 0x4f5   :  { %959 = vadd.xlane.f32.xlu1 %v958_v8 }
 0x4f7   :  { %1891 = vrot.lane.b32.xlu0 %v7190_v39, %s6923_s27 }
 0x506   :  { %1437 = vrot.lane.b32.xlu1 %v7192_v58, %s6922_s24 }
 0x50a   :  { %1539 = vrot.lane.b32.xlu1 %v7212_v63, %s6921_s2 }
 0x50c   :  { %v939_v10 = vpop.xlane.xlu0 %938 }
 0x50d   :  { %6568 = vrcp.f32 %v939_v10 }
 0x50e   :  { %1537 = vrot.lane.b32.xlu1 %v7212_v63, %s6922_s24 }
 0x511   :  { %v945_v11 = vpop.xlane.xlu0 %944 }
 0x512   :  { %6570 = vrcp.f32 %v945_v11  ;;  %1639 = vrot.lane.b32.xlu1 %v7220_v0, %s6921_s2 }
 0x514   :  { %v942_v12 = vpop.xlane.xlu1 %941 }
 0x515   :  { %6572 = vrcp.f32 %v942_v12 }
 0x516   :  { %1637 = vrot.lane.b32.xlu1 %v7220_v0, %s6922_s24 }
 0x517   :  { %v6569_v13 = vpop.eup %6568 }
 0x518   :  { %v969_v14 = vmul.f32 %v6569_v13, %v7310_v28  ;;  %v1323_v28 = vpop.permute.xlu1 %1322 }
 0x519   :  { %v951_v15 = vpop.xlane.xlu0 %950 }
 0x51a   :  { %6574 = vrcp.f32 %v951_v15  ;;  %1739 = vrot.lane.b32.xlu1 %v7228_v1, %s6921_s2  ;;  %v977_v16 = vpack.c.bf16 %v969_v14, %v969_v14 }
 0x51c   :  { %v6571_v17 = vpop.eup %6570  ;;  %6013 = vmatmul.mubr.msk.bf16.vlgmr.msra.gmra.mrb[16].mxu0 %vm484_vm2, %v977_v16 }
 0x51d   :  { %6023 = vmatpush3.bf16.msra.mxu0 %v1088_v19  ;;  %6024 = vmatprep.mubr.msk.bf16.mxu0 %vm6919_vm1, %v6917_v20  ;;  %v971_v22 = vmul.f32 %v6571_v17, %v7314_v43  ;;  %v1275_v24 = vpop.permute.xlu0 %1274 }
 0x51e   :  { %1737 = vrot.lane.b32.xlu1 %v7228_v1, %s6922_s24  ;;  %6034 = vmatprep.subr.bf16.mxu0 %v6917_v20  ;;  %v1280_v40 = vsel %vm990_vm3, %v1275_v24, 0 }
 0x51f   :  { %v6573_v23 = vpop.eup %6572  ;;  %v979_v30 = vpack.c.bf16 %v971_v22, %v971_v22 }
 0x520   :  { %v970_v27 = vmul.f32 %v6573_v23, %v7318_v42 }
 0x522   :  { %1939 = vrot.lane.b32.xlu1 %v7192_v58, %s6923_s27  ;;  %v978_v18 = vpack.c.bf16 %v970_v27, %v970_v27 }
 0x524   :  { %v6575_v31 = vpop.eup %6574  ;;  %6019 = vmatmul.mubr.msk.bf16.vlgmr.msra.gmra.mrb[24].mxu1 %vm484_vm2, %v978_v18  ;;  %6025 = vmatmul.mubr.msk.bf16.vlgmr.msra.gmra.mrb[20].mxu0 %vm484_vm2, %v979_v30 }
 0x525   :  { %6029 = vmatpush3.bf16.msra.mxu1 %v1136_v32  ;;  %6035 = vmatpush3.bf16.msra.mxu0 %v1184_v33  ;;  %v973_v35 = vmul.f32 %v6575_v31, %v7322_v21 }
 0x526   :  { %1987 = vrot.lane.b32.xlu1 %v7202_v61, %s6923_s27  ;;  %6036 = vmatprep.mubr.msk.bf16.mxu0 %vm6919_vm1, %v6917_v20 }
 0x527   :  { %6046 = vmatprep.subr.bf16.mxu0 %v6917_v20  ;;  %6030 = vmatprep.mubr.msk.bf16.mxu1 %vm6919_vm1, %v6917_v20  ;;  %v981_v36 = vpack.c.bf16 %v973_v35, %v973_v35 }
 0x528   :  { %6040 = vmatprep.subr.bf16.mxu1 %v6917_v20 }
 0x52a   :  { %2035 = vrot.lane.b32.xlu1 %v7212_v63, %s6923_s27 }
 0x52c   :  { %6037 = vmatmul.mubr.msk.bf16.vlgmr.msra.gmra.mrb[24].mxu0 %vm484_vm2, %v981_v36 }
 0x52d   :  { %6047 = vmatpush3.bf16.msra.mxu0 %v1280_v40  ;;  %6048 = vmatprep.mubr.msk.bf16.mxu0 %vm6919_vm1, %v6917_v20 }
 0x52e   :  { %6058 = vmatprep.subr.bf16.mxu0 %v6917_v20 }
 0x549   :  { %v948_v41 = vpop.xlane.xlu1 %947 }
 0x54a   :  { %6576 = vrcp.f32 %v948_v41 }
 0x54d   :  { %v954_v26 = vpop.xlane.xlu1 %953 }
 0x54e   :  { %6578 = vrcp.f32 %v954_v26  ;;  %v957_v43 = vpop.xlane.xlu0 %956 }
 0x54f   :  { %6580 = vrcp.f32 %v957_v43 }
 0x551   :  { %v1440_v8 = vpop.permute.xlu1 %1439 }
 0x552   :  { %v1390_v34 = vpop.permute.xlu0 %1389  ;;  %v1445_v17 = vsel %vm484_vm2, %v1440_v8, 0 }
 0x553   :  { %v1395_v55 = vsel %vm484_vm2, %v1390_v34, 0 }
 0x554   :  { %v6577_v42 = vpop.eup %6576 }
 0x555   :  { %v972_v44 = vmul.f32 %v6577_v42, %v7334_v57  ;;  %v1328_v57 = vsel %vm990_vm3, %v1323_v28, 0 }
 0x556   :  { %v1388_v21 = vpop.permute.xlu0 %1387 }
 0x557   :  { %v980_v45 = vpack.c.bf16 %v972_v44, %v972_v44 }
 0x558   :  { %v6579_v46 = vpop.eup %6578 }
 0x559   :  { %v6581_v47 = vpop.eup %6580  ;;  %6031 = vmatmul.mubr.msk.bf16.vlgmr.msra.gmra.mrb[28].mxu1 %vm484_vm2, %v980_v45  ;;  %v974_v52 = vmul.f32 %v6579_v46, %v7338_v49 }
 0x55a   :  { %6041 = vmatpush3.bf16.msra.mxu1 %v1232_v51  ;;  %v1490_v29 = vpop.permute.xlu0 %1489  ;;  %v975_v38 = vmul.f32 %v6581_v47, %v7340_v53  ;;  %6042 = vmatprep.mubr.msk.bf16.mxu1 %vm6919_vm1, %v6917_v20 }
 0x55b   :  { %6052 = vmatprep.subr.bf16.mxu1 %v6917_v20  ;;  %v982_v50 = vpack.c.bf16 %v974_v52, %v974_v52  ;;  %v1495_v49 = vsel %vm484_vm2, %v1490_v29, 0 }
 0x55c   :  { %v983_v54 = vpack.c.bf16 %v975_v38, %v975_v38 }
 0x55e   :  { %v1488_v56 = vpop.permute.xlu0 %1487  ;;  %6049 = vmatmul.mubr.msk.bf16.vlgmr.msra.gmra.mrb[28].mxu0 %vm484_vm2, %v983_v54 }
 0x55f   :  { %6059 = vmatpush3.bf16.xpose.msra.mxu0 %v1395_v55  ;;  %6060 = vmatprep.mubr.msk.bf16.mxu0 %vm6919_vm1, %v6917_v20 }
 0x560   :  { %6070 = vmatprep.subr.bf16.mxu0 %v6917_v20 }
 0x561   :  { %6043 = vmatmul.mubr.msk.bf16.vlgmr.msra.gmra.mrb[32].mxu1 %vm484_vm2, %v982_v50 }
 0x562   :  { %6053 = vmatpush3.bf16.msra.mxu1 %v1328_v57  ;;  %6054 = vmatprep.mubr.msk.bf16.mxu1 %vm6919_vm1, %v6917_v20  ;;  %v1590_v48 = vpop.permute.xlu0 %1589 }
 0x563   :  { %6064 = vmatprep.subr.bf16.mxu1 %v6917_v20  ;;  %v1595_v59 = vsel %vm484_vm2, %v1590_v48, 0 }
 0x566   :  { %6061 = vmatmul.mubr.msk.bf16.vlgmr.msra.gmra.mrb[32].mxu0 %vm484_vm2, %v1388_v21  ;;  %v1588_v53 = vpop.permute.xlu0 %1587 }
 0x567   :  { %6071 = vmatpush3.bf16.xpose.msra.mxu0 %v1495_v49  ;;  %6072 = vmatprep.mubr.msk.bf16.mxu0 %vm6919_vm1, %v6917_v20 }
 0x568   :  { %6082 = vmatprep.subr.bf16.mxu0 %v6917_v20 }
 0x56a   :  { %v1690_v2 = vpop.permute.xlu0 %1689 }
 0x56b   :  { %v1695_v4 = vsel %vm484_vm2, %v1690_v2, 0 }
 0x56e   :  { %6073 = vmatmul.mubr.msk.bf16.vlgmr.msra.gmra.mrb[36].mxu0 %vm484_vm2, %v1488_v56  ;;  %v1688_v3 = vpop.permute.xlu0 %1687 }
 0x56f   :  { %6083 = vmatpush3.bf16.xpose.msra.mxu0 %v1595_v59  ;;  %6084 = vmatprep.mubr.msk.bf16.mxu0 %vm6919_vm1, %v6917_v20 }
 0x570   :  { %6094 = vmatprep.subr.bf16.mxu0 %v6917_v20 }
 0x572   :  { %v1892_v5 = vpop.permute.xlu0 %1891 }
 0x573   :  { %v1897_v9 = vsel %vm990_vm3, %v1892_v5, 0 }
 0x576   :  { %6085 = vmatmul.mubr.msk.bf16.vlgmr.msra.gmra.mrb[40].mxu0 %vm484_vm2, %v1588_v53 }
 0x577   :  { %6095 = vmatpush3.bf16.xpose.msra.mxu0 %v1695_v4  ;;  %6096 = vmatprep.mubr.msk.bf16.mxu0 %vm6919_vm1, %v6917_v20 }
 0x578   :  { %6106 = vmatprep.subr.bf16.mxu0 %v6917_v20 }
 0x57e   :  { %6097 = vmatmul.mubr.msk.bf16.vlgmr.msra.gmra.mrb[44].mxu0 %vm484_vm2, %v1688_v3 }
 0x57f   :  { %6107 = vmatpush3.bf16.msra.mxu0 %v1897_v9  ;;  %6108 = vmatprep.mubr.msk.bf16.mxu0 %vm6919_vm1, %v6917_v20 }
 0x580   :  { %6118 = vmatprep.subr.bf16.mxu0 %v6917_v20 }
 0x582   :  { %v960_v10 = vpop.xlane.xlu1 %959 }
 0x583   :  { %6582 = vrcp.f32 %v960_v10 }
 0x586   :  { %v1438_v11 = vpop.permute.xlu1 %1437 }
 0x58a   :  { %v1540_v12 = vpop.permute.xlu1 %1539 }
 0x58b   :  { %v1545_v22 = vsel %vm484_vm2, %v1540_v12, 0 }
 0x58d   :  { %v6583_v13 = vpop.eup %6582 }
 0x58e   :  { %v976_v14 = vmul.f32 %v6583_v13, %v7363_v6  ;;  %v1538_v16 = vpop.permute.xlu1 %1537 }
 0x590   :  { %v984_v15 = vpack.c.bf16 %v976_v14, %v976_v14 }
 0x592   :  { %6055 = vmatmul.mubr.msk.bf16.vlgmr.msra.gmra.mrb[36].mxu1 %vm484_vm2, %v984_v15  ;;  %v1640_v19 = vpop.permute.xlu1 %1639 }
 0x593   :  { %6065 = vmatpush3.bf16.xpose.msra.mxu1 %v1445_v17  ;;  %6066 = vmatprep.mubr.msk.bf16.mxu1 %vm6919_vm1, %v6917_v20  ;;  %v1645_v23 = vsel %vm484_vm2, %v1640_v19, 0 }
 0x594   :  { %6076 = vmatprep.subr.bf16.mxu1 %v6917_v20 }
 0x596   :  { %v1638_v6 = vpop.permute.xlu1 %1637 }
 0x59a   :  { %6067 = vmatmul.mubr.msk.bf16.vlgmr.msra.gmra.mrb[40].mxu1 %vm484_vm2, %v1438_v11  ;;  %v1740_v27 = vpop.permute.xlu1 %1739 }
 0x59b   :  { %6077 = vmatpush3.bf16.xpose.msra.mxu1 %v1545_v22  ;;  %6078 = vmatprep.mubr.msk.bf16.mxu1 %vm6919_vm1, %v6917_v20  ;;  %v1745_v30 = vsel %vm484_vm2, %v1740_v27, 0 }
 0x59c   :  { %6088 = vmatprep.subr.bf16.mxu1 %v6917_v20 }
 0x59e   :  { %v1738_v18 = vpop.permute.xlu1 %1737 }
 0x5a2   :  { %6079 = vmatmul.mubr.msk.bf16.vlgmr.msra.gmra.mrb[44].mxu1 %vm484_vm2, %v1538_v16  ;;  %v1940_v31 = vpop.permute.xlu1 %1939 }
 0x5a3   :  { %6089 = vmatpush3.bf16.xpose.msra.mxu1 %v1645_v23  ;;  %6090 = vmatprep.mubr.msk.bf16.mxu1 %vm6919_vm1, %v6917_v20  ;;  %v1945_v32 = vsel %vm990_vm3, %v1940_v31, 0 }
 0x5a4   :  { %6100 = vmatprep.subr.bf16.mxu1 %v6917_v20 }
 0x5aa   :  { %6091 = vmatmul.mubr.msk.bf16.vlgmr.msra.gmra.mrb[48].mxu1 %vm484_vm2, %v1638_v6 }
 0x5ab   :  { %6101 = vmatpush3.bf16.xpose.msra.mxu1 %v1745_v30  ;;  %6102 = vmatprep.mubr.msk.bf16.mxu1 %vm6919_vm1, %v6917_v20 }
 0x5ac   :  { %6112 = vmatprep.subr.bf16.mxu1 %v6917_v20 }
 0x5b2   :  { %6103 = vmatmul.mubr.msk.bf16.vlgmr.msra.gmra.mrb[52].mxu1 %vm484_vm2, %v1738_v18 }
 0x5b3   :  { %6113 = vmatpush3.bf16.msra.mxu1 %v1945_v32  ;;  %6114 = vmatprep.mubr.msk.bf16.mxu1 %vm6919_vm1, %v6917_v20 }
 0x5b4   :  { %6124 = vmatprep.subr.bf16.mxu1 %v6917_v20 }
 0x5ef   :  { %v1028_v33 = vpop.f32.mrb[16].mxu0 }
 0x5f0   :  { %v1370_v35 = vpack.c.bf16 %v1028_v33, %v1028_v33  ;;  %v6014_v24 = vpop.f32.mrb[17].mxu0 }
 0x5f1   :  { %v1031_v36 = vpop.f32.mrb[18].mxu0 }
 0x5f2   :  { %1379 = vst.msk [vmem:[#allocation2] sm:$0xf] %vm1378_vm4, %v1370_v35  ;;  %v6015_v40 = vpop.f32.mrb[19].mxu0 }
 0x5f7   :  { %v1076_v28 = vpop.f32.mrb[24].mxu1  ;;  %v1124_v41 = vpop.f32.mrb[20].mxu0 }
 0x5f8   :  { %v1371_v26 = vpack.c.bf16 %v1076_v28, %v1076_v28  ;;  %v1372_v43 = vpack.c.bf16 %v1124_v41, %v1124_v41  ;;  %v6020_v34 = vpop.f32.mrb[25].mxu1  ;;  %v6026_v42 = vpop.f32.mrb[21].mxu0 }
 0x5f9   :  { %v1079_v44 = vpop.f32.mrb[26].mxu1  ;;  %v1127_v21 = vpop.f32.mrb[22].mxu0 }
 0x5fa   :  { %1380 = vst.msk [vmem:[#allocation2 + $0x4] sm:$0xf] %vm1378_vm4, %v1371_v26  ;;  %1381 = vst.msk [vmem:[#allocation2 + $0x8] sm:$0xf] %vm1378_vm4, %v1372_v43  ;;  %v6021_v45 = vpop.f32.mrb[27].mxu1  ;;  %v6027_v46 = vpop.f32.mrb[23].mxu0 }
 0x5ff   :  { %v1220_v47 = vpop.f32.mrb[24].mxu0 }
 0x600   :  { %v1374_v51 = vpack.c.bf16 %v1220_v47, %v1220_v47  ;;  %v6038_v29 = vpop.f32.mrb[25].mxu0 }
 0x601   :  { %v1223_v38 = vpop.f32.mrb[26].mxu0 }
 0x602   :  { %1383 = vst.msk [vmem:[#allocation2 + $0x10] sm:$0xf] %vm1378_vm4, %v1374_v51  ;;  %v6039_v52 = vpop.f32.mrb[27].mxu0 }
 0x62c   :  { %v1172_v54 = vpop.f32.mrb[28].mxu1 }
 0x62d   :  { %v1373_v55 = vpack.c.bf16 %v1172_v54, %v1172_v54  ;;  %v6032_v56 = vpop.f32.mrb[29].mxu1 }
 0x62e   :  { %v1175_v50 = vpop.f32.mrb[30].mxu1 }
 0x62f   :  { %1382 = vst.msk [vmem:[#allocation2 + $0xc] sm:$0xf] %vm1378_vm4, %v1373_v55  ;;  %v6033_v57 = vpop.f32.mrb[31].mxu1 }
 0x631   :  { %v1316_v48 = vpop.f32.mrb[28].mxu0 }
 0x632   :  { %v1376_v49 = vpack.c.bf16 %v1316_v48, %v1316_v48  ;;  %v6050_v53 = vpop.f32.mrb[29].mxu0 }
 0x633   :  { %v1319_v59 = vpop.f32.mrb[30].mxu0 }
 0x634   :  { %1385 = vst.msk [vmem:[#allocation2 + $0x18] sm:$0xf] %vm1378_vm4, %v1376_v49  ;;  %v1268_v2 = vpop.f32.mrb[32].mxu1  ;;  %v6051_v3 = vpop.f32.mrb[31].mxu0 }
 0x635   :  { %v1375_v4 = vpack.c.bf16 %v1268_v2, %v1268_v2  ;;  %v6044_v5 = vpop.f32.mrb[33].mxu1 }
 0x636   :  { %v1271_v8 = vpop.f32.mrb[34].mxu1 }
 0x637   :  { %1384 = vst.msk [vmem:[#allocation2 + $0x14] sm:$0xf] %vm1378_vm4, %v1375_v4  ;;  %v6045_v9 = vpop.f32.mrb[35].mxu1 }
 0x639   :  { %v1431_v10 = vpop.f32.mrb[32].mxu0 }
 0x63a   :  { %v7489_v11 = vmul.f32 0.35355338, %v1431_v10  ;;  %v6062_v12 = vpop.f32.mrb[33].mxu0 }
 0x63b   :  { %v1434_v13 = vpop.f32.mrb[34].mxu0 }
 0x63c   :  { %v6063_v14 = vpop.f32.mrb[35].mxu0  ;;  %v1795_v15 = vsel %vm484_vm2, %v7489_v11, -inf }
 0x63d   :  { %1796 = vmax.xlane.f32.xlu0 %v1795_v15 }
 0x641   :  { %v1531_v16 = vpop.f32.mrb[36].mxu0 }
 0x642   :  { %v1789_v17 = vmul.f32 0.35355338, %v1531_v16  ;;  %v6074_v19 = vpop.f32.mrb[37].mxu0 }
 0x643   :  { %v1534_v22 = vpop.f32.mrb[38].mxu0 }
 0x644   :  { %v6075_v6 = vpop.f32.mrb[39].mxu0  ;;  %v1801_v23 = vsel %vm484_vm2, %v1789_v17, -inf }
 0x645   :  { %1802 = vmax.xlane.f32.xlu0 %v1801_v23 }
 0x649   :  { %v1631_v27 = vpop.f32.mrb[40].mxu0 }
 0x64a   :  { %v6086_v18 = vpop.f32.mrb[41].mxu0  ;;  %v1791_v38 = vmul.f32 0.35355338, %v1631_v27 }
 0x64b   :  { %v1634_v30 = vpop.f32.mrb[42].mxu0  ;;  %v1988_v18 = vpop.permute.xlu1 %1987 }
 0x64c   :  { %v6087_v31 = vpop.f32.mrb[43].mxu0  ;;  %v1807_v56 = vsel %vm484_vm2, %v1791_v38, -inf }
 0x651   :  { %v1731_v32 = vpop.f32.mrb[44].mxu0 }
 0x652   :  { %v6098_v33 = vpop.f32.mrb[45].mxu0  ;;  %v7497_v55 = vmul.f32 0.35355338, %v1731_v32 }
 0x653   :  { %v1734_v35 = vpop.f32.mrb[46].mxu0 }
 0x654   :  { %v6099_v24 = vpop.f32.mrb[47].mxu0  ;;  %v1813_v59 = vsel %vm484_vm2, %v7497_v55, -inf }
 0x665   :  { %v1364_v36 = vpop.f32.mrb[36].mxu1 }
 0x666   :  { %v1377_v40 = vpack.c.bf16 %v1364_v36, %v1364_v36  ;;  %v6056_v28 = vpop.f32.mrb[37].mxu1 }
 0x667   :  { %v1367_v41 = vpop.f32.mrb[38].mxu1 }
 0x668   :  { %1386 = vst.msk [vmem:[#allocation2 + $0x1c] sm:$0xf] %vm1378_vm4, %v1377_v40  ;;  %v6057_v26 = vpop.f32.mrb[39].mxu1 }
 0x66d   :  { %v1481_v43 = vpop.f32.mrb[40].mxu1 }
 0x66e   :  { %v1788_v34 = vmul.f32 0.35355338, %v1481_v43  ;;  %v6068_v42 = vpop.f32.mrb[41].mxu1 }
 0x66f   :  { %v1484_v44 = vpop.f32.mrb[42].mxu1 }
 0x670   :  { %v6069_v21 = vpop.f32.mrb[43].mxu1  ;;  %v1798_v45 = vsel %vm484_vm2, %v1788_v34, -inf }
 0x671   :  { %1799 = vmax.xlane.f32.xlu1 %v1798_v45 }
 0x675   :  { %v1581_v46 = vpop.f32.mrb[44].mxu1 }
 0x676   :  { %v1790_v47 = vmul.f32 0.35355338, %v1581_v46  ;;  %v6080_v51 = vpop.f32.mrb[45].mxu1 }
 0x677   :  { %v1584_v29 = vpop.f32.mrb[46].mxu1 }
 0x678   :  { %v6081_v52 = vpop.f32.mrb[47].mxu1  ;;  %v1804_v54 = vsel %vm484_vm2, %v1790_v47, -inf }
 0x679   :  { %1805 = vmax.xlane.f32.xlu0 %v1804_v54 }
 0x67d   :  { %1808 = vmax.xlane.f32.xlu0 %v1807_v56  ;;  %v1681_v50 = vpop.f32.mrb[48].mxu1 }
 0x67e   :  { %v1792_v57 = vmul.f32 0.35355338, %v1681_v50  ;;  %v6092_v48 = vpop.f32.mrb[49].mxu1 }
 0x67f   :  { %v1684_v49 = vpop.f32.mrb[50].mxu1 }
 0x680   :  { %v6093_v53 = vpop.f32.mrb[51].mxu1  ;;  %v1810_v2 = vsel %vm484_vm2, %v1792_v57, -inf }
 0x681   :  { %1814 = vmax.xlane.f32.xlu0 %v1813_v59  ;;  %1811 = vmax.xlane.f32.xlu1 %v1810_v2 }
 0x685   :  { %v1781_v3 = vpop.f32.mrb[52].mxu1 }
 0x686   :  { %v6104_v4 = vpop.f32.mrb[53].mxu1  ;;  %v7507_v9 = vmul.f32 0.35355338, %v1781_v3 }
 0x687   :  { %v1784_v5 = vpop.f32.mrb[54].mxu1  ;;  %v1993_v4 = vsel %vm990_vm3, %v1988_v18, 0 }
 0x688   :  { %v6105_v8 = vpop.f32.mrb[55].mxu1  ;;  %v1816_v10 = vsel %vm484_vm2, %v7507_v9, -inf }
 0x692   :  { %2131 = vrot.lane.b32.xlu1 %v7220_v0, %s6923_s27 }
 0x697   :  { %2083 = vrot.lane.b32.xlu0 %v7200_v60, %s6923_s27 }
 0x6b6   :  { %1817 = vmax.xlane.f32.xlu1 %v1816_v10 }
 0x6ca   :  { %v1797_v12 = vpop.xlane.xlu0 %1796 }
 0x6cb   :  { %v1819_v13 = vsub.f32 %v7489_v11, %v1797_v12  ;;  %v7520_v11 = vpop.permute.xlu1 %2035 }
 0x6cd   :  { %v1827_v14 = vmul.f32 1.442695, %v1819_v13 }
 0x6cf   :  { %6584 = vpow2.f32 %v1827_v14 }
 0x6d2   :  { %v1803_v15 = vpop.xlane.xlu0 %1802 }
 0x6d3   :  { %v1821_v16 = vsub.f32 %v1789_v17, %v1803_v15 }
 0x6d5   :  { %v1831_v19 = vmul.f32 1.442695, %v1821_v16 }
 0x6d7   :  { %6586 = vpow2.f32 %v1831_v19 }
 0x6d9   :  { %v7512_v22 = vpop.eup %6584 }
 0x6da   :  { %v1843_v6 = vsel %vm484_vm2, %v7512_v22, 0.0 }
 0x6db   :  { %1844 = vadd.xlane.f32.xlu0 %v1843_v6 }
 0x6e1   :  { %v7516_v23 = vpop.eup %6586 }
 0x6e2   :  { %v1849_v27 = vsel %vm484_vm2, %v7516_v23, 0.0 }
 0x6e3   :  { %1850 = vadd.xlane.f32.xlu0 %v1849_v27 }
 0x6fe   :  { %v1800_v30 = vpop.xlane.xlu1 %1799 }
 0x6ff   :  { %v1820_v31 = vsub.f32 %v1788_v34, %v1800_v30 }
 0x701   :  { %v1829_v17 = vmul.f32 1.442695, %v1820_v31 }
 0x703   :  { %6588 = vpow2.f32 %v1829_v17 }
 0x706   :  { %v1806_v32 = vpop.xlane.xlu0 %1805 }
 0x707   :  { %v1822_v33 = vsub.f32 %v1790_v47, %v1806_v32 }
 0x709   :  { %v1833_v35 = vmul.f32 1.442695, %v1822_v33 }
 0x70a   :  { %v1809_v24 = vpop.xlane.xlu0 %1808 }
 0x70b   :  { %6590 = vpow2.f32 %v1833_v35  ;;  %v1823_v36 = vsub.f32 %v1791_v38, %v1809_v24 }
 0x70d   :  { %v7522_v40 = vpop.eup %6588  ;;  %v1835_v28 = vmul.f32 1.442695, %v1823_v36 }
 0x70e   :  { %v1846_v41 = vsel %vm484_vm2, %v7522_v40, 0.0  ;;  %v1812_v44 = vpop.xlane.xlu1 %1811  ;;  %v1815_v45 = vpop.xlane.xlu0 %1814 }
 0x70f   :  { %6592 = vpow2.f32 %v1835_v28  ;;  %1847 = vadd.xlane.f32.xlu1 %v1846_v41  ;;  %v1824_v21 = vsub.f32 %v1792_v57, %v1812_v44  ;;  %v1825_v46 = vsub.f32 %v7497_v55, %v1815_v45 }
 0x711   :  { %v1837_v47 = vmul.f32 1.442695, %v1824_v21  ;;  %v1839_v51 = vmul.f32 1.442695, %v1825_v46 }
 0x712   :  { %v2084_v55 = vpop.permute.xlu0 %2083  ;;  %v7549_v56 = vpop.permute.xlu1 %2131 }
 0x713   :  { %6594 = vpow2.f32 %v1837_v47  ;;  %v2089_v12 = vsel %vm990_vm3, %v2084_v55, 0 }
 0x714   :  { %6596 = vpow2.f32 %v1839_v51 }
 0x715   :  { %v7526_v26 = vpop.eup %6590 }
 0x716   :  { %v1852_v43 = vsel %vm484_vm2, %v7526_v26, 0.0 }
 0x717   :  { %1853 = vadd.xlane.f32.xlu1 %v1852_v43 }
 0x719   :  { %v7530_v34 = vpop.eup %6592 }
 0x71a   :  { %v1855_v42 = vsel %vm484_vm2, %v7530_v34, 0.0 }
 0x71b   :  { %1856 = vadd.xlane.f32.xlu0 %v1855_v42 }
 0x71d   :  { %v7539_v29 = vpop.eup %6594 }
 0x71e   :  { %v1858_v38 = vsel %vm484_vm2, %v7539_v29, 0.0  ;;  %v7543_v52 = vpop.eup %6596 }
 0x71f   :  { %v1861_v54 = vsel %vm484_vm2, %v7543_v52, 0.0 }
 0x728   :  { %2227 = vrot.lane.b32.xlu1 %v7228_v1, %s6923_s27 }
 0x731   :  { %2179 = vrot.lane.b32.xlu0 %v7210_v62, %s6923_s27 }
 0x743   :  { %v1818_v50 = vpop.xlane.xlu1 %1817 }
 0x744   :  { %v1826_v48 = vsub.f32 %v7507_v9, %v1818_v50 }
 0x746   :  { %v1841_v49 = vmul.f32 1.442695, %v1826_v48 }
 0x74c   :  { %1859 = vadd.xlane.f32.xlu1 %v1858_v38 }
 0x750   :  { %1862 = vadd.xlane.f32.xlu0 %v1861_v54 }
 0x75d   :  { %2392 = vrot.lane.b32.xlu1 %v7192_v58, %s6924_s4 }
 0x766   :  { %2342 = vrot.lane.b32.xlu0 %v7190_v39, %s6924_s4 }
 0x768   :  { %v1845_v57 = vpop.xlane.xlu0 %1844 }
 0x769   :  { %6598 = vrcp.f32 %v1845_v57 }
 0x76a   :  { %2340 = vrot.lane.b32.xlu0 %v7190_v39, %s6925_s25 }
 0x76e   :  { %2442 = vrot.lane.b32.xlu0 %v7202_v61, %s6924_s4 }
 0x770   :  { %v1851_v53 = vpop.xlane.xlu0 %1850 }
 0x771   :  { %6600 = vrcp.f32 %v1851_v53 }
 0x772   :  { %2440 = vrot.lane.b32.xlu0 %v7202_v61, %s6925_s25  ;;  %6602 = vpow2.f32 %v1841_v49 }
 0x773   :  { %v6599_v59 = vpop.eup %6598 }
 0x774   :  { %v1875_v2 = vmul.f32 %v6599_v59, %v7512_v22 }
 0x776   :  { %2542 = vrot.lane.b32.xlu0 %v7200_v60, %s6924_s4  ;;  %v1883_v3 = vpack.c.bf16 %v1875_v2, %v1875_v2 }
 0x778   :  { %6109 = vmatmul.mubr.msk.bf16.vlgmr.msra.gmra.mrb[48].mxu0 %vm484_vm2, %v1883_v3 }
 0x779   :  { %6119 = vmatpush3.bf16.msra.mxu0 %v1993_v4  ;;  %6120 = vmatprep.mubr.msk.bf16.mxu0 %vm6919_vm1, %v6917_v20 }
 0x77a   :  { %2540 = vrot.lane.b32.xlu0 %v7200_v60, %s6925_s25  ;;  %6130 = vmatprep.subr.bf16.mxu0 %v6917_v20 }
 0x77b   :  { %v6601_v5 = vpop.eup %6600 }
 0x77c   :  { %v1877_v8 = vmul.f32 %v6601_v5, %v7516_v23  ;;  %v7571_v9 = vpop.eup %6602  ;;  %v2041_v23 = vsel %vm990_vm3, %v7520_v11, 0  ;;  %v2137_v11 = vsel %vm990_vm3, %v7549_v56, 0 }
 0x77d   :  { %v1864_v13 = vsel %vm484_vm2, %v7571_v9, 0.0 }
 0x77e   :  { %2642 = vrot.lane.b32.xlu0 %v7210_v62, %s6924_s4  ;;  %v1885_v10 = vpack.c.bf16 %v1877_v8, %v1877_v8 }
 0x780   :  { %6121 = vmatmul.mubr.msk.bf16.vlgmr.msra.gmra.mrb[52].mxu0 %vm484_vm2, %v1885_v10 }
 0x781   :  { %6131 = vmatpush3.bf16.msra.mxu0 %v2089_v12  ;;  %1865 = vadd.xlane.f32.xlu1 %v1864_v13 }
 0x782   :  { %2640 = vrot.lane.b32.xlu0 %v7210_v62, %s6925_s25  ;;  %6132 = vmatprep.mubr.msk.bf16.mxu0 %vm6919_vm1, %v6917_v20 }
 0x783   :  { %6142 = vmatprep.subr.bf16.mxu0 %v6917_v20 }
 0x786   :  { %2844 = vrot.lane.b32.xlu0 %v7190_v39, %s6926_s8 }
 0x792   :  { %2390 = vrot.lane.b32.xlu1 %v7192_v58, %s6925_s25 }
 0x796   :  { %2492 = vrot.lane.b32.xlu1 %v7212_v63, %s6924_s4 }
 0x79a   :  { %2490 = vrot.lane.b32.xlu1 %v7212_v63, %s6925_s25 }
 0x79c   :  { %v1848_v14 = vpop.xlane.xlu1 %1847 }
 0x79d   :  { %6604 = vrcp.f32 %v1848_v14 }
 0x79e   :  { %2592 = vrot.lane.b32.xlu1 %v7220_v0, %s6924_s4 }
 0x7a2   :  { %2590 = vrot.lane.b32.xlu1 %v7220_v0, %s6925_s25 }
 0x7a4   :  { %v1854_v15 = vpop.xlane.xlu1 %1853 }
 0x7a5   :  { %6606 = vrcp.f32 %v1854_v15 }
 0x7a6   :  { %2692 = vrot.lane.b32.xlu1 %v7228_v1, %s6924_s4 }
 0x7a7   :  { %v6605_v16 = vpop.eup %6604 }
 0x7a8   :  { %v1857_v19 = vpop.xlane.xlu0 %1856  ;;  %v1876_v22 = vmul.f32 %v6605_v16, %v7522_v40  ;;  %v2228_v24 = vpop.permute.xlu1 %2227 }
 0x7a9   :  { %6608 = vrcp.f32 %v1857_v19  ;;  %v2233_v44 = vsel %vm990_vm3, %v2228_v24, 0 }
 0x7aa   :  { %2690 = vrot.lane.b32.xlu1 %v7228_v1, %s6925_s25  ;;  %v1884_v6 = vpack.c.bf16 %v1876_v22, %v1876_v22 }
 0x7ac   :  { %6115 = vmatmul.mubr.msk.bf16.vlgmr.msra.gmra.mrb[56].mxu1 %vm484_vm2, %v1884_v6  ;;  %v2180_v32 = vpop.permute.xlu0 %2179 }
 0x7ad   :  { %6125 = vmatpush3.bf16.msra.mxu1 %v2041_v23  ;;  %6126 = vmatprep.mubr.msk.bf16.mxu1 %vm6919_vm1, %v6917_v20  ;;  %v2185_v35 = vsel %vm990_vm3, %v2180_v32, 0 }
 0x7ae   :  { %2892 = vrot.lane.b32.xlu1 %v7192_v58, %s6926_s8  ;;  %6136 = vmatprep.subr.bf16.mxu1 %v6917_v20 }
 0x7af   :  { %v6607_v27 = vpop.eup %6606 }
 0x7b0   :  { %v1878_v18 = vmul.f32 %v6607_v27, %v7526_v26 }
 0x7b2   :  { %2940 = vrot.lane.b32.xlu1 %v7202_v61, %s6926_s8  ;;  %v1886_v30 = vpack.c.bf16 %v1878_v18, %v1878_v18 }
 0x7b3   :  { %v6609_v31 = vpop.eup %6608 }
 0x7b4   :  { %6127 = vmatmul.mubr.msk.bf16.vlgmr.msra.gmra.mrb[60].mxu1 %vm484_vm2, %v1886_v30  ;;  %v1879_v17 = vmul.f32 %v6609_v31, %v7530_v34 }
 0x7b5   :  { %6137 = vmatpush3.bf16.msra.mxu1 %v2137_v11  ;;  %6138 = vmatprep.mubr.msk.bf16.mxu1 %vm6919_vm1, %v6917_v20 }
 0x7b6   :  { %2988 = vrot.lane.b32.xlu1 %v7212_v63, %s6926_s8  ;;  %v1887_v33 = vpack.c.bf16 %v1879_v17, %v1879_v17  ;;  %6148 = vmatprep.subr.bf16.mxu1 %v6917_v20 }
 0x7b8   :  { %6133 = vmatmul.mubr.msk.bf16.vlgmr.msra.gmra.mrb[56].mxu0 %vm484_vm2, %v1887_v33 }
 0x7b9   :  { %6143 = vmatpush3.bf16.msra.mxu0 %v2185_v35  ;;  %6144 = vmatprep.mubr.msk.bf16.mxu0 %vm6919_vm1, %v6917_v20 }
 0x7ba   :  { %6154 = vmatprep.subr.bf16.mxu0 %v6917_v20 }
 0x7d9   :  { %v1860_v36 = vpop.xlane.xlu1 %1859 }
 0x7da   :  { %6610 = vrcp.f32 %v1860_v36 }
 0x7dd   :  { %v1863_v40 = vpop.xlane.xlu0 %1862  ;;  %v2393_v57 = vpop.permute.xlu1 %2392 }
 0x7de   :  { %6612 = vrcp.f32 %v1863_v40  ;;  %v2398_v10 = vsel %vm484_vm2, %v2393_v57, 0 }
 0x7e1   :  { %v2343_v28 = vpop.permute.xlu0 %2342 }
 0x7e2   :  { %v2348_v47 = vsel %vm484_vm2, %v2343_v28, 0 }
 0x7e4   :  { %v6611_v41 = vpop.eup %6610 }
 0x7e5   :  { %v2341_v26 = vpop.permute.xlu0 %2340  ;;  %v1880_v43 = vmul.f32 %v6611_v41, %v7539_v29 }
 0x7e7   :  { %v1888_v34 = vpack.c.bf16 %v1880_v43, %v1880_v43 }
 0x7e8   :  { %v6613_v42 = vpop.eup %6612 }
 0x7e9   :  { %v2443_v21 = vpop.permute.xlu0 %2442  ;;  %6139 = vmatmul.mubr.msk.bf16.vlgmr.msra.gmra.mrb[64].mxu1 %vm484_vm2, %v1888_v34  ;;  %v1881_v45 = vmul.f32 %v6613_v42, %v7543_v52 }
 0x7ea   :  { %6149 = vmatpush3.bf16.msra.mxu1 %v2233_v44  ;;  %6150 = vmatprep.mubr.msk.bf16.mxu1 %vm6919_vm1, %v6917_v20  ;;  %v2448_v38 = vsel %vm484_vm2, %v2443_v21, 0 }
 0x7eb   :  { %v1889_v46 = vpack.c.bf16 %v1881_v45, %v1881_v45  ;;  %6160 = vmatprep.subr.bf16.mxu1 %v6917_v20 }
 0x7ed   :  { %v2441_v51 = vpop.permute.xlu0 %2440  ;;  %6145 = vmatmul.mubr.msk.bf16.vlgmr.msra.gmra.mrb[60].mxu0 %vm484_vm2, %v1889_v46 }
 0x7ee   :  { %6155 = vmatpush3.bf16.xpose.msra.mxu0 %v2348_v47  ;;  %6156 = vmatprep.mubr.msk.bf16.mxu0 %vm6919_vm1, %v6917_v20 }
 0x7ef   :  { %6166 = vmatprep.subr.bf16.mxu0 %v6917_v20 }
 0x7f1   :  { %v2543_v29 = vpop.permute.xlu0 %2542 }
 0x7f2   :  { %v2548_v54 = vsel %vm484_vm2, %v2543_v29, 0 }
 0x7f5   :  { %6157 = vmatmul.mubr.msk.bf16.vlgmr.msra.gmra.mrb[64].mxu0 %vm484_vm2, %v2341_v26  ;;  %v2541_v52 = vpop.permute.xlu0 %2540 }
 0x7f6   :  { %6167 = vmatpush3.bf16.xpose.msra.mxu0 %v2448_v38  ;;  %6168 = vmatprep.mubr.msk.bf16.mxu0 %vm6919_vm1, %v6917_v20 }
 0x7f7   :  { %6178 = vmatprep.subr.bf16.mxu0 %v6917_v20 }
 0x7f9   :  { %v2643_v55 = vpop.permute.xlu0 %2642 }
 0x7fa   :  { %v2648_v50 = vsel %vm484_vm2, %v2643_v55, 0 }
 0x7fd   :  { %6169 = vmatmul.mubr.msk.bf16.vlgmr.msra.gmra.mrb[68].mxu0 %vm484_vm2, %v2441_v51  ;;  %v2641_v56 = vpop.permute.xlu0 %2640 }
 0x7fe   :  { %6179 = vmatpush3.bf16.xpose.msra.mxu0 %v2548_v54  ;;  %6180 = vmatprep.mubr.msk.bf16.mxu0 %vm6919_vm1, %v6917_v20 }
 0x7ff   :  { %6190 = vmatprep.subr.bf16.mxu0 %v6917_v20 }
 0x801   :  { %v2845_v48 = vpop.permute.xlu0 %2844 }
 0x802   :  { %v2850_v49 = vsel %vm990_vm3, %v2845_v48, 0 }
 0x805   :  { %6181 = vmatmul.mubr.msk.bf16.vlgmr.msra.gmra.mrb[72].mxu0 %vm484_vm2, %v2541_v52 }
 0x806   :  { %6191 = vmatpush3.bf16.xpose.msra.mxu0 %v2648_v50  ;;  %6192 = vmatprep.mubr.msk.bf16.mxu0 %vm6919_vm1, %v6917_v20 }
 0x807   :  { %6202 = vmatprep.subr.bf16.mxu0 %v6917_v20 }
 0x80d   :  { %6193 = vmatmul.mubr.msk.bf16.vlgmr.msra.gmra.mrb[76].mxu0 %vm484_vm2, %v2641_v56 }
 0x80e   :  { %6203 = vmatpush3.bf16.msra.mxu0 %v2850_v49  ;;  %v1866_v53 = vpop.xlane.xlu1 %1865  ;;  %6204 = vmatprep.mubr.msk.bf16.mxu0 %vm6919_vm1, %v6917_v20 }
 0x80f   :  { %6614 = vrcp.f32 %v1866_v53  ;;  %6214 = vmatprep.subr.bf16.mxu0 %v6917_v20 }
 0x812   :  { %v2391_v59 = vpop.permute.xlu1 %2390 }
 0x816   :  { %v2493_v2 = vpop.permute.xlu1 %2492 }
 0x817   :  { %v2498_v13 = vsel %vm484_vm2, %v2493_v2, 0 }
 0x819   :  { %v6615_v3 = vpop.eup %6614 }
 0x81a   :  { %v1882_v4 = vmul.f32 %v6615_v3, %v7571_v9  ;;  %v2491_v8 = vpop.permute.xlu1 %2490 }
 0x81c   :  { %v1890_v5 = vpack.c.bf16 %v1882_v4, %v1882_v4 }
 0x81e   :  { %6151 = vmatmul.mubr.msk.bf16.vlgmr.msra.gmra.mrb[68].mxu1 %vm484_vm2, %v1890_v5  ;;  %v2593_v12 = vpop.permute.xlu1 %2592 }
 0x81f   :  { %6161 = vmatpush3.bf16.xpose.msra.mxu1 %v2398_v10  ;;  %6162 = vmatprep.mubr.msk.bf16.mxu1 %vm6919_vm1, %v6917_v20  ;;  %v2598_v14 = vsel %vm484_vm2, %v2593_v12, 0 }
 0x820   :  { %6172 = vmatprep.subr.bf16.mxu1 %v6917_v20 }
 0x822   :  { %v2591_v9 = vpop.permute.xlu1 %2590 }
 0x826   :  { %6163 = vmatmul.mubr.msk.bf16.vlgmr.msra.gmra.mrb[72].mxu1 %vm484_vm2, %v2391_v59  ;;  %v2693_v15 = vpop.permute.xlu1 %2692 }
 0x827   :  { %6173 = vmatpush3.bf16.xpose.msra.mxu1 %v2498_v13  ;;  %6174 = vmatprep.mubr.msk.bf16.mxu1 %vm6919_vm1, %v6917_v20  ;;  %v2698_v19 = vsel %vm484_vm2, %v2693_v15, 0 }
 0x828   :  { %6184 = vmatprep.subr.bf16.mxu1 %v6917_v20 }
 0x82a   :  { %v2691_v16 = vpop.permute.xlu1 %2690 }
 0x82e   :  { %6175 = vmatmul.mubr.msk.bf16.vlgmr.msra.gmra.mrb[76].mxu1 %vm484_vm2, %v2491_v8  ;;  %v2893_v22 = vpop.permute.xlu1 %2892 }
 0x82f   :  { %6185 = vmatpush3.bf16.xpose.msra.mxu1 %v2598_v14  ;;  %6186 = vmatprep.mubr.msk.bf16.mxu1 %vm6919_vm1, %v6917_v20  ;;  %v2898_v6 = vsel %vm990_vm3, %v2893_v22, 0 }
 0x830   :  { %6196 = vmatprep.subr.bf16.mxu1 %v6917_v20 }
 0x836   :  { %6187 = vmatmul.mubr.msk.bf16.vlgmr.msra.gmra.mrb[80].mxu1 %vm484_vm2, %v2591_v9 }
 0x837   :  { %6197 = vmatpush3.bf16.xpose.msra.mxu1 %v2698_v19  ;;  %6198 = vmatprep.mubr.msk.bf16.mxu1 %vm6919_vm1, %v6917_v20 }
 0x838   :  { %6208 = vmatprep.subr.bf16.mxu1 %v6917_v20 }
 0x83e   :  { %6199 = vmatmul.mubr.msk.bf16.vlgmr.msra.gmra.mrb[84].mxu1 %vm484_vm2, %v2691_v16 }
 0x83f   :  { %6209 = vmatpush3.bf16.msra.mxu1 %v2898_v6  ;;  %6210 = vmatprep.mubr.msk.bf16.mxu1 %vm6919_vm1, %v6917_v20 }
 0x840   :  { %6220 = vmatprep.subr.bf16.mxu1 %v6917_v20 }
 0x84b   :  { %v7684_v23 = vpop.f32.mrb[48].mxu0 }
 0x84c   :  { %v6110_v27 = vpop.f32.mrb[49].mxu0 }
 0x84d   :  { %v1936_v18 = vpop.f32.mrb[50].mxu0 }
 0x84e   :  { %v6111_v30 = vpop.f32.mrb[51].mxu0 }
 0x853   :  { %v7686_v31 = vpop.f32.mrb[52].mxu0 }
 0x854   :  { %v6122_v11 = vpop.f32.mrb[53].mxu0 }
 0x855   :  { %v2032_v17 = vpop.f32.mrb[54].mxu0 }
 0x856   :  { %v6123_v32 = vpop.f32.mrb[55].mxu0 }
 0x87f   :  { %v7688_v33 = vpop.f32.mrb[56].mxu1 }
 0x880   :  { %v6116_v35 = vpop.f32.mrb[57].mxu1 }
 0x881   :  { %v1984_v24 = vpop.f32.mrb[58].mxu1 }
 0x882   :  { %v6117_v36 = vpop.f32.mrb[59].mxu1 }
 0x887   :  { %v7690_v40 = vpop.f32.mrb[60].mxu1 }
 0x888   :  { %v6128_v28 = vpop.f32.mrb[61].mxu1 }
 0x889   :  { %v2080_v41 = vpop.f32.mrb[62].mxu1 }
 0x88a   :  { %v6129_v26 = vpop.f32.mrb[63].mxu1 }
 0x88b   :  { %v7692_v43 = vpop.f32.mrb[56].mxu0 }
 0x88c   :  { %v6134_v34 = vpop.f32.mrb[57].mxu0 }
 0x88d   :  { %v2128_v42 = vpop.f32.mrb[58].mxu0 }
 0x88e   :  { %v6135_v44 = vpop.f32.mrb[59].mxu0 }
 0x8bc   :  { %v7694_v21 = vpop.f32.mrb[64].mxu1 }
 0x8bd   :  { %v6140_v45 = vpop.f32.mrb[65].mxu1 }
 0x8be   :  { %v2176_v46 = vpop.f32.mrb[66].mxu1 }
 0x8bf   :  { %v6141_v47 = vpop.f32.mrb[67].mxu1 }
 0x8c0   :  { %v7696_v51 = vpop.f32.mrb[60].mxu0 }
 0x8c1   :  { %v6146_v29 = vpop.f32.mrb[61].mxu0 }
 0x8c2   :  { %v2224_v38 = vpop.f32.mrb[62].mxu0 }
 0x8c3   :  { %v6147_v52 = vpop.f32.mrb[63].mxu0 }
 0x8c8   :  { %v2384_v54 = vpop.f32.mrb[64].mxu0 }
 0x8c9   :  { %v7698_v55 = vmul.f32 0.35355338, %v2384_v54  ;;  %v6158_v56 = vpop.f32.mrb[65].mxu0 }
 0x8ca   :  { %v2387_v50 = vpop.f32.mrb[66].mxu0 }
 0x8cb   :  { %v6159_v57 = vpop.f32.mrb[67].mxu0  ;;  %v2748_v48 = vsel %vm484_vm2, %v7698_v55, -inf }
 0x8cc   :  { %2749 = vmax.xlane.f32.xlu0 %v2748_v48 }
 0x8d0   :  { %v2484_v49 = vpop.f32.mrb[68].mxu0 }
 0x8d1   :  { %v2742_v53 = vmul.f32 0.35355338, %v2484_v49  ;;  %v6170_v59 = vpop.f32.mrb[69].mxu0 }
 0x8d2   :  { %v2487_v2 = vpop.f32.mrb[70].mxu0 }
 0x8d3   :  { %v6171_v3 = vpop.f32.mrb[71].mxu0  ;;  %v2754_v4 = vsel %vm484_vm2, %v2742_v53, -inf }
 0x8d4   :  { %2755 = vmax.xlane.f32.xlu0 %v2754_v4 }
 0x8d8   :  { %v2584_v5 = vpop.f32.mrb[72].mxu0 }
 0x8d9   :  { %v6182_v8 = vpop.f32.mrb[73].mxu0  ;;  %v2744_v41 = vmul.f32 0.35355338, %v2584_v5 }
 0x8da   :  { %v2587_v10 = vpop.f32.mrb[74].mxu0 }
 0x8db   :  { %v6183_v12 = vpop.f32.mrb[75].mxu0  ;;  %v2760_v44 = vsel %vm484_vm2, %v2744_v41, -inf }
 0x8e0   :  { %v2684_v13 = vpop.f32.mrb[76].mxu0 }
 0x8e1   :  { %v6194_v9 = vpop.f32.mrb[77].mxu0  ;;  %v7707_v42 = vmul.f32 0.35355338, %v2684_v13 }
 0x8e2   :  { %v2687_v14 = vpop.f32.mrb[78].mxu0 }
 0x8e3   :  { %v6195_v15 = vpop.f32.mrb[79].mxu0  ;;  %v2766_v52 = vsel %vm484_vm2, %v7707_v42, -inf }
 0x8e4   :  { %v2941_v15 = vpop.permute.xlu1 %2940 }
 0x8f1   :  { %v7703_v16 = vpop.f32.mrb[68].mxu1 }
 0x8f2   :  { %v6152_v19 = vpop.f32.mrb[69].mxu1 }
 0x8f3   :  { %v2272_v22 = vpop.f32.mrb[70].mxu1 }
 0x8f4   :  { %v6153_v6 = vpop.f32.mrb[71].mxu1 }
 0x8f9   :  { %v2434_v27 = vpop.f32.mrb[72].mxu1 }
 0x8fa   :  { %v2741_v18 = vmul.f32 0.35355338, %v2434_v27  ;;  %v6164_v30 = vpop.f32.mrb[73].mxu1 }
 0x8fb   :  { %v2437_v11 = vpop.f32.mrb[74].mxu1 }
 0x8fc   :  { %v6165_v17 = vpop.f32.mrb[75].mxu1  ;;  %v2751_v32 = vsel %vm484_vm2, %v2741_v18, -inf }
 0x8fd   :  { %2752 = vmax.xlane.f32.xlu1 %v2751_v32 }
 0x901   :  { %v2534_v35 = vpop.f32.mrb[76].mxu1 }
 0x902   :  { %v2743_v24 = vmul.f32 0.35355338, %v2534_v35  ;;  %v6176_v36 = vpop.f32.mrb[77].mxu1 }
 0x903   :  { %v2537_v28 = vpop.f32.mrb[78].mxu1 }
 0x904   :  { %v6177_v26 = vpop.f32.mrb[79].mxu1  ;;  %v2757_v34 = vsel %vm484_vm2, %v2743_v24, -inf }
 0x905   :  { %2758 = vmax.xlane.f32.xlu0 %v2757_v34 }
 0x909   :  { %2761 = vmax.xlane.f32.xlu0 %v2760_v44  ;;  %v2634_v45 = vpop.f32.mrb[80].mxu1 }
 0x90a   :  { %v2745_v46 = vmul.f32 0.35355338, %v2634_v45  ;;  %v6188_v47 = vpop.f32.mrb[81].mxu1 }
 0x90b   :  { %v2637_v29 = vpop.f32.mrb[82].mxu1 }
 0x90c   :  { %v6189_v38 = vpop.f32.mrb[83].mxu1  ;;  %v2763_v54 = vsel %vm484_vm2, %v2745_v46, -inf }
 0x90d   :  { %2767 = vmax.xlane.f32.xlu0 %v2766_v52  ;;  %2764 = vmax.xlane.f32.xlu1 %v2763_v54 }
 0x911   :  { %v2734_v56 = vpop.f32.mrb[84].mxu1 }
 0x912   :  { %v6200_v50 = vpop.f32.mrb[85].mxu1  ;;  %v7717_v49 = vmul.f32 0.35355338, %v2734_v56 }
 0x913   :  { %v2737_v57 = vpop.f32.mrb[86].mxu1 }
 0x914   :  { %v6201_v48 = vpop.f32.mrb[87].mxu1  ;;  %v2769_v59 = vsel %vm484_vm2, %v7717_v49, -inf }
 0x91e   :  { %3084 = vrot.lane.b32.xlu1 %v7220_v0, %s6926_s8 }
 0x923   :  { %3036 = vrot.lane.b32.xlu0 %v7200_v60, %s6926_s8 }
 0x942   :  { %2770 = vmax.xlane.f32.xlu1 %v2769_v59 }
 0x959   :  { %v2750_v2 = vpop.xlane.xlu0 %2749 }
 0x95a   :  { %v2772_v3 = vsub.f32 %v7698_v55, %v2750_v2  ;;  %v7730_v55 = vpop.permute.xlu1 %2988 }
 0x95c   :  { %v2780_v4 = vmul.f32 1.442695, %v2772_v3 }
 0x95e   :  { %6616 = vpow2.f32 %v2780_v4 }
 0x961   :  { %v2756_v5 = vpop.xlane.xlu0 %2755 }
 0x962   :  { %v2774_v8 = vsub.f32 %v2742_v53, %v2756_v5 }
 0x964   :  { %v2784_v10 = vmul.f32 1.442695, %v2774_v8 }
 0x966   :  { %6618 = vpow2.f32 %v2784_v10 }
 0x968   :  { %v7722_v12 = vpop.eup %6616 }
 0x969   :  { %v2796_v13 = vsel %vm484_vm2, %v7722_v12, 0.0 }
 0x96a   :  { %2797 = vadd.xlane.f32.xlu0 %v2796_v13 }
 0x970   :  { %v7726_v9 = vpop.eup %6618 }
 0x971   :  { %v2802_v14 = vsel %vm484_vm2, %v7726_v9, 0.0 }
 0x972   :  { %2803 = vadd.xlane.f32.xlu0 %v2802_v14 }
 0x98a   :  { %v2753_v19 = vpop.xlane.xlu1 %2752 }
 0x98b   :  { %v2773_v22 = vsub.f32 %v2741_v18, %v2753_v19 }
 0x98d   :  { %v2782_v53 = vmul.f32 1.442695, %v2773_v22 }
 0x98f   :  { %6620 = vpow2.f32 %v2782_v53 }
 0x992   :  { %v2759_v6 = vpop.xlane.xlu0 %2758 }
 0x993   :  { %v2775_v27 = vsub.f32 %v2743_v24, %v2759_v6 }
 0x995   :  { %v2786_v30 = vmul.f32 1.442695, %v2775_v27 }
 0x996   :  { %v2762_v11 = vpop.xlane.xlu0 %2761 }
 0x997   :  { %6622 = vpow2.f32 %v2786_v30  ;;  %v2776_v17 = vsub.f32 %v2744_v41, %v2762_v11  ;;  %v2994_v30 = vsel %vm990_vm3, %v7730_v55, 0 }
 0x999   :  { %v7732_v32 = vpop.eup %6620  ;;  %v2788_v35 = vmul.f32 1.442695, %v2776_v17 }
 0x99a   :  { %v2799_v36 = vsel %vm484_vm2, %v7732_v32, 0.0  ;;  %v2765_v41 = vpop.xlane.xlu1 %2764  ;;  %v2768_v44 = vpop.xlane.xlu0 %2767 }
 0x99b   :  { %6624 = vpow2.f32 %v2788_v35  ;;  %2800 = vadd.xlane.f32.xlu1 %v2799_v36  ;;  %v2777_v34 = vsub.f32 %v2745_v46, %v2765_v41  ;;  %v2778_v45 = vsub.f32 %v7707_v42, %v2768_v44 }
 0x99d   :  { %v2790_v47 = vmul.f32 1.442695, %v2777_v34  ;;  %v2792_v29 = vmul.f32 1.442695, %v2778_v45 }
 0x99e   :  { %v7759_v42 = vpop.permute.xlu1 %3084  ;;  %v3037_v46 = vpop.permute.xlu0 %3036 }
 0x99f   :  { %6626 = vpow2.f32 %v2790_v47  ;;  %v3090_v36 = vsel %vm990_vm3, %v7759_v42, 0 }
 0x9a0   :  { %6628 = vpow2.f32 %v2792_v29 }
 0x9a1   :  { %v7736_v28 = vpop.eup %6622 }
 0x9a2   :  { %v2805_v18 = vsel %vm484_vm2, %v7736_v28, 0.0 }
 0x9a3   :  { %2806 = vadd.xlane.f32.xlu1 %v2805_v18 }
 0x9a5   :  { %v7740_v26 = vpop.eup %6624 }
 0x9a6   :  { %v2808_v24 = vsel %vm484_vm2, %v7740_v26, 0.0 }
 0x9a7   :  { %2809 = vadd.xlane.f32.xlu0 %v2808_v24 }
 0x9a9   :  { %v7749_v38 = vpop.eup %6626 }
 0x9aa   :  { %v2811_v52 = vsel %vm484_vm2, %v7749_v38, 0.0  ;;  %v7753_v54 = vpop.eup %6628 }
 0x9ab   :  { %v2814_v56 = vsel %vm484_vm2, %v7753_v54, 0.0 }
 0x9b4   :  { %3180 = vrot.lane.b32.xlu1 %v7228_v1, %s6926_s8 }
 0x9bd   :  { %3132 = vrot.lane.b32.xlu0 %v7210_v62, %s6926_s8 }
 0x9cf   :  { %v2771_v50 = vpop.xlane.xlu1 %2770 }
 0x9d0   :  { %v2779_v57 = vsub.f32 %v7717_v49, %v2771_v50  ;;  %v2946_v49 = vsel %vm990_vm3, %v2941_v15, 0  ;;  %v3042_v15 = vsel %vm990_vm3, %v3037_v46, 0 }
 0x9d2   :  { %v2794_v59 = vmul.f32 1.442695, %v2779_v57 }
 0x9d8   :  { %2812 = vadd.xlane.f32.xlu1 %v2811_v52 }
 0x9dc   :  { %2815 = vadd.xlane.f32.xlu0 %v2814_v56 }
 0x9e9   :  { %3345 = vrot.lane.b32.xlu1 %v7192_v58, %s6927_s26 }
 0x9f2   :  { %3295 = vrot.lane.b32.xlu0 %v7190_v39, %s6927_s26 }
 0x9f6   :  { %3293 = vrot.lane.b32.xlu0 %v7190_v39, %s6928_s28 }
 0x9f7   :  { %v2798_v48 = vpop.xlane.xlu0 %2797 }
 0x9f8   :  { %6630 = vrcp.f32 %v2798_v48 }
 0x9f9   :  { %6632 = vpow2.f32 %v2794_v59 }
 0x9fa   :  { %3395 = vrot.lane.b32.xlu0 %v7202_v61, %s6927_s26 }
 0x9fe   :  { %3393 = vrot.lane.b32.xlu0 %v7202_v61, %s6928_s28 }
 0x9ff   :  { %v2804_v2 = vpop.xlane.xlu0 %2803 }
 0xa00   :  { %6634 = vrcp.f32 %v2804_v2 }
 0xa02   :  { %v6631_v3 = vpop.eup %6630  ;;  %3495 = vrot.lane.b32.xlu0 %v7200_v60, %s6927_s26 }
 0xa03   :  { %v2828_v4 = vmul.f32 %v6631_v3, %v7722_v12  ;;  %v7779_v8 = vpop.eup %6632 }
 0xa04   :  { %v2817_v13 = vsel %vm484_vm2, %v7779_v8, 0.0 }
 0xa05   :  { %v2836_v5 = vpack.c.bf16 %v2828_v4, %v2828_v4 }
 0xa06   :  { %3493 = vrot.lane.b32.xlu0 %v7200_v60, %s6928_s28 }
 0xa07   :  { %6205 = vmatmul.mubr.msk.bf16.vlgmr.msra.gmra.mrb[80].mxu0 %vm484_vm2, %v2836_v5 }
 0xa08   :  { %6215 = vmatpush3.bf16.msra.mxu0 %v2946_v49  ;;  %6216 = vmatprep.mubr.msk.bf16.mxu0 %vm6919_vm1, %v6917_v20 }
 0xa09   :  { %6226 = vmatprep.subr.bf16.mxu0 %v6917_v20 }
 0xa0a   :  { %v6635_v10 = vpop.eup %6634  ;;  %3595 = vrot.lane.b32.xlu0 %v7210_v62, %s6927_s26 }
 0xa0b   :  { %v2830_v12 = vmul.f32 %v6635_v10, %v7726_v9 }
 0xa0d   :  { %2818 = vadd.xlane.f32.xlu1 %v2817_v13  ;;  %v2838_v14 = vpack.c.bf16 %v2830_v12, %v2830_v12 }
 0xa0e   :  { %3593 = vrot.lane.b32.xlu0 %v7210_v62, %s6928_s28 }
 0xa0f   :  { %6217 = vmatmul.mubr.msk.bf16.vlgmr.msra.gmra.mrb[84].mxu0 %vm484_vm2, %v2838_v14 }
 0xa10   :  { %6227 = vmatpush3.bf16.msra.mxu0 %v3042_v15  ;;  %6228 = vmatprep.mubr.msk.bf16.mxu0 %vm6919_vm1, %v6917_v20 }
 0xa11   :  { %6238 = vmatprep.subr.bf16.mxu0 %v6917_v20 }
 0xa1e   :  { %3343 = vrot.lane.b32.xlu1 %v7192_v58, %s6928_s28 }
 0xa22   :  { %3445 = vrot.lane.b32.xlu1 %v7212_v63, %s6927_s26 }
 0xa26   :  { %3443 = vrot.lane.b32.xlu1 %v7212_v63, %s6928_s28 }
 0xa28   :  { %v2801_v9 = vpop.xlane.xlu1 %2800 }
 0xa29   :  { %6636 = vrcp.f32 %v2801_v9 }
 0xa2a   :  { %3545 = vrot.lane.b32.xlu1 %v7220_v0, %s6927_s26 }
 0xa2e   :  { %3543 = vrot.lane.b32.xlu1 %v7220_v0, %s6928_s28 }
 0xa30   :  { %v2807_v19 = vpop.xlane.xlu1 %2806 }
 0xa31   :  { %6638 = vrcp.f32 %v2807_v19 }
 0xa32   :  { %3645 = vrot.lane.b32.xlu1 %v7228_v1, %s6927_s26 }
 0xa33   :  { %v6637_v22 = vpop.eup %6636 }
 0xa34   :  { %v2829_v53 = vmul.f32 %v6637_v22, %v7732_v32  ;;  %v2810_v6 = vpop.xlane.xlu0 %2809 }
 0xa35   :  { %6640 = vrcp.f32 %v2810_v6 }
 0xa36   :  { %3643 = vrot.lane.b32.xlu1 %v7228_v1, %s6928_s28  ;;  %v2837_v27 = vpack.c.bf16 %v2829_v53, %v2829_v53 }
 0xa38   :  { %6211 = vmatmul.mubr.msk.bf16.vlgmr.msra.gmra.mrb[88].mxu1 %vm484_vm2, %v2837_v27  ;;  %v3133_v55 = vpop.permute.xlu0 %3132 }
 0xa39   :  { %6221 = vmatpush3.bf16.msra.mxu1 %v2994_v30  ;;  %6222 = vmatprep.mubr.msk.bf16.mxu1 %vm6919_vm1, %v6917_v20  ;;  %v3138_v41 = vsel %vm990_vm3, %v3133_v55, 0 }
 0xa3a   :  { %6232 = vmatprep.subr.bf16.mxu1 %v6917_v20 }
 0xa3b   :  { %v6639_v11 = vpop.eup %6638 }
 0xa3c   :  { %v2831_v17 = vmul.f32 %v6639_v11, %v7736_v28  ;;  %v3181_v28 = vpop.permute.xlu1 %3180 }
 0xa3d   :  { %v3186_v42 = vsel %vm990_vm3, %v3181_v28, 0 }
 0xa3e   :  { %v2839_v32 = vpack.c.bf16 %v2831_v17, %v2831_v17 }
 0xa3f   :  { %v6641_v35 = vpop.eup %6640 }
 0xa40   :  { %v2832_v18 = vmul.f32 %v6641_v35, %v7740_v26  ;;  %6223 = vmatmul.mubr.msk.bf16.vlgmr.msra.gmra.mrb[92].mxu1 %vm484_vm2, %v2839_v32 }
 0xa41   :  { %6233 = vmatpush3.bf16.msra.mxu1 %v3090_v36  ;;  %6234 = vmatprep.mubr.msk.bf16.mxu1 %vm6919_vm1, %v6917_v20 }
 0xa42   :  { %v2840_v24 = vpack.c.bf16 %v2832_v18, %v2832_v18  ;;  %6244 = vmatprep.subr.bf16.mxu1 %v6917_v20 }
 0xa44   :  { %6229 = vmatmul.mubr.msk.bf16.vlgmr.msra.gmra.mrb[88].mxu0 %vm484_vm2, %v2840_v24 }
 0xa45   :  { %6239 = vmatpush3.bf16.msra.mxu0 %v3138_v41  ;;  %6240 = vmatprep.mubr.msk.bf16.mxu0 %vm6919_vm1, %v6917_v20 }
 0xa46   :  { %6250 = vmatprep.subr.bf16.mxu0 %v6917_v20 }
 0xa65   :  { %v2813_v26 = vpop.xlane.xlu1 %2812 }
 0xa66   :  { %6642 = vrcp.f32 %v2813_v26 }
 0xa69   :  { %v2816_v34 = vpop.xlane.xlu0 %2815  ;;  %v3346_v49 = vpop.permute.xlu1 %3345 }
 0xa6a   :  { %6644 = vrcp.f32 %v2816_v34  ;;  %v3351_v22 = vsel %vm484_vm2, %v3346_v49, 0 }
 0xa6d   :  { %v3296_v44 = vpop.permute.xlu0 %3295 }
 0xa6e   :  { %v3301_v48 = vsel %vm484_vm2, %v3296_v44, 0 }
 0xa70   :  { %v6643_v45 = vpop.eup %6642 }
 0xa71   :  { %v2833_v47 = vmul.f32 %v6643_v45, %v7749_v38  ;;  %v3294_v29 = vpop.permute.xlu0 %3293 }
 0xa73   :  { %v2841_v52 = vpack.c.bf16 %v2833_v47, %v2833_v47 }
 0xa74   :  { %v6645_v56 = vpop.eup %6644 }
 0xa75   :  { %v2834_v46 = vmul.f32 %v6645_v56, %v7753_v54  ;;  %6235 = vmatmul.mubr.msk.bf16.vlgmr.msra.gmra.mrb[96].mxu1 %vm484_vm2, %v2841_v52  ;;  %v3396_v50 = vpop.permute.xlu0 %3395 }
 0xa76   :  { %6245 = vmatpush3.bf16.msra.mxu1 %v3186_v42  ;;  %6246 = vmatprep.mubr.msk.bf16.mxu1 %vm6919_vm1, %v6917_v20  ;;  %v3401_v54 = vsel %vm484_vm2, %v3396_v50, 0 }
 0xa77   :  { %v2842_v57 = vpack.c.bf16 %v2834_v46, %v2834_v46  ;;  %6256 = vmatprep.subr.bf16.mxu1 %v6917_v20 }
 0xa79   :  { %6241 = vmatmul.mubr.msk.bf16.vlgmr.msra.gmra.mrb[92].mxu0 %vm484_vm2, %v2842_v57  ;;  %v3394_v38 = vpop.permute.xlu0 %3393 }
 0xa7a   :  { %6251 = vmatpush3.bf16.xpose.msra.mxu0 %v3301_v48  ;;  %6252 = vmatprep.mubr.msk.bf16.mxu0 %vm6919_vm1, %v6917_v20 }
 0xa7b   :  { %6262 = vmatprep.subr.bf16.mxu0 %v6917_v20 }
 0xa7d   :  { %v3496_v59 = vpop.permute.xlu0 %3495 }
 0xa7e   :  { %v3501_v3 = vsel %vm484_vm2, %v3496_v59, 0 }
 0xa81   :  { %6253 = vmatmul.mubr.msk.bf16.vlgmr.msra.gmra.mrb[96].mxu0 %vm484_vm2, %v3294_v29  ;;  %v3494_v2 = vpop.permute.xlu0 %3493 }
 0xa82   :  { %6263 = vmatpush3.bf16.xpose.msra.mxu0 %v3401_v54  ;;  %6264 = vmatprep.mubr.msk.bf16.mxu0 %vm6919_vm1, %v6917_v20 }
 0xa83   :  { %6274 = vmatprep.subr.bf16.mxu0 %v6917_v20 }
 0xa85   :  { %v3596_v4 = vpop.permute.xlu0 %3595 }
 0xa86   :  { %v3601_v5 = vsel %vm484_vm2, %v3596_v4, 0 }
 0xa89   :  { %6265 = vmatmul.mubr.msk.bf16.vlgmr.msra.gmra.mrb[100].mxu0 %vm484_vm2, %v3394_v38  ;;  %v3594_v10 = vpop.permute.xlu0 %3593 }
 0xa8a   :  { %6275 = vmatpush3.bf16.xpose.msra.mxu0 %v3501_v3  ;;  %6276 = vmatprep.mubr.msk.bf16.mxu0 %vm6919_vm1, %v6917_v20 }
 0xa8b   :  { %6286 = vmatprep.subr.bf16.mxu0 %v6917_v20 }
 0xa91   :  { %6277 = vmatmul.mubr.msk.bf16.vlgmr.msra.gmra.mrb[104].mxu0 %vm484_vm2, %v3494_v2 }
 0xa92   :  { %6287 = vmatpush3.bf16.xpose.msra.mxu0 %v3601_v5  ;;  %6288 = vmatprep.mubr.msk.bf16.mxu0 %vm6919_vm1, %v6917_v20 }
 0xa93   :  { %6298 = vmatprep.subr.bf16.mxu0 %v6917_v20 }
 0xa99   :  { %6289 = vmatmul.mubr.msk.bf16.vlgmr.msra.gmra.mrb[108].mxu0 %vm484_vm2, %v3594_v10 }
 0xa9a   :  { %v2819_v12 = vpop.xlane.xlu1 %2818  ;;  %6300 = vmatprep.mubr.msk.bf16.mxu0 %vm6919_vm1, %v6917_v20 }
 0xa9b   :  { %6646 = vrcp.f32 %v2819_v12 }
 0xa9e   :  { %v3344_v13 = vpop.permute.xlu1 %3343 }
 0xaa2   :  { %v3446_v9 = vpop.permute.xlu1 %3445 }
 0xaa3   :  { %v3451_v6 = vsel %vm484_vm2, %v3446_v9, 0 }
 0xaa5   :  { %v6647_v14 = vpop.eup %6646 }
 0xaa6   :  { %v2835_v15 = vmul.f32 %v6647_v14, %v7779_v8  ;;  %v3444_v53 = vpop.permute.xlu1 %3443 }
 0xaa8   :  { %v2843_v19 = vpack.c.bf16 %v2835_v15, %v2835_v15 }
 0xaaa   :  { %6247 = vmatmul.mubr.msk.bf16.vlgmr.msra.gmra.mrb[100].mxu1 %vm484_vm2, %v2843_v19  ;;  %v3546_v27 = vpop.permute.xlu1 %3545 }
 0xaab   :  { %6257 = vmatpush3.bf16.xpose.msra.mxu1 %v3351_v22  ;;  %6258 = vmatprep.mubr.msk.bf16.mxu1 %vm6919_vm1, %v6917_v20  ;;  %v3551_v30 = vsel %vm484_vm2, %v3546_v27, 0 }
 0xaac   :  { %6268 = vmatprep.subr.bf16.mxu1 %v6917_v20 }
 0xaae   :  { %v3544_v8 = vpop.permute.xlu1 %3543 }
 0xab2   :  { %6259 = vmatmul.mubr.msk.bf16.vlgmr.msra.gmra.mrb[104].mxu1 %vm484_vm2, %v3344_v13  ;;  %v3646_v11 = vpop.permute.xlu1 %3645 }
 0xab3   :  { %6269 = vmatpush3.bf16.xpose.msra.mxu1 %v3451_v6  ;;  %6270 = vmatprep.mubr.msk.bf16.mxu1 %vm6919_vm1, %v6917_v20  ;;  %v3651_v17 = vsel %vm484_vm2, %v3646_v11, 0 }
 0xab4   :  { %6280 = vmatprep.subr.bf16.mxu1 %v6917_v20 }
 0xab6   :  { %v3644_v32 = vpop.permute.xlu1 %3643 }
 0xaba   :  { %6271 = vmatmul.mubr.msk.bf16.vlgmr.msra.gmra.mrb[108].mxu1 %vm484_vm2, %v3444_v53 }
 0xabb   :  { %6281 = vmatpush3.bf16.xpose.msra.mxu1 %v3551_v30  ;;  %6282 = vmatprep.mubr.msk.bf16.mxu1 %vm6919_vm1, %v6917_v20 }
 0xabc   :  { %6292 = vmatprep.subr.bf16.mxu1 %v6917_v20 }
 0xac2   :  { %6283 = vmatmul.mubr.msk.bf16.vlgmr.msra.gmra.mrb[112].mxu1 %vm484_vm2, %v3544_v8 }
 0xac3   :  { %6293 = vmatpush3.bf16.xpose.msra.mxu1 %v3651_v17  ;;  %6294 = vmatprep.mubr.msk.bf16.mxu1 %vm6919_vm1, %v6917_v20 }
 0xac4   :  { %6304 = vmatprep.subr.bf16.mxu1 %v6917_v20 }
 0xaca   :  { %6295 = vmatmul.mubr.msk.bf16.vlgmr.msra.gmra.mrb[116].mxu1 %vm484_vm2, %v3644_v32 }
 0xacb   :  { %6306 = vmatprep.mubr.msk.bf16.mxu1 %vm6919_vm1, %v6917_v20 }
 0xada   :  { %v7882_v35 = vpop.f32.mrb[80].mxu0 }
 0xadb   :  { %v6206_v36 = vpop.f32.mrb[81].mxu0 }
 0xadc   :  { %v2889_v18 = vpop.f32.mrb[82].mxu0 }
 0xadd   :  { %v6207_v55 = vpop.f32.mrb[83].mxu0 }
 0xae2   :  { %v7884_v24 = vpop.f32.mrb[84].mxu0 }
 0xae3   :  { %v6218_v41 = vpop.f32.mrb[85].mxu0 }
 0xae4   :  { %v2985_v28 = vpop.f32.mrb[86].mxu0 }
 0xae5   :  { %v6219_v26 = vpop.f32.mrb[87].mxu0 }
 0xb0b   :  { %v7886_v34 = vpop.f32.mrb[88].mxu1 }
 0xb0c   :  { %v6212_v44 = vpop.f32.mrb[89].mxu1 }
 0xb0d   :  { %v2937_v45 = vpop.f32.mrb[90].mxu1 }
 0xb0e   :  { %v6213_v47 = vpop.f32.mrb[91].mxu1 }
 0xb13   :  { %v7888_v29 = vpop.f32.mrb[92].mxu1 }
 0xb14   :  { %v6224_v52 = vpop.f32.mrb[93].mxu1 }
 0xb15   :  { %v3033_v56 = vpop.f32.mrb[94].mxu1 }
 0xb16   :  { %v6225_v42 = vpop.f32.mrb[95].mxu1 }
 0xb17   :  { %v7890_v46 = vpop.f32.mrb[88].mxu0 }
 0xb18   :  { %v6230_v50 = vpop.f32.mrb[89].mxu0 }
 0xb19   :  { %v3081_v57 = vpop.f32.mrb[90].mxu0 }
 0xb1a   :  { %v6231_v48 = vpop.f32.mrb[91].mxu0 }
 0xb48   :  { %v7892_v38 = vpop.f32.mrb[96].mxu1 }
 0xb49   :  { %v6236_v54 = vpop.f32.mrb[97].mxu1 }
 0xb4a   :  { %v3129_v59 = vpop.f32.mrb[98].mxu1 }
 0xb4b   :  { %v6237_v2 = vpop.f32.mrb[99].mxu1 }
 0xb4c   :  { %v7894_v3 = vpop.f32.mrb[92].mxu0 }
 0xb4d   :  { %v6242_v4 = vpop.f32.mrb[93].mxu0 }
 0xb4e   :  { %v3177_v5 = vpop.f32.mrb[94].mxu0 }
 0xb4f   :  { %v6243_v49 = vpop.f32.mrb[95].mxu0 }
 0xb54   :  { %v3337_v10 = vpop.f32.mrb[96].mxu0 }
 0xb55   :  { %v7896_v12 = vmul.f32 0.35355338, %v3337_v10  ;;  %v6254_v13 = vpop.f32.mrb[97].mxu0 }
 0xb56   :  { %v3340_v14 = vpop.f32.mrb[98].mxu0 }
 0xb57   :  { %v6255_v15 = vpop.f32.mrb[99].mxu0  ;;  %v3701_v9 = vsel %vm484_vm2, %v7896_v12, -inf }
 0xb58   :  { %3702 = vmax.xlane.f32.xlu0 %v3701_v9 }
 0xb5c   :  { %v3437_v19 = vpop.f32.mrb[100].mxu0 }
 0xb5d   :  { %v7900_v22 = vmul.f32 0.35355338, %v3437_v19  ;;  %v6266_v53 = vpop.f32.mrb[101].mxu0 }
 0xb5e   :  { %v3440_v6 = vpop.f32.mrb[102].mxu0 }
 0xb5f   :  { %v6267_v27 = vpop.f32.mrb[103].mxu0  ;;  %v3707_v8 = vsel %vm484_vm2, %v7900_v22, -inf }
 0xb60   :  { %3708 = vmax.xlane.f32.xlu0 %v3707_v8 }
 0xb64   :  { %v3537_v30 = vpop.f32.mrb[104].mxu0 }
 0xb65   :  { %v6278_v11 = vpop.f32.mrb[105].mxu0  ;;  %v3697_v4 = vmul.f32 0.35355338, %v3537_v30 }
 0xb66   :  { %v3540_v17 = vpop.f32.mrb[106].mxu0 }
 0xb67   :  { %v6279_v32 = vpop.f32.mrb[107].mxu0  ;;  %v3713_v13 = vsel %vm484_vm2, %v3697_v4, -inf }
 0xb6c   :  { %v3637_v36 = vpop.f32.mrb[108].mxu0 }
 0xb6d   :  { %v6290_v18 = vpop.f32.mrb[109].mxu0  ;;  %v3699_v10 = vmul.f32 0.35355338, %v3637_v36 }
 0xb6e   :  { %v3640_v55 = vpop.f32.mrb[110].mxu0 }
 0xb6f   :  { %v6291_v41 = vpop.f32.mrb[111].mxu0  ;;  %v3719_v6 = vsel %vm484_vm2, %v3699_v10, -inf }
 0xb7d   :  { %v7904_v28 = vpop.f32.mrb[100].mxu1 }
 0xb7e   :  { %v6248_v26 = vpop.f32.mrb[101].mxu1 }
 0xb7f   :  { %v3225_v44 = vpop.f32.mrb[102].mxu1 }
 0xb80   :  { %v6249_v45 = vpop.f32.mrb[103].mxu1 }
 0xb85   :  { %v3387_v47 = vpop.f32.mrb[104].mxu1 }
 0xb86   :  { %v3694_v52 = vmul.f32 0.35355338, %v3387_v47  ;;  %v6260_v56 = vpop.f32.mrb[105].mxu1 }
 0xb87   :  { %v3390_v42 = vpop.f32.mrb[106].mxu1 }
 0xb88   :  { %v6261_v50 = vpop.f32.mrb[107].mxu1  ;;  %v3704_v57 = vsel %vm484_vm2, %v3694_v52, -inf }
 0xb89   :  { %3705 = vmax.xlane.f32.xlu1 %v3704_v57 }
 0xb8d   :  { %v3487_v48 = vpop.f32.mrb[108].mxu1 }
 0xb8e   :  { %v7907_v54 = vmul.f32 0.35355338, %v3487_v48  ;;  %v6272_v59 = vpop.f32.mrb[109].mxu1 }
 0xb8f   :  { %v3490_v2 = vpop.f32.mrb[110].mxu1 }
 0xb90   :  { %v6273_v5 = vpop.f32.mrb[111].mxu1  ;;  %v3710_v49 = vsel %vm484_vm2, %v7907_v54, -inf }
 0xb91   :  { %3711 = vmax.xlane.f32.xlu0 %v3710_v49 }
 0xb95   :  { %3714 = vmax.xlane.f32.xlu0 %v3713_v13  ;;  %v3587_v14 = vpop.f32.mrb[112].mxu1 }
 0xb96   :  { %v7912_v15 = vmul.f32 0.35355338, %v3587_v14  ;;  %v6284_v9 = vpop.f32.mrb[113].mxu1 }
 0xb97   :  { %v3590_v19 = vpop.f32.mrb[114].mxu1 }
 0xb98   :  { %v6285_v53 = vpop.f32.mrb[115].mxu1  ;;  %v3716_v27 = vsel %vm484_vm2, %v7912_v15, -inf }
 0xb99   :  { %3720 = vmax.xlane.f32.xlu0 %v3719_v6  ;;  %3717 = vmax.xlane.f32.xlu1 %v3716_v27 }
 0xb9d   :  { %v3687_v8 = vpop.f32.mrb[116].mxu1 }
 0xb9e   :  { %v6296_v30 = vpop.f32.mrb[117].mxu1  ;;  %v7923_v32 = vmul.f32 0.35355338, %v3687_v8 }
 0xb9f   :  { %v3690_v11 = vpop.f32.mrb[118].mxu1 }
 0xba0   :  { %v6297_v17 = vpop.f32.mrb[119].mxu1  ;;  %v3722_v36 = vsel %vm484_vm2, %v7923_v32, -inf  ;;  %v5738_v11 = vpack.c.bf16 %v7684_v23, %v7684_v23 }
 0xbaa   :  { %3845 = vrot.lane.b32.xlu1 %v7192_v58, %s6929_s29 }
 0xbae   :  { %3893 = vrot.lane.b32.xlu1 %v7202_v61, %s6929_s29 }
 0xbaf   :  { %3797 = vrot.lane.b32.xlu0 %v7190_v39, %s6929_s29 }
 0xbd2   :  { %3723 = vmax.xlane.f32.xlu1 %v3722_v36 }
 0xbe3   :  { %3941 = vrot.lane.b32.xlu1 %v7212_v63, %s6929_s29 }
 0xbe5   :  { %v3703_v18 = vpop.xlane.xlu0 %3702 }
 0xbe6   :  { %v3725_v55 = vsub.f32 %v7896_v12, %v3703_v18 }
 0xbe8   :  { %v3733_v41 = vmul.f32 1.442695, %v3725_v55 }
 0xbea   :  { %6648 = vpow2.f32 %v3733_v41  ;;  %v5748_v41 = vpack.c.bf16 %v7884_v24, %v7884_v24  ;;  %v5739_v24 = vpack.c.bf16 %v7688_v33, %v7688_v33  ;;  %v5745_v33 = vpack.c.bf16 %v7703_v16, %v7703_v16 }
 0xbeb   :  { %v5749_v16 = vpack.c.bf16 %v7888_v29, %v7888_v29  ;;  %v5753_v29 = vpack.c.bf16 %v7904_v28, %v7904_v28 }
 0xbed   :  { %v3709_v58 = vpop.xlane.xlu0 %3708 }
 0xbee   :  { %v3727_v61 = vsub.f32 %v7900_v22, %v3709_v58  ;;  %v5752_v58 = vpack.c.bf16 %v7894_v3, %v7894_v3  ;;  %v5741_v3 = vpack.c.bf16 %v7690_v40, %v7690_v40  ;;  %v5747_v40 = vpack.c.bf16 %v7886_v34, %v7886_v34 }
 0xbf0   :  { %v3737_v26 = vmul.f32 1.442695, %v3727_v61 }
 0xbf2   :  { %6650 = vpow2.f32 %v3737_v26  ;;  %v5743_v26 = vpack.c.bf16 %v7694_v21, %v7694_v21 }
 0xbf4   :  { %v7931_v39 = vpop.eup %6648 }
 0xbf5   :  { %v3749_v44 = vsel %vm484_vm2, %v7931_v39, 0.0 }
 0xbf6   :  { %3750 = vadd.xlane.f32.xlu0 %v3749_v44 }
 0xbfc   :  { %v7935_v45 = vpop.eup %6650 }
 0xbfd   :  { %v3755_v63 = vsel %vm484_vm2, %v7935_v45, 0.0 }
 0xbfe   :  { %3756 = vadd.xlane.f32.xlu0 %v3755_v63 }
 0xc14   :  { %3989 = vrot.lane.b32.xlu0 %v7200_v60, %s6929_s29 }
 0xc16   :  { %v3706_v12 = vpop.xlane.xlu1 %3705 }
 0xc17   :  { %v3726_v47 = vsub.f32 %v3694_v52, %v3706_v12 }
 0xc19   :  { %v3735_v22 = vmul.f32 1.442695, %v3726_v47 }
 0xc1b   :  { %6652 = vpow2.f32 %v3735_v22 }
 0xc1e   :  { %v3712_v56 = vpop.xlane.xlu0 %3711 }
 0xc1f   :  { %v3728_v6 = vsub.f32 %v7907_v54, %v3712_v56  ;;  %v5742_v54 = vpack.c.bf16 %v7692_v43, %v7692_v43  ;;  %v5751_v56 = vpack.c.bf16 %v7892_v38, %v7892_v38 }
 0xc21   :  { %v3739_v27 = vmul.f32 1.442695, %v3728_v6 }
 0xc22   :  { %v3715_v42 = vpop.xlane.xlu0 %3714 }
 0xc23   :  { %v3729_v50 = vsub.f32 %v3697_v4, %v3715_v42 }
 0xc25   :  { %v7941_v57 = vpop.eup %6652  ;;  %v3741_v48 = vmul.f32 1.442695, %v3729_v50 }
 0xc26   :  { %v3721_v59 = vpop.xlane.xlu0 %3720  ;;  %v3718_v2 = vpop.xlane.xlu1 %3717  ;;  %v3752_v5 = vsel %vm484_vm2, %v7941_v57, 0.0 }
 0xc27   :  { %6654 = vpow2.f32 %v3741_v48  ;;  %v3731_v49 = vsub.f32 %v3699_v10, %v3721_v59  ;;  %3753 = vadd.xlane.f32.xlu1 %v3752_v5  ;;  %v3730_v8 = vsub.f32 %v7912_v15, %v3718_v2 }
 0xc29   :  { %v3745_v13 = vmul.f32 1.442695, %v3731_v49  ;;  %v3743_v30 = vmul.f32 1.442695, %v3730_v8 }
 0xc2a   :  { %v3798_v60 = vpop.permute.xlu0 %3797  ;;  %v3846_v14 = vpop.permute.xlu1 %3845 }
 0xc2b   :  { %6656 = vpow2.f32 %v3745_v13  ;;  %v3803_v52 = vsel %vm990_vm3, %v3798_v60, 0  ;;  %v3851_v9 = vsel %vm990_vm3, %v3846_v14, 0 }
 0xc2c   :  { %6299 = vmatpush3.bf16.msra.mxu0 %v3803_v52  ;;  %6305 = vmatpush3.bf16.msra.mxu1 %v3851_v9  ;;  %6658 = vpow2.f32 %v3739_v27 }
 0xc2d   :  { %6310 = vmatprep.subr.bf16.mxu0 %v6917_v20  ;;  %6316 = vmatprep.subr.bf16.mxu1 %v6917_v20  ;;  %6660 = vpow2.f32 %v3743_v30 }
 0xc2e   :  { %v3894_v23 = vpop.permute.xlu1 %3893 }
 0xc2f   :  { %v3899_v47 = vsel %vm990_vm3, %v3894_v23, 0 }
 0xc31   :  { %v7949_v4 = vpop.eup %6654 }
 0xc32   :  { %v3761_v10 = vsel %vm484_vm2, %v7949_v4, 0.0 }
 0xc33   :  { %3762 = vadd.xlane.f32.xlu0 %v3761_v10 }
 0xc35   :  { %v7953_v19 = vpop.eup %6656 }
 0xc36   :  { %v3767_v53 = vsel %vm484_vm2, %v7953_v19, 0.0  ;;  %v7971_v15 = vpop.eup %6658 }
 0xc37   :  { %3768 = vadd.xlane.f32.xlu0 %v3767_v53  ;;  %v3758_v17 = vsel %vm484_vm2, %v7971_v15, 0.0  ;;  %v7978_v36 = vpop.eup %6660 }
 0xc38   :  { %4037 = vrot.lane.b32.xlu1 %v7220_v0, %s6929_s29  ;;  %v5740_v0 = vpack.c.bf16 %v7686_v31, %v7686_v31  ;;  %v5746_v31 = vpack.c.bf16 %v7882_v35, %v7882_v35  ;;  %v3764_v18 = vsel %vm484_vm2, %v7978_v36, 0.0  ;;  %v5750_v35 = vpack.c.bf16 %v7890_v46, %v7890_v46 }
 0xc4d   :  { %4085 = vrot.lane.b32.xlu0 %v7210_v62, %s6929_s29  ;;  %v5744_v62 = vpack.c.bf16 %v7696_v51, %v7696_v51 }
 0xc51   :  { %2307 = vrot.lane.b32.xlu0 %v5738_v11, %s6930_s30 }
 0xc55   :  { %2311 = vrot.lane.b32.xlu0 %v5740_v0, %s6930_s30 }
 0xc59   :  { %2315 = vrot.lane.b32.xlu0 %v5742_v54, %s6930_s30 }
 0xc5c   :  { %3759 = vadd.xlane.f32.xlu1 %v3758_v17 }
 0xc5d   :  { %2319 = vrot.lane.b32.xlu0 %v5744_v62, %s6930_s30 }
 0xc5f   :  { %v3724_v43 = vpop.xlane.xlu1 %3723 }
 0xc60   :  { %v3732_v55 = vsub.f32 %v7923_v32, %v3724_v43  ;;  %3765 = vadd.xlane.f32.xlu1 %v3764_v18 }
 0xc61   :  { %3260 = vrot.lane.b32.xlu0 %v5746_v31, %s6931_s14 }
 0xc62   :  { %v3747_v51 = vmul.f32 1.442695, %v3732_v55 }
 0xc64   :  { %6662 = vpow2.f32 %v3747_v51 }
 0xc65   :  { %3264 = vrot.lane.b32.xlu0 %v5748_v41, %s6931_s14 }
 0xc69   :  { %3268 = vrot.lane.b32.xlu0 %v5750_v35, %s6931_s14 }
 0xc6d   :  { %3272 = vrot.lane.b32.xlu0 %v5752_v58, %s6931_s14 }
 0xc6e   :  { %v7996_v32 = vpop.eup %6662 }
 0xc6f   :  { %v3770_v61 = vsel %vm484_vm2, %v7996_v32, 0.0 }
 0xc70   :  { %3771 = vadd.xlane.f32.xlu1 %v3770_v61 }
 0xc81   :  { %4133 = vrot.lane.b32.xlu1 %v7228_v1, %s6929_s29 }
 0xc83   :  { %v3751_v46 = vpop.xlane.xlu0 %3750 }
 0xc84   :  { %6664 = vrcp.f32 %v3751_v46 }
 0xc85   :  { %2309 = vrot.lane.b32.xlu1 %v5739_v24, %s6930_s30 }
 0xc89   :  { %2313 = vrot.lane.b32.xlu1 %v5741_v3, %s6930_s30 }
 0xc8b   :  { %v3757_v44 = vpop.xlane.xlu0 %3756 }
 0xc8c   :  { %6666 = vrcp.f32 %v3757_v44 }
 0xc8d   :  { %2317 = vrot.lane.b32.xlu1 %v5743_v26, %s6930_s30 }
 0xc8e   :  { %v6665_v1 = vpop.eup %6664 }
 0xc8f   :  { %v3781_v63 = vmul.f32 %v6665_v1, %v7931_v39  ;;  %v3990_v22 = vpop.permute.xlu0 %3989 }
 0xc90   :  { %v3995_v42 = vsel %vm990_vm3, %v3990_v22, 0 }
 0xc91   :  { %2321 = vrot.lane.b32.xlu1 %v5745_v33, %s6930_s30  ;;  %v3789_v12 = vpack.c.bf16 %v3781_v63, %v3781_v63 }
 0xc93   :  { %6301 = vmatmul.mubr.msk.bf16.vlgmr.msra.gmra.mrb[112].mxu0 %vm484_vm2, %v3789_v12 }
 0xc94   :  { %6311 = vmatpush3.bf16.msra.mxu0 %v3899_v47  ;;  %6312 = vmatprep.mubr.msk.bf16.mxu0 %vm6919_vm1, %v6917_v20 }
 0xc95   :  { %3262 = vrot.lane.b32.xlu1 %v5747_v40, %s6931_s14  ;;  %6322 = vmatprep.subr.bf16.mxu0 %v6917_v20 }
 0xc96   :  { %v6667_v21 = vpop.eup %6666 }
 0xc97   :  { %v3783_v39 = vmul.f32 %v6667_v21, %v7935_v45  ;;  %v3942_v45 = vpop.permute.xlu1 %3941 }
 0xc98   :  { %v3947_v5 = vsel %vm990_vm3, %v3942_v45, 0 }
 0xc99   :  { %3266 = vrot.lane.b32.xlu1 %v5749_v16, %s6931_s14  ;;  %v3791_v34 = vpack.c.bf16 %v3783_v39, %v3783_v39 }
 0xc9b   :  { %6313 = vmatmul.mubr.msk.bf16.vlgmr.msra.gmra.mrb[116].mxu0 %vm484_vm2, %v3791_v34 }
 0xc9c   :  { %6323 = vmatpush3.bf16.msra.mxu0 %v3995_v42  ;;  %6324 = vmatprep.mubr.msk.bf16.mxu0 %vm6919_vm1, %v6917_v20 }
 0xc9d   :  { %3270 = vrot.lane.b32.xlu1 %v5751_v56, %s6931_s14  ;;  %6334 = vmatprep.subr.bf16.mxu0 %v6917_v20 }
 0xca1   :  { %3274 = vrot.lane.b32.xlu1 %v5753_v29, %s6931_s14 }
 0xcb4   :  { %v3754_v50 = vpop.xlane.xlu1 %3753 }
 0xcb5   :  { %6668 = vrcp.f32 %v3754_v50 }
 0xcb8   :  { %v4038_v0 = vpop.permute.xlu1 %4037 }
 0xcb9   :  { %v4043_v18 = vsel %vm990_vm3, %v4038_v0, 0 }
 0xcbf   :  { %v6669_v38 = vpop.eup %6668 }
 0xcc0   :  { %v3782_v48 = vmul.f32 %v6669_v38, %v7941_v57  ;;  %v3763_v59 = vpop.xlane.xlu0 %3762 }
 0xcc1   :  { %6670 = vrcp.f32 %v3763_v59 }
 0xcc2   :  { %v3790_v2 = vpack.c.bf16 %v3782_v48, %v3782_v48 }
 0xcc4   :  { %v3769_v49 = vpop.xlane.xlu0 %3768  ;;  %6307 = vmatmul.mubr.msk.bf16.vlgmr.msra.gmra.mrb[120].mxu1 %vm484_vm2, %v3790_v2 }
 0xcc5   :  { %6672 = vrcp.f32 %v3769_v49  ;;  %6317 = vmatpush3.bf16.msra.mxu1 %v3947_v5  ;;  %6318 = vmatprep.mubr.msk.bf16.mxu1 %vm6919_vm1, %v6917_v20 }
 0xcc6   :  { %6328 = vmatprep.subr.bf16.mxu1 %v6917_v20 }
 0xcc8   :  { %v4086_v28 = vpop.permute.xlu0 %4085 }
 0xcc9   :  { %v4091_v9 = vsel %vm990_vm3, %v4086_v28, 0 }
 0xccb   :  { %v6671_v13 = vpop.eup %6670 }
 0xccc   :  { %v3785_v57 = vmul.f32 %v6671_v13, %v7949_v4  ;;  %v2308_v60 = vpop.permute.xlu0 %2307 }
 0xccd   :  { %2332 = vst.msk [vmem:[#allocation2] sm:$0xf] %vm2331_vm5, %v2308_v60 }
 0xcce   :  { %v3793_v14 = vpack.c.bf16 %v3785_v57, %v3785_v57 }
 0xccf   :  { %v6673_v52 = vpop.eup %6672 }
 0xcd0   :  { %v2312_v10 = vpop.permute.xlu0 %2311  ;;  %6325 = vmatmul.mubr.msk.bf16.vlgmr.msra.gmra.mrb[120].mxu0 %vm484_vm2, %v3793_v14  ;;  %v3787_v53 = vmul.f32 %v6673_v52, %v7953_v19 }
 0xcd1   :  { %2334 = vst.msk [vmem:[#allocation2 + $0x8] sm:$0xf] %vm2331_vm5, %v2312_v10  ;;  %6335 = vmatpush3.bf16.msra.mxu0 %v4091_v9  ;;  %6336 = vmatprep.mubr.msk.bf16.mxu0 %vm6919_vm1, %v6917_v20 }
 0xcd2   :  { %v3795_v4 = vpack.c.bf16 %v3787_v53, %v3787_v53 }
 0xcd4   :  { %v2316_v6 = vpop.permute.xlu0 %2315 }
 0xcd5   :  { %2336 = vst.msk [vmem:[#allocation2 + $0x10] sm:$0xf] %vm2331_vm5, %v2316_v6 }
 0xcd8   :  { %v2320_v27 = vpop.permute.xlu0 %2319  ;;  %6337 = vmatmul.mubr.msk.bf16.vlgmr.msra.gmra.mrb[124].mxu0 %vm484_vm2, %v3795_v4 }
 0xcd9   :  { %2338 = vst.msk [vmem:[#allocation2 + $0x18] sm:$0xf] %vm2331_vm5, %v2320_v27 }
 0xcdc   :  { %v3261_v8 = vpop.permute.xlu0 %3260 }
 0xcdd   :  { %3285 = vst.msk [vmem:[#allocation2] sm:$0xf] %vm3284_vm6, %v3261_v8 }
 0xce0   :  { %v3265_v30 = vpop.permute.xlu0 %3264 }
 0xce1   :  { %3287 = vst.msk [vmem:[#allocation2 + $0x8] sm:$0xf] %vm3284_vm6, %v3265_v30  ;;  %v6520_v30 = vld [vmem:[#allocation6] sm:$0xff]  }
 0xce2   :  { %6346 = vmatprep.subr.bf16.mxu0 %v6520_v30 }
 0xce3   :  { %6347 = vmatpush3.bf16.msra.mxu0 %v6520_v30 }
 0xce4   :  { %v3269_v11 = vpop.permute.xlu0 %3268 }
 0xce5   :  { %3289 = vst.msk [vmem:[#allocation2 + $0x10] sm:$0xf] %vm3284_vm6, %v3269_v11  ;;  %v6521_v11 = vld [vmem:[#allocation6 + $0x8] sm:$0xff]  }
 0xce6   :  { %6348 = vmatprep.subr.bf16.mxu0 %v6521_v11 }
 0xce7   :  { %6349 = vmatpush3.bf16.msra.mxu0 %v6521_v11 }
 0xce8   :  { %v3273_v19 = vpop.permute.xlu0 %3272 }
 0xce9   :  { %3291 = vst.msk [vmem:[#allocation2 + $0x18] sm:$0xf] %vm3284_vm6, %v3273_v19  ;;  %v3760_v54 = vpop.xlane.xlu1 %3759 }
 0xcea   :  { %6674 = vrcp.f32 %v3760_v54 }
 0xced   :  { %v3766_v62 = vpop.xlane.xlu1 %3765 }
 0xcee   :  { %6676 = vrcp.f32 %v3766_v62 }
 0xcf4   :  { %v6675_v23 = vpop.eup %6674 }
 0xcf5   :  { %v3784_v17 = vmul.f32 %v6675_v23, %v7971_v15 }
 0xcf7   :  { %v3792_v31 = vpack.c.bf16 %v3784_v17, %v3784_v17 }
 0xcf8   :  { %v6677_v43 = vpop.eup %6676 }
 0xcf9   :  { %6319 = vmatmul.mubr.msk.bf16.vlgmr.msra.gmra.mrb[124].mxu1 %vm484_vm2, %v3792_v31  ;;  %v3786_v55 = vmul.f32 %v6677_v43, %v7978_v36 }
 0xcfa   :  { %6329 = vmatpush3.bf16.msra.mxu1 %v4043_v18  ;;  %6330 = vmatprep.mubr.msk.bf16.mxu1 %vm6919_vm1, %v6917_v20 }
 0xcfb   :  { %6340 = vmatprep.subr.bf16.mxu1 %v6917_v20  ;;  %v3794_v41 = vpack.c.bf16 %v3786_v55, %v3786_v55 }
 0xcfd   :  { %v3772_v51 = vpop.xlane.xlu1 %3771 }
 0xcfe   :  { %6678 = vrcp.f32 %v3772_v51 }
 0xd01   :  { %6331 = vmatmul.mubr.msk.bf16.vlgmr.msra.gmra.mrb[128].mxu1 %vm484_vm2, %v3794_v41  ;;  %v4134_v15 = vpop.permute.xlu1 %4133 }
 0xd02   :  { %v4139_v35 = vsel %vm990_vm3, %v4134_v15, 0  ;;  %6342 = vmatprep.mubr.msk.bf16.mxu1 %vm6919_vm1, %v6917_v20 }
 0xd03   :  { %6341 = vmatpush3.bf16.msra.mxu1 %v4139_v35 }
 0xd05   :  { %v2310_v58 = vpop.permute.xlu1 %2309 }
 0xd06   :  { %2333 = vst.msk [vmem:[#allocation2 + $0x4] sm:$0xf] %vm2331_vm5, %v2310_v58 }
 0xd08   :  { %v6679_v61 = vpop.eup %6678 }
 0xd09   :  { %v3788_v36 = vmul.f32 %v6679_v61, %v7996_v32  ;;  %v2314_v24 = vpop.permute.xlu1 %2313 }
 0xd0a   :  { %2335 = vst.msk [vmem:[#allocation2 + $0xc] sm:$0xf] %vm2331_vm5, %v2314_v24 }
 0xd0b   :  { %v3796_v46 = vpack.c.bf16 %v3788_v36, %v3788_v36 }
 0xd0d   :  { %6343 = vmatmul.mubr.msk.bf16.vlgmr.msra.gmra.mrb[132].mxu1 %vm484_vm2, %v3796_v46  ;;  %v2318_v3 = vpop.permute.xlu1 %2317 }
 0xd0e   :  { %2337 = vst.msk [vmem:[#allocation2 + $0x14] sm:$0xf] %vm2331_vm5, %v2318_v3 }
 0xd11   :  { %v2322_v26 = vpop.permute.xlu1 %2321 }
 0xd12   :  { %2339 = vst.msk [vmem:[#allocation2 + $0x1c] sm:$0xf] %vm2331_vm5, %v2322_v26 }
 0xd15   :  { %v3263_v20 = vpop.permute.xlu1 %3262 }
 0xd16   :  { %3286 = vst.msk [vmem:[#allocation2 + $0x4] sm:$0xf] %vm3284_vm6, %v3263_v20 }
 0xd19   :  { %v3267_v44 = vpop.permute.xlu1 %3266 }
 0xd1a   :  { %3288 = vst.msk [vmem:[#allocation2 + $0xc] sm:$0xf] %vm3284_vm6, %v3267_v44 }
 0xd1d   :  { %v3271_v1 = vpop.permute.xlu1 %3270 }
 0xd1e   :  { %3290 = vst.msk [vmem:[#allocation2 + $0x14] sm:$0xf] %vm3284_vm6, %v3271_v1 }
 0xd21   :  { %v3275_v32 = vpop.permute.xlu1 %3274 }
 0xd22   :  { %3292 = vst.msk [vmem:[#allocation2 + $0x1c] sm:$0xf] %vm3284_vm6, %v3275_v32 }
 0xd66   :  { %v3839_v33 = vpop.f32.mrb[112].mxu0 }
 0xd67   :  { %v5754_v63 = vpack.c.bf16 %v3839_v33, %v3839_v33  ;;  %v6302_v12 = vpop.f32.mrb[113].mxu0 }
 0xd68   :  { %v3842_v40 = vpop.f32.mrb[114].mxu0 }
 0xd69   :  { %4213 = vrot.lane.b32.xlu0 %v5754_v63, %s6932_s7  ;;  %v6303_v47 = vpop.f32.mrb[115].mxu0 }
 0xd6e   :  { %v3935_v21 = vpop.f32.mrb[116].mxu0 }
 0xd6f   :  { %v5756_v16 = vpack.c.bf16 %v3935_v21, %v3935_v21  ;;  %v6314_v39 = vpop.f32.mrb[117].mxu0 }
 0xd70   :  { %v3938_v22 = vpop.f32.mrb[118].mxu0 }
 0xd71   :  { %4217 = vrot.lane.b32.xlu0 %v5756_v16, %s6932_s7  ;;  %v6315_v34 = vpop.f32.mrb[119].mxu0 }
 0xd97   :  { %v3887_v56 = vpop.f32.mrb[120].mxu1 }
 0xd98   :  { %v5755_v42 = vpack.c.bf16 %v3887_v56, %v3887_v56  ;;  %v6308_v29 = vpop.f32.mrb[121].mxu1 }
 0xd99   :  { %v3890_v45 = vpop.f32.mrb[122].mxu1 }
 0xd9a   :  { %4215 = vrot.lane.b32.xlu1 %v5755_v42, %s6932_s7  ;;  %v6309_v50 = vpop.f32.mrb[123].mxu1 }
 0xda3   :  { %v4031_v38 = vpop.f32.mrb[120].mxu0 }
 0xda4   :  { %v5758_v48 = vpack.c.bf16 %v4031_v38, %v4031_v38  ;;  %v6326_v59 = vpop.f32.mrb[121].mxu0 }
 0xda5   :  { %v4034_v2 = vpop.f32.mrb[122].mxu0 }
 0xda6   :  { %4221 = vrot.lane.b32.xlu0 %v5758_v48, %s6932_s7  ;;  %v6327_v5 = vpop.f32.mrb[123].mxu0 }
 0xdab   :  { %v4127_v49 = vpop.f32.mrb[124].mxu0 }
 0xdac   :  { %v5760_v28 = vpack.c.bf16 %v4127_v49, %v4127_v49  ;;  %v6338_v13 = vpop.f32.mrb[125].mxu0 }
 0xdad   :  { %v4130_v57 = vpop.f32.mrb[126].mxu0 }
 0xdae   :  { %4225 = vrot.lane.b32.xlu0 %v5760_v28, %s6932_s7  ;;  %v6339_v60 = vpop.f32.mrb[127].mxu0 }
 0xdcc   :  { %v3983_v14 = vpop.f32.mrb[124].mxu1 }
 0xdcd   :  { %v5757_v52 = vpack.c.bf16 %v3983_v14, %v3983_v14  ;;  %v6320_v9 = vpop.f32.mrb[125].mxu1 }
 0xdce   :  { %v3986_v10 = vpop.f32.mrb[126].mxu1 }
 0xdcf   :  { %4219 = vrot.lane.b32.xlu1 %v5757_v52, %s6932_s7  ;;  %v6321_v53 = vpop.f32.mrb[127].mxu1  ;;  %v5667_v10 = vld [vmem:[#allocation8] ss:$0 sm:$0xff] }
 0xdd4   :  { %v4079_v6 = vpop.f32.mrb[128].mxu1 }
 0xdd5   :  { %v5759_v4 = vpack.c.bf16 %v4079_v6, %v4079_v6  ;;  %v6332_v27 = vpop.f32.mrb[129].mxu1 }
 0xdd6   :  { %v4082_v8 = vpop.f32.mrb[130].mxu1 }
 0xdd7   :  { %4223 = vrot.lane.b32.xlu1 %v5759_v4, %s6932_s7  ;;  %v6333_v0 = vpop.f32.mrb[131].mxu1  ;;  %v6761_v4 = vld [vmem:[%s8408_s0] sm:$0xff] }
 0xdd8   :  { %v6762_v0 = vld [vmem:[%s8408_s0 + $0x8] sm:$0xff] }
 0xddb   :  { %v4214_v19 = vpop.permute.xlu0 %4213 }
 0xddc   :  { %4238 = vst.msk [vmem:[#allocation2] sm:$0xf] %vm4237_vm7, %v4214_v19 }
 0xde0   :  { %v4175_v54 = vpop.f32.mrb[132].mxu1 }
 0xde1   :  { %v5761_v62 = vpack.c.bf16 %v4175_v54, %v4175_v54  ;;  %v6344_v23 = vpop.f32.mrb[133].mxu1 }
 0xde2   :  { %v4178_v17 = vpop.f32.mrb[134].mxu1 }
 0xde3   :  { %v4218_v31 = vpop.permute.xlu0 %4217  ;;  %4227 = vrot.lane.b32.xlu1 %v5761_v62, %s6932_s7  ;;  %v6345_v43 = vpop.f32.mrb[135].mxu1  ;;  %v6763_v62 = vld [vmem:[%s8408_s0 + $0x18] sm:$0xff] }
 0xde4   :  { %4240 = vst.msk [vmem:[#allocation2 + $0x8] sm:$0xf] %vm4237_vm7, %v4218_v31 }
 0xe0c   :  { %v4216_v18 = vpop.permute.xlu1 %4215 }
 0xe0d   :  { %4239 = vst.msk [vmem:[#allocation2 + $0x4] sm:$0xf] %vm4237_vm7, %v4216_v18 }
 0xe18   :  { %v4222_v55 = vpop.permute.xlu0 %4221 }
 0xe19   :  { %4242 = vst.msk [vmem:[#allocation2 + $0x10] sm:$0xf] %vm4237_vm7, %v4222_v55 }
 0xe20   :  { %v4226_v51 = vpop.permute.xlu0 %4225  ;;  %v6522_v58 = vld [vmem:[#allocation2] ss:$16 sps:$4 sm:$0xff]  }
 0xe21   :  { %4244 = vst.msk [vmem:[#allocation2 + $0x18] sm:$0xf] %vm4237_vm7, %v4226_v51  ;;  %v4261_v24 = vrot.slane %v6522_v58, %v7164_v7 }
 0xe28   :  { %v6523_v35 = vld [vmem:[#allocation2 + $0x8] ss:$16 sps:$4 sm:$0xff]  }
 0xe29   :  { %v4269_v36 = vrot.slane %v6523_v35, %v7164_v7 }
 0xe2b   :  { %v4270_v46 = vcombine.low %v4261_v24, %v4269_v36  ;;  %v4271_v44 = vcombine.high %v4261_v24, %v4269_v36  ;;  %v6765_v36 = vld [vmem:[%s8408_s0 + $0x38] sm:$0xff] }
 0xe2d   :  { %v4278_v20 = vrot.slane %v4270_v46, %v7168_v25  ;;  %v4285_v40 = vrot.slane %v4271_v44, %v7168_v25  ;;  %v6766_v46 = vld [vmem:[%s8408_s0 + $0x28] sm:$0xff] }
 0xe2f   :  { %v4286_v12 = vcombine.high %v4278_v20, %v6918_v37  ;;  %v4325_v16 = vshrl.u32 %v4278_v20, 16  ;;  %v4337_v56 = vshrl.u32 %v4285_v40, 16  ;;  %v4287_v5 = vcombine.high %v4285_v40, %v6918_v37 }
 0xe31   :  { %v4331_v34 = vshrl.u32 %v4286_v12, 16  ;;  %v4343_v57 = vshrl.u32 %v4287_v5, 16 }
 0xe41   :  { %v4220_v41 = vpop.permute.xlu1 %4219 }
 0xe42   :  { %4241 = vst.msk [vmem:[#allocation2 + $0xc] sm:$0xf] %vm4237_vm7, %v4220_v41  ;;  %v6764_v41 = vld [vmem:[%s8408_s0 + $0x20] sm:$0xff] }
 0xe49   :  { %v4224_v15 = vpop.permute.xlu1 %4223 }
 0xe4a   :  { %4243 = vst.msk [vmem:[#allocation2 + $0x14] sm:$0xf] %vm4237_vm7, %v4224_v15 }
 0xe51   :  { %v6524_v3 = vld [vmem:[#allocation2 + $0x4] ss:$16 sps:$4 sm:$0xff]  }
 0xe52   :  { %v4295_v1 = vrot.slane %v6524_v3, %v7164_v7 }
 0xe55   :  { %v4228_v61 = vpop.permute.xlu1 %4227 }
 0xe56   :  { %4245 = vst.msk [vmem:[#allocation2 + $0x1c] sm:$0xf] %vm4237_vm7, %v4228_v61 }
 0xe5d   :  { %v6525_v26 = vld [vmem:[#allocation2 + $0xc] ss:$16 sps:$4 sm:$0xff]  }
 0xe5e   :  { %v4303_v32 = vrot.slane %v6525_v26, %v7164_v7  ;;  %v6767_v26 = vld [vmem:[%s8408_s0 + $0x30] sm:$0xff] }
 0xe60   :  { %v4304_v33 = vcombine.low %v4295_v1, %v4303_v32  ;;  %v4305_v63 = vcombine.high %v4295_v1, %v4303_v32 }
 0xe62   :  { %v4312_v47 = vrot.slane %v4304_v33, %v7168_v25  ;;  %v4319_v21 = vrot.slane %v4305_v63, %v7168_v25 }
 0xe64   :  { %v4326_v39 = vshrl.u32 %v4312_v47, 16  ;;  %v4320_v22 = vcombine.high %v4312_v47, %v6918_v37  ;;  %v4338_v42 = vshrl.u32 %v4319_v21, 16  ;;  %v4324_v29 = vpack.i.b16 %v4312_v47, %v4278_v20 }
 0xe65   :  { %v4321_v50 = vcombine.high %v4319_v21, %v6918_v37  ;;  %v4336_v49 = vpack.i.b16 %v4319_v21, %v4285_v40  ;;  %v6760_v37 = vld [vmem:[%s8408_s0 + $0x10] sm:$0xff] }
 0xe66   :  { %v4327_v45 = vpack.i.b16 %v4326_v39, %v4325_v16  ;;  %v4332_v7 = vshrl.u32 %v4320_v22, 16  ;;  %v4339_v38 = vpack.i.b16 %v4338_v42, %v4337_v56  ;;  %v4330_v59 = vpack.i.b16 %v4320_v22, %v4286_v12  ;;  %v6526_v16 = vld [vmem:[%s8417_s9] sm:$0xff]   ;;  %v6527_v39 = vld [vmem:[%s8417_s9 + $0x8] sm:$0xff]   ;;  %s6933_s9 = smov 32  }
 0xe67   :  { %v4344_v28 = vshrl.u32 %v4321_v50, 16  ;;  %v4342_v14 = vpack.i.b16 %v4321_v50, %v4287_v5  ;;  %6358 = vmatprep.subr.bf16.mxu1 %v6526_v16 }
 0xe68   :  { %v5657_v48 = vcombine.low %v4324_v29, %v4327_v45  ;;  %v4333_v2 = vpack.i.b16 %v4332_v7, %v4331_v34  ;;  %v5659_v13 = vcombine.low %v4336_v49, %v4339_v38  ;;  %6359 = vmatpush3.bf16.msra.mxu1 %v6526_v16 }
 0xe69   :  { %v4345_v60 = vpack.i.b16 %v4344_v28, %v4343_v57  ;;  %6360 = vmatprep.subr.bf16.mxu1 %v6527_v39 }
 0xe6a   :  { %6350 = vmatprep.mubr.msk.bf16.mxu0 %vm118_vm0, %v5657_v48  ;;  %v5658_v25 = vcombine.low %v4330_v59, %v4333_v2 }
 0xe6b   :  { %v5660_v52 = vcombine.low %v4342_v14, %v4345_v60 }
 0xe6c   :  { %6351 = vmatmul.mubr.msk.bf16.vlgmr.msra.gmra.mrb[128].mxu0 %vm118_vm0, %v5658_v25  ;;  %6361 = vmatpush3.bf16.msra.mxu1 %v6527_v39 }
 0xe6d   :  { %6354 = vmatprep.mubr.msk.bf16.mxu0 %vm118_vm0, %v5659_v13 }
 0xe74   :  { %6355 = vmatmul.mubr.msk.bf16.gmra.mrb[132].mxu0 %vm118_vm0, %v5660_v52 }
 0xf3f   :  { %v6352_v9 = vpop.f32.mrb[128].mxu0 }
 0xf40   :  { %v4420_v53 = vpop.f32.mrb[129].mxu0  ;;  %v4453_v6 = vadd.f32 %v6760_v37, %v6352_v9 }
 0xf41   :  { %v4451_v27 = vadd.f32 %v6761_v4, %v4420_v53  ;;  %v6353_v8 = vpop.f32.mrb[130].mxu0 }
 0xf42   :  { %v4423_v30 = vpop.f32.mrb[131].mxu0  ;;  %v8123_v54 = vadd.f32 %v5667_v10, %v4453_v6  ;;  %v4454_v23 = vadd.f32 %v6763_v62, %v6353_v8 }
 0xf43   :  { %v8118_v11 = vadd.f32 %v5667_v10, %v4451_v27  ;;  %v4452_v19 = vadd.f32 %v6762_v0, %v4423_v30 }
 0xf44   :  { %v8134_v51 = vadd.f32 %v5667_v10, %v4454_v23  ;;  %v4482_v58 = vsel %vm118_vm0, %v8123_v54, 0.0 }
 0xf45   :  { %v8128_v17 = vadd.f32 %v5667_v10, %v4452_v19  ;;  %v4476_v31 = vsel %vm118_vm0, %v8118_v11, 0.0 }
 0xf46   :  { %4477 = vadd.xlane.f32.xlu0 %v4476_v31  ;;  %v4485_v32 = vsel %vm118_vm0, %v8134_v51, 0.0 }
 0xf47   :  { %v6356_v43 = vpop.f32.mrb[132].mxu0  ;;  %v4479_v18 = vsel %vm118_vm0, %v8128_v17, 0.0 }
 0xf48   :  { %4480 = vadd.xlane.f32.xlu1 %v4479_v18  ;;  %v4436_v55 = vpop.f32.mrb[133].mxu0  ;;  %v4457_v20 = vadd.f32 %v6767_v26, %v6356_v43 }
 0xf49   :  { %v4455_v15 = vadd.f32 %v6764_v41, %v4436_v55  ;;  %v6357_v35 = vpop.f32.mrb[134].mxu0 }
 0xf4a   :  { %4483 = vadd.xlane.f32.xlu0 %v4482_v58  ;;  %v4439_v61 = vpop.f32.mrb[135].mxu0  ;;  %v4458_v24 = vadd.f32 %v6765_v36, %v6357_v35  ;;  %v8160_v12 = vadd.f32 %v5667_v10, %v4457_v20  ;;  %v8229_v35 = vld [vmem:[%s8418_s10] ss:$0 sm:$0xff] }
 0xf4b   :  { %v4456_v3 = vadd.f32 %v6766_v46, %v4439_v61  ;;  %v8150_v44 = vadd.f32 %v5667_v10, %v4455_v15 }
 0xf4c   :  { %v8156_v33 = vadd.f32 %v5667_v10, %v4458_v24  ;;  %v4494_v21 = vsel %vm118_vm0, %v8160_v12, 0.0 }
 0xf4d   :  { %v8152_v1 = vadd.f32 %v5667_v10, %v4456_v3  ;;  %v4488_v40 = vsel %vm118_vm0, %v8150_v44, 0.0 }
 0xf4e   :  { %4486 = vadd.xlane.f32.xlu0 %v4485_v32  ;;  %v4497_v47 = vsel %vm118_vm0, %v8156_v33, 0.0 }
 0xf4f   :  { %v4491_v63 = vsel %vm118_vm0, %v8152_v1, 0.0 }
 0xf50   :  { %4492 = vadd.xlane.f32.xlu1 %v4491_v63 }
 0xf52   :  { %4489 = vadd.xlane.f32.xlu0 %v4488_v40 }
 0xf54   :  { %4498 = vadd.xlane.f32.xlu1 %v4497_v47 }
 0xf56   :  { %4495 = vadd.xlane.f32.xlu0 %v4494_v21 }
 0xfd3   :  { %v4478_v22 = vpop.xlane.xlu0 %4477 }
 0xfd4   :  { %v4500_v34 = vmul.f32 0.03125, %v4478_v22 }
 0xfd5   :  { %v4481_v56 = vpop.xlane.xlu1 %4480 }
 0xfd6   :  { %v8175_v42 = vsub.f32 %v8118_v11, %v4500_v34  ;;  %v4501_v29 = vmul.f32 0.03125, %v4481_v56  ;;  %v5668_v56 = vld [vmem:[#allocation9] ss:$0 sm:$0xff] }
 0xfd7   :  { %v4484_v45 = vpop.xlane.xlu0 %4483 }
 0xfd8   :  { %v8178_v7 = vsub.f32 %v8128_v17, %v4501_v29  ;;  %v4502_v50 = vmul.f32 0.03125, %v4484_v45  ;;  %v4516_v38 = vmul.f32 %v8175_v42, %v8175_v42 }
 0xfda   :  { %v8183_v48 = vsub.f32 %v8123_v54, %v4502_v50  ;;  %v4524_v59 = vsel %vm118_vm0, %v4516_v38, 0.0  ;;  %v4517_v2 = vmul.f32 %v8178_v7, %v8178_v7 }
 0xfdb   :  { %v4487_v5 = vpop.xlane.xlu0 %4486  ;;  %4525 = vadd.xlane.f32.xlu0 %v4524_v59 }
 0xfdc   :  { %v4503_v49 = vmul.f32 0.03125, %v4487_v5  ;;  %v4527_v25 = vsel %vm118_vm0, %v4517_v2, 0.0  ;;  %v4518_v28 = vmul.f32 %v8183_v48, %v8183_v48 }
 0xfdd   :  { %4528 = vadd.xlane.f32.xlu1 %v4527_v25  ;;  %v4493_v13 = vpop.xlane.xlu1 %4492 }
 0xfde   :  { %v8192_v57 = vsub.f32 %v8134_v51, %v4503_v49  ;;  %v4505_v60 = vmul.f32 0.03125, %v4493_v13  ;;  %v4530_v14 = vsel %vm118_vm0, %v4518_v28, 0.0 }
 0xfdf   :  { %4531 = vadd.xlane.f32.xlu0 %v4530_v14  ;;  %v4490_v52 = vpop.xlane.xlu0 %4489 }
 0xfe0   :  { %v8196_v9 = vsub.f32 %v8152_v1, %v4505_v60  ;;  %v4504_v10 = vmul.f32 0.03125, %v4490_v52  ;;  %v4519_v53 = vmul.f32 %v8192_v57, %v8192_v57  ;;  %v5669_v52 = vld [vmem:[#allocation11] ss:$0 sm:$0xff] }
 0xfe1   :  { %v4499_v37 = vpop.xlane.xlu1 %4498 }
 0xfe2   :  { %v8201_v6 = vsub.f32 %v8150_v44, %v4504_v10  ;;  %v4507_v4 = vmul.f32 0.03125, %v4499_v37  ;;  %v4533_v27 = vsel %vm118_vm0, %v4519_v53, 0.0  ;;  %v4521_v8 = vmul.f32 %v8196_v9, %v8196_v9 }
 0xfe3   :  { %v4496_v30 = vpop.xlane.xlu0 %4495  ;;  %4534 = vadd.xlane.f32.xlu1 %v4533_v27 }
 0xfe4   :  { %v8207_v0 = vsub.f32 %v8156_v33, %v4507_v4  ;;  %v4506_v19 = vmul.f32 0.03125, %v4496_v30  ;;  %v4520_v62 = vmul.f32 %v8201_v6, %v8201_v6  ;;  %v4539_v43 = vsel %vm118_vm0, %v4521_v8, 0.0 }
 0xfe6   :  { %v8212_v23 = vsub.f32 %v8160_v12, %v4506_v19  ;;  %v4536_v31 = vsel %vm118_vm0, %v4520_v62, 0.0  ;;  %v4523_v18 = vmul.f32 %v8207_v0, %v8207_v0 }
 0xfe7   :  { %4537 = vadd.xlane.f32.xlu0 %v4536_v31  ;;  %4540 = vadd.xlane.f32.xlu1 %v4539_v43 }
 0xfe8   :  { %v4522_v55 = vmul.f32 %v8212_v23, %v8212_v23  ;;  %v4545_v15 = vsel %vm118_vm0, %v4523_v18, 0.0 }
 0xfea   :  { %v4542_v41 = vsel %vm118_vm0, %v4522_v55, 0.0 }
 0xfeb   :  { %4543 = vadd.xlane.f32.xlu0 %v4542_v41  ;;  %4546 = vadd.xlane.f32.xlu1 %v4545_v15 }
 0xffc   :  { %4870 = vrot.lane.b32.xlu1 %v6527_v39, %s6920_s1 }
0x1000   :  { %5083 = vrot.lane.b32.xlu1 %v6526_v16, %s6909_s18 }
0x1001   :  { %4868 = vrot.lane.b32.xlu0 %v6526_v16, %s6920_s1 }
0x1004   :  { %5085 = vrot.lane.b32.xlu1 %v6527_v39, %s6909_s18 }
0x1005   :  { %5298 = vrot.lane.b32.xlu0 %v6526_v16, %s6933_s9 }
0x1008   :  { %5300 = vrot.lane.b32.xlu1 %v6527_v39, %s6933_s9 }
0x1009   :  { %4874 = vrot.lane.b32.xlu0 %v8229_v35, %s6920_s1 }
0x100c   :  { %5089 = vrot.lane.b32.xlu1 %v8229_v35, %s6909_s18 }
0x100d   :  { %5304 = vrot.lane.b32.xlu0 %v8229_v35, %s6933_s9 }
0x1068   :  { %v4526_v58 = vpop.xlane.xlu0 %4525 }
0x1069   :  { %v4548_v61 = vmul.f32 0.03125, %v4526_v58 }
0x106a   :  { %v4529_v36 = vpop.xlane.xlu1 %4528 }
0x106b   :  { %v4556_v24 = vadd.f32 1e-05, %v4548_v61  ;;  %v4549_v46 = vmul.f32 0.03125, %v4529_v36 }
0x106c   :  { %v4532_v3 = vpop.xlane.xlu0 %4531 }
0x106d   :  { %6680 = vrsqrt.f32 %v4556_v24  ;;  %v4557_v26 = vadd.f32 1e-05, %v4549_v46  ;;  %v4550_v20 = vmul.f32 0.03125, %v4532_v3 }
0x106f   :  { %6682 = vrsqrt.f32 %v4557_v26  ;;  %v4558_v32 = vadd.f32 1e-05, %v4550_v20 }
0x1070   :  { %v4535_v63 = vpop.xlane.xlu1 %4534 }
0x1071   :  { %6684 = vrsqrt.f32 %v4558_v32  ;;  %v4551_v40 = vmul.f32 0.03125, %v4535_v63 }
0x1073   :  { %v4559_v47 = vadd.f32 1e-05, %v4551_v40 }
0x1074   :  { %v4538_v21 = vpop.xlane.xlu0 %4537  ;;  %v4541_v16 = vpop.xlane.xlu1 %4540 }
0x1075   :  { %6686 = vrsqrt.f32 %v4559_v47  ;;  %v4552_v39 = vmul.f32 0.03125, %v4538_v21  ;;  %v4553_v22 = vmul.f32 0.03125, %v4541_v16  ;;  %v6528_v16 = vld [vmem:[%s8419_s11] sm:$0xff]  }
0x1076   :  { %6370 = vmatprep.subr.bf16.mxu0 %v6528_v16 }
0x1077   :  { %v6681_v34 = vpop.eup %6680  ;;  %v4560_v29 = vadd.f32 1e-05, %v4552_v39  ;;  %v4561_v45 = vadd.f32 1e-05, %v4553_v22  ;;  %6371 = vmatpush3.bf16.msra.mxu0 %v6528_v16  ;;  %v6529_v39 = vld [vmem:[%s8419_s11 + $0x8] sm:$0xff]   ;;  %v8269_v22 = vld [vmem:[%s8419_s11 + $0x10] sm:$0xff]  }
0x1078   :  { %v4572_v50 = vmul.f32 %v6681_v34, %v8175_v42  ;;  %v4544_v38 = vpop.xlane.xlu0 %4543  ;;  %v4547_v59 = vpop.xlane.xlu1 %4546  ;;  %6372 = vmatprep.subr.bf16.mxu0 %v6529_v39 }
0x1079   :  { %v6683_v2 = vpop.eup %6682  ;;  %6688 = vrsqrt.f32 %v4560_v29  ;;  %v4554_v5 = vmul.f32 0.03125, %v4544_v38  ;;  %v4555_v49 = vmul.f32 0.03125, %v4547_v59 }
0x107a   :  { %v4573_v25 = vmul.f32 %v6683_v2, %v8178_v7  ;;  %6690 = vrsqrt.f32 %v4561_v45  ;;  %v4586_v28 = vmul.f32 %v5668_v56, %v4572_v50 }
0x107b   :  { %v6685_v13 = vpop.eup %6684  ;;  %v4562_v60 = vadd.f32 1e-05, %v4554_v5  ;;  %v4563_v14 = vadd.f32 1e-05, %v4555_v49  ;;  %6373 = vmatpush3.bf16.msra.mxu0 %v6529_v39 }
0x107c   :  { %v4574_v10 = vmul.f32 %v6685_v13, %v8183_v48  ;;  %v4587_v53 = vmul.f32 %v5668_v56, %v4573_v25  ;;  %v4869_v37 = vpop.permute.xlu0 %4868  ;;  %v4600_v42 = vadd.f32 %v5669_v52, %v4586_v28  ;;  %v4871_v36 = vpop.permute.xlu1 %4870  ;;  %6394 = vmatprep.subr.bf16.mxu0 %v8269_v22 }
0x107d   :  { %6692 = vrsqrt.f32 %v4562_v60  ;;  %6382 = vmatprep.subr.bf16.mxu1 %v4869_v37 }
0x107e   :  { %6694 = vrsqrt.f32 %v4563_v14  ;;  %v4601_v4 = vadd.f32 %v5669_v52, %v4587_v53  ;;  %v4588_v8 = vmul.f32 %v5668_v56, %v4574_v10 }
0x107f   :  { %v6687_v27 = vpop.eup %6686 }
0x1080   :  { %v4575_v30 = vmul.f32 %v6687_v27, %v8192_v57  ;;  %v4608_v7 = vpack.c.bf16 %v4601_v4, %v4600_v42  ;;  %v4602_v48 = vadd.f32 %v5669_v52, %v4588_v8 }
0x1082   :  { %v4589_v19 = vmul.f32 %v5668_v56, %v4575_v30  ;;  %6362 = vmatprep.mubr.msk.bf16.mxu1 %vm118_vm0, %v4608_v7 }
0x1083   :  { %v6689_v62 = vpop.eup %6688 }
0x1084   :  { %v6691_v31 = vpop.eup %6690  ;;  %v4576_v43 = vmul.f32 %v6689_v62, %v8201_v6  ;;  %v4603_v18 = vadd.f32 %v5669_v52, %v4589_v19 }
0x1085   :  { %v4577_v55 = vmul.f32 %v6691_v31, %v8196_v9  ;;  %v5084_v9 = vpop.permute.xlu1 %5083 }
0x1086   :  { %v4609_v41 = vpack.c.bf16 %v4603_v18, %v4602_v48  ;;  %v4590_v15 = vmul.f32 %v5668_v56, %v4576_v43 }
0x1087   :  { %v6693_v58 = vpop.eup %6692  ;;  %v4591_v61 = vmul.f32 %v5668_v56, %v4577_v55 }
0x1088   :  { %v6695_v24 = vpop.eup %6694  ;;  %v4578_v57 = vmul.f32 %v6693_v58, %v8212_v23  ;;  %6363 = vmatmul.mubr.msk.bf16.vlgmr.msra.gmra.mrb[136].mxu1 %vm118_vm0, %v4609_v41  ;;  %v4604_v46 = vadd.f32 %v5669_v52, %v4590_v15 }
0x1089   :  { %v4579_v3 = vmul.f32 %v6695_v24, %v8207_v0  ;;  %6383 = vmatpush3.bf16.msra.mxu1 %v4869_v37  ;;  %v4605_v26 = vadd.f32 %v5669_v52, %v4591_v61  ;;  %v5086_v23 = vpop.permute.xlu1 %5085  ;;  %v5299_v0 = vpop.permute.xlu0 %5298 }
0x108a   :  { %6384 = vmatprep.subr.bf16.mxu1 %v4871_v36  ;;  %v4592_v6 = vmul.f32 %v5668_v56, %v4578_v57 }
0x108b   :  { %v4610_v20 = vpack.c.bf16 %v4605_v26, %v4604_v46  ;;  %v4593_v32 = vmul.f32 %v5668_v56, %v4579_v3 }
0x108c   :  { %v4606_v63 = vadd.f32 %v5669_v52, %v4592_v6 }
0x108d   :  { %6366 = vmatprep.mubr.msk.bf16.mxu1 %vm118_vm0, %v4610_v20  ;;  %v4607_v40 = vadd.f32 %v5669_v52, %v4593_v32  ;;  %6385 = vmatpush3.bf16.msra.mxu1 %v4871_v36  ;;  %v5301_v21 = vpop.permute.xlu1 %5300  ;;  %v4875_v62 = vpop.permute.xlu0 %4874 }
0x108e   :  { %6406 = vmatprep.subr.bf16.mxu1 %v5084_v9 }
0x108f   :  { %v4611_v47 = vpack.c.bf16 %v4607_v40, %v4606_v63 }
0x1091   :  { %6367 = vmatmul.mubr.msk.bf16.gmra.mrb[140].mxu1 %vm118_vm0, %v4611_v47 }
0x1092   :  { %6386 = vmatprep.mubr.msk.bf16.mxu1 %vm118_vm0, %v4608_v7 }
0x1099   :  { %6387 = vmatmul.mubr.msk.bf16.vlgmr.msra.gmra.mrb[144].mxu1 %vm118_vm0, %v4609_v41 }
0x109a   :  { %6407 = vmatpush3.bf16.msra.mxu1 %v5084_v9  ;;  %6390 = vmatprep.mubr.msk.bf16.mxu1 %vm118_vm0, %v4610_v20 }
0x109b   :  { %6408 = vmatprep.subr.bf16.mxu1 %v5086_v23 }
0x109e   :  { %6409 = vmatpush3.bf16.msra.mxu1 %v5086_v23 }
0x109f   :  { %6430 = vmatprep.subr.bf16.mxu1 %v5299_v0 }
0x10a1   :  { %6391 = vmatmul.mubr.msk.bf16.gmra.mrb[148].mxu1 %vm118_vm0, %v4611_v47 }
0x10a2   :  { %6410 = vmatprep.mubr.msk.bf16.mxu1 %vm118_vm0, %v4608_v7 }
0x10a9   :  { %6411 = vmatmul.mubr.msk.bf16.vlgmr.msra.gmra.mrb[152].mxu1 %vm118_vm0, %v4609_v41 }
0x10aa   :  { %6431 = vmatpush3.bf16.msra.mxu1 %v5299_v0  ;;  %6414 = vmatprep.mubr.msk.bf16.mxu1 %vm118_vm0, %v4610_v20 }
0x10ab   :  { %6432 = vmatprep.subr.bf16.mxu1 %v5301_v21 }
0x10ae   :  { %6433 = vmatpush3.bf16.msra.mxu1 %v5301_v21 }
0x10b1   :  { %6415 = vmatmul.mubr.msk.bf16.gmra.mrb[156].mxu1 %vm118_vm0, %v4611_v47 }
0x10b2   :  { %6434 = vmatprep.mubr.msk.bf16.mxu1 %vm118_vm0, %v4608_v7 }
0x10b9   :  { %6435 = vmatmul.mubr.msk.bf16.vlgmr.msra.gmra.mrb[160].mxu1 %vm118_vm0, %v4609_v41 }
0x10ba   :  { %6438 = vmatprep.mubr.msk.bf16.mxu1 %vm118_vm0, %v4610_v20 }
0x10c1   :  { %6439 = vmatmul.mubr.msk.bf16.gmra.mrb[164].mxu1 %vm118_vm0, %v4611_v47 }
0x115b   :  { %v6364_v34 = vpop.f32.mrb[136].mxu1 }
0x115c   :  { %v4696_v56 = vpop.f32.mrb[137].mxu1  ;;  %v4705_v45 = vadd.f32 %v6364_v34, %v8229_v35 }
0x115d   :  { %v6365_v29 = vpop.f32.mrb[138].mxu1  ;;  %v4697_v59 = vadd.f32 %v8229_v35, %v4696_v56 }
0x115e   :  { %v4708_v50 = vadd.f32 %v6365_v29, %v8229_v35  ;;  %v4699_v38 = vpop.f32.mrb[139].mxu1 }
0x115f   :  { %v4700_v2 = vadd.f32 %v8229_v35, %v4699_v38 }
0x1160   :  { %v8276_v5 = vpack.c.bf16 %v4708_v50, %v4705_v45 }
0x1161   :  { %v8278_v49 = vpack.c.bf16 %v4700_v2, %v4697_v59 }
0x1162   :  { %v5679_v25 = vmul.bf16 3218784218, %v8276_v5 }
0x1163   :  { %v5678_v28 = vmul.bf16 3218784218, %v8278_v49 }
0x1164   :  { %v4743_v13 = vmul.bf16 1069105081, %v5679_v25  ;;  %v6368_v60 = vpop.f32.mrb[140].mxu1 }
0x1165   :  { %v4740_v14 = vmul.bf16 1069105081, %v5678_v28  ;;  %v4712_v52 = vpop.f32.mrb[141].mxu1  ;;  %v4721_v53 = vadd.f32 %v6368_v60, %v8229_v35  ;;  %v5090_v28 = vpop.permute.xlu1 %5089 }
0x1166   :  { %6696 = vpow.bf16 %v4743_v13  ;;  %v6369_v10 = vpop.f32.mrb[142].mxu1  ;;  %v4713_v4 = vadd.f32 %v8229_v35, %v4712_v52 }
0x1167   :  { %6698 = vpow.bf16 %v4740_v14  ;;  %v4724_v37 = vadd.f32 %v6369_v10, %v8229_v35  ;;  %v4715_v42 = vpop.f32.mrb[143].mxu1 }
0x1168   :  { %v4716_v27 = vadd.f32 %v8229_v35, %v4715_v42 }
0x1169   :  { %v8286_v8 = vpack.c.bf16 %v4724_v37, %v4721_v53 }
0x116a   :  { %v8288_v30 = vpack.c.bf16 %v4716_v27, %v4713_v4 }
0x116b   :  { %v5681_v7 = vmul.bf16 3218784218, %v8286_v8 }
0x116c   :  { %v5680_v19 = vmul.bf16 3218784218, %v8288_v30  ;;  %v6388_v31 = vpop.f32.mrb[144].mxu1 }
0x116d   :  { %v4749_v43 = vmul.bf16 1069105081, %v5681_v7  ;;  %v4911_v48 = vpop.f32.mrb[145].mxu1  ;;  %v4920_v41 = vadd.f32 %v6388_v31, %v4875_v62 }
0x116e   :  { %v4746_v18 = vmul.bf16 1069105081, %v5680_v19  ;;  %v6389_v55 = vpop.f32.mrb[146].mxu1  ;;  %v4912_v35 = vadd.f32 %v4911_v48, %v4875_v62 }
0x116f   :  { %6700 = vpow.bf16 %v4749_v43  ;;  %v4923_v15 = vadd.f32 %v6389_v55, %v4875_v62  ;;  %v4914_v58 = vpop.f32.mrb[147].mxu1 }
0x1170   :  { %6702 = vpow.bf16 %v4746_v18  ;;  %v4915_v61 = vadd.f32 %v4914_v58, %v4875_v62 }
0x1171   :  { %v6697_v36 = vpop.eup %6696  ;;  %v8292_v24 = vpack.c.bf16 %v4923_v15, %v4920_v41 }
0x1172   :  { %v6699_v57 = vpop.eup %6698  ;;  %v4752_v46 = vadd.bf16 1065369472, %v6697_v36  ;;  %v8294_v3 = vpack.c.bf16 %v4915_v61, %v4912_v35 }
0x1173   :  { %v4751_v26 = vadd.bf16 1065369472, %v6699_v57  ;;  %v5693_v6 = vmul.bf16 3218784218, %v8292_v24  ;;  %v6531_v57 = vld [vmem:[%s8419_s11 + $0x18] sm:$0xff]  }
0x1174   :  { %6704 = vrcp.bf16 %v4752_v46  ;;  %v5692_v20 = vmul.bf16 3218784218, %v8294_v3  ;;  %v6392_v32 = vpop.f32.mrb[148].mxu1 }
0x1175   :  { %6706 = vrcp.bf16 %v4751_v26  ;;  %v4958_v9 = vmul.bf16 1069105081, %v5693_v6  ;;  %v4927_v63 = vpop.f32.mrb[149].mxu1  ;;  %v4936_v23 = vadd.f32 %v6392_v32, %v4875_v62 }
0x1176   :  { %v4955_v40 = vmul.bf16 1069105081, %v5692_v20  ;;  %v6393_v47 = vpop.f32.mrb[150].mxu1  ;;  %v4928_v16 = vadd.f32 %v4927_v63, %v4875_v62 }
0x1177   :  { %6708 = vpow.bf16 %v4958_v9  ;;  %v4939_v0 = vadd.f32 %v6393_v47, %v4875_v62  ;;  %v4930_v21 = vpop.f32.mrb[151].mxu1  ;;  %v8321_v47 = vld [vmem:[%s8419_s11 + $0x20] sm:$0xff]  }
0x1178   :  { %6710 = vpow.bf16 %v4955_v40  ;;  %v4931_v39 = vadd.f32 %v4930_v21, %v4875_v62 }
0x1179   :  { %v8298_v34 = vpack.c.bf16 %v4939_v0, %v4936_v23 }
0x117a   :  { %v6701_v56 = vpop.eup %6700  ;;  %v8300_v29 = vpack.c.bf16 %v4931_v39, %v4928_v16 }
0x117b   :  { %v6703_v45 = vpop.eup %6702  ;;  %v4754_v50 = vadd.bf16 1065369472, %v6701_v56  ;;  %v5695_v38 = vmul.bf16 3218784218, %v8298_v34 }
0x117c   :  { %v4753_v59 = vadd.bf16 1065369472, %v6703_v45  ;;  %v5694_v2 = vmul.bf16 3218784218, %v8300_v29  ;;  %v6412_v25 = vpop.f32.mrb[152].mxu1 }
0x117d   :  { %6712 = vrcp.bf16 %v4754_v50  ;;  %v4964_v13 = vmul.bf16 1069105081, %v5695_v38  ;;  %v5126_v60 = vpop.f32.mrb[153].mxu1  ;;  %v5135_v53 = vadd.f32 %v6412_v25, %v5090_v28  ;;  %v5305_v25 = vpop.permute.xlu0 %5304 }
0x117e   :  { %6714 = vrcp.bf16 %v4753_v59  ;;  %v4961_v14 = vmul.bf16 1069105081, %v5694_v2  ;;  %v6413_v52 = vpop.f32.mrb[154].mxu1  ;;  %v5127_v7 = vadd.f32 %v5126_v60, %v5090_v28 }
0x117f   :  { %v6705_v10 = vpop.eup %6704  ;;  %6716 = vpow.bf16 %v4964_v13  ;;  %v5138_v37 = vadd.f32 %v6413_v52, %v5090_v28  ;;  %v5129_v42 = vpop.f32.mrb[155].mxu1 }
0x1180   :  { %v6707_v4 = vpop.eup %6706  ;;  %v4758_v27 = vmul.bf16 1065369472, %v6705_v10  ;;  %6718 = vpow.bf16 %v4961_v14  ;;  %v5130_v19 = vadd.f32 %v5129_v42, %v5090_v28 }
0x1181   :  { %v4756_v62 = vmul.bf16 1065369472, %v6707_v4  ;;  %v8304_v31 = vpack.c.bf16 %v5138_v37, %v5135_v53 }
0x1182   :  { %v6709_v43 = vpop.eup %6708  ;;  %v8306_v48 = vpack.c.bf16 %v5130_v19, %v5127_v7  ;;  %v4764_v58 = vmul.bf16 %v4758_v27, %v8276_v5 }
0x1183   :  { %v6711_v18 = vpop.eup %6710  ;;  %v4763_v55 = vmul.bf16 %v4756_v62, %v8278_v49  ;;  %v4967_v41 = vadd.bf16 1065369472, %v6709_v43  ;;  %v5707_v15 = vmul.bf16 3218784218, %v8304_v31 }
0x1184   :  { %v4966_v35 = vadd.bf16 1065369472, %v6711_v18  ;;  %v5706_v61 = vmul.bf16 3218784218, %v8306_v48  ;;  %v6416_v36 = vpop.f32.mrb[156].mxu1 }
0x1185   :  { %6720 = vrcp.bf16 %v4967_v41  ;;  %v5173_v46 = vmul.bf16 1069105081, %v5707_v15  ;;  %v5142_v26 = vpop.f32.mrb[157].mxu1  ;;  %6374 = vmatprep.mubr.msk.bf16.mxu0 %vm118_vm0, %v4763_v55  ;;  %v5151_v5 = vadd.f32 %v6416_v36, %v5090_v28 }
0x1186   :  { %6722 = vrcp.bf16 %v4966_v35  ;;  %v5170_v49 = vmul.bf16 1069105081, %v5706_v61  ;;  %v6417_v6 = vpop.f32.mrb[158].mxu1  ;;  %6375 = vmatmul.mubr.msk.bf16.vlgmr.msra.gmra.mrb[136].mxu0 %vm118_vm0, %v4764_v58  ;;  %v5143_v63 = vadd.f32 %v5142_v26, %v5090_v28 }
0x1187   :  { %6724 = vpow.bf16 %v5173_v46  ;;  %v5154_v20 = vadd.f32 %v6417_v6, %v5090_v28  ;;  %v5145_v32 = vpop.f32.mrb[159].mxu1  ;;  %6395 = vmatpush3.bf16.msra.mxu0 %v8269_v22 }
0x1188   :  { %v6713_v9 = vpop.eup %6712  ;;  %6726 = vpow.bf16 %v5170_v49  ;;  %v5146_v40 = vadd.f32 %v5145_v32, %v5090_v28  ;;  %6396 = vmatprep.subr.bf16.mxu0 %v6531_v57  ;;  %v6533_v49 = vld [vmem:[%s8419_s11 + $0x28] sm:$0xff]  }
0x1189   :  { %v6715_v23 = vpop.eup %6714  ;;  %v4762_v0 = vmul.bf16 1065369472, %v6713_v9  ;;  %v8323_v21 = vpack.c.bf16 %v5154_v20, %v5151_v5 }
0x118a   :  { %v6717_v16 = vpop.eup %6716  ;;  %v4760_v39 = vmul.bf16 1065369472, %v6715_v23  ;;  %v8325_v56 = vpack.c.bf16 %v5146_v40, %v5143_v63 }
0x118b   :  { %v6719_v45 = vpop.eup %6718  ;;  %v4969_v22 = vadd.bf16 1065369472, %v6717_v16  ;;  %v5709_v50 = vmul.bf16 3218784218, %v8323_v21  ;;  %6397 = vmatpush3.bf16.msra.mxu0 %v6531_v57  ;;  %v4766_v13 = vmul.bf16 %v4762_v0, %v8286_v8  ;;  %v6534_v16 = vld [vmem:[%s8419_s11 + $0x30] sm:$0xff]  }
0x118c   :  { %v4765_v38 = vmul.bf16 %v4760_v39, %v8288_v30  ;;  %v4968_v59 = vadd.bf16 1065369472, %v6719_v45  ;;  %v5708_v2 = vmul.bf16 3218784218, %v8325_v56  ;;  %v6436_v28 = vpop.f32.mrb[160].mxu1  ;;  %6418 = vmatprep.subr.bf16.mxu0 %v8321_v47 }
0x118d   :  { %6728 = vrcp.bf16 %v4969_v22  ;;  %v5179_v60 = vmul.bf16 1069105081, %v5709_v50  ;;  %v5341_v14 = vpop.f32.mrb[161].mxu1  ;;  %v5350_v53 = vadd.f32 %v6436_v28, %v5305_v25 }
0x118e   :  { %6730 = vrcp.bf16 %v4968_v59  ;;  %v5176_v52 = vmul.bf16 1069105081, %v5708_v2  ;;  %6378 = vmatprep.mubr.msk.bf16.mxu0 %vm118_vm0, %v4765_v38  ;;  %v6437_v10 = vpop.f32.mrb[162].mxu1  ;;  %v5342_v4 = vadd.f32 %v5341_v14, %v5305_v25 }
0x118f   :  { %6732 = vpow.bf16 %v5179_v60  ;;  %v5353_v30 = vadd.f32 %v6437_v10, %v5305_v25  ;;  %6379 = vmatmul.mubr.msk.bf16.gmra.mrb[140].mxu0 %vm118_vm0, %v4766_v13  ;;  %v5344_v37 = vpop.f32.mrb[163].mxu1 }
0x1190   :  { %v6721_v42 = vpop.eup %6720  ;;  %6734 = vpow.bf16 %v5176_v52  ;;  %v5345_v27 = vadd.f32 %v5344_v37, %v5305_v25 }
0x1191   :  { %v6723_v7 = vpop.eup %6722  ;;  %v4973_v8 = vmul.bf16 1065369472, %v6721_v42  ;;  %v8334_v19 = vpack.c.bf16 %v5353_v30, %v5350_v53 }
0x1192   :  { %v6725_v62 = vpop.eup %6724  ;;  %v4971_v43 = vmul.bf16 1065369472, %v6723_v7  ;;  %v8336_v18 = vpack.c.bf16 %v5345_v27, %v5342_v4  ;;  %v6535_v27 = vld [vmem:[%s8419_s11 + $0x38] sm:$0xff]  }
0x1193   :  { %v6727_v55 = vpop.eup %6726  ;;  %v5182_v41 = vadd.bf16 1065369472, %v6725_v62  ;;  %v5721_v15 = vmul.bf16 3218784218, %v8334_v19  ;;  %v4979_v57 = vmul.bf16 %v4973_v8, %v8292_v24 }
0x1194   :  { %v4978_v58 = vmul.bf16 %v4971_v43, %v8294_v3  ;;  %v5181_v35 = vadd.bf16 1065369472, %v6727_v55  ;;  %v5720_v61 = vmul.bf16 3218784218, %v8336_v18  ;;  %v6440_v36 = vpop.f32.mrb[164].mxu1 }
0x1195   :  { %6736 = vrcp.bf16 %v5182_v41  ;;  %v5388_v46 = vmul.bf16 1069105081, %v5721_v15  ;;  %v5357_v26 = vpop.f32.mrb[165].mxu1  ;;  %v5366_v3 = vadd.f32 %v6440_v36, %v5305_v25 }
0x1196   :  { %6738 = vrcp.bf16 %v5181_v35  ;;  %v5385_v6 = vmul.bf16 1069105081, %v5720_v61  ;;  %6398 = vmatprep.mubr.msk.bf16.mxu0 %vm118_vm0, %v4978_v58  ;;  %v6441_v5 = vpop.f32.mrb[166].mxu1  ;;  %v5358_v24 = vadd.f32 %v5357_v26, %v5305_v25 }
0x1197   :  { %6740 = vpow.bf16 %v5388_v46  ;;  %v5369_v20 = vadd.f32 %v6441_v5, %v5305_v25  ;;  %6399 = vmatmul.mubr.msk.bf16.vlgmr.msra.gmra.mrb[136].mxu0 %vm118_vm0, %v4979_v57  ;;  %v5360_v32 = vpop.f32.mrb[167].mxu1 }
0x1198   :  { %v6729_v9 = vpop.eup %6728  ;;  %6742 = vpow.bf16 %v5385_v6  ;;  %v5361_v63 = vadd.f32 %v5360_v32, %v5305_v25  ;;  %6419 = vmatpush3.bf16.msra.mxu0 %v8321_v47 }
0x1199   :  { %v6731_v40 = vpop.eup %6730  ;;  %v4977_v23 = vmul.bf16 1065369472, %v6729_v9  ;;  %v8348_v0 = vpack.c.bf16 %v5369_v20, %v5366_v3  ;;  %6420 = vmatprep.subr.bf16.mxu0 %v6533_v49 }
0x119a   :  { %v6733_v39 = vpop.eup %6732  ;;  %v4975_v45 = vmul.bf16 1065369472, %v6731_v40  ;;  %v5374_v22 = vpack.c.bf16 %v5361_v63, %v5358_v24 }
0x119b   :  { %v6735_v50 = vpop.eup %6734  ;;  %v5184_v38 = vadd.bf16 1065369472, %v6733_v39  ;;  %v5723_v59 = vmul.bf16 3218784218, %v8348_v0  ;;  %v4981_v28 = vmul.bf16 %v4977_v23, %v8298_v34 }
0x119c   :  { %v4980_v2 = vmul.bf16 %v4975_v45, %v8300_v29  ;;  %v5183_v25 = vadd.bf16 1065369472, %v6735_v50  ;;  %v5722_v47 = vmul.bf16 3218784218, %v5374_v22  ;;  %6421 = vmatpush3.bf16.msra.mxu0 %v6533_v49 }
0x119d   :  { %6744 = vrcp.bf16 %v5184_v38  ;;  %v5394_v13 = vmul.bf16 1069105081, %v5723_v59  ;;  %6442 = vmatprep.subr.bf16.mxu0 %v6534_v16 }
0x119e   :  { %6746 = vrcp.bf16 %v5183_v25  ;;  %v5391_v60 = vmul.bf16 1069105081, %v5722_v47  ;;  %6402 = vmatprep.mubr.msk.bf16.mxu0 %vm118_vm0, %v4980_v2 }
0x119f   :  { %6748 = vpow.bf16 %v5394_v13  ;;  %6403 = vmatmul.mubr.msk.bf16.gmra.mrb[140].mxu0 %vm118_vm0, %v4981_v28 }
0x11a0   :  { %v6737_v14 = vpop.eup %6736  ;;  %6750 = vpow.bf16 %v5391_v60 }
0x11a1   :  { %v6739_v52 = vpop.eup %6738  ;;  %v5188_v10 = vmul.bf16 1065369472, %v6737_v14 }
0x11a2   :  { %v6741_v29 = vpop.eup %6740  ;;  %v5186_v53 = vmul.bf16 1065369472, %v6739_v52 }
0x11a3   :  { %v6743_v30 = vpop.eup %6742  ;;  %v5397_v37 = vadd.bf16 1065369472, %v6741_v29  ;;  %v5194_v4 = vmul.bf16 %v5188_v10, %v8304_v31 }
0x11a4   :  { %v5193_v34 = vmul.bf16 %v5186_v53, %v8306_v48  ;;  %v5396_v42 = vadd.bf16 1065369472, %v6743_v30 }
0x11a5   :  { %6752 = vrcp.bf16 %v5397_v37 }
0x11a6   :  { %6754 = vrcp.bf16 %v5396_v42  ;;  %6422 = vmatprep.mubr.msk.bf16.mxu0 %vm118_vm0, %v5193_v34 }
0x11a7   :  { %6423 = vmatmul.mubr.msk.bf16.vlgmr.msra.gmra.mrb[136].mxu0 %vm118_vm0, %v5194_v4 }
0x11a8   :  { %v6745_v7 = vpop.eup %6744  ;;  %6443 = vmatpush3.bf16.msra.mxu0 %v6534_v16 }
0x11a9   :  { %v6747_v8 = vpop.eup %6746  ;;  %v5192_v62 = vmul.bf16 1065369472, %v6745_v7  ;;  %6444 = vmatprep.subr.bf16.mxu0 %v6535_v27 }
0x11aa   :  { %v6749_v43 = vpop.eup %6748  ;;  %v5190_v48 = vmul.bf16 1065369472, %v6747_v8 }
0x11ab   :  { %v6751_v55 = vpop.eup %6750  ;;  %v5399_v41 = vadd.bf16 1065369472, %v6749_v43  ;;  %v5196_v58 = vmul.bf16 %v5192_v62, %v8323_v21 }
0x11ac   :  { %v5195_v31 = vmul.bf16 %v5190_v48, %v8325_v56  ;;  %v5398_v15 = vadd.bf16 1065369472, %v6751_v55  ;;  %6445 = vmatpush3.bf16.msra.mxu0 %v6535_v27 }
0x11ad   :  { %6756 = vrcp.bf16 %v5399_v41 }
0x11ae   :  { %6758 = vrcp.bf16 %v5398_v15  ;;  %6426 = vmatprep.mubr.msk.bf16.mxu0 %vm118_vm0, %v5195_v31 }
0x11af   :  { %6427 = vmatmul.mubr.msk.bf16.gmra.mrb[140].mxu0 %vm118_vm0, %v5196_v58 }
0x11b0   :  { %v6753_v35 = vpop.eup %6752 }
0x11b1   :  { %v6755_v61 = vpop.eup %6754  ;;  %v5403_v36 = vmul.bf16 1065369472, %v6753_v35 }
0x11b2   :  { %v5401_v57 = vmul.bf16 1065369472, %v6755_v61 }
0x11b3   :  { %v5409_v26 = vmul.bf16 %v5403_v36, %v8334_v19 }
0x11b4   :  { %v5408_v46 = vmul.bf16 %v5401_v57, %v8336_v18  ;;  %v5670_v18 = vld [vmem:[%s8420_s12] ss:$0 sm:$0xff]  ;;  %s6934_s12 = smov [#allocation12]  }
0x11b5   :  { %v4621_v19 = vadd.f32 %v5670_v18, %v8123_v54  ;;  %v4619_v32 = vadd.f32 %v5670_v18, %v8118_v11  ;;  %v4622_v63 = vadd.f32 %v5670_v18, %v8134_v51  ;;  %v4625_v11 = vadd.f32 %v5670_v18, %v8160_v12  ;;  %s5526_s27 = sshll.u32 %s6934_s12, 4  ;;  %s5527_s27 = int_to_ptr.vmem [resolvable:$true] %s5526_s27 }
0x11b6   :  { %6446 = vmatprep.mubr.msk.bf16.mxu0 %vm118_vm0, %v5408_v46  ;;  %v4623_v51 = vadd.f32 %v5670_v18, %v8150_v44  ;;  %v4624_v2 = vadd.f32 %v5670_v18, %v8152_v1  ;;  %s6878_s4 = scalar_lea.vmem %s5527_s27, 1024  ;;  %p6883_p13 = scmp.lt.s32.totalorder %s5527_s27, %s5527_s27 }
0x11b7   :  { %6447 = vmatmul.mubr.msk.bf16.vlgmr.msra.gmra.mrb[136].mxu0 %vm118_vm0, %v5409_v26  ;;  %p6879_p12 = scmp.ne.s32.totalorder %s5527_s27, %s6878_s4  ;;  %p6884_p0 = scmp.lt.s32.totalorder %s6878_s4, %s6878_s4 }
0x11b8   :  { %v6757_v56 = vpop.eup %6756 }
0x11b9   :  { %v6759_v21 = vpop.eup %6758  ;;  %v5407_v49 = vmul.bf16 1065369472, %v6757_v56  ;;  %p6885_p1 = por %p6884_p0, %p6883_p13 }
0x11ba   :  { %v5405_v6 = vmul.bf16 1065369472, %v6759_v21 }
0x11bb   :  { %v5411_v3 = vmul.bf16 %v5407_v49, %v8348_v0  ;;  %v4620_v0 = vadd.f32 %v5670_v18, %v8128_v17  ;;  %v4626_v17 = vadd.f32 %v5670_v18, %v8156_v33  ;;  %p6886_p2 = pnand %p6885_p1, %p6879_p12 }
0x11bc   :  { %v5410_v5 = vmul.bf16 %v5405_v6, %v5374_v22 }
0x11be   :  { %6450 = vmatprep.mubr.msk.bf16.mxu0 %vm118_vm0, %v5410_v5 }
0x11bf   :  { %6451 = vmatmul.mubr.msk.bf16.gmra.mrb[140].mxu0 %vm118_vm0, %v5411_v3 }
0x128a   :  { %v6448_v20 = vpop.f32.mrb[136].mxu0 }
0x128b   :  { %v6458_v9 = vadd.f32 %v6448_v20, %v4621_v19  ;;  %v5474_v24 = vpop.f32.mrb[137].mxu0 }
0x128c   :  { %v6459_v40 = vadd.f32 %v5474_v24, %v4619_v32  ;;  %v6449_v23 = vpop.f32.mrb[138].mxu0 }
0x128d   :  { %5515 = vst.msk [vmem:[#allocation12 + $0x10] sm:$0xff] %vm118_vm0, %v6458_v9  ;;  %v6460_v16 = vadd.f32 %v6449_v23, %v4622_v63  ;;  %v5477_v39 = vpop.f32.mrb[139].mxu0 }
0x128e   :  { %5513 = vst.msk [vmem:[#allocation12] sm:$0xff] %vm118_vm0, %v6459_v40  ;;  %v6461_v45 = vadd.f32 %v5477_v39, %v4620_v0 }
0x128f   :  { %5516 = vst.msk [vmem:[#allocation12 + $0x18] sm:$0xff] %vm118_vm0, %v6460_v16 }
0x1290   :  { %5514 = vst.msk [vmem:[#allocation12 + $0x8] sm:$0xff] %vm118_vm0, %v6461_v45 }
0x1292   :  { %v6452_v54 = vpop.f32.mrb[140].mxu0 }
0x1293   :  { %v6462_v22 = vadd.f32 %v6452_v54, %v4625_v11  ;;  %v5490_v50 = vpop.f32.mrb[141].mxu0 }
0x1294   :  { %v6463_v38 = vadd.f32 %v5490_v50, %v4623_v51  ;;  %v6453_v59 = vpop.f32.mrb[142].mxu0 }
0x1295   :  { %5519 = vst.msk [vmem:[#allocation12 + $0x30] sm:$0xff] %vm118_vm0, %v6462_v22  ;;  %v6464_v25 = vadd.f32 %v6453_v59, %v4626_v17  ;;  %v5493_v47 = vpop.f32.mrb[143].mxu0 }
0x1296   :  { %5517 = vst.msk [vmem:[#allocation12 + $0x20] sm:$0xff] %vm118_vm0, %v6463_v38  ;;  %v6465_v12 = vadd.f32 %v5493_v47, %v4624_v2 }
0x1297   :  { %5520 = vst.msk [vmem:[#allocation12 + $0x38] sm:$0xff] %vm118_vm0, %v6464_v25 }
0x1298   :  { %5518 = vst.msk [vmem:[#allocation12 + $0x28] sm:$0xff] %vm118_vm0, %v6465_v12 }
0x1299   :  { %6889 = shalt.err (!%p6886_p2)
}
0x129a   :  { %s6890_s8 = scalar_lea.hbm %s8421_s13, 1024 }
0x129b   :  { %p6891_p3 = scmp.ne.s32.totalorder %s8421_s13, %s6890_s8  ;;  %p6894_p4 = scmp.lt.u32.totalorder %s6890_s8, %s8421_s13 }
0x129d   :  { %p6896_p5 = pnand %p6894_p4, %p6891_p3 }
0x129f   :  { %6899 = shalt.err (!%p6896_p5)
}
0x12a0   :  { %s6935_s14 = smov 128  }
0x12a1   :  { %5532 = dma.vmem_to_hbm [thread:$0]  %s5527_s27, 1024, %s8421_s13, [#allocation5], %s6935_s14, %s6935_s14, %s6930_s30  }
0x12a2   :  { %6906 = dma.done.wait [#allocation5], 1024  }
0x12a3   :  { %6907 = vsyncadd [#allocation5], 4294966272 }
0x12a4   :  { %5536 = vsyncpa [#allocation4], 1 }
0x12a5   :  { %5537 = vsyncpa [#allocation7], 1 }
0x12a6   :  { %5538 = vsyncpa [#allocation10], 1 }
0x12a7   :  { %5539 = vsyncpa [#allocation5], 1 }

// kernel: tpu_custom_call.1
= control target key start
LH: loop header
LB: loop body
LE: loop exit
PB: predicated region body
PF: predicated region fallthrough
CT: control target
= control target key end

     0   :  { %18 = vsyncpa [#allocation4], 0  ;;  %s8408_s0 = inlined_call_operand.vmem [shape: f32[8,8,32], index: 0, kind: input, shape index: {}]   ;;  %s8409_s1 = inlined_call_operand.vmem [shape: f32[1,32], index: 1, kind: input, shape index: {}]   ;;  %s8410_s2 = inlined_call_operand.vmem [shape: f32[1,32], index: 2, kind: input, shape index: {}]   ;;  %s8411_s3 = inlined_call_operand.vmem [shape: bf16[32,96], index: 3, kind: input, shape index: {}]   ;;  %s8412_s4 = inlined_call_operand.hbm [shape: f32[1,96], index: 4, kind: input, shape index: {}]   ;;  %s8413_s5 = inlined_call_operand.hbm [shape: bf16[32,32], index: 5, kind: input, shape index: {}]   ;;  %s8414_s6 = inlined_call_operand.hbm [shape: f32[1,32], index: 6, kind: input, shape index: {}]   ;;  %s8415_s7 = inlined_call_operand.hbm [shape: f32[1,32], index: 7, kind: input, shape index: {}]   ;;  %s8416_s8 = inlined_call_operand.hbm [shape: f32[1,32], index: 8, kind: input, shape index: {}]   ;;  %s8417_s9 = inlined_call_operand.vmem [shape: bf16[32,128], index: 9, kind: input, shape index: {}]   ;;  %s8418_s10 = inlined_call_operand.vmem [shape: f32[1,128], index: 10, kind: input, shape index: {}]   ;;  %s8419_s11 = inlined_call_operand.vmem [shape: bf16[128,32], index: 11, kind: input, shape index: {}]   ;;  %s8420_s12 = inlined_call_operand.vmem [shape: f32[1,32], index: 12, kind: input, shape index: {}]   ;;  %s8421_s13 = inlined_call_operand.hbm [shape: f32[8,8,32], index: 13, kind: output, shape index: {}]  }
   0x1   :  { %19 = vsyncpa [#allocation7], 0 }
   0x2   :  { %20 = vsyncpa [#allocation10], 0 }
   0x3   :  { %21 = vsyncpa [#allocation5], 0  ;;  %s6908_s25 = smov [#allocation6]   ;;  %s6768_s29 = scalar_lea.hbm %s8413_s5, 256 }
   0x4   :  { %s45_s26 = sshll.u32 %s6908_s25, 4  ;;  %p6769_p0 = scmp.ne.s32.totalorder %s8413_s5, %s6768_s29  ;;  %s46_s26 = int_to_ptr.vmem [resolvable:$true] %s45_s26 }
   0x5   :  { %p6772_p1 = scmp.lt.u32.totalorder %s6768_s29, %s8413_s5 }
   0x7   :  { %p6774_p2 = pnand %p6772_p1, %p6769_p0 }
   0x9   :  { %6777 = shalt.err (!%p6774_p2)
}
   0xa   :  { %s6778_s17 = scalar_lea.vmem %s46_s26, 256  ;;  %p6783_p4 = scmp.lt.s32.totalorder %s46_s26, %s46_s26 }
   0xb   :  { %p6779_p3 = scmp.ne.s32.totalorder %s46_s26, %s6778_s17  ;;  %p6784_p5 = scmp.lt.s32.totalorder %s6778_s17, %s6778_s17 }
   0xd   :  { %p6785_p6 = por %p6784_p5, %p6783_p4 }
   0xf   :  { %p6786_p7 = pnand %p6785_p6, %p6779_p3 }
  0x11   :  { %6789 = shalt.err (!%p6786_p7)
}
  0x12   :  { %s6909_s18 = smov 64   ;;  %s6910_s19 = smov 4  }
  0x13   :  { %51 = dma.hbm_to_vmem [thread:$0]  %s8413_s5, 256, %s46_s26, [#allocation7], %s6909_s18, %s6909_s18, %s6910_s19  }
  0x14   :  { %s6911_s22 = smov [#allocation9]   ;;  %s6912_s24 = smov [#allocation3]  }
  0x15   :  { %s68_s23 = sshll.u32 %s6911_s22, 4  ;;  %s36_s25 = sshll.u32 %s6912_s24, 4  ;;  %s69_s23 = int_to_ptr.vmem [resolvable:$true] %s68_s23  ;;  %s37_s25 = int_to_ptr.vmem [resolvable:$true] %s36_s25 }
  0x16   :  { %s6790_s29 = scalar_lea.hbm %s8415_s7, 16 }
  0x17   :  { %p6791_p8 = scmp.ne.s32.totalorder %s8415_s7, %s6790_s29  ;;  %p6794_p9 = scmp.lt.u32.totalorder %s6790_s29, %s8415_s7 }
  0x19   :  { %p6796_p10 = pnand %p6794_p9, %p6791_p8 }
  0x1b   :  { %6799 = shalt.err (!%p6796_p10)
}
  0x1c   :  { %s6800_s5 = scalar_lea.vmem %s69_s23, 16  ;;  %s6804_s26 = scalar_lea.vmem %s69_s23, 32 }
  0x1d   :  { %p6801_p11 = scmp.ne.s32.totalorder %s69_s23, %s6800_s5  ;;  %p6805_p12 = scmp.lt.s32.totalorder %s69_s23, %s69_s23 }
  0x1e   :  { %p6806_p13 = scmp.lt.s32.totalorder %s6804_s26, %s6800_s5 }
  0x20   :  { %p6807_p0 = por %p6806_p13, %p6805_p12 }
  0x22   :  { %p6808_p1 = pnand %p6807_p0, %p6801_p11 }
  0x24   :  { %6811 = shalt.err (!%p6808_p1)
}
  0x25   :  { %71 = dma.hbm_to_vmem [thread:$0]  %s8415_s7, 16, %s69_s23, [#allocation10]  }
  0x26   :  { %s6812_s22 = scalar_lea.hbm %s8412_s4, 16 }
  0x27   :  { %p6813_p2 = scmp.ne.s32.totalorder %s8412_s4, %s6812_s22  ;;  %p6816_p3 = scmp.lt.u32.totalorder %s6812_s22, %s8412_s4 }
  0x29   :  { %p6818_p4 = pnand %p6816_p3, %p6813_p2 }
  0x2b   :  { %6821 = shalt.err (!%p6818_p4)
}
  0x2c   :  { %s6822_s30 = scalar_lea.vmem %s37_s25, 16  ;;  %s6826_s14 = scalar_lea.vmem %s37_s25, 32 }
  0x2d   :  { %p6823_p5 = scmp.ne.s32.totalorder %s37_s25, %s6822_s30  ;;  %p6827_p6 = scmp.lt.s32.totalorder %s37_s25, %s37_s25 }
  0x2e   :  { %p6828_p7 = scmp.lt.s32.totalorder %s6826_s14, %s6822_s30 }
  0x30   :  { %p6829_p8 = por %p6828_p7, %p6827_p6 }
  0x32   :  { %p6830_p9 = pnand %p6829_p8, %p6823_p5 }
  0x34   :  { %6833 = shalt.err (!%p6830_p9)
}
  0x35   :  { %39 = dma.hbm_to_vmem [thread:$0]  %s8412_s4, 16, %s37_s25, [#allocation4]  }
  0x36   :  { %s6913_s15 = smov [#allocation8]   ;;  %s6914_s5 = smov [#allocation11]  }
  0x37   :  { %s58_s16 = sshll.u32 %s6913_s15, 4  ;;  %s78_s26 = sshll.u32 %s6914_s5, 4  ;;  %s59_s16 = int_to_ptr.vmem [resolvable:$true] %s58_s16  ;;  %s79_s26 = int_to_ptr.vmem [resolvable:$true] %s78_s26 }
  0x38   :  { %s6834_s20 = scalar_lea.hbm %s8414_s6, 16 }
  0x39   :  { %p6835_p10 = scmp.ne.s32.totalorder %s8414_s6, %s6834_s20  ;;  %p6838_p11 = scmp.lt.u32.totalorder %s6834_s20, %s8414_s6 }
  0x3b   :  { %p6840_p12 = pnand %p6838_p11, %p6835_p10 }
  0x3d   :  { %6843 = shalt.err (!%p6840_p12)
}
  0x3e   :  { %s6844_s4 = scalar_lea.vmem %s59_s16, 16  ;;  %s6848_s25 = scalar_lea.vmem %s59_s16, 32 }
  0x3f   :  { %p6845_p13 = scmp.ne.s32.totalorder %s59_s16, %s6844_s4  ;;  %p6849_p0 = scmp.lt.s32.totalorder %s59_s16, %s59_s16 }
  0x40   :  { %p6850_p1 = scmp.lt.s32.totalorder %s6848_s25, %s6844_s4 }
  0x42   :  { %p6851_p2 = por %p6850_p1, %p6849_p0 }
  0x44   :  { %p6852_p3 = pnand %p6851_p2, %p6845_p13 }
  0x46   :  { %6855 = shalt.err (!%p6852_p3)
}
  0x47   :  { %61 = dma.hbm_to_vmem [thread:$0]  %s8414_s6, 16, %s59_s16, [#allocation7]  }
  0x48   :  { %s6856_s7 = scalar_lea.hbm %s8416_s8, 16 }
  0x49   :  { %p6857_p4 = scmp.ne.s32.totalorder %s8416_s8, %s6856_s7  ;;  %p6860_p5 = scmp.lt.u32.totalorder %s6856_s7, %s8416_s8 }
  0x4b   :  { %p6862_p6 = pnand %p6860_p5, %p6857_p4 }
  0x4d   :  { %6865 = shalt.err (!%p6862_p6)
}
  0x4e   :  { %s6866_s19 = scalar_lea.vmem %s79_s26, 16  ;;  %s6870_s20 = scalar_lea.vmem %s79_s26, 32 }
  0x4f   :  { %p6867_p7 = scmp.ne.s32.totalorder %s79_s26, %s6866_s19  ;;  %p6871_p8 = scmp.lt.s32.totalorder %s79_s26, %s79_s26 }
  0x50   :  { %p6872_p9 = scmp.lt.s32.totalorder %s6870_s20, %s6866_s19 }
  0x52   :  { %p6873_p10 = por %p6872_p9, %p6871_p8 }
  0x54   :  { %p6874_p11 = pnand %p6873_p10, %p6867_p7 }
  0x56   :  { %6877 = shalt.err (!%p6874_p11)
}
  0x57   :  { %81 = dma.hbm_to_vmem [thread:$0]  %s8416_s8, 16, %s79_s26, [#allocation10]  }
  0x58   :  { %6900 = dma.done.wait [#allocation4], 16  }
  0x59   :  { %6901 = vsyncadd [#allocation4], 4294967280 }
  0x5a   :  { %6902 = dma.done.wait [#allocation7], 272  }
  0x5b   :  { %6903 = vsyncadd [#allocation7], 4294967024 }
  0x5c   :  { %6904 = dma.done.wait [#allocation10], 32  }
  0x5d   :  { %6905 = vsyncadd [#allocation10], 4294967264  ;;  %vm118_vm0 = vcmask 261120   ;;  %v108_v0 = vld [vmem:[%s8408_s0] sm:$0xff]  ;;  %v109_v2 = vld [vmem:[%s8408_s0 + $0x8] sm:$0xff]  ;;  %vm6919_vm1 = vmmov 0  }
  0x5e   :  { %v112_v1 = vld [vmem:[%s8408_s0 + $0x20] sm:$0xff]  ;;  %v119_v3 = vsel %vm118_vm0, %v108_v0, 0.0  ;;  %v113_v5 = vld [vmem:[%s8408_s0 + $0x28] sm:$0xff]  ;;  %v110_v6 = vld [vmem:[%s8408_s0 + $0x10] sm:$0xff]  ;;  %v122_v8 = vsel %vm118_vm0, %v109_v2, 0.0  ;;  %vm484_vm2 = vcmask 64512  }
  0x5f   :  { %v131_v4 = vsel %vm118_vm0, %v112_v1, 0.0  ;;  %v111_v7 = vld [vmem:[%s8408_s0 + $0x18] sm:$0xff]  ;;  %120 = vadd.xlane.f32.xlu0 %v119_v3  ;;  %v134_v9 = vsel %vm118_vm0, %v113_v5, 0.0  ;;  %v125_v10 = vsel %vm118_vm0, %v110_v6, 0.0  ;;  %v114_v12 = vld [vmem:[%s8408_s0 + $0x30] sm:$0xff]  ;;  %v6518_v56 = vld [vmem:[%s8411_s3] sm:$0xff]  }
  0x60   :  { %132 = vadd.xlane.f32.xlu1 %v131_v4  ;;  %v128_v11 = vsel %vm118_vm0, %v111_v7, 0.0  ;;  %v115_v13 = vld [vmem:[%s8408_s0 + $0x38] sm:$0xff]  ;;  %v137_v14 = vsel %vm118_vm0, %v114_v12, 0.0  ;;  %5950 = vmatprep.subr.bf16.mxu0 %v6518_v56  ;;  %v6519_v57 = vld [vmem:[%s8411_s3 + $0x8] sm:$0xff]   ;;  %vm990_vm3 = vcmask 1043456   ;;  %s6922_s24 = smov 120  }
  0x61   :  { %v140_v15 = vsel %vm118_vm0, %v115_v13, 0.0  ;;  %6454 = vmatprep.subr.bf16.mxu1 %v6518_v56  ;;  %5951 = vmatpush3.bf16.msra.mxu0 %v6518_v56  ;;  %s6923_s27 = smov 56   ;;  %vm1378_vm4 = vcmask 60416   ;;  %s6924_s4 = smov 80   ;;  %vm2331_vm5 = vcmask 126016   ;;  %vm3284_vm6 = vcmask 191616  }
  0x62   :  { %6456 = vmatpush3.bf16.msra.mxu1 %v6518_v56  ;;  %5952 = vmatprep.subr.bf16.mxu0 %v6519_v57  ;;  %s6925_s25 = smov 112   ;;  %s6926_s8 = smov 48   ;;  %vm4237_vm7 = vcmask 257216  }
  0x63   :  { %123 = vadd.xlane.f32.xlu0 %v122_v8  ;;  %6455 = vmatprep.subr.bf16.mxu1 %v6519_v57  ;;  %s6927_s26 = smov 72   ;;  %s6928_s28 = smov 104  }
  0x64   :  { %135 = vadd.xlane.f32.xlu1 %v134_v9  ;;  %s6929_s29 = smov 40   ;;  %s6930_s30 = smov 8  }
  0x65   :  { %5953 = vmatpush3.bf16.msra.mxu0 %v6519_v57  ;;  %s6931_s14 = smov 16   ;;  %s6932_s7 = smov 24  }
  0x66   :  { %6457 = vmatpush3.bf16.msra.mxu1 %v6519_v57 }
  0x67   :  { %126 = vadd.xlane.f32.xlu0 %v125_v10 }
  0x68   :  { %129 = vadd.xlane.f32.xlu1 %v128_v11 }
  0x6b   :  { %138 = vadd.xlane.f32.xlu0 %v137_v14 }
  0x6c   :  { %141 = vadd.xlane.f32.xlu1 %v140_v15 }
  0xec   :  { %v121_v16 = vpop.xlane.xlu0 %120 }
  0xed   :  { %v133_v17 = vpop.xlane.xlu1 %132  ;;  %v144_v18 = vmul.f32 0.03125, %v121_v16 }
  0xee   :  { %v148_v19 = vmul.f32 0.03125, %v133_v17 }
  0xef   :  { %v7100_v20 = vsub.f32 %v108_v0, %v144_v18 }
  0xf0   :  { %v7102_v21 = vsub.f32 %v112_v1, %v148_v19  ;;  %v124_v22 = vpop.xlane.xlu0 %123  ;;  %v5540_v19 = vld [vmem:[%s8409_s1] ss:$0 sm:$0xff]  ;;  %s6920_s1 = smov 96  }
  0xf1   :  { %v136_v23 = vpop.xlane.xlu1 %135  ;;  %v145_v24 = vmul.f32 0.03125, %v124_v22  ;;  %v160_v26 = vmul.f32 %v7100_v20, %v7100_v20 }
  0xf2   :  { %v149_v25 = vmul.f32 0.03125, %v136_v23  ;;  %v164_v27 = vmul.f32 %v7102_v21, %v7102_v21 }
  0xf3   :  { %v7108_v28 = vsub.f32 %v109_v2, %v145_v24  ;;  %v168_v30 = vsel %vm118_vm0, %v160_v26, 0.0 }
  0xf4   :  { %v7110_v29 = vsub.f32 %v113_v5, %v149_v25  ;;  %169 = vadd.xlane.f32.xlu0 %v168_v30  ;;  %v127_v31 = vpop.xlane.xlu0 %126  ;;  %v180_v33 = vsel %vm118_vm0, %v164_v27, 0.0  ;;  %v5541_v27 = vld [vmem:[%s8410_s2] ss:$0 sm:$0xff]  ;;  %s6921_s2 = smov 88  }
  0xf5   :  { %v130_v32 = vpop.xlane.xlu1 %129  ;;  %v146_v34 = vmul.f32 0.03125, %v127_v31  ;;  %v161_v36 = vmul.f32 %v7108_v28, %v7108_v28 }
  0xf6   :  { %v147_v35 = vmul.f32 0.03125, %v130_v32  ;;  %v165_v37 = vmul.f32 %v7110_v29, %v7110_v29 }
  0xf7   :  { %v7118_v38 = vsub.f32 %v110_v6, %v146_v34  ;;  %v171_v40 = vsel %vm118_vm0, %v161_v36, 0.0 }
  0xf8   :  { %v7120_v39 = vsub.f32 %v111_v7, %v147_v35  ;;  %181 = vadd.xlane.f32.xlu0 %v180_v33  ;;  %172 = vadd.xlane.f32.xlu1 %v171_v40  ;;  %v139_v41 = vpop.xlane.xlu0 %138  ;;  %v183_v43 = vsel %vm118_vm0, %v165_v37, 0.0 }
  0xf9   :  { %v142_v42 = vpop.xlane.xlu1 %141  ;;  %v150_v44 = vmul.f32 0.03125, %v139_v41  ;;  %v162_v46 = vmul.f32 %v7118_v38, %v7118_v38 }
  0xfa   :  { %v151_v45 = vmul.f32 0.03125, %v142_v42  ;;  %v163_v47 = vmul.f32 %v7120_v39, %v7120_v39 }
  0xfb   :  { %v7128_v48 = vsub.f32 %v114_v12, %v150_v44  ;;  %v174_v50 = vsel %vm118_vm0, %v162_v46, 0.0 }
  0xfc   :  { %v7130_v49 = vsub.f32 %v115_v13, %v151_v45  ;;  %184 = vadd.xlane.f32.xlu1 %v183_v43  ;;  %175 = vadd.xlane.f32.xlu0 %v174_v50  ;;  %v177_v51 = vsel %vm118_vm0, %v163_v47, 0.0 }
  0xfd   :  { %v166_v52 = vmul.f32 %v7128_v48, %v7128_v48 }
  0xfe   :  { %v167_v53 = vmul.f32 %v7130_v49, %v7130_v49 }
  0xff   :  { %v186_v54 = vsel %vm118_vm0, %v166_v52, 0.0 }
 0x100   :  { %178 = vadd.xlane.f32.xlu1 %v177_v51  ;;  %187 = vadd.xlane.f32.xlu0 %v186_v54  ;;  %v189_v55 = vsel %vm118_vm0, %v167_v53, 0.0 }
 0x104   :  { %190 = vadd.xlane.f32.xlu1 %v189_v55 }
 0x181   :  { %v170_v58 = vpop.xlane.xlu0 %169 }
 0x182   :  { %v192_v59 = vmul.f32 0.03125, %v170_v58 }
 0x184   :  { %v200_v60 = vadd.f32 1e-05, %v192_v59  ;;  %v392_v59 = vlaneseq }
 0x185   :  { %v173_v61 = vpop.xlane.xlu1 %172  ;;  %v182_v62 = vpop.xlane.xlu0 %181 }
 0x186   :  { %6536 = vrsqrt.f32 %v200_v60  ;;  %v193_v63 = vmul.f32 0.03125, %v173_v61  ;;  %v196_v0 = vmul.f32 0.03125, %v182_v62 }
 0x188   :  { %v201_v1 = vadd.f32 1e-05, %v193_v63  ;;  %v204_v2 = vadd.f32 1e-05, %v196_v0  ;;  %v393_v63 = vshrl.u32 %v392_v59, 7 }
 0x189   :  { %v185_v3 = vpop.xlane.xlu1 %184  ;;  %v176_v4 = vpop.xlane.xlu0 %175  ;;  %v5542_v0 = vld [vmem:[#allocation3] ss:$0 sm:$0xff] }
 0x18a   :  { %6538 = vrsqrt.f32 %v201_v1  ;;  %v197_v5 = vmul.f32 0.03125, %v185_v3  ;;  %v194_v6 = vmul.f32 0.03125, %v176_v4 }
 0x18b   :  { %6540 = vrsqrt.f32 %v204_v2 }
 0x18c   :  { %v205_v7 = vadd.f32 1e-05, %v197_v5  ;;  %v202_v8 = vadd.f32 1e-05, %v194_v6 }
 0x18d   :  { %v179_v9 = vpop.xlane.xlu1 %178  ;;  %v188_v10 = vpop.xlane.xlu0 %187 }
 0x18e   :  { %6542 = vrsqrt.f32 %v205_v7  ;;  %v195_v11 = vmul.f32 0.03125, %v179_v9  ;;  %v198_v12 = vmul.f32 0.03125, %v188_v10 }
 0x18f   :  { %6544 = vrsqrt.f32 %v202_v8 }
 0x190   :  { %v6537_v13 = vpop.eup %6536  ;;  %v203_v14 = vadd.f32 1e-05, %v195_v11  ;;  %v206_v15 = vadd.f32 1e-05, %v198_v12 }
 0x191   :  { %v191_v16 = vpop.xlane.xlu1 %190  ;;  %v216_v17 = vmul.f32 %v6537_v13, %v7100_v20 }
 0x192   :  { %6546 = vrsqrt.f32 %v203_v14  ;;  %v199_v18 = vmul.f32 0.03125, %v191_v16 }
 0x193   :  { %6548 = vrsqrt.f32 %v206_v15  ;;  %v230_v26 = vmul.f32 %v5540_v19, %v216_v17 }
 0x194   :  { %v6539_v22 = vpop.eup %6538  ;;  %v207_v23 = vadd.f32 1e-05, %v199_v18 }
 0x195   :  { %v6541_v24 = vpop.eup %6540  ;;  %v217_v25 = vmul.f32 %v6539_v22, %v7108_v28  ;;  %v244_v33 = vadd.f32 %v5541_v27, %v230_v26 }
 0x196   :  { %6550 = vrsqrt.f32 %v207_v23  ;;  %v220_v20 = vmul.f32 %v6541_v24, %v7102_v21 }
 0x197   :  { %v231_v30 = vmul.f32 %v5540_v19, %v217_v25 }
 0x198   :  { %v6543_v31 = vpop.eup %6542  ;;  %v234_v36 = vmul.f32 %v5540_v19, %v220_v20  ;;  %v6917_v20 = vmov 0.0  }
 0x199   :  { %v6545_v32 = vpop.eup %6544  ;;  %v245_v34 = vadd.f32 %v5541_v27, %v231_v30  ;;  %v221_v35 = vmul.f32 %v6543_v31, %v7110_v29  ;;  %5962 = vmatprep.subr.bf16.mxu1 %v6917_v20  ;;  %5974 = vmatprep.subr.bf16.mxu0 %v6917_v20 }
 0x19a   :  { %v218_v37 = vmul.f32 %v6545_v32, %v7118_v38  ;;  %v248_v43 = vadd.f32 %v5541_v27, %v234_v36 }
 0x19b   :  { %v252_v40 = vpack.c.bf16 %v245_v34, %v244_v33  ;;  %v235_v28 = vmul.f32 %v5540_v19, %v221_v35 }
 0x19c   :  { %v6547_v41 = vpop.eup %6546  ;;  %v232_v45 = vmul.f32 %v5540_v19, %v218_v37  ;;  %v6918_v37 = vmov 0  }
 0x19d   :  { %v6549_v42 = vpop.eup %6548  ;;  %5954 = vmatprep.mubr.msk.bf16.mxu0 %vm118_vm0, %v252_v40  ;;  %v249_v44 = vadd.f32 %v5541_v27, %v235_v28  ;;  %v219_v21 = vmul.f32 %v6547_v41, %v7120_v39 }
 0x19e   :  { %v222_v46 = vmul.f32 %v6549_v42, %v7128_v48  ;;  %v246_v29 = vadd.f32 %v5541_v27, %v232_v45  ;;  %v6915_v48 = vmov 1983009808  }
 0x19f   :  { %v254_v47 = vpack.c.bf16 %v249_v44, %v248_v43  ;;  %v233_v50 = vmul.f32 %v5540_v19, %v219_v21  ;;  %v390_v58 = vunpack.c.l.s4 %v6915_v48 }
 0x1a0   :  { %v6551_v51 = vpop.eup %6550  ;;  %v236_v53 = vmul.f32 %v5540_v19, %v222_v46 }
 0x1a1   :  { %5958 = vmatprep.mubr.msk.bf16.mxu1 %vm118_vm0, %v254_v47  ;;  %v247_v38 = vadd.f32 %v5541_v27, %v233_v50  ;;  %v223_v52 = vmul.f32 %v6551_v51, %v7130_v49  ;;  %v391_v62 = vunpack.c.0.s8 %v390_v58  ;;  %v6916_v49 = vmov 1934713408  }
 0x1a2   :  { %v250_v56 = vadd.f32 %v5541_v27, %v236_v53  ;;  %v407_v2 = vunpack.c.l.s4 %v6916_v49 }
 0x1a3   :  { %v253_v54 = vpack.c.bf16 %v247_v38, %v246_v29  ;;  %v237_v55 = vmul.f32 %v5540_v19, %v223_v52  ;;  %v7164_v7 = vsub.s32 %v391_v62, %v393_v63 }
 0x1a4   :  { %v408_v11 = vunpack.c.0.s8 %v407_v2 }
 0x1a5   :  { %5955 = vmatmul.mubr.msk.bf16.vlgmr.msra.gmra.mrb[0].mxu0 %vm118_vm0, %v253_v54  ;;  %v251_v57 = vadd.f32 %v5541_v27, %v237_v55 }
 0x1a6   :  { %v7168_v25 = vsub.s32 %v408_v11, %v393_v63  ;;  %5976 = vmatprep.mubr.msk.bf16.mxu0 %vm6919_vm1, %v6917_v20 }
 0x1a7   :  { %v255_v39 = vpack.c.bf16 %v251_v57, %v250_v56 }
 0x1a9   :  { %5959 = vmatmul.mubr.msk.bf16.vlgmr.msra.gmra.mrb[0].mxu1 %vm118_vm0, %v255_v39 }
 0x1aa   :  { %5964 = vmatprep.mubr.msk.bf16.mxu1 %vm6919_vm1, %v6917_v20 }
 0x278   :  { %v5956_v60 = vpop.f32.mrb[0].mxu0 }
 0x279   :  { %v325_v61 = vpop.f32.mrb[1].mxu0  ;;  %v334_v5 = vadd.f32 %v5956_v60, %v5542_v0 }
 0x27a   :  { %v5957_v1 = vpop.f32.mrb[2].mxu0  ;;  %v326_v9 = vadd.f32 %v5542_v0, %v325_v61 }
 0x27b   :  { %v328_v3 = vpop.f32.mrb[3].mxu0  ;;  %v337_v13 = vadd.f32 %v5957_v1, %v5542_v0 }
 0x27c   :  { %v5960_v4 = vpop.f32.mrb[0].mxu1  ;;  %v329_v17 = vadd.f32 %v5542_v0, %v328_v3 }
 0x27d   :  { %v350_v6 = vadd.f32 %v5960_v4, %v5542_v0  ;;  %v341_v8 = vpop.f32.mrb[1].mxu1 }
 0x27e   :  { %v342_v10 = vadd.f32 %v5542_v0, %v341_v8  ;;  %v5961_v12 = vpop.f32.mrb[2].mxu1 }
 0x27f   :  { %v5558_v14 = vpack.c.bf16 %v350_v6, %v334_v5  ;;  %v353_v15 = vadd.f32 %v5961_v12, %v5542_v0  ;;  %v344_v16 = vpop.f32.mrb[3].mxu1 }
 0x280   :  { %v5557_v18 = vpack.c.bf16 %v342_v10, %v326_v9  ;;  %v345_v19 = vadd.f32 %v5542_v0, %v344_v16 }
 0x281   :  { %v403_v22 = vrot.slane %v5558_v14, %v7164_v7  ;;  %v5560_v23 = vpack.c.bf16 %v353_v15, %v337_v13 }
 0x282   :  { %v395_v24 = vrot.slane %v5557_v18, %v7164_v7  ;;  %v5559_v26 = vpack.c.bf16 %v345_v19, %v329_v17 }
 0x283   :  { %v437_v27 = vrot.slane %v5560_v23, %v7164_v7 }
 0x284   :  { %v404_v30 = vcombine.low %v395_v24, %v403_v22  ;;  %v405_v31 = vcombine.high %v395_v24, %v403_v22  ;;  %v429_v32 = vrot.slane %v5559_v26, %v7164_v7 }
 0x286   :  { %v412_v33 = vrot.slane %v404_v30, %v7168_v25  ;;  %v419_v34 = vrot.slane %v405_v31, %v7168_v25  ;;  %v438_v35 = vcombine.low %v429_v32, %v437_v27  ;;  %v439_v36 = vcombine.high %v429_v32, %v437_v27 }
 0x288   :  { %v420_v40 = vcombine.high %v412_v33, %v6918_v37  ;;  %v446_v28 = vrot.slane %v438_v35, %v7168_v25  ;;  %v453_v41 = vrot.slane %v439_v36, %v7168_v25  ;;  %v421_v42 = vcombine.high %v419_v34, %v6918_v37 }
 0x289   :  { %v459_v43 = vshrl.u32 %v412_v33, 16  ;;  %v471_v50 = vshrl.u32 %v419_v34, 16 }
 0x28a   :  { %v454_v44 = vcombine.high %v446_v28, %v6918_v37  ;;  %v455_v21 = vcombine.high %v453_v41, %v6918_v37  ;;  %v458_v45 = vpack.i.b16 %v446_v28, %v412_v33  ;;  %v460_v46 = vshrl.u32 %v446_v28, 16 }
 0x28b   :  { %v465_v47 = vshrl.u32 %v420_v40, 16  ;;  %v470_v51 = vpack.i.b16 %v453_v41, %v419_v34  ;;  %v472_v29 = vshrl.u32 %v453_v41, 16  ;;  %v477_v55 = vshrl.u32 %v421_v42, 16 }
 0x28c   :  { %v461_v38 = vpack.i.b16 %v460_v46, %v459_v43  ;;  %v464_v52 = vpack.i.b16 %v454_v44, %v420_v40  ;;  %v466_v53 = vshrl.u32 %v454_v44, 16  ;;  %v7186_v54 = vpack.i.b16 %v455_v21, %v421_v42 }
 0x28d   :  { %v7188_v56 = vpack.i.b16 %v472_v29, %v471_v50  ;;  %v478_v57 = vshrl.u32 %v455_v21, 16  ;;  %v7190_v39 = vcombine.low %v458_v45, %v458_v45  ;;  %v7200_v60 = vcombine.low %v470_v51, %v470_v51 }
 0x28e   :  { %v467_v48 = vpack.i.b16 %v466_v53, %v465_v47  ;;  %v7192_v58 = vcombine.low %v461_v38, %v461_v38  ;;  %v7202_v61 = vcombine.low %v464_v52, %v464_v52  ;;  %v7210_v62 = vcombine.low %v7186_v54, %v7186_v54 }
 0x28f   :  { %v7194_v59 = vpack.i.b16 %v478_v57, %v477_v55  ;;  %482 = vrot.lane.b32.xlu0 %v7190_v39, %s6920_s1  ;;  %v7220_v0 = vcombine.low %v7188_v56, %v7188_v56 }
 0x290   :  { %533 = vrot.lane.b32.xlu1 %v7192_v58, %s6920_s1  ;;  %v7212_v63 = vcombine.low %v467_v48, %v467_v48 }
 0x291   :  { %v7228_v1 = vcombine.low %v7194_v59, %v7194_v59 }
 0x293   :  { %683 = vrot.lane.b32.xlu0 %v7200_v60, %s6920_s1 }
 0x294   :  { %583 = vrot.lane.b32.xlu1 %v7202_v61, %s6920_s1 }
 0x297   :  { %783 = vrot.lane.b32.xlu0 %v7210_v62, %s6920_s1 }
 0x298   :  { %633 = vrot.lane.b32.xlu1 %v7212_v63, %s6920_s1 }
 0x29b   :  { %985 = vrot.lane.b32.xlu0 %v7190_v39, %s6909_s18 }
 0x29c   :  { %733 = vrot.lane.b32.xlu1 %v7220_v0, %s6920_s1 }
 0x2a0   :  { %833 = vrot.lane.b32.xlu1 %v7228_v1, %s6920_s1 }
 0x2a4   :  { %1034 = vrot.lane.b32.xlu1 %v7192_v58, %s6909_s18 }
 0x2a8   :  { %1082 = vrot.lane.b32.xlu1 %v7202_v61, %s6909_s18 }
 0x2ac   :  { %1130 = vrot.lane.b32.xlu1 %v7212_v63, %s6909_s18 }
 0x301   :  { %v483_v49 = vpop.permute.xlu0 %482 }
 0x302   :  { %v489_v2 = vsel %vm484_vm2, %v483_v49, 0  ;;  %v534_v3 = vpop.permute.xlu1 %533 }
 0x303   :  { %5963 = vmatpush3.bf16.xpose.msra.mxu1 %v489_v2  ;;  %v539_v6 = vsel %vm484_vm2, %v534_v3, 0 }
 0x304   :  { %5968 = vmatprep.subr.bf16.mxu1 %v6917_v20 }
 0x305   :  { %v684_v8 = vpop.permute.xlu0 %683 }
 0x306   :  { %v584_v4 = vpop.permute.xlu1 %583  ;;  %v689_v9 = vsel %vm484_vm2, %v684_v8, 0 }
 0x307   :  { %v589_v5 = vsel %vm484_vm2, %v584_v4, 0 }
 0x308   :  { %5975 = vmatpush3.bf16.xpose.msra.mxu0 %v589_v5 }
 0x309   :  { %5986 = vmatprep.subr.bf16.mxu0 %v6917_v20  ;;  %v784_v12 = vpop.permute.xlu0 %783 }
 0x30a   :  { %5965 = vmatmul.mubr.msk.bf16.vlgmr.msra.gmra.mrb[4].mxu1 %vm484_vm2, %v458_v45  ;;  %v634_v10 = vpop.permute.xlu1 %633  ;;  %v789_v13 = vsel %vm484_vm2, %v784_v12, 0 }
 0x30b   :  { %5969 = vmatpush3.bf16.xpose.msra.mxu1 %v539_v6  ;;  %5970 = vmatprep.mubr.msk.bf16.mxu1 %vm6919_vm1, %v6917_v20  ;;  %v639_v11 = vsel %vm484_vm2, %v634_v10, 0 }
 0x30c   :  { %5980 = vmatprep.subr.bf16.mxu1 %v6917_v20 }
 0x30d   :  { %v986_v16 = vpop.permute.xlu0 %985 }
 0x30e   :  { %v734_v14 = vpop.permute.xlu1 %733  ;;  %v992_v17 = vsel %vm990_vm3, %v986_v16, 0 }
 0x30f   :  { %5977 = vmatmul.mubr.msk.bf16.vlgmr.msra.gmra.mrb[4].mxu0 %vm484_vm2, %v464_v52  ;;  %v739_v15 = vsel %vm484_vm2, %v734_v14, 0 }
 0x310   :  { %5987 = vmatpush3.bf16.xpose.msra.mxu0 %v689_v9  ;;  %5988 = vmatprep.mubr.msk.bf16.mxu0 %vm6919_vm1, %v6917_v20 }
 0x311   :  { %5998 = vmatprep.subr.bf16.mxu0 %v6917_v20 }
 0x312   :  { %5971 = vmatmul.mubr.msk.bf16.vlgmr.msra.gmra.mrb[8].mxu1 %vm484_vm2, %v461_v38  ;;  %v834_v18 = vpop.permute.xlu1 %833 }
 0x313   :  { %5981 = vmatpush3.bf16.xpose.msra.mxu1 %v639_v11  ;;  %5982 = vmatprep.mubr.msk.bf16.mxu1 %vm6919_vm1, %v6917_v20  ;;  %v839_v19 = vsel %vm484_vm2, %v834_v18, 0 }
 0x314   :  { %5992 = vmatprep.subr.bf16.mxu1 %v6917_v20 }
 0x316   :  { %v1035_v22 = vpop.permute.xlu1 %1034 }
 0x317   :  { %5989 = vmatmul.mubr.msk.bf16.vlgmr.msra.gmra.mrb[8].mxu0 %vm484_vm2, %v470_v51  ;;  %v1040_v23 = vsel %vm990_vm3, %v1035_v22, 0 }
 0x318   :  { %5999 = vmatpush3.bf16.xpose.msra.mxu0 %v789_v13  ;;  %6000 = vmatprep.mubr.msk.bf16.mxu0 %vm6919_vm1, %v6917_v20 }
 0x319   :  { %6010 = vmatprep.subr.bf16.mxu0 %v6917_v20 }
 0x31a   :  { %5983 = vmatmul.mubr.msk.bf16.vlgmr.msra.gmra.mrb[12].mxu1 %vm484_vm2, %v467_v48  ;;  %v7306_v18 = vpop.permute.xlu1 %1082 }
 0x31b   :  { %5993 = vmatpush3.bf16.xpose.msra.mxu1 %v739_v15  ;;  %5994 = vmatprep.mubr.msk.bf16.mxu1 %vm6919_vm1, %v6917_v20 }
 0x31c   :  { %6004 = vmatprep.subr.bf16.mxu1 %v6917_v20 }
 0x31f   :  { %6001 = vmatmul.mubr.msk.bf16.vlgmr.msra.gmra.mrb[12].mxu0 %vm484_vm2, %v7186_v54 }
 0x320   :  { %6011 = vmatpush3.bf16.msra.mxu0 %v992_v17  ;;  %6012 = vmatprep.mubr.msk.bf16.mxu0 %vm6919_vm1, %v6917_v20 }
 0x321   :  { %6022 = vmatprep.subr.bf16.mxu0 %v6917_v20 }
 0x322   :  { %5995 = vmatmul.mubr.msk.bf16.vlgmr.msra.gmra.mrb[16].mxu1 %vm484_vm2, %v7188_v56 }
 0x323   :  { %6005 = vmatpush3.bf16.xpose.msra.mxu1 %v839_v19  ;;  %6006 = vmatprep.mubr.msk.bf16.mxu1 %vm6919_vm1, %v6917_v20 }
 0x324   :  { %6016 = vmatprep.subr.bf16.mxu1 %v6917_v20 }
 0x32a   :  { %6007 = vmatmul.mubr.msk.bf16.vlgmr.msra.gmra.mrb[20].mxu1 %vm484_vm2, %v7194_v59 }
 0x32b   :  { %6017 = vmatpush3.bf16.msra.mxu1 %v1040_v23  ;;  %6018 = vmatprep.mubr.msk.bf16.mxu1 %vm6919_vm1, %v6917_v20 }
 0x32c   :  { %6028 = vmatprep.subr.bf16.mxu1 %v6917_v20 }
 0x3dd   :  { %v525_v24 = vpop.f32.mrb[4].mxu1 }
 0x3de   :  { %v881_v26 = vmul.f32 0.35355338, %v525_v24  ;;  %v5966_v27 = vpop.f32.mrb[5].mxu1  ;;  %v7308_v24 = vpop.permute.xlu1 %1130 }
 0x3df   :  { %v528_v30 = vpop.f32.mrb[6].mxu1 }
 0x3e0   :  { %v5967_v31 = vpop.f32.mrb[7].mxu1  ;;  %v889_v32 = vsel %vm484_vm2, %v881_v26, -inf }
 0x3e1   :  { %890 = vmax.xlane.f32.xlu0 %v889_v32 }
 0x3e2   :  { %v625_v33 = vpop.f32.mrb[4].mxu0 }
 0x3e3   :  { %v883_v34 = vmul.f32 0.35355338, %v625_v33  ;;  %v5978_v35 = vpop.f32.mrb[5].mxu0 }
 0x3e4   :  { %v628_v36 = vpop.f32.mrb[6].mxu0 }
 0x3e5   :  { %v575_v40 = vpop.f32.mrb[8].mxu1  ;;  %v5979_v28 = vpop.f32.mrb[7].mxu0  ;;  %v895_v41 = vsel %vm484_vm2, %v883_v34, -inf }
 0x3e6   :  { %v882_v42 = vmul.f32 0.35355338, %v575_v40  ;;  %v5972_v43 = vpop.f32.mrb[9].mxu1  ;;  %896 = vmax.xlane.f32.xlu0 %v895_v41 }
 0x3e7   :  { %v578_v44 = vpop.f32.mrb[10].mxu1 }
 0x3e8   :  { %v5973_v21 = vpop.f32.mrb[11].mxu1  ;;  %v892_v45 = vsel %vm484_vm2, %v882_v42, -inf }
 0x3e9   :  { %893 = vmax.xlane.f32.xlu1 %v892_v45 }
 0x3ea   :  { %v725_v46 = vpop.f32.mrb[8].mxu0 }
 0x3eb   :  { %v885_v47 = vmul.f32 0.35355338, %v725_v46  ;;  %v5990_v50 = vpop.f32.mrb[9].mxu0 }
 0x3ec   :  { %v728_v51 = vpop.f32.mrb[10].mxu0 }
 0x3ed   :  { %v675_v29 = vpop.f32.mrb[12].mxu1  ;;  %v5991_v38 = vpop.f32.mrb[11].mxu0  ;;  %v901_v52 = vsel %vm484_vm2, %v885_v47, -inf }
 0x3ee   :  { %v7289_v53 = vmul.f32 0.35355338, %v675_v29  ;;  %v5984_v54 = vpop.f32.mrb[13].mxu1  ;;  %902 = vmax.xlane.f32.xlu0 %v901_v52 }
 0x3ef   :  { %v678_v55 = vpop.f32.mrb[14].mxu1 }
 0x3f0   :  { %v5985_v56 = vpop.f32.mrb[15].mxu1  ;;  %v898_v57 = vsel %vm484_vm2, %v7289_v53, -inf }
 0x3f2   :  { %v825_v48 = vpop.f32.mrb[12].mxu0  ;;  %899 = vmax.xlane.f32.xlu0 %v898_v57 }
 0x3f3   :  { %v7293_v59 = vmul.f32 0.35355338, %v825_v48  ;;  %v6002_v49 = vpop.f32.mrb[13].mxu0 }
 0x3f4   :  { %v828_v2 = vpop.f32.mrb[14].mxu0 }
 0x3f5   :  { %v775_v3 = vpop.f32.mrb[16].mxu1  ;;  %v6003_v4 = vpop.f32.mrb[15].mxu0  ;;  %v907_v5 = vsel %vm484_vm2, %v7293_v59, -inf }
 0x3f6   :  { %v5996_v6 = vpop.f32.mrb[17].mxu1  ;;  %908 = vmax.xlane.f32.xlu0 %v907_v5  ;;  %v886_v14 = vmul.f32 0.35355338, %v775_v3 }
 0x3f7   :  { %v778_v8 = vpop.f32.mrb[18].mxu1 }
 0x3f8   :  { %v5997_v9 = vpop.f32.mrb[19].mxu1  ;;  %v904_v16 = vsel %vm484_vm2, %v886_v14, -inf }
 0x3fa   :  { %1226 = vrot.lane.b32.xlu1 %v7220_v0, %s6909_s18 }
 0x3fd   :  { %v875_v10 = vpop.f32.mrb[20].mxu1 }
 0x3fe   :  { %v6008_v11 = vpop.f32.mrb[21].mxu1  ;;  %v7301_v15 = vmul.f32 0.35355338, %v875_v10 }
 0x3ff   :  { %v878_v12 = vpop.f32.mrb[22].mxu1 }
 0x400   :  { %v6009_v13 = vpop.f32.mrb[23].mxu1  ;;  %v910_v17 = vsel %vm484_vm2, %v7301_v15, -inf }
 0x40c   :  { %1178 = vrot.lane.b32.xlu0 %v7200_v60, %s6909_s18 }
 0x41e   :  { %905 = vmax.xlane.f32.xlu1 %v904_v16 }
 0x422   :  { %911 = vmax.xlane.f32.xlu1 %v910_v17 }
 0x46e   :  { %v891_v19 = vpop.xlane.xlu0 %890 }
 0x46f   :  { %v913_v22 = vsub.f32 %v881_v26, %v891_v19  ;;  %v1088_v19 = vsel %vm990_vm3, %v7306_v18, 0 }
 0x471   :  { %v921_v23 = vmul.f32 1.442695, %v913_v22 }
 0x473   :  { %6552 = vpow2.f32 %v921_v23  ;;  %v897_v27 = vpop.xlane.xlu0 %896 }
 0x474   :  { %v915_v30 = vsub.f32 %v883_v34, %v897_v27 }
 0x476   :  { %v925_v31 = vmul.f32 1.442695, %v915_v30  ;;  %v894_v32 = vpop.xlane.xlu1 %893 }
 0x477   :  { %v914_v33 = vsub.f32 %v882_v42, %v894_v32  ;;  %v1136_v32 = vsel %vm990_vm3, %v7308_v24, 0 }
 0x478   :  { %6554 = vpow2.f32 %v925_v31 }
 0x479   :  { %v923_v35 = vmul.f32 1.442695, %v914_v33 }
 0x47a   :  { %v7331_v50 = vpop.permute.xlu1 %1226 }
 0x47b   :  { %6556 = vpow2.f32 %v923_v35  ;;  %v903_v36 = vpop.xlane.xlu0 %902 }
 0x47c   :  { %v917_v40 = vsub.f32 %v885_v47, %v903_v36 }
 0x47d   :  { %v7310_v28 = vpop.eup %6552 }
 0x47e   :  { %v929_v41 = vmul.f32 1.442695, %v917_v40  ;;  %v937_v26 = vsel %vm484_vm2, %v7310_v28, 0.0 }
 0x47f   :  { %938 = vadd.xlane.f32.xlu0 %v937_v26  ;;  %v900_v46 = vpop.xlane.xlu0 %899 }
 0x480   :  { %6558 = vpow2.f32 %v929_v41  ;;  %v916_v47 = vsub.f32 %v7289_v53, %v900_v46 }
 0x482   :  { %v7314_v43 = vpop.eup %6554  ;;  %v927_v29 = vmul.f32 1.442695, %v916_v47 }
 0x483   :  { %v943_v34 = vsel %vm484_vm2, %v7314_v43, 0.0  ;;  %v909_v51 = vpop.xlane.xlu0 %908 }
 0x484   :  { %944 = vadd.xlane.f32.xlu0 %v943_v34  ;;  %v919_v38 = vsub.f32 %v7293_v59, %v909_v51  ;;  %6560 = vpow2.f32 %v927_v29  ;;  %v1232_v51 = vsel %vm990_vm3, %v7331_v50, 0 }
 0x485   :  { %v7318_v42 = vpop.eup %6556 }
 0x486   :  { %v940_v44 = vsel %vm484_vm2, %v7318_v42, 0.0  ;;  %v933_v56 = vmul.f32 1.442695, %v919_v38 }
 0x487   :  { %941 = vadd.xlane.f32.xlu1 %v940_v44  ;;  %v1179_v9 = vpop.permute.xlu0 %1178 }
 0x488   :  { %v1184_v33 = vsel %vm990_vm3, %v1179_v9, 0 }
 0x48a   :  { %v7322_v21 = vpop.eup %6558 }
 0x48b   :  { %v949_v45 = vsel %vm484_vm2, %v7322_v21, 0.0 }
 0x48c   :  { %950 = vadd.xlane.f32.xlu0 %v949_v45 }
 0x48e   :  { %v7334_v57 = vpop.eup %6560 }
 0x48f   :  { %v946_v48 = vsel %vm484_vm2, %v7334_v57, 0.0 }
 0x498   :  { %1322 = vrot.lane.b32.xlu1 %v7228_v1, %s6909_s18 }
 0x4a2   :  { %1274 = vrot.lane.b32.xlu0 %v7210_v62, %s6909_s18 }
 0x4ab   :  { %v906_v52 = vpop.xlane.xlu1 %905 }
 0x4ac   :  { %v918_v54 = vsub.f32 %v886_v14, %v906_v52 }
 0x4ae   :  { %v931_v55 = vmul.f32 1.442695, %v918_v54 }
 0x4af   :  { %v912_v3 = vpop.xlane.xlu1 %911 }
 0x4b0   :  { %6562 = vpow2.f32 %v931_v55  ;;  %v920_v4 = vsub.f32 %v7301_v15, %v912_v3 }
 0x4b1   :  { %6564 = vpow2.f32 %v933_v56 }
 0x4b2   :  { %v935_v5 = vmul.f32 1.442695, %v920_v4 }
 0x4b4   :  { %6566 = vpow2.f32 %v935_v5 }
 0x4ba   :  { %v7338_v49 = vpop.eup %6562 }
 0x4bb   :  { %v7340_v53 = vpop.eup %6564  ;;  %v952_v59 = vsel %vm484_vm2, %v7338_v49, 0.0 }
 0x4bc   :  { %947 = vadd.xlane.f32.xlu1 %v946_v48  ;;  %v955_v2 = vsel %vm484_vm2, %v7340_v53, 0.0 }
 0x4be   :  { %v7363_v6 = vpop.eup %6566 }
 0x4bf   :  { %v958_v8 = vsel %vm484_vm2, %v7363_v6, 0.0 }
 0x4c0   :  { %953 = vadd.xlane.f32.xlu1 %v952_v59 }
 0x4c1   :  { %956 = vadd.xlane.f32.xlu0 %v955_v2 }
 0x4d1   :  { %1439 = vrot.lane.b32.xlu1 %v7192_v58, %s6921_s2 }
 0x4d7   :  { %1389 = vrot.lane.b32.xlu0 %v7190_v39, %s6921_s2 }
 0x4db   :  { %1387 = vrot.lane.b32.xlu0 %v7190_v39, %s6922_s24 }
 0x4df   :  { %1489 = vrot.lane.b32.xlu0 %v7202_v61, %s6921_s2 }
 0x4e3   :  { %1487 = vrot.lane.b32.xlu0 %v7202_v61, %s6922_s24 }
 0x4e7   :  { %1589 = vrot.lane.b32.xlu0 %v7200_v60, %s6921_s2 }
 0x4eb   :  { %1587 = vrot.lane.b32.xlu0 %v7200_v60, %s6922_s24 }
 0x4ef   :  { %1689 = vrot.lane.b32.xlu0 %v7210_v62, %s6921_s2 }
 0x4f3   :  { %1687 = vrot.lane.b32.xlu0 %v7210_v62, %s6922_s24 }
 0x4f5   :  { %959 = vadd.xlane.f32.xlu1 %v958_v8 }
 0x4f7   :  { %1891 = vrot.lane.b32.xlu0 %v7190_v39, %s6923_s27 }
 0x506   :  { %1437 = vrot.lane.b32.xlu1 %v7192_v58, %s6922_s24 }
 0x50a   :  { %1539 = vrot.lane.b32.xlu1 %v7212_v63, %s6921_s2 }
 0x50c   :  { %v939_v10 = vpop.xlane.xlu0 %938 }
 0x50d   :  { %6568 = vrcp.f32 %v939_v10 }
 0x50e   :  { %1537 = vrot.lane.b32.xlu1 %v7212_v63, %s6922_s24 }
 0x511   :  { %v945_v11 = vpop.xlane.xlu0 %944 }
 0x512   :  { %6570 = vrcp.f32 %v945_v11  ;;  %1639 = vrot.lane.b32.xlu1 %v7220_v0, %s6921_s2 }
 0x514   :  { %v942_v12 = vpop.xlane.xlu1 %941 }
 0x515   :  { %6572 = vrcp.f32 %v942_v12 }
 0x516   :  { %1637 = vrot.lane.b32.xlu1 %v7220_v0, %s6922_s24 }
 0x517   :  { %v6569_v13 = vpop.eup %6568 }
 0x518   :  { %v969_v14 = vmul.f32 %v6569_v13, %v7310_v28  ;;  %v1323_v28 = vpop.permute.xlu1 %1322 }
 0x519   :  { %v951_v15 = vpop.xlane.xlu0 %950 }
 0x51a   :  { %6574 = vrcp.f32 %v951_v15  ;;  %1739 = vrot.lane.b32.xlu1 %v7228_v1, %s6921_s2  ;;  %v977_v16 = vpack.c.bf16 %v969_v14, %v969_v14 }
 0x51c   :  { %v6571_v17 = vpop.eup %6570  ;;  %6013 = vmatmul.mubr.msk.bf16.vlgmr.msra.gmra.mrb[16].mxu0 %vm484_vm2, %v977_v16 }
 0x51d   :  { %6023 = vmatpush3.bf16.msra.mxu0 %v1088_v19  ;;  %6024 = vmatprep.mubr.msk.bf16.mxu0 %vm6919_vm1, %v6917_v20  ;;  %v971_v22 = vmul.f32 %v6571_v17, %v7314_v43  ;;  %v1275_v24 = vpop.permute.xlu0 %1274 }
 0x51e   :  { %1737 = vrot.lane.b32.xlu1 %v7228_v1, %s6922_s24  ;;  %6034 = vmatprep.subr.bf16.mxu0 %v6917_v20  ;;  %v1280_v40 = vsel %vm990_vm3, %v1275_v24, 0 }
 0x51f   :  { %v6573_v23 = vpop.eup %6572  ;;  %v979_v30 = vpack.c.bf16 %v971_v22, %v971_v22 }
 0x520   :  { %v970_v27 = vmul.f32 %v6573_v23, %v7318_v42 }
 0x522   :  { %1939 = vrot.lane.b32.xlu1 %v7192_v58, %s6923_s27  ;;  %v978_v18 = vpack.c.bf16 %v970_v27, %v970_v27 }
 0x524   :  { %v6575_v31 = vpop.eup %6574  ;;  %6019 = vmatmul.mubr.msk.bf16.vlgmr.msra.gmra.mrb[24].mxu1 %vm484_vm2, %v978_v18  ;;  %6025 = vmatmul.mubr.msk.bf16.vlgmr.msra.gmra.mrb[20].mxu0 %vm484_vm2, %v979_v30 }
 0x525   :  { %6029 = vmatpush3.bf16.msra.mxu1 %v1136_v32  ;;  %6035 = vmatpush3.bf16.msra.mxu0 %v1184_v33  ;;  %v973_v35 = vmul.f32 %v6575_v31, %v7322_v21 }
 0x526   :  { %1987 = vrot.lane.b32.xlu1 %v7202_v61, %s6923_s27  ;;  %6036 = vmatprep.mubr.msk.bf16.mxu0 %vm6919_vm1, %v6917_v20 }
 0x527   :  { %6046 = vmatprep.subr.bf16.mxu0 %v6917_v20  ;;  %6030 = vmatprep.mubr.msk.bf16.mxu1 %vm6919_vm1, %v6917_v20  ;;  %v981_v36 = vpack.c.bf16 %v973_v35, %v973_v35 }
 0x528   :  { %6040 = vmatprep.subr.bf16.mxu1 %v6917_v20 }
 0x52a   :  { %2035 = vrot.lane.b32.xlu1 %v7212_v63, %s6923_s27 }
 0x52c   :  { %6037 = vmatmul.mubr.msk.bf16.vlgmr.msra.gmra.mrb[24].mxu0 %vm484_vm2, %v981_v36 }
 0x52d   :  { %6047 = vmatpush3.bf16.msra.mxu0 %v1280_v40  ;;  %6048 = vmatprep.mubr.msk.bf16.mxu0 %vm6919_vm1, %v6917_v20 }
 0x52e   :  { %6058 = vmatprep.subr.bf16.mxu0 %v6917_v20 }
 0x549   :  { %v948_v41 = vpop.xlane.xlu1 %947 }
 0x54a   :  { %6576 = vrcp.f32 %v948_v41 }
 0x54d   :  { %v954_v26 = vpop.xlane.xlu1 %953 }
 0x54e   :  { %6578 = vrcp.f32 %v954_v26  ;;  %v957_v43 = vpop.xlane.xlu0 %956 }
 0x54f   :  { %6580 = vrcp.f32 %v957_v43 }
 0x551   :  { %v1440_v8 = vpop.permute.xlu1 %1439 }
 0x552   :  { %v1390_v34 = vpop.permute.xlu0 %1389  ;;  %v1445_v17 = vsel %vm484_vm2, %v1440_v8, 0 }
 0x553   :  { %v1395_v55 = vsel %vm484_vm2, %v1390_v34, 0 }
 0x554   :  { %v6577_v42 = vpop.eup %6576 }
 0x555   :  { %v972_v44 = vmul.f32 %v6577_v42, %v7334_v57  ;;  %v1328_v57 = vsel %vm990_vm3, %v1323_v28, 0 }
 0x556   :  { %v1388_v21 = vpop.permute.xlu0 %1387 }
 0x557   :  { %v980_v45 = vpack.c.bf16 %v972_v44, %v972_v44 }
 0x558   :  { %v6579_v46 = vpop.eup %6578 }
 0x559   :  { %v6581_v47 = vpop.eup %6580  ;;  %6031 = vmatmul.mubr.msk.bf16.vlgmr.msra.gmra.mrb[28].mxu1 %vm484_vm2, %v980_v45  ;;  %v974_v52 = vmul.f32 %v6579_v46, %v7338_v49 }
 0x55a   :  { %6041 = vmatpush3.bf16.msra.mxu1 %v1232_v51  ;;  %v1490_v29 = vpop.permute.xlu0 %1489  ;;  %v975_v38 = vmul.f32 %v6581_v47, %v7340_v53  ;;  %6042 = vmatprep.mubr.msk.bf16.mxu1 %vm6919_vm1, %v6917_v20 }
 0x55b   :  { %6052 = vmatprep.subr.bf16.mxu1 %v6917_v20  ;;  %v982_v50 = vpack.c.bf16 %v974_v52, %v974_v52  ;;  %v1495_v49 = vsel %vm484_vm2, %v1490_v29, 0 }
 0x55c   :  { %v983_v54 = vpack.c.bf16 %v975_v38, %v975_v38 }
 0x55e   :  { %v1488_v56 = vpop.permute.xlu0 %1487  ;;  %6049 = vmatmul.mubr.msk.bf16.vlgmr.msra.gmra.mrb[28].mxu0 %vm484_vm2, %v983_v54 }
 0x55f   :  { %6059 = vmatpush3.bf16.xpose.msra.mxu0 %v1395_v55  ;;  %6060 = vmatprep.mubr.msk.bf16.mxu0 %vm6919_vm1, %v6917_v20 }
 0x560   :  { %6070 = vmatprep.subr.bf16.mxu0 %v6917_v20 }
 0x561   :  { %6043 = vmatmul.mubr.msk.bf16.vlgmr.msra.gmra.mrb[32].mxu1 %vm484_vm2, %v982_v50 }
 0x562   :  { %6053 = vmatpush3.bf16.msra.mxu1 %v1328_v57  ;;  %6054 = vmatprep.mubr.msk.bf16.mxu1 %vm6919_vm1, %v6917_v20  ;;  %v1590_v48 = vpop.permute.xlu0 %1589 }
 0x563   :  { %6064 = vmatprep.subr.bf16.mxu1 %v6917_v20  ;;  %v1595_v59 = vsel %vm484_vm2, %v1590_v48, 0 }
 0x566   :  { %6061 = vmatmul.mubr.msk.bf16.vlgmr.msra.gmra.mrb[32].mxu0 %vm484_vm2, %v1388_v21  ;;  %v1588_v53 = vpop.permute.xlu0 %1587 }
 0x567   :  { %6071 = vmatpush3.bf16.xpose.msra.mxu0 %v1495_v49  ;;  %6072 = vmatprep.mubr.msk.bf16.mxu0 %vm6919_vm1, %v6917_v20 }
 0x568   :  { %6082 = vmatprep.subr.bf16.mxu0 %v6917_v20 }
 0x56a   :  { %v1690_v2 = vpop.permute.xlu0 %1689 }
 0x56b   :  { %v1695_v4 = vsel %vm484_vm2, %v1690_v2, 0 }
 0x56e   :  { %6073 = vmatmul.mubr.msk.bf16.vlgmr.msra.gmra.mrb[36].mxu0 %vm484_vm2, %v1488_v56  ;;  %v1688_v3 = vpop.permute.xlu0 %1687 }
 0x56f   :  { %6083 = vmatpush3.bf16.xpose.msra.mxu0 %v1595_v59  ;;  %6084 = vmatprep.mubr.msk.bf16.mxu0 %vm6919_vm1, %v6917_v20 }
 0x570   :  { %6094 = vmatprep.subr.bf16.mxu0 %v6917_v20 }
 0x572   :  { %v1892_v5 = vpop.permute.xlu0 %1891 }
 0x573   :  { %v1897_v9 = vsel %vm990_vm3, %v1892_v5, 0 }
 0x576   :  { %6085 = vmatmul.mubr.msk.bf16.vlgmr.msra.gmra.mrb[40].mxu0 %vm484_vm2, %v1588_v53 }
 0x577   :  { %6095 = vmatpush3.bf16.xpose.msra.mxu0 %v1695_v4  ;;  %6096 = vmatprep.mubr.msk.bf16.mxu0 %vm6919_vm1, %v6917_v20 }
 0x578   :  { %6106 = vmatprep.subr.bf16.mxu0 %v6917_v20 }
 0x57e   :  { %6097 = vmatmul.mubr.msk.bf16.vlgmr.msra.gmra.mrb[44].mxu0 %vm484_vm2, %v1688_v3 }
 0x57f   :  { %6107 = vmatpush3.bf16.msra.mxu0 %v1897_v9  ;;  %6108 = vmatprep.mubr.msk.bf16.mxu0 %vm6919_vm1, %v6917_v20 }
 0x580   :  { %6118 = vmatprep.subr.bf16.mxu0 %v6917_v20 }
 0x582   :  { %v960_v10 = vpop.xlane.xlu1 %959 }
 0x583   :  { %6582 = vrcp.f32 %v960_v10 }
 0x586   :  { %v1438_v11 = vpop.permute.xlu1 %1437 }
 0x58a   :  { %v1540_v12 = vpop.permute.xlu1 %1539 }
 0x58b   :  { %v1545_v22 = vsel %vm484_vm2, %v1540_v12, 0 }
 0x58d   :  { %v6583_v13 = vpop.eup %6582 }
 0x58e   :  { %v976_v14 = vmul.f32 %v6583_v13, %v7363_v6  ;;  %v1538_v16 = vpop.permute.xlu1 %1537 }
 0x590   :  { %v984_v15 = vpack.c.bf16 %v976_v14, %v976_v14 }
 0x592   :  { %6055 = vmatmul.mubr.msk.bf16.vlgmr.msra.gmra.mrb[36].mxu1 %vm484_vm2, %v984_v15  ;;  %v1640_v19 = vpop.permute.xlu1 %1639 }
 0x593   :  { %6065 = vmatpush3.bf16.xpose.msra.mxu1 %v1445_v17  ;;  %6066 = vmatprep.mubr.msk.bf16.mxu1 %vm6919_vm1, %v6917_v20  ;;  %v1645_v23 = vsel %vm484_vm2, %v1640_v19, 0 }
 0x594   :  { %6076 = vmatprep.subr.bf16.mxu1 %v6917_v20 }
 0x596   :  { %v1638_v6 = vpop.permute.xlu1 %1637 }
 0x59a   :  { %6067 = vmatmul.mubr.msk.bf16.vlgmr.msra.gmra.mrb[40].mxu1 %vm484_vm2, %v1438_v11  ;;  %v1740_v27 = vpop.permute.xlu1 %1739 }
 0x59b   :  { %6077 = vmatpush3.bf16.xpose.msra.mxu1 %v1545_v22  ;;  %6078 = vmatprep.mubr.msk.bf16.mxu1 %vm6919_vm1, %v6917_v20  ;;  %v1745_v30 = vsel %vm484_vm2, %v1740_v27, 0 }
 0x59c   :  { %6088 = vmatprep.subr.bf16.mxu1 %v6917_v20 }
 0x59e   :  { %v1738_v18 = vpop.permute.xlu1 %1737 }
 0x5a2   :  { %6079 = vmatmul.mubr.msk.bf16.vlgmr.msra.gmra.mrb[44].mxu1 %vm484_vm2, %v1538_v16  ;;  %v1940_v31 = vpop.permute.xlu1 %1939 }
 0x5a3   :  { %6089 = vmatpush3.bf16.xpose.msra.mxu1 %v1645_v23  ;;  %6090 = vmatprep.mubr.msk.bf16.mxu1 %vm6919_vm1, %v6917_v20  ;;  %v1945_v32 = vsel %vm990_vm3, %v1940_v31, 0 }
 0x5a4   :  { %6100 = vmatprep.subr.bf16.mxu1 %v6917_v20 }
 0x5aa   :  { %6091 = vmatmul.mubr.msk.bf16.vlgmr.msra.gmra.mrb[48].mxu1 %vm484_vm2, %v1638_v6 }
 0x5ab   :  { %6101 = vmatpush3.bf16.xpose.msra.mxu1 %v1745_v30  ;;  %6102 = vmatprep.mubr.msk.bf16.mxu1 %vm6919_vm1, %v6917_v20 }
 0x5ac   :  { %6112 = vmatprep.subr.bf16.mxu1 %v6917_v20 }
 0x5b2   :  { %6103 = vmatmul.mubr.msk.bf16.vlgmr.msra.gmra.mrb[52].mxu1 %vm484_vm2, %v1738_v18 }
 0x5b3   :  { %6113 = vmatpush3.bf16.msra.mxu1 %v1945_v32  ;;  %6114 = vmatprep.mubr.msk.bf16.mxu1 %vm6919_vm1, %v6917_v20 }
 0x5b4   :  { %6124 = vmatprep.subr.bf16.mxu1 %v6917_v20 }
 0x5ef   :  { %v1028_v33 = vpop.f32.mrb[16].mxu0 }
 0x5f0   :  { %v1370_v35 = vpack.c.bf16 %v1028_v33, %v1028_v33  ;;  %v6014_v24 = vpop.f32.mrb[17].mxu0 }
 0x5f1   :  { %v1031_v36 = vpop.f32.mrb[18].mxu0 }
 0x5f2   :  { %1379 = vst.msk [vmem:[#allocation2] sm:$0xf] %vm1378_vm4, %v1370_v35  ;;  %v6015_v40 = vpop.f32.mrb[19].mxu0 }
 0x5f7   :  { %v1076_v28 = vpop.f32.mrb[24].mxu1  ;;  %v1124_v41 = vpop.f32.mrb[20].mxu0 }
 0x5f8   :  { %v1371_v26 = vpack.c.bf16 %v1076_v28, %v1076_v28  ;;  %v1372_v43 = vpack.c.bf16 %v1124_v41, %v1124_v41  ;;  %v6020_v34 = vpop.f32.mrb[25].mxu1  ;;  %v6026_v42 = vpop.f32.mrb[21].mxu0 }
 0x5f9   :  { %v1079_v44 = vpop.f32.mrb[26].mxu1  ;;  %v1127_v21 = vpop.f32.mrb[22].mxu0 }
 0x5fa   :  { %1380 = vst.msk [vmem:[#allocation2 + $0x4] sm:$0xf] %vm1378_vm4, %v1371_v26  ;;  %1381 = vst.msk [vmem:[#allocation2 + $0x8] sm:$0xf] %vm1378_vm4, %v1372_v43  ;;  %v6021_v45 = vpop.f32.mrb[27].mxu1  ;;  %v6027_v46 = vpop.f32.mrb[23].mxu0 }
 0x5ff   :  { %v1220_v47 = vpop.f32.mrb[24].mxu0 }
 0x600   :  { %v1374_v51 = vpack.c.bf16 %v1220_v47, %v1220_v47  ;;  %v6038_v29 = vpop.f32.mrb[25].mxu0 }
 0x601   :  { %v1223_v38 = vpop.f32.mrb[26].mxu0 }
 0x602   :  { %1383 = vst.msk [vmem:[#allocation2 + $0x10] sm:$0xf] %vm1378_vm4, %v1374_v51  ;;  %v6039_v52 = vpop.f32.mrb[27].mxu0 }
 0x62c   :  { %v1172_v54 = vpop.f32.mrb[28].mxu1 }
 0x62d   :  { %v1373_v55 = vpack.c.bf16 %v1172_v54, %v1172_v54  ;;  %v6032_v56 = vpop.f32.mrb[29].mxu1 }
 0x62e   :  { %v1175_v50 = vpop.f32.mrb[30].mxu1 }
 0x62f   :  { %1382 = vst.msk [vmem:[#allocation2 + $0xc] sm:$0xf] %vm1378_vm4, %v1373_v55  ;;  %v6033_v57 = vpop.f32.mrb[31].mxu1 }
 0x631   :  { %v1316_v48 = vpop.f32.mrb[28].mxu0 }
 0x632   :  { %v1376_v49 = vpack.c.bf16 %v1316_v48, %v1316_v48  ;;  %v6050_v53 = vpop.f32.mrb[29].mxu0 }
 0x633   :  { %v1319_v59 = vpop.f32.mrb[30].mxu0 }
 0x634   :  { %1385 = vst.msk [vmem:[#allocation2 + $0x18] sm:$0xf] %vm1378_vm4, %v1376_v49  ;;  %v1268_v2 = vpop.f32.mrb[32].mxu1  ;;  %v6051_v3 = vpop.f32.mrb[31].mxu0 }
 0x635   :  { %v1375_v4 = vpack.c.bf16 %v1268_v2, %v1268_v2  ;;  %v6044_v5 = vpop.f32.mrb[33].mxu1 }
 0x636   :  { %v1271_v8 = vpop.f32.mrb[34].mxu1 }
 0x637   :  { %1384 = vst.msk [vmem:[#allocation2 + $0x14] sm:$0xf] %vm1378_vm4, %v1375_v4  ;;  %v6045_v9 = vpop.f32.mrb[35].mxu1 }
 0x639   :  { %v1431_v10 = vpop.f32.mrb[32].mxu0 }
 0x63a   :  { %v7489_v11 = vmul.f32 0.35355338, %v1431_v10  ;;  %v6062_v12 = vpop.f32.mrb[33].mxu0 }
 0x63b   :  { %v1434_v13 = vpop.f32.mrb[34].mxu0 }
 0x63c   :  { %v6063_v14 = vpop.f32.mrb[35].mxu0  ;;  %v1795_v15 = vsel %vm484_vm2, %v7489_v11, -inf }
 0x63d   :  { %1796 = vmax.xlane.f32.xlu0 %v1795_v15 }
 0x641   :  { %v1531_v16 = vpop.f32.mrb[36].mxu0 }
 0x642   :  { %v1789_v17 = vmul.f32 0.35355338, %v1531_v16  ;;  %v6074_v19 = vpop.f32.mrb[37].mxu0 }
 0x643   :  { %v1534_v22 = vpop.f32.mrb[38].mxu0 }
 0x644   :  { %v6075_v6 = vpop.f32.mrb[39].mxu0  ;;  %v1801_v23 = vsel %vm484_vm2, %v1789_v17, -inf }
 0x645   :  { %1802 = vmax.xlane.f32.xlu0 %v1801_v23 }
 0x649   :  { %v1631_v27 = vpop.f32.mrb[40].mxu0 }
 0x64a   :  { %v6086_v18 = vpop.f32.mrb[41].mxu0  ;;  %v1791_v38 = vmul.f32 0.35355338, %v1631_v27 }
 0x64b   :  { %v1634_v30 = vpop.f32.mrb[42].mxu0  ;;  %v1988_v18 = vpop.permute.xlu1 %1987 }
 0x64c   :  { %v6087_v31 = vpop.f32.mrb[43].mxu0  ;;  %v1807_v56 = vsel %vm484_vm2, %v1791_v38, -inf }
 0x651   :  { %v1731_v32 = vpop.f32.mrb[44].mxu0 }
 0x652   :  { %v6098_v33 = vpop.f32.mrb[45].mxu0  ;;  %v7497_v55 = vmul.f32 0.35355338, %v1731_v32 }
 0x653   :  { %v1734_v35 = vpop.f32.mrb[46].mxu0 }
 0x654   :  { %v6099_v24 = vpop.f32.mrb[47].mxu0  ;;  %v1813_v59 = vsel %vm484_vm2, %v7497_v55, -inf }
 0x665   :  { %v1364_v36 = vpop.f32.mrb[36].mxu1 }
 0x666   :  { %v1377_v40 = vpack.c.bf16 %v1364_v36, %v1364_v36  ;;  %v6056_v28 = vpop.f32.mrb[37].mxu1 }
 0x667   :  { %v1367_v41 = vpop.f32.mrb[38].mxu1 }
 0x668   :  { %1386 = vst.msk [vmem:[#allocation2 + $0x1c] sm:$0xf] %vm1378_vm4, %v1377_v40  ;;  %v6057_v26 = vpop.f32.mrb[39].mxu1 }
 0x66d   :  { %v1481_v43 = vpop.f32.mrb[40].mxu1 }
 0x66e   :  { %v1788_v34 = vmul.f32 0.35355338, %v1481_v43  ;;  %v6068_v42 = vpop.f32.mrb[41].mxu1 }
 0x66f   :  { %v1484_v44 = vpop.f32.mrb[42].mxu1 }
 0x670   :  { %v6069_v21 = vpop.f32.mrb[43].mxu1  ;;  %v1798_v45 = vsel %vm484_vm2, %v1788_v34, -inf }
 0x671   :  { %1799 = vmax.xlane.f32.xlu1 %v1798_v45 }
 0x675   :  { %v1581_v46 = vpop.f32.mrb[44].mxu1 }
 0x676   :  { %v1790_v47 = vmul.f32 0.35355338, %v1581_v46  ;;  %v6080_v51 = vpop.f32.mrb[45].mxu1 }
 0x677   :  { %v1584_v29 = vpop.f32.mrb[46].mxu1 }
 0x678   :  { %v6081_v52 = vpop.f32.mrb[47].mxu1  ;;  %v1804_v54 = vsel %vm484_vm2, %v1790_v47, -inf }
 0x679   :  { %1805 = vmax.xlane.f32.xlu0 %v1804_v54 }
 0x67d   :  { %1808 = vmax.xlane.f32.xlu0 %v1807_v56  ;;  %v1681_v50 = vpop.f32.mrb[48].mxu1 }
 0x67e   :  { %v1792_v57 = vmul.f32 0.35355338, %v1681_v50  ;;  %v6092_v48 = vpop.f32.mrb[49].mxu1 }
 0x67f   :  { %v1684_v49 = vpop.f32.mrb[50].mxu1 }
 0x680   :  { %v6093_v53 = vpop.f32.mrb[51].mxu1  ;;  %v1810_v2 = vsel %vm484_vm2, %v1792_v57, -inf }
 0x681   :  { %1814 = vmax.xlane.f32.xlu0 %v1813_v59  ;;  %1811 = vmax.xlane.f32.xlu1 %v1810_v2 }
 0x685   :  { %v1781_v3 = vpop.f32.mrb[52].mxu1 }
 0x686   :  { %v6104_v4 = vpop.f32.mrb[53].mxu1  ;;  %v7507_v9 = vmul.f32 0.35355338, %v1781_v3 }
 0x687   :  { %v1784_v5 = vpop.f32.mrb[54].mxu1  ;;  %v1993_v4 = vsel %vm990_vm3, %v1988_v18, 0 }
 0x688   :  { %v6105_v8 = vpop.f32.mrb[55].mxu1  ;;  %v1816_v10 = vsel %vm484_vm2, %v7507_v9, -inf }
 0x692   :  { %2131 = vrot.lane.b32.xlu1 %v7220_v0, %s6923_s27 }
 0x697   :  { %2083 = vrot.lane.b32.xlu0 %v7200_v60, %s6923_s27 }
 0x6b6   :  { %1817 = vmax.xlane.f32.xlu1 %v1816_v10 }
 0x6ca   :  { %v1797_v12 = vpop.xlane.xlu0 %1796 }
 0x6cb   :  { %v1819_v13 = vsub.f32 %v7489_v11, %v1797_v12  ;;  %v7520_v11 = vpop.permute.xlu1 %2035 }
 0x6cd   :  { %v1827_v14 = vmul.f32 1.442695, %v1819_v13 }
 0x6cf   :  { %6584 = vpow2.f32 %v1827_v14 }
 0x6d2   :  { %v1803_v15 = vpop.xlane.xlu0 %1802 }
 0x6d3   :  { %v1821_v16 = vsub.f32 %v1789_v17, %v1803_v15 }
 0x6d5   :  { %v1831_v19 = vmul.f32 1.442695, %v1821_v16 }
 0x6d7   :  { %6586 = vpow2.f32 %v1831_v19 }
 0x6d9   :  { %v7512_v22 = vpop.eup %6584 }
 0x6da   :  { %v1843_v6 = vsel %vm484_vm2, %v7512_v22, 0.0 }
 0x6db   :  { %1844 = vadd.xlane.f32.xlu0 %v1843_v6 }
 0x6e1   :  { %v7516_v23 = vpop.eup %6586 }
 0x6e2   :  { %v1849_v27 = vsel %vm484_vm2, %v7516_v23, 0.0 }
 0x6e3   :  { %1850 = vadd.xlane.f32.xlu0 %v1849_v27 }
 0x6fe   :  { %v1800_v30 = vpop.xlane.xlu1 %1799 }
 0x6ff   :  { %v1820_v31 = vsub.f32 %v1788_v34, %v1800_v30 }
 0x701   :  { %v1829_v17 = vmul.f32 1.442695, %v1820_v31 }
 0x703   :  { %6588 = vpow2.f32 %v1829_v17 }
 0x706   :  { %v1806_v32 = vpop.xlane.xlu0 %1805 }
 0x707   :  { %v1822_v33 = vsub.f32 %v1790_v47, %v1806_v32 }
 0x709   :  { %v1833_v35 = vmul.f32 1.442695, %v1822_v33 }
 0x70a   :  { %v1809_v24 = vpop.xlane.xlu0 %1808 }
 0x70b   :  { %6590 = vpow2.f32 %v1833_v35  ;;  %v1823_v36 = vsub.f32 %v1791_v38, %v1809_v24 }
 0x70d   :  { %v7522_v40 = vpop.eup %6588  ;;  %v1835_v28 = vmul.f32 1.442695, %v1823_v36 }
 0x70e   :  { %v1846_v41 = vsel %vm484_vm2, %v7522_v40, 0.0  ;;  %v1812_v44 = vpop.xlane.xlu1 %1811  ;;  %v1815_v45 = vpop.xlane.xlu0 %1814 }
 0x70f   :  { %6592 = vpow2.f32 %v1835_v28  ;;  %1847 = vadd.xlane.f32.xlu1 %v1846_v41  ;;  %v1824_v21 = vsub.f32 %v1792_v57, %v1812_v44  ;;  %v1825_v46 = vsub.f32 %v7497_v55, %v1815_v45 }
 0x711   :  { %v1837_v47 = vmul.f32 1.442695, %v1824_v21  ;;  %v1839_v51 = vmul.f32 1.442695, %v1825_v46 }
 0x712   :  { %v2084_v55 = vpop.permute.xlu0 %2083  ;;  %v7549_v56 = vpop.permute.xlu1 %2131 }
 0x713   :  { %6594 = vpow2.f32 %v1837_v47  ;;  %v2089_v12 = vsel %vm990_vm3, %v2084_v55, 0 }
 0x714   :  { %6596 = vpow2.f32 %v1839_v51 }
 0x715   :  { %v7526_v26 = vpop.eup %6590 }
 0x716   :  { %v1852_v43 = vsel %vm484_vm2, %v7526_v26, 0.0 }
 0x717   :  { %1853 = vadd.xlane.f32.xlu1 %v1852_v43 }
 0x719   :  { %v7530_v34 = vpop.eup %6592 }
 0x71a   :  { %v1855_v42 = vsel %vm484_vm2, %v7530_v34, 0.0 }
 0x71b   :  { %1856 = vadd.xlane.f32.xlu0 %v1855_v42 }
 0x71d   :  { %v7539_v29 = vpop.eup %6594 }
 0x71e   :  { %v1858_v38 = vsel %vm484_vm2, %v7539_v29, 0.0  ;;  %v7543_v52 = vpop.eup %6596 }
 0x71f   :  { %v1861_v54 = vsel %vm484_vm2, %v7543_v52, 0.0 }
 0x728   :  { %2227 = vrot.lane.b32.xlu1 %v7228_v1, %s6923_s27 }
 0x731   :  { %2179 = vrot.lane.b32.xlu0 %v7210_v62, %s6923_s27 }
 0x743   :  { %v1818_v50 = vpop.xlane.xlu1 %1817 }
 0x744   :  { %v1826_v48 = vsub.f32 %v7507_v9, %v1818_v50 }
 0x746   :  { %v1841_v49 = vmul.f32 1.442695, %v1826_v48 }
 0x74c   :  { %1859 = vadd.xlane.f32.xlu1 %v1858_v38 }
 0x750   :  { %1862 = vadd.xlane.f32.xlu0 %v1861_v54 }
 0x75d   :  { %2392 = vrot.lane.b32.xlu1 %v7192_v58, %s6924_s4 }
 0x766   :  { %2342 = vrot.lane.b32.xlu0 %v7190_v39, %s6924_s4 }
 0x768   :  { %v1845_v57 = vpop.xlane.xlu0 %1844 }
 0x769   :  { %6598 = vrcp.f32 %v1845_v57 }
 0x76a   :  { %2340 = vrot.lane.b32.xlu0 %v7190_v39, %s6925_s25 }
 0x76e   :  { %2442 = vrot.lane.b32.xlu0 %v7202_v61, %s6924_s4 }
 0x770   :  { %v1851_v53 = vpop.xlane.xlu0 %1850 }
 0x771   :  { %6600 = vrcp.f32 %v1851_v53 }
 0x772   :  { %2440 = vrot.lane.b32.xlu0 %v7202_v61, %s6925_s25  ;;  %6602 = vpow2.f32 %v1841_v49 }
 0x773   :  { %v6599_v59 = vpop.eup %6598 }
 0x774   :  { %v1875_v2 = vmul.f32 %v6599_v59, %v7512_v22 }
 0x776   :  { %2542 = vrot.lane.b32.xlu0 %v7200_v60, %s6924_s4  ;;  %v1883_v3 = vpack.c.bf16 %v1875_v2, %v1875_v2 }
 0x778   :  { %6109 = vmatmul.mubr.msk.bf16.vlgmr.msra.gmra.mrb[48].mxu0 %vm484_vm2, %v1883_v3 }
 0x779   :  { %6119 = vmatpush3.bf16.msra.mxu0 %v1993_v4  ;;  %6120 = vmatprep.mubr.msk.bf16.mxu0 %vm6919_vm1, %v6917_v20 }
 0x77a   :  { %2540 = vrot.lane.b32.xlu0 %v7200_v60, %s6925_s25  ;;  %6130 = vmatprep.subr.bf16.mxu0 %v6917_v20 }
 0x77b   :  { %v6601_v5 = vpop.eup %6600 }
 0x77c   :  { %v1877_v8 = vmul.f32 %v6601_v5, %v7516_v23  ;;  %v7571_v9 = vpop.eup %6602  ;;  %v2041_v23 = vsel %vm990_vm3, %v7520_v11, 0  ;;  %v2137_v11 = vsel %vm990_vm3, %v7549_v56, 0 }
 0x77d   :  { %v1864_v13 = vsel %vm484_vm2, %v7571_v9, 0.0 }
 0x77e   :  { %2642 = vrot.lane.b32.xlu0 %v7210_v62, %s6924_s4  ;;  %v1885_v10 = vpack.c.bf16 %v1877_v8, %v1877_v8 }
 0x780   :  { %6121 = vmatmul.mubr.msk.bf16.vlgmr.msra.gmra.mrb[52].mxu0 %vm484_vm2, %v1885_v10 }
 0x781   :  { %6131 = vmatpush3.bf16.msra.mxu0 %v2089_v12  ;;  %1865 = vadd.xlane.f32.xlu1 %v1864_v13 }
 0x782   :  { %2640 = vrot.lane.b32.xlu0 %v7210_v62, %s6925_s25  ;;  %6132 = vmatprep.mubr.msk.bf16.mxu0 %vm6919_vm1, %v6917_v20 }
 0x783   :  { %6142 = vmatprep.subr.bf16.mxu0 %v6917_v20 }
 0x786   :  { %2844 = vrot.lane.b32.xlu0 %v7190_v39, %s6926_s8 }
 0x792   :  { %2390 = vrot.lane.b32.xlu1 %v7192_v58, %s6925_s25 }
 0x796   :  { %2492 = vrot.lane.b32.xlu1 %v7212_v63, %s6924_s4 }
 0x79a   :  { %2490 = vrot.lane.b32.xlu1 %v7212_v63, %s6925_s25 }
 0x79c   :  { %v1848_v14 = vpop.xlane.xlu1 %1847 }
 0x79d   :  { %6604 = vrcp.f32 %v1848_v14 }
 0x79e   :  { %2592 = vrot.lane.b32.xlu1 %v7220_v0, %s6924_s4 }
 0x7a2   :  { %2590 = vrot.lane.b32.xlu1 %v7220_v0, %s6925_s25 }
 0x7a4   :  { %v1854_v15 = vpop.xlane.xlu1 %1853 }
 0x7a5   :  { %6606 = vrcp.f32 %v1854_v15 }
 0x7a6   :  { %2692 = vrot.lane.b32.xlu1 %v7228_v1, %s6924_s4 }
 0x7a7   :  { %v6605_v16 = vpop.eup %6604 }
 0x7a8   :  { %v1857_v19 = vpop.xlane.xlu0 %1856  ;;  %v1876_v22 = vmul.f32 %v6605_v16, %v7522_v40  ;;  %v2228_v24 = vpop.permute.xlu1 %2227 }
 0x7a9   :  { %6608 = vrcp.f32 %v1857_v19  ;;  %v2233_v44 = vsel %vm990_vm3, %v2228_v24, 0 }
 0x7aa   :  { %2690 = vrot.lane.b32.xlu1 %v7228_v1, %s6925_s25  ;;  %v1884_v6 = vpack.c.bf16 %v1876_v22, %v1876_v22 }
 0x7ac   :  { %6115 = vmatmul.mubr.msk.bf16.vlgmr.msra.gmra.mrb[56].mxu1 %vm484_vm2, %v1884_v6  ;;  %v2180_v32 = vpop.permute.xlu0 %2179 }
 0x7ad   :  { %6125 = vmatpush3.bf16.msra.mxu1 %v2041_v23  ;;  %6126 = vmatprep.mubr.msk.bf16.mxu1 %vm6919_vm1, %v6917_v20  ;;  %v2185_v35 = vsel %vm990_vm3, %v2180_v32, 0 }
 0x7ae   :  { %2892 = vrot.lane.b32.xlu1 %v7192_v58, %s6926_s8  ;;  %6136 = vmatprep.subr.bf16.mxu1 %v6917_v20 }
 0x7af   :  { %v6607_v27 = vpop.eup %6606 }
 0x7b0   :  { %v1878_v18 = vmul.f32 %v6607_v27, %v7526_v26 }
 0x7b2   :  { %2940 = vrot.lane.b32.xlu1 %v7202_v61, %s6926_s8  ;;  %v1886_v30 = vpack.c.bf16 %v1878_v18, %v1878_v18 }
 0x7b3   :  { %v6609_v31 = vpop.eup %6608 }
 0x7b4   :  { %6127 = vmatmul.mubr.msk.bf16.vlgmr.msra.gmra.mrb[60].mxu1 %vm484_vm2, %v1886_v30  ;;  %v1879_v17 = vmul.f32 %v6609_v31, %v7530_v34 }
 0x7b5   :  { %6137 = vmatpush3.bf16.msra.mxu1 %v2137_v11  ;;  %6138 = vmatprep.mubr.msk.bf16.mxu1 %vm6919_vm1, %v6917_v20 }
 0x7b6   :  { %2988 = vrot.lane.b32.xlu1 %v7212_v63, %s6926_s8  ;;  %v1887_v33 = vpack.c.bf16 %v1879_v17, %v1879_v17  ;;  %6148 = vmatprep.subr.bf16.mxu1 %v6917_v20 }
 0x7b8   :  { %6133 = vmatmul.mubr.msk.bf16.vlgmr.msra.gmra.mrb[56].mxu0 %vm484_vm2, %v1887_v33 }
 0x7b9   :  { %6143 = vmatpush3.bf16.msra.mxu0 %v2185_v35  ;;  %6144 = vmatprep.mubr.msk.bf16.mxu0 %vm6919_vm1, %v6917_v20 }
 0x7ba   :  { %6154 = vmatprep.subr.bf16.mxu0 %v6917_v20 }
 0x7d9   :  { %v1860_v36 = vpop.xlane.xlu1 %1859 }
 0x7da   :  { %6610 = vrcp.f32 %v1860_v36 }
 0x7dd   :  { %v1863_v40 = vpop.xlane.xlu0 %1862  ;;  %v2393_v57 = vpop.permute.xlu1 %2392 }
 0x7de   :  { %6612 = vrcp.f32 %v1863_v40  ;;  %v2398_v10 = vsel %vm484_vm2, %v2393_v57, 0 }
 0x7e1   :  { %v2343_v28 = vpop.permute.xlu0 %2342 }
 0x7e2   :  { %v2348_v47 = vsel %vm484_vm2, %v2343_v28, 0 }
 0x7e4   :  { %v6611_v41 = vpop.eup %6610 }
 0x7e5   :  { %v2341_v26 = vpop.permute.xlu0 %2340  ;;  %v1880_v43 = vmul.f32 %v6611_v41, %v7539_v29 }
 0x7e7   :  { %v1888_v34 = vpack.c.bf16 %v1880_v43, %v1880_v43 }
 0x7e8   :  { %v6613_v42 = vpop.eup %6612 }
 0x7e9   :  { %v2443_v21 = vpop.permute.xlu0 %2442  ;;  %6139 = vmatmul.mubr.msk.bf16.vlgmr.msra.gmra.mrb[64].mxu1 %vm484_vm2, %v1888_v34  ;;  %v1881_v45 = vmul.f32 %v6613_v42, %v7543_v52 }
 0x7ea   :  { %6149 = vmatpush3.bf16.msra.mxu1 %v2233_v44  ;;  %6150 = vmatprep.mubr.msk.bf16.mxu1 %vm6919_vm1, %v6917_v20  ;;  %v2448_v38 = vsel %vm484_vm2, %v2443_v21, 0 }
 0x7eb   :  { %v1889_v46 = vpack.c.bf16 %v1881_v45, %v1881_v45  ;;  %6160 = vmatprep.subr.bf16.mxu1 %v6917_v20 }
 0x7ed   :  { %v2441_v51 = vpop.permute.xlu0 %2440  ;;  %6145 = vmatmul.mubr.msk.bf16.vlgmr.msra.gmra.mrb[60].mxu0 %vm484_vm2, %v1889_v46 }
 0x7ee   :  { %6155 = vmatpush3.bf16.xpose.msra.mxu0 %v2348_v47  ;;  %6156 = vmatprep.mubr.msk.bf16.mxu0 %vm6919_vm1, %v6917_v20 }
 0x7ef   :  { %6166 = vmatprep.subr.bf16.mxu0 %v6917_v20 }
 0x7f1   :  { %v2543_v29 = vpop.permute.xlu0 %2542 }
 0x7f2   :  { %v2548_v54 = vsel %vm484_vm2, %v2543_v29, 0 }
 0x7f5   :  { %6157 = vmatmul.mubr.msk.bf16.vlgmr.msra.gmra.mrb[64].mxu0 %vm484_vm2, %v2341_v26  ;;  %v2541_v52 = vpop.permute.xlu0 %2540 }
 0x7f6   :  { %6167 = vmatpush3.bf16.xpose.msra.mxu0 %v2448_v38  ;;  %6168 = vmatprep.mubr.msk.bf16.mxu0 %vm6919_vm1, %v6917_v20 }
 0x7f7   :  { %6178 = vmatprep.subr.bf16.mxu0 %v6917_v20 }
 0x7f9   :  { %v2643_v55 = vpop.permute.xlu0 %2642 }
 0x7fa   :  { %v2648_v50 = vsel %vm484_vm2, %v2643_v55, 0 }
 0x7fd   :  { %6169 = vmatmul.mubr.msk.bf16.vlgmr.msra.gmra.mrb[68].mxu0 %vm484_vm2, %v2441_v51  ;;  %v2641_v56 = vpop.permute.xlu0 %2640 }
 0x7fe   :  { %6179 = vmatpush3.bf16.xpose.msra.mxu0 %v2548_v54  ;;  %6180 = vmatprep.mubr.msk.bf16.mxu0 %vm6919_vm1, %v6917_v20 }
 0x7ff   :  { %6190 = vmatprep.subr.bf16.mxu0 %v6917_v20 }
 0x801   :  { %v2845_v48 = vpop.permute.xlu0 %2844 }
 0x802   :  { %v2850_v49 = vsel %vm990_vm3, %v2845_v48, 0 }
 0x805   :  { %6181 = vmatmul.mubr.msk.bf16.vlgmr.msra.gmra.mrb[72].mxu0 %vm484_vm2, %v2541_v52 }
 0x806   :  { %6191 = vmatpush3.bf16.xpose.msra.mxu0 %v2648_v50  ;;  %6192 = vmatprep.mubr.msk.bf16.mxu0 %vm6919_vm1, %v6917_v20 }
 0x807   :  { %6202 = vmatprep.subr.bf16.mxu0 %v6917_v20 }
 0x80d   :  { %6193 = vmatmul.mubr.msk.bf16.vlgmr.msra.gmra.mrb[76].mxu0 %vm484_vm2, %v2641_v56 }
 0x80e   :  { %6203 = vmatpush3.bf16.msra.mxu0 %v2850_v49  ;;  %v1866_v53 = vpop.xlane.xlu1 %1865  ;;  %6204 = vmatprep.mubr.msk.bf16.mxu0 %vm6919_vm1, %v6917_v20 }
 0x80f   :  { %6614 = vrcp.f32 %v1866_v53  ;;  %6214 = vmatprep.subr.bf16.mxu0 %v6917_v20 }
 0x812   :  { %v2391_v59 = vpop.permute.xlu1 %2390 }
 0x816   :  { %v2493_v2 = vpop.permute.xlu1 %2492 }
 0x817   :  { %v2498_v13 = vsel %vm484_vm2, %v2493_v2, 0 }
 0x819   :  { %v6615_v3 = vpop.eup %6614 }
 0x81a   :  { %v1882_v4 = vmul.f32 %v6615_v3, %v7571_v9  ;;  %v2491_v8 = vpop.permute.xlu1 %2490 }
 0x81c   :  { %v1890_v5 = vpack.c.bf16 %v1882_v4, %v1882_v4 }
 0x81e   :  { %6151 = vmatmul.mubr.msk.bf16.vlgmr.msra.gmra.mrb[68].mxu1 %vm484_vm2, %v1890_v5  ;;  %v2593_v12 = vpop.permute.xlu1 %2592 }
 0x81f   :  { %6161 = vmatpush3.bf16.xpose.msra.mxu1 %v2398_v10  ;;  %6162 = vmatprep.mubr.msk.bf16.mxu1 %vm6919_vm1, %v6917_v20  ;;  %v2598_v14 = vsel %vm484_vm2, %v2593_v12, 0 }
 0x820   :  { %6172 = vmatprep.subr.bf16.mxu1 %v6917_v20 }
 0x822   :  { %v2591_v9 = vpop.permute.xlu1 %2590 }
 0x826   :  { %6163 = vmatmul.mubr.msk.bf16.vlgmr.msra.gmra.mrb[72].mxu1 %vm484_vm2, %v2391_v59  ;;  %v2693_v15 = vpop.permute.xlu1 %2692 }
 0x827   :  { %6173 = vmatpush3.bf16.xpose.msra.mxu1 %v2498_v13  ;;  %6174 = vmatprep.mubr.msk.bf16.mxu1 %vm6919_vm1, %v6917_v20  ;;  %v2698_v19 = vsel %vm484_vm2, %v2693_v15, 0 }
 0x828   :  { %6184 = vmatprep.subr.bf16.mxu1 %v6917_v20 }
 0x82a   :  { %v2691_v16 = vpop.permute.xlu1 %2690 }
 0x82e   :  { %6175 = vmatmul.mubr.msk.bf16.vlgmr.msra.gmra.mrb[76].mxu1 %vm484_vm2, %v2491_v8  ;;  %v2893_v22 = vpop.permute.xlu1 %2892 }
 0x82f   :  { %6185 = vmatpush3.bf16.xpose.msra.mxu1 %v2598_v14  ;;  %6186 = vmatprep.mubr.msk.bf16.mxu1 %vm6919_vm1, %v6917_v20  ;;  %v2898_v6 = vsel %vm990_vm3, %v2893_v22, 0 }
 0x830   :  { %6196 = vmatprep.subr.bf16.mxu1 %v6917_v20 }
 0x836   :  { %6187 = vmatmul.mubr.msk.bf16.vlgmr.msra.gmra.mrb[80].mxu1 %vm484_vm2, %v2591_v9 }
 0x837   :  { %6197 = vmatpush3.bf16.xpose.msra.mxu1 %v2698_v19  ;;  %6198 = vmatprep.mubr.msk.bf16.mxu1 %vm6919_vm1, %v6917_v20 }
 0x838   :  { %6208 = vmatprep.subr.bf16.mxu1 %v6917_v20 }
 0x83e   :  { %6199 = vmatmul.mubr.msk.bf16.vlgmr.msra.gmra.mrb[84].mxu1 %vm484_vm2, %v2691_v16 }
 0x83f   :  { %6209 = vmatpush3.bf16.msra.mxu1 %v2898_v6  ;;  %6210 = vmatprep.mubr.msk.bf16.mxu1 %vm6919_vm1, %v6917_v20 }
 0x840   :  { %6220 = vmatprep.subr.bf16.mxu1 %v6917_v20 }
 0x84b   :  { %v7684_v23 = vpop.f32.mrb[48].mxu0 }
 0x84c   :  { %v6110_v27 = vpop.f32.mrb[49].mxu0 }
 0x84d   :  { %v1936_v18 = vpop.f32.mrb[50].mxu0 }
 0x84e   :  { %v6111_v30 = vpop.f32.mrb[51].mxu0 }
 0x853   :  { %v7686_v31 = vpop.f32.mrb[52].mxu0 }
 0x854   :  { %v6122_v11 = vpop.f32.mrb[53].mxu0 }
 0x855   :  { %v2032_v17 = vpop.f32.mrb[54].mxu0 }
 0x856   :  { %v6123_v32 = vpop.f32.mrb[55].mxu0 }
 0x87f   :  { %v7688_v33 = vpop.f32.mrb[56].mxu1 }
 0x880   :  { %v6116_v35 = vpop.f32.mrb[57].mxu1 }
 0x881   :  { %v1984_v24 = vpop.f32.mrb[58].mxu1 }
 0x882   :  { %v6117_v36 = vpop.f32.mrb[59].mxu1 }
 0x887   :  { %v7690_v40 = vpop.f32.mrb[60].mxu1 }
 0x888   :  { %v6128_v28 = vpop.f32.mrb[61].mxu1 }
 0x889   :  { %v2080_v41 = vpop.f32.mrb[62].mxu1 }
 0x88a   :  { %v6129_v26 = vpop.f32.mrb[63].mxu1 }
 0x88b   :  { %v7692_v43 = vpop.f32.mrb[56].mxu0 }
 0x88c   :  { %v6134_v34 = vpop.f32.mrb[57].mxu0 }
 0x88d   :  { %v2128_v42 = vpop.f32.mrb[58].mxu0 }
 0x88e   :  { %v6135_v44 = vpop.f32.mrb[59].mxu0 }
 0x8bc   :  { %v7694_v21 = vpop.f32.mrb[64].mxu1 }
 0x8bd   :  { %v6140_v45 = vpop.f32.mrb[65].mxu1 }
 0x8be   :  { %v2176_v46 = vpop.f32.mrb[66].mxu1 }
 0x8bf   :  { %v6141_v47 = vpop.f32.mrb[67].mxu1 }
 0x8c0   :  { %v7696_v51 = vpop.f32.mrb[60].mxu0 }
 0x8c1   :  { %v6146_v29 = vpop.f32.mrb[61].mxu0 }
 0x8c2   :  { %v2224_v38 = vpop.f32.mrb[62].mxu0 }
 0x8c3   :  { %v6147_v52 = vpop.f32.mrb[63].mxu0 }
 0x8c8   :  { %v2384_v54 = vpop.f32.mrb[64].mxu0 }
 0x8c9   :  { %v7698_v55 = vmul.f32 0.35355338, %v2384_v54  ;;  %v6158_v56 = vpop.f32.mrb[65].mxu0 }
 0x8ca   :  { %v2387_v50 = vpop.f32.mrb[66].mxu0 }
 0x8cb   :  { %v6159_v57 = vpop.f32.mrb[67].mxu0  ;;  %v2748_v48 = vsel %vm484_vm2, %v7698_v55, -inf }
 0x8cc   :  { %2749 = vmax.xlane.f32.xlu0 %v2748_v48 }
 0x8d0   :  { %v2484_v49 = vpop.f32.mrb[68].mxu0 }
 0x8d1   :  { %v2742_v53 = vmul.f32 0.35355338, %v2484_v49  ;;  %v6170_v59 = vpop.f32.mrb[69].mxu0 }
 0x8d2   :  { %v2487_v2 = vpop.f32.mrb[70].mxu0 }
 0x8d3   :  { %v6171_v3 = vpop.f32.mrb[71].mxu0  ;;  %v2754_v4 = vsel %vm484_vm2, %v2742_v53, -inf }
 0x8d4   :  { %2755 = vmax.xlane.f32.xlu0 %v2754_v4 }
 0x8d8   :  { %v2584_v5 = vpop.f32.mrb[72].mxu0 }
 0x8d9   :  { %v6182_v8 = vpop.f32.mrb[73].mxu0  ;;  %v2744_v41 = vmul.f32 0.35355338, %v2584_v5 }
 0x8da   :  { %v2587_v10 = vpop.f32.mrb[74].mxu0 }
 0x8db   :  { %v6183_v12 = vpop.f32.mrb[75].mxu0  ;;  %v2760_v44 = vsel %vm484_vm2, %v2744_v41, -inf }
 0x8e0   :  { %v2684_v13 = vpop.f32.mrb[76].mxu0 }
 0x8e1   :  { %v6194_v9 = vpop.f32.mrb[77].mxu0  ;;  %v7707_v42 = vmul.f32 0.35355338, %v2684_v13 }
 0x8e2   :  { %v2687_v14 = vpop.f32.mrb[78].mxu0 }
 0x8e3   :  { %v6195_v15 = vpop.f32.mrb[79].mxu0  ;;  %v2766_v52 = vsel %vm484_vm2, %v7707_v42, -inf }
 0x8e4   :  { %v2941_v15 = vpop.permute.xlu1 %2940 }
 0x8f1   :  { %v7703_v16 = vpop.f32.mrb[68].mxu1 }
 0x8f2   :  { %v6152_v19 = vpop.f32.mrb[69].mxu1 }
 0x8f3   :  { %v2272_v22 = vpop.f32.mrb[70].mxu1 }
 0x8f4   :  { %v6153_v6 = vpop.f32.mrb[71].mxu1 }
 0x8f9   :  { %v2434_v27 = vpop.f32.mrb[72].mxu1 }
 0x8fa   :  { %v2741_v18 = vmul.f32 0.35355338, %v2434_v27  ;;  %v6164_v30 = vpop.f32.mrb[73].mxu1 }
 0x8fb   :  { %v2437_v11 = vpop.f32.mrb[74].mxu1 }
 0x8fc   :  { %v6165_v17 = vpop.f32.mrb[75].mxu1  ;;  %v2751_v32 = vsel %vm484_vm2, %v2741_v18, -inf }
 0x8fd   :  { %2752 = vmax.xlane.f32.xlu1 %v2751_v32 }
 0x901   :  { %v2534_v35 = vpop.f32.mrb[76].mxu1 }
 0x902   :  { %v2743_v24 = vmul.f32 0.35355338, %v2534_v35  ;;  %v6176_v36 = vpop.f32.mrb[77].mxu1 }
 0x903   :  { %v2537_v28 = vpop.f32.mrb[78].mxu1 }
 0x904   :  { %v6177_v26 = vpop.f32.mrb[79].mxu1  ;;  %v2757_v34 = vsel %vm484_vm2, %v2743_v24, -inf }
 0x905   :  { %2758 = vmax.xlane.f32.xlu0 %v2757_v34 }
 0x909   :  { %2761 = vmax.xlane.f32.xlu0 %v2760_v44  ;;  %v2634_v45 = vpop.f32.mrb[80].mxu1 }
 0x90a   :  { %v2745_v46 = vmul.f32 0.35355338, %v2634_v45  ;;  %v6188_v47 = vpop.f32.mrb[81].mxu1 }
 0x90b   :  { %v2637_v29 = vpop.f32.mrb[82].mxu1 }
 0x90c   :  { %v6189_v38 = vpop.f32.mrb[83].mxu1  ;;  %v2763_v54 = vsel %vm484_vm2, %v2745_v46, -inf }
 0x90d   :  { %2767 = vmax.xlane.f32.xlu0 %v2766_v52  ;;  %2764 = vmax.xlane.f32.xlu1 %v2763_v54 }
 0x911   :  { %v2734_v56 = vpop.f32.mrb[84].mxu1 }
 0x912   :  { %v6200_v50 = vpop.f32.mrb[85].mxu1  ;;  %v7717_v49 = vmul.f32 0.35355338, %v2734_v56 }
 0x913   :  { %v2737_v57 = vpop.f32.mrb[86].mxu1 }
 0x914   :  { %v6201_v48 = vpop.f32.mrb[87].mxu1  ;;  %v2769_v59 = vsel %vm484_vm2, %v7717_v49, -inf }
 0x91e   :  { %3084 = vrot.lane.b32.xlu1 %v7220_v0, %s6926_s8 }
 0x923   :  { %3036 = vrot.lane.b32.xlu0 %v7200_v60, %s6926_s8 }
 0x942   :  { %2770 = vmax.xlane.f32.xlu1 %v2769_v59 }
 0x959   :  { %v2750_v2 = vpop.xlane.xlu0 %2749 }
 0x95a   :  { %v2772_v3 = vsub.f32 %v7698_v55, %v2750_v2  ;;  %v7730_v55 = vpop.permute.xlu1 %2988 }
 0x95c   :  { %v2780_v4 = vmul.f32 1.442695, %v2772_v3 }
 0x95e   :  { %6616 = vpow2.f32 %v2780_v4 }
 0x961   :  { %v2756_v5 = vpop.xlane.xlu0 %2755 }
 0x962   :  { %v2774_v8 = vsub.f32 %v2742_v53, %v2756_v5 }
 0x964   :  { %v2784_v10 = vmul.f32 1.442695, %v2774_v8 }
 0x966   :  { %6618 = vpow2.f32 %v2784_v10 }
 0x968   :  { %v7722_v12 = vpop.eup %6616 }
 0x969   :  { %v2796_v13 = vsel %vm484_vm2, %v7722_v12, 0.0 }
 0x96a   :  { %2797 = vadd.xlane.f32.xlu0 %v2796_v13 }
 0x970   :  { %v7726_v9 = vpop.eup %6618 }
 0x971   :  { %v2802_v14 = vsel %vm484_vm2, %v7726_v9, 0.0 }
 0x972   :  { %2803 = vadd.xlane.f32.xlu0 %v2802_v14 }
 0x98a   :  { %v2753_v19 = vpop.xlane.xlu1 %2752 }
 0x98b   :  { %v2773_v22 = vsub.f32 %v2741_v18, %v2753_v19 }
 0x98d   :  { %v2782_v53 = vmul.f32 1.442695, %v2773_v22 }
 0x98f   :  { %6620 = vpow2.f32 %v2782_v53 }
 0x992   :  { %v2759_v6 = vpop.xlane.xlu0 %2758 }
 0x993   :  { %v2775_v27 = vsub.f32 %v2743_v24, %v2759_v6 }
 0x995   :  { %v2786_v30 = vmul.f32 1.442695, %v2775_v27 }
 0x996   :  { %v2762_v11 = vpop.xlane.xlu0 %2761 }
 0x997   :  { %6622 = vpow2.f32 %v2786_v30  ;;  %v2776_v17 = vsub.f32 %v2744_v41, %v2762_v11  ;;  %v2994_v30 = vsel %vm990_vm3, %v7730_v55, 0 }
 0x999   :  { %v7732_v32 = vpop.eup %6620  ;;  %v2788_v35 = vmul.f32 1.442695, %v2776_v17 }
 0x99a   :  { %v2799_v36 = vsel %vm484_vm2, %v7732_v32, 0.0  ;;  %v2765_v41 = vpop.xlane.xlu1 %2764  ;;  %v2768_v44 = vpop.xlane.xlu0 %2767 }
 0x99b   :  { %6624 = vpow2.f32 %v2788_v35  ;;  %2800 = vadd.xlane.f32.xlu1 %v2799_v36  ;;  %v2777_v34 = vsub.f32 %v2745_v46, %v2765_v41  ;;  %v2778_v45 = vsub.f32 %v7707_v42, %v2768_v44 }
 0x99d   :  { %v2790_v47 = vmul.f32 1.442695, %v2777_v34  ;;  %v2792_v29 = vmul.f32 1.442695, %v2778_v45 }
 0x99e   :  { %v7759_v42 = vpop.permute.xlu1 %3084  ;;  %v3037_v46 = vpop.permute.xlu0 %3036 }
 0x99f   :  { %6626 = vpow2.f32 %v2790_v47  ;;  %v3090_v36 = vsel %vm990_vm3, %v7759_v42, 0 }
 0x9a0   :  { %6628 = vpow2.f32 %v2792_v29 }
 0x9a1   :  { %v7736_v28 = vpop.eup %6622 }
 0x9a2   :  { %v2805_v18 = vsel %vm484_vm2, %v7736_v28, 0.0 }
 0x9a3   :  { %2806 = vadd.xlane.f32.xlu1 %v2805_v18 }
 0x9a5   :  { %v7740_v26 = vpop.eup %6624 }
 0x9a6   :  { %v2808_v24 = vsel %vm484_vm2, %v7740_v26, 0.0 }
 0x9a7   :  { %2809 = vadd.xlane.f32.xlu0 %v2808_v24 }
 0x9a9   :  { %v7749_v38 = vpop.eup %6626 }
 0x9aa   :  { %v2811_v52 = vsel %vm484_vm2, %v7749_v38, 0.0  ;;  %v7753_v54 = vpop.eup %6628 }
 0x9ab   :  { %v2814_v56 = vsel %vm484_vm2, %v7753_v54, 0.0 }
 0x9b4   :  { %3180 = vrot.lane.b32.xlu1 %v7228_v1, %s6926_s8 }
 0x9bd   :  { %3132 = vrot.lane.b32.xlu0 %v7210_v62, %s6926_s8 }
 0x9cf   :  { %v2771_v50 = vpop.xlane.xlu1 %2770 }
 0x9d0   :  { %v2779_v57 = vsub.f32 %v7717_v49, %v2771_v50  ;;  %v2946_v49 = vsel %vm990_vm3, %v2941_v15, 0  ;;  %v3042_v15 = vsel %vm990_vm3, %v3037_v46, 0 }
 0x9d2   :  { %v2794_v59 = vmul.f32 1.442695, %v2779_v57 }
 0x9d8   :  { %2812 = vadd.xlane.f32.xlu1 %v2811_v52 }
 0x9dc   :  { %2815 = vadd.xlane.f32.xlu0 %v2814_v56 }
 0x9e9   :  { %3345 = vrot.lane.b32.xlu1 %v7192_v58, %s6927_s26 }
 0x9f2   :  { %3295 = vrot.lane.b32.xlu0 %v7190_v39, %s6927_s26 }
 0x9f6   :  { %3293 = vrot.lane.b32.xlu0 %v7190_v39, %s6928_s28 }
 0x9f7   :  { %v2798_v48 = vpop.xlane.xlu0 %2797 }
 0x9f8   :  { %6630 = vrcp.f32 %v2798_v48 }
 0x9f9   :  { %6632 = vpow2.f32 %v2794_v59 }
 0x9fa   :  { %3395 = vrot.lane.b32.xlu0 %v7202_v61, %s6927_s26 }
 0x9fe   :  { %3393 = vrot.lane.b32.xlu0 %v7202_v61, %s6928_s28 }
 0x9ff   :  { %v2804_v2 = vpop.xlane.xlu0 %2803 }
 0xa00   :  { %6634 = vrcp.f32 %v2804_v2 }
 0xa02   :  { %v6631_v3 = vpop.eup %6630  ;;  %3495 = vrot.lane.b32.xlu0 %v7200_v60, %s6927_s26 }
 0xa03   :  { %v2828_v4 = vmul.f32 %v6631_v3, %v7722_v12  ;;  %v7779_v8 = vpop.eup %6632 }
 0xa04   :  { %v2817_v13 = vsel %vm484_vm2, %v7779_v8, 0.0 }
 0xa05   :  { %v2836_v5 = vpack.c.bf16 %v2828_v4, %v2828_v4 }
 0xa06   :  { %3493 = vrot.lane.b32.xlu0 %v7200_v60, %s6928_s28 }
 0xa07   :  { %6205 = vmatmul.mubr.msk.bf16.vlgmr.msra.gmra.mrb[80].mxu0 %vm484_vm2, %v2836_v5 }
 0xa08   :  { %6215 = vmatpush3.bf16.msra.mxu0 %v2946_v49  ;;  %6216 = vmatprep.mubr.msk.bf16.mxu0 %vm6919_vm1, %v6917_v20 }
 0xa09   :  { %6226 = vmatprep.subr.bf16.mxu0 %v6917_v20 }
 0xa0a   :  { %v6635_v10 = vpop.eup %6634  ;;  %3595 = vrot.lane.b32.xlu0 %v7210_v62, %s6927_s26 }
 0xa0b   :  { %v2830_v12 = vmul.f32 %v6635_v10, %v7726_v9 }
 0xa0d   :  { %2818 = vadd.xlane.f32.xlu1 %v2817_v13  ;;  %v2838_v14 = vpack.c.bf16 %v2830_v12, %v2830_v12 }
 0xa0e   :  { %3593 = vrot.lane.b32.xlu0 %v7210_v62, %s6928_s28 }
 0xa0f   :  { %6217 = vmatmul.mubr.msk.bf16.vlgmr.msra.gmra.mrb[84].mxu0 %vm484_vm2, %v2838_v14 }
 0xa10   :  { %6227 = vmatpush3.bf16.msra.mxu0 %v3042_v15  ;;  %6228 = vmatprep.mubr.msk.bf16.mxu0 %vm6919_vm1, %v6917_v20 }
 0xa11   :  { %6238 = vmatprep.subr.bf16.mxu0 %v6917_v20 }
 0xa1e   :  { %3343 = vrot.lane.b32.xlu1 %v7192_v58, %s6928_s28 }
 0xa22   :  { %3445 = vrot.lane.b32.xlu1 %v7212_v63, %s6927_s26 }
 0xa26   :  { %3443 = vrot.lane.b32.xlu1 %v7212_v63, %s6928_s28 }
 0xa28   :  { %v2801_v9 = vpop.xlane.xlu1 %2800 }
 0xa29   :  { %6636 = vrcp.f32 %v2801_v9 }
 0xa2a   :  { %3545 = vrot.lane.b32.xlu1 %v7220_v0, %s6927_s26 }
 0xa2e   :  { %3543 = vrot.lane.b32.xlu1 %v7220_v0, %s6928_s28 }
 0xa30   :  { %v2807_v19 = vpop.xlane.xlu1 %2806 }
 0xa31   :  { %6638 = vrcp.f32 %v2807_v19 }
 0xa32   :  { %3645 = vrot.lane.b32.xlu1 %v7228_v1, %s6927_s26 }
 0xa33   :  { %v6637_v22 = vpop.eup %6636 }
 0xa34   :  { %v2829_v53 = vmul.f32 %v6637_v22, %v7732_v32  ;;  %v2810_v6 = vpop.xlane.xlu0 %2809 }
 0xa35   :  { %6640 = vrcp.f32 %v2810_v6 }
 0xa36   :  { %3643 = vrot.lane.b32.xlu1 %v7228_v1, %s6928_s28  ;;  %v2837_v27 = vpack.c.bf16 %v2829_v53, %v2829_v53 }
 0xa38   :  { %6211 = vmatmul.mubr.msk.bf16.vlgmr.msra.gmra.mrb[88].mxu1 %vm484_vm2, %v2837_v27  ;;  %v3133_v55 = vpop.permute.xlu0 %3132 }
 0xa39   :  { %6221 = vmatpush3.bf16.msra.mxu1 %v2994_v30  ;;  %6222 = vmatprep.mubr.msk.bf16.mxu1 %vm6919_vm1, %v6917_v20  ;;  %v3138_v41 = vsel %vm990_vm3, %v3133_v55, 0 }
 0xa3a   :  { %6232 = vmatprep.subr.bf16.mxu1 %v6917_v20 }
 0xa3b   :  { %v6639_v11 = vpop.eup %6638 }
 0xa3c   :  { %v2831_v17 = vmul.f32 %v6639_v11, %v7736_v28  ;;  %v3181_v28 = vpop.permute.xlu1 %3180 }
 0xa3d   :  { %v3186_v42 = vsel %vm990_vm3, %v3181_v28, 0 }
 0xa3e   :  { %v2839_v32 = vpack.c.bf16 %v2831_v17, %v2831_v17 }
 0xa3f   :  { %v6641_v35 = vpop.eup %6640 }
 0xa40   :  { %v2832_v18 = vmul.f32 %v6641_v35, %v7740_v26  ;;  %6223 = vmatmul.mubr.msk.bf16.vlgmr.msra.gmra.mrb[92].mxu1 %vm484_vm2, %v2839_v32 }
 0xa41   :  { %6233 = vmatpush3.bf16.msra.mxu1 %v3090_v36  ;;  %6234 = vmatprep.mubr.msk.bf16.mxu1 %vm6919_vm1, %v6917_v20 }
 0xa42   :  { %v2840_v24 = vpack.c.bf16 %v2832_v18, %v2832_v18  ;;  %6244 = vmatprep.subr.bf16.mxu1 %v6917_v20 }
 0xa44   :  { %6229 = vmatmul.mubr.msk.bf16.vlgmr.msra.gmra.mrb[88].mxu0 %vm484_vm2, %v2840_v24 }
 0xa45   :  { %6239 = vmatpush3.bf16.msra.mxu0 %v3138_v41  ;;  %6240 = vmatprep.mubr.msk.bf16.mxu0 %vm6919_vm1, %v6917_v20 }
 0xa46   :  { %6250 = vmatprep.subr.bf16.mxu0 %v6917_v20 }
 0xa65   :  { %v2813_v26 = vpop.xlane.xlu1 %2812 }
 0xa66   :  { %6642 = vrcp.f32 %v2813_v26 }
 0xa69   :  { %v2816_v34 = vpop.xlane.xlu0 %2815  ;;  %v3346_v49 = vpop.permute.xlu1 %3345 }
 0xa6a   :  { %6644 = vrcp.f32 %v2816_v34  ;;  %v3351_v22 = vsel %vm484_vm2, %v3346_v49, 0 }
 0xa6d   :  { %v3296_v44 = vpop.permute.xlu0 %3295 }
 0xa6e   :  { %v3301_v48 = vsel %vm484_vm2, %v3296_v44, 0 }
 0xa70   :  { %v6643_v45 = vpop.eup %6642 }
 0xa71   :  { %v2833_v47 = vmul.f32 %v6643_v45, %v7749_v38  ;;  %v3294_v29 = vpop.permute.xlu0 %3293 }
 0xa73   :  { %v2841_v52 = vpack.c.bf16 %v2833_v47, %v2833_v47 }
 0xa74   :  { %v6645_v56 = vpop.eup %6644 }
 0xa75   :  { %v2834_v46 = vmul.f32 %v6645_v56, %v7753_v54  ;;  %6235 = vmatmul.mubr.msk.bf16.vlgmr.msra.gmra.mrb[96].mxu1 %vm484_vm2, %v2841_v52  ;;  %v3396_v50 = vpop.permute.xlu0 %3395 }
 0xa76   :  { %6245 = vmatpush3.bf16.msra.mxu1 %v3186_v42  ;;  %6246 = vmatprep.mubr.msk.bf16.mxu1 %vm6919_vm1, %v6917_v20  ;;  %v3401_v54 = vsel %vm484_vm2, %v3396_v50, 0 }
 0xa77   :  { %v2842_v57 = vpack.c.bf16 %v2834_v46, %v2834_v46  ;;  %6256 = vmatprep.subr.bf16.mxu1 %v6917_v20 }
 0xa79   :  { %6241 = vmatmul.mubr.msk.bf16.vlgmr.msra.gmra.mrb[92].mxu0 %vm484_vm2, %v2842_v57  ;;  %v3394_v38 = vpop.permute.xlu0 %3393 }
 0xa7a   :  { %6251 = vmatpush3.bf16.xpose.msra.mxu0 %v3301_v48  ;;  %6252 = vmatprep.mubr.msk.bf16.mxu0 %vm6919_vm1, %v6917_v20 }
 0xa7b   :  { %6262 = vmatprep.subr.bf16.mxu0 %v6917_v20 }
 0xa7d   :  { %v3496_v59 = vpop.permute.xlu0 %3495 }
 0xa7e   :  { %v3501_v3 = vsel %vm484_vm2, %v3496_v59, 0 }
 0xa81   :  { %6253 = vmatmul.mubr.msk.bf16.vlgmr.msra.gmra.mrb[96].mxu0 %vm484_vm2, %v3294_v29  ;;  %v3494_v2 = vpop.permute.xlu0 %3493 }
 0xa82   :  { %6263 = vmatpush3.bf16.xpose.msra.mxu0 %v3401_v54  ;;  %6264 = vmatprep.mubr.msk.bf16.mxu0 %vm6919_vm1, %v6917_v20 }
 0xa83   :  { %6274 = vmatprep.subr.bf16.mxu0 %v6917_v20 }
 0xa85   :  { %v3596_v4 = vpop.permute.xlu0 %3595 }
 0xa86   :  { %v3601_v5 = vsel %vm484_vm2, %v3596_v4, 0 }
 0xa89   :  { %6265 = vmatmul.mubr.msk.bf16.vlgmr.msra.gmra.mrb[100].mxu0 %vm484_vm2, %v3394_v38  ;;  %v3594_v10 = vpop.permute.xlu0 %3593 }
 0xa8a   :  { %6275 = vmatpush3.bf16.xpose.msra.mxu0 %v3501_v3  ;;  %6276 = vmatprep.mubr.msk.bf16.mxu0 %vm6919_vm1, %v6917_v20 }
 0xa8b   :  { %6286 = vmatprep.subr.bf16.mxu0 %v6917_v20 }
 0xa91   :  { %6277 = vmatmul.mubr.msk.bf16.vlgmr.msra.gmra.mrb[104].mxu0 %vm484_vm2, %v3494_v2 }
 0xa92   :  { %6287 = vmatpush3.bf16.xpose.msra.mxu0 %v3601_v5  ;;  %6288 = vmatprep.mubr.msk.bf16.mxu0 %vm6919_vm1, %v6917_v20 }
 0xa93   :  { %6298 = vmatprep.subr.bf16.mxu0 %v6917_v20 }
 0xa99   :  { %6289 = vmatmul.mubr.msk.bf16.vlgmr.msra.gmra.mrb[108].mxu0 %vm484_vm2, %v3594_v10 }
 0xa9a   :  { %v2819_v12 = vpop.xlane.xlu1 %2818  ;;  %6300 = vmatprep.mubr.msk.bf16.mxu0 %vm6919_vm1, %v6917_v20 }
 0xa9b   :  { %6646 = vrcp.f32 %v2819_v12 }
 0xa9e   :  { %v3344_v13 = vpop.permute.xlu1 %3343 }
 0xaa2   :  { %v3446_v9 = vpop.permute.xlu1 %3445 }
 0xaa3   :  { %v3451_v6 = vsel %vm484_vm2, %v3446_v9, 0 }
 0xaa5   :  { %v6647_v14 = vpop.eup %6646 }
 0xaa6   :  { %v2835_v15 = vmul.f32 %v6647_v14, %v7779_v8  ;;  %v3444_v53 = vpop.permute.xlu1 %3443 }
 0xaa8   :  { %v2843_v19 = vpack.c.bf16 %v2835_v15, %v2835_v15 }
 0xaaa   :  { %6247 = vmatmul.mubr.msk.bf16.vlgmr.msra.gmra.mrb[100].mxu1 %vm484_vm2, %v2843_v19  ;;  %v3546_v27 = vpop.permute.xlu1 %3545 }
 0xaab   :  { %6257 = vmatpush3.bf16.xpose.msra.mxu1 %v3351_v22  ;;  %6258 = vmatprep.mubr.msk.bf16.mxu1 %vm6919_vm1, %v6917_v20  ;;  %v3551_v30 = vsel %vm484_vm2, %v3546_v27, 0 }
 0xaac   :  { %6268 = vmatprep.subr.bf16.mxu1 %v6917_v20 }
 0xaae   :  { %v3544_v8 = vpop.permute.xlu1 %3543 }
 0xab2   :  { %6259 = vmatmul.mubr.msk.bf16.vlgmr.msra.gmra.mrb[104].mxu1 %vm484_vm2, %v3344_v13  ;;  %v3646_v11 = vpop.permute.xlu1 %3645 }
 0xab3   :  { %6269 = vmatpush3.bf16.xpose.msra.mxu1 %v3451_v6  ;;  %6270 = vmatprep.mubr.msk.bf16.mxu1 %vm6919_vm1, %v6917_v20  ;;  %v3651_v17 = vsel %vm484_vm2, %v3646_v11, 0 }
 0xab4   :  { %6280 = vmatprep.subr.bf16.mxu1 %v6917_v20 }
 0xab6   :  { %v3644_v32 = vpop.permute.xlu1 %3643 }
 0xaba   :  { %6271 = vmatmul.mubr.msk.bf16.vlgmr.msra.gmra.mrb[108].mxu1 %vm484_vm2, %v3444_v53 }
 0xabb   :  { %6281 = vmatpush3.bf16.xpose.msra.mxu1 %v3551_v30  ;;  %6282 = vmatprep.mubr.msk.bf16.mxu1 %vm6919_vm1, %v6917_v20 }
 0xabc   :  { %6292 = vmatprep.subr.bf16.mxu1 %v6917_v20 }
 0xac2   :  { %6283 = vmatmul.mubr.msk.bf16.vlgmr.msra.gmra.mrb[112].mxu1 %vm484_vm2, %v3544_v8 }
 0xac3   :  { %6293 = vmatpush3.bf16.xpose.msra.mxu1 %v3651_v17  ;;  %6294 = vmatprep.mubr.msk.bf16.mxu1 %vm6919_vm1, %v6917_v20 }
 0xac4   :  { %6304 = vmatprep.subr.bf16.mxu1 %v6917_v20 }
 0xaca   :  { %6295 = vmatmul.mubr.msk.bf16.vlgmr.msra.gmra.mrb[116].mxu1 %vm484_vm2, %v3644_v32 }
 0xacb   :  { %6306 = vmatprep.mubr.msk.bf16.mxu1 %vm6919_vm1, %v6917_v20 }
 0xada   :  { %v7882_v35 = vpop.f32.mrb[80].mxu0 }
 0xadb   :  { %v6206_v36 = vpop.f32.mrb[81].mxu0 }
 0xadc   :  { %v2889_v18 = vpop.f32.mrb[82].mxu0 }
 0xadd   :  { %v6207_v55 = vpop.f32.mrb[83].mxu0 }
 0xae2   :  { %v7884_v24 = vpop.f32.mrb[84].mxu0 }
 0xae3   :  { %v6218_v41 = vpop.f32.mrb[85].mxu0 }
 0xae4   :  { %v2985_v28 = vpop.f32.mrb[86].mxu0 }
 0xae5   :  { %v6219_v26 = vpop.f32.mrb[87].mxu0 }
 0xb0b   :  { %v7886_v34 = vpop.f32.mrb[88].mxu1 }
 0xb0c   :  { %v6212_v44 = vpop.f32.mrb[89].mxu1 }
 0xb0d   :  { %v2937_v45 = vpop.f32.mrb[90].mxu1 }
 0xb0e   :  { %v6213_v47 = vpop.f32.mrb[91].mxu1 }
 0xb13   :  { %v7888_v29 = vpop.f32.mrb[92].mxu1 }
 0xb14   :  { %v6224_v52 = vpop.f32.mrb[93].mxu1 }
 0xb15   :  { %v3033_v56 = vpop.f32.mrb[94].mxu1 }
 0xb16   :  { %v6225_v42 = vpop.f32.mrb[95].mxu1 }
 0xb17   :  { %v7890_v46 = vpop.f32.mrb[88].mxu0 }
 0xb18   :  { %v6230_v50 = vpop.f32.mrb[89].mxu0 }
 0xb19   :  { %v3081_v57 = vpop.f32.mrb[90].mxu0 }
 0xb1a   :  { %v6231_v48 = vpop.f32.mrb[91].mxu0 }
 0xb48   :  { %v7892_v38 = vpop.f32.mrb[96].mxu1 }
 0xb49   :  { %v6236_v54 = vpop.f32.mrb[97].mxu1 }
 0xb4a   :  { %v3129_v59 = vpop.f32.mrb[98].mxu1 }
 0xb4b   :  { %v6237_v2 = vpop.f32.mrb[99].mxu1 }
 0xb4c   :  { %v7894_v3 = vpop.f32.mrb[92].mxu0 }
 0xb4d   :  { %v6242_v4 = vpop.f32.mrb[93].mxu0 }
 0xb4e   :  { %v3177_v5 = vpop.f32.mrb[94].mxu0 }
 0xb4f   :  { %v6243_v49 = vpop.f32.mrb[95].mxu0 }
 0xb54   :  { %v3337_v10 = vpop.f32.mrb[96].mxu0 }
 0xb55   :  { %v7896_v12 = vmul.f32 0.35355338, %v3337_v10  ;;  %v6254_v13 = vpop.f32.mrb[97].mxu0 }
 0xb56   :  { %v3340_v14 = vpop.f32.mrb[98].mxu0 }
 0xb57   :  { %v6255_v15 = vpop.f32.mrb[99].mxu0  ;;  %v3701_v9 = vsel %vm484_vm2, %v7896_v12, -inf }
 0xb58   :  { %3702 = vmax.xlane.f32.xlu0 %v3701_v9 }
 0xb5c   :  { %v3437_v19 = vpop.f32.mrb[100].mxu0 }
 0xb5d   :  { %v7900_v22 = vmul.f32 0.35355338, %v3437_v19  ;;  %v6266_v53 = vpop.f32.mrb[101].mxu0 }
 0xb5e   :  { %v3440_v6 = vpop.f32.mrb[102].mxu0 }
 0xb5f   :  { %v6267_v27 = vpop.f32.mrb[103].mxu0  ;;  %v3707_v8 = vsel %vm484_vm2, %v7900_v22, -inf }
 0xb60   :  { %3708 = vmax.xlane.f32.xlu0 %v3707_v8 }
 0xb64   :  { %v3537_v30 = vpop.f32.mrb[104].mxu0 }
 0xb65   :  { %v6278_v11 = vpop.f32.mrb[105].mxu0  ;;  %v3697_v4 = vmul.f32 0.35355338, %v3537_v30 }
 0xb66   :  { %v3540_v17 = vpop.f32.mrb[106].mxu0 }
 0xb67   :  { %v6279_v32 = vpop.f32.mrb[107].mxu0  ;;  %v3713_v13 = vsel %vm484_vm2, %v3697_v4, -inf }
 0xb6c   :  { %v3637_v36 = vpop.f32.mrb[108].mxu0 }
 0xb6d   :  { %v6290_v18 = vpop.f32.mrb[109].mxu0  ;;  %v3699_v10 = vmul.f32 0.35355338, %v3637_v36 }
 0xb6e   :  { %v3640_v55 = vpop.f32.mrb[110].mxu0 }
 0xb6f   :  { %v6291_v41 = vpop.f32.mrb[111].mxu0  ;;  %v3719_v6 = vsel %vm484_vm2, %v3699_v10, -inf }
 0xb7d   :  { %v7904_v28 = vpop.f32.mrb[100].mxu1 }
 0xb7e   :  { %v6248_v26 = vpop.f32.mrb[101].mxu1 }
 0xb7f   :  { %v3225_v44 = vpop.f32.mrb[102].mxu1 }
 0xb80   :  { %v6249_v45 = vpop.f32.mrb[103].mxu1 }
 0xb85   :  { %v3387_v47 = vpop.f32.mrb[104].mxu1 }
 0xb86   :  { %v3694_v52 = vmul.f32 0.35355338, %v3387_v47  ;;  %v6260_v56 = vpop.f32.mrb[105].mxu1 }
 0xb87   :  { %v3390_v42 = vpop.f32.mrb[106].mxu1 }
 0xb88   :  { %v6261_v50 = vpop.f32.mrb[107].mxu1  ;;  %v3704_v57 = vsel %vm484_vm2, %v3694_v52, -inf }
 0xb89   :  { %3705 = vmax.xlane.f32.xlu1 %v3704_v57 }
 0xb8d   :  { %v3487_v48 = vpop.f32.mrb[108].mxu1 }
 0xb8e   :  { %v7907_v54 = vmul.f32 0.35355338, %v3487_v48  ;;  %v6272_v59 = vpop.f32.mrb[109].mxu1 }
 0xb8f   :  { %v3490_v2 = vpop.f32.mrb[110].mxu1 }
 0xb90   :  { %v6273_v5 = vpop.f32.mrb[111].mxu1  ;;  %v3710_v49 = vsel %vm484_vm2, %v7907_v54, -inf }
 0xb91   :  { %3711 = vmax.xlane.f32.xlu0 %v3710_v49 }
 0xb95   :  { %3714 = vmax.xlane.f32.xlu0 %v3713_v13  ;;  %v3587_v14 = vpop.f32.mrb[112].mxu1 }
 0xb96   :  { %v7912_v15 = vmul.f32 0.35355338, %v3587_v14  ;;  %v6284_v9 = vpop.f32.mrb[113].mxu1 }
 0xb97   :  { %v3590_v19 = vpop.f32.mrb[114].mxu1 }
 0xb98   :  { %v6285_v53 = vpop.f32.mrb[115].mxu1  ;;  %v3716_v27 = vsel %vm484_vm2, %v7912_v15, -inf }
 0xb99   :  { %3720 = vmax.xlane.f32.xlu0 %v3719_v6  ;;  %3717 = vmax.xlane.f32.xlu1 %v3716_v27 }
 0xb9d   :  { %v3687_v8 = vpop.f32.mrb[116].mxu1 }
 0xb9e   :  { %v6296_v30 = vpop.f32.mrb[117].mxu1  ;;  %v7923_v32 = vmul.f32 0.35355338, %v3687_v8 }
 0xb9f   :  { %v3690_v11 = vpop.f32.mrb[118].mxu1 }
 0xba0   :  { %v6297_v17 = vpop.f32.mrb[119].mxu1  ;;  %v3722_v36 = vsel %vm484_vm2, %v7923_v32, -inf  ;;  %v5738_v11 = vpack.c.bf16 %v7684_v23, %v7684_v23 }
 0xbaa   :  { %3845 = vrot.lane.b32.xlu1 %v7192_v58, %s6929_s29 }
 0xbae   :  { %3893 = vrot.lane.b32.xlu1 %v7202_v61, %s6929_s29 }
 0xbaf   :  { %3797 = vrot.lane.b32.xlu0 %v7190_v39, %s6929_s29 }
 0xbd2   :  { %3723 = vmax.xlane.f32.xlu1 %v3722_v36 }
 0xbe3   :  { %3941 = vrot.lane.b32.xlu1 %v7212_v63, %s6929_s29 }
 0xbe5   :  { %v3703_v18 = vpop.xlane.xlu0 %3702 }
 0xbe6   :  { %v3725_v55 = vsub.f32 %v7896_v12, %v3703_v18 }
 0xbe8   :  { %v3733_v41 = vmul.f32 1.442695, %v3725_v55 }
 0xbea   :  { %6648 = vpow2.f32 %v3733_v41  ;;  %v5748_v41 = vpack.c.bf16 %v7884_v24, %v7884_v24  ;;  %v5739_v24 = vpack.c.bf16 %v7688_v33, %v7688_v33  ;;  %v5745_v33 = vpack.c.bf16 %v7703_v16, %v7703_v16 }
 0xbeb   :  { %v5749_v16 = vpack.c.bf16 %v7888_v29, %v7888_v29  ;;  %v5753_v29 = vpack.c.bf16 %v7904_v28, %v7904_v28 }
 0xbed   :  { %v3709_v58 = vpop.xlane.xlu0 %3708 }
 0xbee   :  { %v3727_v61 = vsub.f32 %v7900_v22, %v3709_v58  ;;  %v5752_v58 = vpack.c.bf16 %v7894_v3, %v7894_v3  ;;  %v5741_v3 = vpack.c.bf16 %v7690_v40, %v7690_v40  ;;  %v5747_v40 = vpack.c.bf16 %v7886_v34, %v7886_v34 }
 0xbf0   :  { %v3737_v26 = vmul.f32 1.442695, %v3727_v61 }
 0xbf2   :  { %6650 = vpow2.f32 %v3737_v26  ;;  %v5743_v26 = vpack.c.bf16 %v7694_v21, %v7694_v21 }
 0xbf4   :  { %v7931_v39 = vpop.eup %6648 }
 0xbf5   :  { %v3749_v44 = vsel %vm484_vm2, %v7931_v39, 0.0 }
 0xbf6   :  { %3750 = vadd.xlane.f32.xlu0 %v3749_v44 }
 0xbfc   :  { %v7935_v45 = vpop.eup %6650 }
 0xbfd   :  { %v3755_v63 = vsel %vm484_vm2, %v7935_v45, 0.0 }
 0xbfe   :  { %3756 = vadd.xlane.f32.xlu0 %v3755_v63 }
 0xc14   :  { %3989 = vrot.lane.b32.xlu0 %v7200_v60, %s6929_s29 }
 0xc16   :  { %v3706_v12 = vpop.xlane.xlu1 %3705 }
 0xc17   :  { %v3726_v47 = vsub.f32 %v3694_v52, %v3706_v12 }
 0xc19   :  { %v3735_v22 = vmul.f32 1.442695, %v3726_v47 }
 0xc1b   :  { %6652 = vpow2.f32 %v3735_v22 }
 0xc1e   :  { %v3712_v56 = vpop.xlane.xlu0 %3711 }
 0xc1f   :  { %v3728_v6 = vsub.f32 %v7907_v54, %v3712_v56  ;;  %v5742_v54 = vpack.c.bf16 %v7692_v43, %v7692_v43  ;;  %v5751_v56 = vpack.c.bf16 %v7892_v38, %v7892_v38 }
 0xc21   :  { %v3739_v27 = vmul.f32 1.442695, %v3728_v6 }
 0xc22   :  { %v3715_v42 = vpop.xlane.xlu0 %3714 }
 0xc23   :  { %v3729_v50 = vsub.f32 %v3697_v4, %v3715_v42 }
 0xc25   :  { %v7941_v57 = vpop.eup %6652  ;;  %v3741_v48 = vmul.f32 1.442695, %v3729_v50 }
 0xc26   :  { %v3721_v59 = vpop.xlane.xlu0 %3720  ;;  %v3718_v2 = vpop.xlane.xlu1 %3717  ;;  %v3752_v5 = vsel %vm484_vm2, %v7941_v57, 0.0 }
 0xc27   :  { %6654 = vpow2.f32 %v3741_v48  ;;  %v3731_v49 = vsub.f32 %v3699_v10, %v3721_v59  ;;  %3753 = vadd.xlane.f32.xlu1 %v3752_v5  ;;  %v3730_v8 = vsub.f32 %v7912_v15, %v3718_v2 }
 0xc29   :  { %v3745_v13 = vmul.f32 1.442695, %v3731_v49  ;;  %v3743_v30 = vmul.f32 1.442695, %v3730_v8 }
 0xc2a   :  { %v3798_v60 = vpop.permute.xlu0 %3797  ;;  %v3846_v14 = vpop.permute.xlu1 %3845 }
 0xc2b   :  { %6656 = vpow2.f32 %v3745_v13  ;;  %v3803_v52 = vsel %vm990_vm3, %v3798_v60, 0  ;;  %v3851_v9 = vsel %vm990_vm3, %v3846_v14, 0 }
 0xc2c   :  { %6299 = vmatpush3.bf16.msra.mxu0 %v3803_v52  ;;  %6305 = vmatpush3.bf16.msra.mxu1 %v3851_v9  ;;  %6658 = vpow2.f32 %v3739_v27 }
 0xc2d   :  { %6310 = vmatprep.subr.bf16.mxu0 %v6917_v20  ;;  %6316 = vmatprep.subr.bf16.mxu1 %v6917_v20  ;;  %6660 = vpow2.f32 %v3743_v30 }
 0xc2e   :  { %v3894_v23 = vpop.permute.xlu1 %3893 }
 0xc2f   :  { %v3899_v47 = vsel %vm990_vm3, %v3894_v23, 0 }
 0xc31   :  { %v7949_v4 = vpop.eup %6654 }
 0xc32   :  { %v3761_v10 = vsel %vm484_vm2, %v7949_v4, 0.0 }
 0xc33   :  { %3762 = vadd.xlane.f32.xlu0 %v3761_v10 }
 0xc35   :  { %v7953_v19 = vpop.eup %6656 }
 0xc36   :  { %v3767_v53 = vsel %vm484_vm2, %v7953_v19, 0.0  ;;  %v7971_v15 = vpop.eup %6658 }
 0xc37   :  { %3768 = vadd.xlane.f32.xlu0 %v3767_v53  ;;  %v3758_v17 = vsel %vm484_vm2, %v7971_v15, 0.0  ;;  %v7978_v36 = vpop.eup %6660 }
 0xc38   :  { %4037 = vrot.lane.b32.xlu1 %v7220_v0, %s6929_s29  ;;  %v5740_v0 = vpack.c.bf16 %v7686_v31, %v7686_v31  ;;  %v5746_v31 = vpack.c.bf16 %v7882_v35, %v7882_v35  ;;  %v3764_v18 = vsel %vm484_vm2, %v7978_v36, 0.0  ;;  %v5750_v35 = vpack.c.bf16 %v7890_v46, %v7890_v46 }
 0xc4d   :  { %4085 = vrot.lane.b32.xlu0 %v7210_v62, %s6929_s29  ;;  %v5744_v62 = vpack.c.bf16 %v7696_v51, %v7696_v51 }
 0xc51   :  { %2307 = vrot.lane.b32.xlu0 %v5738_v11, %s6930_s30 }
 0xc55   :  { %2311 = vrot.lane.b32.xlu0 %v5740_v0, %s6930_s30 }
 0xc59   :  { %2315 = vrot.lane.b32.xlu0 %v5742_v54, %s6930_s30 }
 0xc5c   :  { %3759 = vadd.xlane.f32.xlu1 %v3758_v17 }
 0xc5d   :  { %2319 = vrot.lane.b32.xlu0 %v5744_v62, %s6930_s30 }
 0xc5f   :  { %v3724_v43 = vpop.xlane.xlu1 %3723 }
 0xc60   :  { %v3732_v55 = vsub.f32 %v7923_v32, %v3724_v43  ;;  %3765 = vadd.xlane.f32.xlu1 %v3764_v18 }
 0xc61   :  { %3260 = vrot.lane.b32.xlu0 %v5746_v31, %s6931_s14 }
 0xc62   :  { %v3747_v51 = vmul.f32 1.442695, %v3732_v55 }
 0xc64   :  { %6662 = vpow2.f32 %v3747_v51 }
 0xc65   :  { %3264 = vrot.lane.b32.xlu0 %v5748_v41, %s6931_s14 }
 0xc69   :  { %3268 = vrot.lane.b32.xlu0 %v5750_v35, %s6931_s14 }
 0xc6d   :  { %3272 = vrot.lane.b32.xlu0 %v5752_v58, %s6931_s14 }
 0xc6e   :  { %v7996_v32 = vpop.eup %6662 }
 0xc6f   :  { %v3770_v61 = vsel %vm484_vm2, %v7996_v32, 0.0 }
 0xc70   :  { %3771 = vadd.xlane.f32.xlu1 %v3770_v61 }
 0xc81   :  { %4133 = vrot.lane.b32.xlu1 %v7228_v1, %s6929_s29 }
 0xc83   :  { %v3751_v46 = vpop.xlane.xlu0 %3750 }
 0xc84   :  { %6664 = vrcp.f32 %v3751_v46 }
 0xc85   :  { %2309 = vrot.lane.b32.xlu1 %v5739_v24, %s6930_s30 }
 0xc89   :  { %2313 = vrot.lane.b32.xlu1 %v5741_v3, %s6930_s30 }
 0xc8b   :  { %v3757_v44 = vpop.xlane.xlu0 %3756 }
 0xc8c   :  { %6666 = vrcp.f32 %v3757_v44 }
 0xc8d   :  { %2317 = vrot.lane.b32.xlu1 %v5743_v26, %s6930_s30 }
 0xc8e   :  { %v6665_v1 = vpop.eup %6664 }
 0xc8f   :  { %v3781_v63 = vmul.f32 %v6665_v1, %v7931_v39  ;;  %v3990_v22 = vpop.permute.xlu0 %3989 }
 0xc90   :  { %v3995_v42 = vsel %vm990_vm3, %v3990_v22, 0 }
 0xc91   :  { %2321 = vrot.lane.b32.xlu1 %v5745_v33, %s6930_s30  ;;  %v3789_v12 = vpack.c.bf16 %v3781_v63, %v3781_v63 }
 0xc93   :  { %6301 = vmatmul.mubr.msk.bf16.vlgmr.msra.gmra.mrb[112].mxu0 %vm484_vm2, %v3789_v12 }
 0xc94   :  { %6311 = vmatpush3.bf16.msra.mxu0 %v3899_v47  ;;  %6312 = vmatprep.mubr.msk.bf16.mxu0 %vm6919_vm1, %v6917_v20 }
 0xc95   :  { %3262 = vrot.lane.b32.xlu1 %v5747_v40, %s6931_s14  ;;  %6322 = vmatprep.subr.bf16.mxu0 %v6917_v20 }
 0xc96   :  { %v6667_v21 = vpop.eup %6666 }
 0xc97   :  { %v3783_v39 = vmul.f32 %v6667_v21, %v7935_v45  ;;  %v3942_v45 = vpop.permute.xlu1 %3941 }
 0xc98   :  { %v3947_v5 = vsel %vm990_vm3, %v3942_v45, 0 }
 0xc99   :  { %3266 = vrot.lane.b32.xlu1 %v5749_v16, %s6931_s14  ;;  %v3791_v34 = vpack.c.bf16 %v3783_v39, %v3783_v39 }
 0xc9b   :  { %6313 = vmatmul.mubr.msk.bf16.vlgmr.msra.gmra.mrb[116].mxu0 %vm484_vm2, %v3791_v34 }
 0xc9c   :  { %6323 = vmatpush3.bf16.msra.mxu0 %v3995_v42  ;;  %6324 = vmatprep.mubr.msk.bf16.mxu0 %vm6919_vm1, %v6917_v20 }
 0xc9d   :  { %3270 = vrot.lane.b32.xlu1 %v5751_v56, %s6931_s14  ;;  %6334 = vmatprep.subr.bf16.mxu0 %v6917_v20 }
 0xca1   :  { %3274 = vrot.lane.b32.xlu1 %v5753_v29, %s6931_s14 }
 0xcb4   :  { %v3754_v50 = vpop.xlane.xlu1 %3753 }
 0xcb5   :  { %6668 = vrcp.f32 %v3754_v50 }
 0xcb8   :  { %v4038_v0 = vpop.permute.xlu1 %4037 }
 0xcb9   :  { %v4043_v18 = vsel %vm990_vm3, %v4038_v0, 0 }
 0xcbf   :  { %v6669_v38 = vpop.eup %6668 }
 0xcc0   :  { %v3782_v48 = vmul.f32 %v6669_v38, %v7941_v57  ;;  %v3763_v59 = vpop.xlane.xlu0 %3762 }
 0xcc1   :  { %6670 = vrcp.f32 %v3763_v59 }
 0xcc2   :  { %v3790_v2 = vpack.c.bf16 %v3782_v48, %v3782_v48 }
 0xcc4   :  { %v3769_v49 = vpop.xlane.xlu0 %3768  ;;  %6307 = vmatmul.mubr.msk.bf16.vlgmr.msra.gmra.mrb[120].mxu1 %vm484_vm2, %v3790_v2 }
 0xcc5   :  { %6672 = vrcp.f32 %v3769_v49  ;;  %6317 = vmatpush3.bf16.msra.mxu1 %v3947_v5  ;;  %6318 = vmatprep.mubr.msk.bf16.mxu1 %vm6919_vm1, %v6917_v20 }
 0xcc6   :  { %6328 = vmatprep.subr.bf16.mxu1 %v6917_v20 }
 0xcc8   :  { %v4086_v28 = vpop.permute.xlu0 %4085 }
 0xcc9   :  { %v4091_v9 = vsel %vm990_vm3, %v4086_v28, 0 }
 0xccb   :  { %v6671_v13 = vpop.eup %6670 }
 0xccc   :  { %v3785_v57 = vmul.f32 %v6671_v13, %v7949_v4  ;;  %v2308_v60 = vpop.permute.xlu0 %2307 }
 0xccd   :  { %2332 = vst.msk [vmem:[#allocation2] sm:$0xf] %vm2331_vm5, %v2308_v60 }
 0xcce   :  { %v3793_v14 = vpack.c.bf16 %v3785_v57, %v3785_v57 }
 0xccf   :  { %v6673_v52 = vpop.eup %6672 }
 0xcd0   :  { %v2312_v10 = vpop.permute.xlu0 %2311  ;;  %6325 = vmatmul.mubr.msk.bf16.vlgmr.msra.gmra.mrb[120].mxu0 %vm484_vm2, %v3793_v14  ;;  %v3787_v53 = vmul.f32 %v6673_v52, %v7953_v19 }
 0xcd1   :  { %2334 = vst.msk [vmem:[#allocation2 + $0x8] sm:$0xf] %vm2331_vm5, %v2312_v10  ;;  %6335 = vmatpush3.bf16.msra.mxu0 %v4091_v9  ;;  %6336 = vmatprep.mubr.msk.bf16.mxu0 %vm6919_vm1, %v6917_v20 }
 0xcd2   :  { %v3795_v4 = vpack.c.bf16 %v3787_v53, %v3787_v53 }
 0xcd4   :  { %v2316_v6 = vpop.permute.xlu0 %2315 }
 0xcd5   :  { %2336 = vst.msk [vmem:[#allocation2 + $0x10] sm:$0xf] %vm2331_vm5, %v2316_v6 }
 0xcd8   :  { %v2320_v27 = vpop.permute.xlu0 %2319  ;;  %6337 = vmatmul.mubr.msk.bf16.vlgmr.msra.gmra.mrb[124].mxu0 %vm484_vm2, %v3795_v4 }
 0xcd9   :  { %2338 = vst.msk [vmem:[#allocation2 + $0x18] sm:$0xf] %vm2331_vm5, %v2320_v27 }
 0xcdc   :  { %v3261_v8 = vpop.permute.xlu0 %3260 }
 0xcdd   :  { %3285 = vst.msk [vmem:[#allocation2] sm:$0xf] %vm3284_vm6, %v3261_v8 }
 0xce0   :  { %v3265_v30 = vpop.permute.xlu0 %3264 }
 0xce1   :  { %3287 = vst.msk [vmem:[#allocation2 + $0x8] sm:$0xf] %vm3284_vm6, %v3265_v30  ;;  %v6520_v30 = vld [vmem:[#allocation6] sm:$0xff]  }
 0xce2   :  { %6346 = vmatprep.subr.bf16.mxu0 %v6520_v30 }
 0xce3   :  { %6347 = vmatpush3.bf16.msra.mxu0 %v6520_v30 }
 0xce4   :  { %v3269_v11 = vpop.permute.xlu0 %3268 }
 0xce5   :  { %3289 = vst.msk [vmem:[#allocation2 + $0x10] sm:$0xf] %vm3284_vm6, %v3269_v11  ;;  %v6521_v11 = vld [vmem:[#allocation6 + $0x8] sm:$0xff]  }
 0xce6   :  { %6348 = vmatprep.subr.bf16.mxu0 %v6521_v11 }
 0xce7   :  { %6349 = vmatpush3.bf16.msra.mxu0 %v6521_v11 }
 0xce8   :  { %v3273_v19 = vpop.permute.xlu0 %3272 }
 0xce9   :  { %3291 = vst.msk [vmem:[#allocation2 + $0x18] sm:$0xf] %vm3284_vm6, %v3273_v19  ;;  %v3760_v54 = vpop.xlane.xlu1 %3759 }
 0xcea   :  { %6674 = vrcp.f32 %v3760_v54 }
 0xced   :  { %v3766_v62 = vpop.xlane.xlu1 %3765 }
 0xcee   :  { %6676 = vrcp.f32 %v3766_v62 }
 0xcf4   :  { %v6675_v23 = vpop.eup %6674 }
 0xcf5   :  { %v3784_v17 = vmul.f32 %v6675_v23, %v7971_v15 }
 0xcf7   :  { %v3792_v31 = vpack.c.bf16 %v3784_v17, %v3784_v17 }
 0xcf8   :  { %v6677_v43 = vpop.eup %6676 }
 0xcf9   :  { %6319 = vmatmul.mubr.msk.bf16.vlgmr.msra.gmra.mrb[124].mxu1 %vm484_vm2, %v3792_v31  ;;  %v3786_v55 = vmul.f32 %v6677_v43, %v7978_v36 }
 0xcfa   :  { %6329 = vmatpush3.bf16.msra.mxu1 %v4043_v18  ;;  %6330 = vmatprep.mubr.msk.bf16.mxu1 %vm6919_vm1, %v6917_v20 }
 0xcfb   :  { %6340 = vmatprep.subr.bf16.mxu1 %v6917_v20  ;;  %v3794_v41 = vpack.c.bf16 %v3786_v55, %v3786_v55 }
 0xcfd   :  { %v3772_v51 = vpop.xlane.xlu1 %3771 }
 0xcfe   :  { %6678 = vrcp.f32 %v3772_v51 }
 0xd01   :  { %6331 = vmatmul.mubr.msk.bf16.vlgmr.msra.gmra.mrb[128].mxu1 %vm484_vm2, %v3794_v41  ;;  %v4134_v15 = vpop.permute.xlu1 %4133 }
 0xd02   :  { %v4139_v35 = vsel %vm990_vm3, %v4134_v15, 0  ;;  %6342 = vmatprep.mubr.msk.bf16.mxu1 %vm6919_vm1, %v6917_v20 }
 0xd03   :  { %6341 = vmatpush3.bf16.msra.mxu1 %v4139_v35 }
 0xd05   :  { %v2310_v58 = vpop.permute.xlu1 %2309 }
 0xd06   :  { %2333 = vst.msk [vmem:[#allocation2 + $0x4] sm:$0xf] %vm2331_vm5, %v2310_v58 }
 0xd08   :  { %v6679_v61 = vpop.eup %6678 }
 0xd09   :  { %v3788_v36 = vmul.f32 %v6679_v61, %v7996_v32  ;;  %v2314_v24 = vpop.permute.xlu1 %2313 }
 0xd0a   :  { %2335 = vst.msk [vmem:[#allocation2 + $0xc] sm:$0xf] %vm2331_vm5, %v2314_v24 }
 0xd0b   :  { %v3796_v46 = vpack.c.bf16 %v3788_v36, %v3788_v36 }
 0xd0d   :  { %6343 = vmatmul.mubr.msk.bf16.vlgmr.msra.gmra.mrb[132].mxu1 %vm484_vm2, %v3796_v46  ;;  %v2318_v3 = vpop.permute.xlu1 %2317 }
 0xd0e   :  { %2337 = vst.msk [vmem:[#allocation2 + $0x14] sm:$0xf] %vm2331_vm5, %v2318_v3 }
 0xd11   :  { %v2322_v26 = vpop.permute.xlu1 %2321 }
 0xd12   :  { %2339 = vst.msk [vmem:[#allocation2 + $0x1c] sm:$0xf] %vm2331_vm5, %v2322_v26 }
 0xd15   :  { %v3263_v20 = vpop.permute.xlu1 %3262 }
 0xd16   :  { %3286 = vst.msk [vmem:[#allocation2 + $0x4] sm:$0xf] %vm3284_vm6, %v3263_v20 }
 0xd19   :  { %v3267_v44 = vpop.permute.xlu1 %3266 }
 0xd1a   :  { %3288 = vst.msk [vmem:[#allocation2 + $0xc] sm:$0xf] %vm3284_vm6, %v3267_v44 }
 0xd1d   :  { %v3271_v1 = vpop.permute.xlu1 %3270 }
 0xd1e   :  { %3290 = vst.msk [vmem:[#allocation2 + $0x14] sm:$0xf] %vm3284_vm6, %v3271_v1 }
 0xd21   :  { %v3275_v32 = vpop.permute.xlu1 %3274 }
 0xd22   :  { %3292 = vst.msk [vmem:[#allocation2 + $0x1c] sm:$0xf] %vm3284_vm6, %v3275_v32 }
 0xd66   :  { %v3839_v33 = vpop.f32.mrb[112].mxu0 }
 0xd67   :  { %v5754_v63 = vpack.c.bf16 %v3839_v33, %v3839_v33  ;;  %v6302_v12 = vpop.f32.mrb[113].mxu0 }
 0xd68   :  { %v3842_v40 = vpop.f32.mrb[114].mxu0 }
 0xd69   :  { %4213 = vrot.lane.b32.xlu0 %v5754_v63, %s6932_s7  ;;  %v6303_v47 = vpop.f32.mrb[115].mxu0 }
 0xd6e   :  { %v3935_v21 = vpop.f32.mrb[116].mxu0 }
 0xd6f   :  { %v5756_v16 = vpack.c.bf16 %v3935_v21, %v3935_v21  ;;  %v6314_v39 = vpop.f32.mrb[117].mxu0 }
 0xd70   :  { %v3938_v22 = vpop.f32.mrb[118].mxu0 }
 0xd71   :  { %4217 = vrot.lane.b32.xlu0 %v5756_v16, %s6932_s7  ;;  %v6315_v34 = vpop.f32.mrb[119].mxu0 }
 0xd97   :  { %v3887_v56 = vpop.f32.mrb[120].mxu1 }
 0xd98   :  { %v5755_v42 = vpack.c.bf16 %v3887_v56, %v3887_v56  ;;  %v6308_v29 = vpop.f32.mrb[121].mxu1 }
 0xd99   :  { %v3890_v45 = vpop.f32.mrb[122].mxu1 }
 0xd9a   :  { %4215 = vrot.lane.b32.xlu1 %v5755_v42, %s6932_s7  ;;  %v6309_v50 = vpop.f32.mrb[123].mxu1 }
 0xda3   :  { %v4031_v38 = vpop.f32.mrb[120].mxu0 }
 0xda4   :  { %v5758_v48 = vpack.c.bf16 %v4031_v38, %v4031_v38  ;;  %v6326_v59 = vpop.f32.mrb[121].mxu0 }
 0xda5   :  { %v4034_v2 = vpop.f32.mrb[122].mxu0 }
 0xda6   :  { %4221 = vrot.lane.b32.xlu0 %v5758_v48, %s6932_s7  ;;  %v6327_v5 = vpop.f32.mrb[123].mxu0 }
 0xdab   :  { %v4127_v49 = vpop.f32.mrb[124].mxu0 }
 0xdac   :  { %v5760_v28 = vpack.c.bf16 %v4127_v49, %v4127_v49  ;;  %v6338_v13 = vpop.f32.mrb[125].mxu0 }
 0xdad   :  { %v4130_v57 = vpop.f32.mrb[126].mxu0 }
 0xdae   :  { %4225 = vrot.lane.b32.xlu0 %v5760_v28, %s6932_s7  ;;  %v6339_v60 = vpop.f32.mrb[127].mxu0 }
 0xdcc   :  { %v3983_v14 = vpop.f32.mrb[124].mxu1 }
 0xdcd   :  { %v5757_v52 = vpack.c.bf16 %v3983_v14, %v3983_v14  ;;  %v6320_v9 = vpop.f32.mrb[125].mxu1 }
 0xdce   :  { %v3986_v10 = vpop.f32.mrb[126].mxu1 }
 0xdcf   :  { %4219 = vrot.lane.b32.xlu1 %v5757_v52, %s6932_s7  ;;  %v6321_v53 = vpop.f32.mrb[127].mxu1  ;;  %v5667_v10 = vld [vmem:[#allocation8] ss:$0 sm:$0xff] }
 0xdd4   :  { %v4079_v6 = vpop.f32.mrb[128].mxu1 }
 0xdd5   :  { %v5759_v4 = vpack.c.bf16 %v4079_v6, %v4079_v6  ;;  %v6332_v27 = vpop.f32.mrb[129].mxu1 }
 0xdd6   :  { %v4082_v8 = vpop.f32.mrb[130].mxu1 }
 0xdd7   :  { %4223 = vrot.lane.b32.xlu1 %v5759_v4, %s6932_s7  ;;  %v6333_v0 = vpop.f32.mrb[131].mxu1  ;;  %v6761_v4 = vld [vmem:[%s8408_s0] sm:$0xff] }
 0xdd8   :  { %v6762_v0 = vld [vmem:[%s8408_s0 + $0x8] sm:$0xff] }
 0xddb   :  { %v4214_v19 = vpop.permute.xlu0 %4213 }
 0xddc   :  { %4238 = vst.msk [vmem:[#allocation2] sm:$0xf] %vm4237_vm7, %v4214_v19 }
 0xde0   :  { %v4175_v54 = vpop.f32.mrb[132].mxu1 }
 0xde1   :  { %v5761_v62 = vpack.c.bf16 %v4175_v54, %v4175_v54  ;;  %v6344_v23 = vpop.f32.mrb[133].mxu1 }
 0xde2   :  { %v4178_v17 = vpop.f32.mrb[134].mxu1 }
 0xde3   :  { %v4218_v31 = vpop.permute.xlu0 %4217  ;;  %4227 = vrot.lane.b32.xlu1 %v5761_v62, %s6932_s7  ;;  %v6345_v43 = vpop.f32.mrb[135].mxu1  ;;  %v6763_v62 = vld [vmem:[%s8408_s0 + $0x18] sm:$0xff] }
 0xde4   :  { %4240 = vst.msk [vmem:[#allocation2 + $0x8] sm:$0xf] %vm4237_vm7, %v4218_v31 }
 0xe0c   :  { %v4216_v18 = vpop.permute.xlu1 %4215 }
 0xe0d   :  { %4239 = vst.msk [vmem:[#allocation2 + $0x4] sm:$0xf] %vm4237_vm7, %v4216_v18 }
 0xe18   :  { %v4222_v55 = vpop.permute.xlu0 %4221 }
 0xe19   :  { %4242 = vst.msk [vmem:[#allocation2 + $0x10] sm:$0xf] %vm4237_vm7, %v4222_v55 }
 0xe20   :  { %v4226_v51 = vpop.permute.xlu0 %4225  ;;  %v6522_v58 = vld [vmem:[#allocation2] ss:$16 sps:$4 sm:$0xff]  }
 0xe21   :  { %4244 = vst.msk [vmem:[#allocation2 + $0x18] sm:$0xf] %vm4237_vm7, %v4226_v51  ;;  %v4261_v24 = vrot.slane %v6522_v58, %v7164_v7 }
 0xe28   :  { %v6523_v35 = vld [vmem:[#allocation2 + $0x8] ss:$16 sps:$4 sm:$0xff]  }
 0xe29   :  { %v4269_v36 = vrot.slane %v6523_v35, %v7164_v7 }
 0xe2b   :  { %v4270_v46 = vcombine.low %v4261_v24, %v4269_v36  ;;  %v4271_v44 = vcombine.high %v4261_v24, %v4269_v36  ;;  %v6765_v36 = vld [vmem:[%s8408_s0 + $0x38] sm:$0xff] }
 0xe2d   :  { %v4278_v20 = vrot.slane %v4270_v46, %v7168_v25  ;;  %v4285_v40 = vrot.slane %v4271_v44, %v7168_v25  ;;  %v6766_v46 = vld [vmem:[%s8408_s0 + $0x28] sm:$0xff] }
 0xe2f   :  { %v4286_v12 = vcombine.high %v4278_v20, %v6918_v37  ;;  %v4325_v16 = vshrl.u32 %v4278_v20, 16  ;;  %v4337_v56 = vshrl.u32 %v4285_v40, 16  ;;  %v4287_v5 = vcombine.high %v4285_v40, %v6918_v37 }
 0xe31   :  { %v4331_v34 = vshrl.u32 %v4286_v12, 16  ;;  %v4343_v57 = vshrl.u32 %v4287_v5, 16 }
 0xe41   :  { %v4220_v41 = vpop.permute.xlu1 %4219 }
 0xe42   :  { %4241 = vst.msk [vmem:[#allocation2 + $0xc] sm:$0xf] %vm4237_vm7, %v4220_v41  ;;  %v6764_v41 = vld [vmem:[%s8408_s0 + $0x20] sm:$0xff] }
 0xe49   :  { %v4224_v15 = vpop.permute.xlu1 %4223 }
 0xe4a   :  { %4243 = vst.msk [vmem:[#allocation2 + $0x14] sm:$0xf] %vm4237_vm7, %v4224_v15 }
 0xe51   :  { %v6524_v3 = vld [vmem:[#allocation2 + $0x4] ss:$16 sps:$4 sm:$0xff]  }
 0xe52   :  { %v4295_v1 = vrot.slane %v6524_v3, %v7164_v7 }
 0xe55   :  { %v4228_v61 = vpop.permute.xlu1 %4227 }
 0xe56   :  { %4245 = vst.msk [vmem:[#allocation2 + $0x1c] sm:$0xf] %vm4237_vm7, %v4228_v61 }
 0xe5d   :  { %v6525_v26 = vld [vmem:[#allocation2 + $0xc] ss:$16 sps:$4 sm:$0xff]  }
 0xe5e   :  { %v4303_v32 = vrot.slane %v6525_v26, %v7164_v7  ;;  %v6767_v26 = vld [vmem:[%s8408_s0 + $0x30] sm:$0xff] }
 0xe60   :  { %v4304_v33 = vcombine.low %v4295_v1, %v4303_v32  ;;  %v4305_v63 = vcombine.high %v4295_v1, %v4303_v32 }
 0xe62   :  { %v4312_v47 = vrot.slane %v4304_v33, %v7168_v25  ;;  %v4319_v21 = vrot.slane %v4305_v63, %v7168_v25 }
 0xe64   :  { %v4326_v39 = vshrl.u32 %v4312_v47, 16  ;;  %v4320_v22 = vcombine.high %v4312_v47, %v6918_v37  ;;  %v4338_v42 = vshrl.u32 %v4319_v21, 16  ;;  %v4324_v29 = vpack.i.b16 %v4312_v47, %v4278_v20 }
 0xe65   :  { %v4321_v50 = vcombine.high %v4319_v21, %v6918_v37  ;;  %v4336_v49 = vpack.i.b16 %v4319_v21, %v4285_v40  ;;  %v6760_v37 = vld [vmem:[%s8408_s0 + $0x10] sm:$0xff] }
 0xe66   :  { %v4327_v45 = vpack.i.b16 %v4326_v39, %v4325_v16  ;;  %v4332_v7 = vshrl.u32 %v4320_v22, 16  ;;  %v4339_v38 = vpack.i.b16 %v4338_v42, %v4337_v56  ;;  %v4330_v59 = vpack.i.b16 %v4320_v22, %v4286_v12  ;;  %v6526_v16 = vld [vmem:[%s8417_s9] sm:$0xff]   ;;  %v6527_v39 = vld [vmem:[%s8417_s9 + $0x8] sm:$0xff]   ;;  %s6933_s9 = smov 32  }
 0xe67   :  { %v4344_v28 = vshrl.u32 %v4321_v50, 16  ;;  %v4342_v14 = vpack.i.b16 %v4321_v50, %v4287_v5  ;;  %6358 = vmatprep.subr.bf16.mxu1 %v6526_v16 }
 0xe68   :  { %v5657_v48 = vcombine.low %v4324_v29, %v4327_v45  ;;  %v4333_v2 = vpack.i.b16 %v4332_v7, %v4331_v34  ;;  %v5659_v13 = vcombine.low %v4336_v49, %v4339_v38  ;;  %6359 = vmatpush3.bf16.msra.mxu1 %v6526_v16 }
 0xe69   :  { %v4345_v60 = vpack.i.b16 %v4344_v28, %v4343_v57  ;;  %6360 = vmatprep.subr.bf16.mxu1 %v6527_v39 }
 0xe6a   :  { %6350 = vmatprep.mubr.msk.bf16.mxu0 %vm118_vm0, %v5657_v48  ;;  %v5658_v25 = vcombine.low %v4330_v59, %v4333_v2 }
 0xe6b   :  { %v5660_v52 = vcombine.low %v4342_v14, %v4345_v60 }
 0xe6c   :  { %6351 = vmatmul.mubr.msk.bf16.vlgmr.msra.gmra.mrb[128].mxu0 %vm118_vm0, %v5658_v25  ;;  %6361 = vmatpush3.bf16.msra.mxu1 %v6527_v39 }
 0xe6d   :  { %6354 = vmatprep.mubr.msk.bf16.mxu0 %vm118_vm0, %v5659_v13 }
 0xe74   :  { %6355 = vmatmul.mubr.msk.bf16.gmra.mrb[132].mxu0 %vm118_vm0, %v5660_v52 }
 0xf3f   :  { %v6352_v9 = vpop.f32.mrb[128].mxu0 }
 0xf40   :  { %v4420_v53 = vpop.f32.mrb[129].mxu0  ;;  %v4453_v6 = vadd.f32 %v6760_v37, %v6352_v9 }
 0xf41   :  { %v4451_v27 = vadd.f32 %v6761_v4, %v4420_v53  ;;  %v6353_v8 = vpop.f32.mrb[130].mxu0 }
 0xf42   :  { %v4423_v30 = vpop.f32.mrb[131].mxu0  ;;  %v8123_v54 = vadd.f32 %v5667_v10, %v4453_v6  ;;  %v4454_v23 = vadd.f32 %v6763_v62, %v6353_v8 }
 0xf43   :  { %v8118_v11 = vadd.f32 %v5667_v10, %v4451_v27  ;;  %v4452_v19 = vadd.f32 %v6762_v0, %v4423_v30 }
 0xf44   :  { %v8134_v51 = vadd.f32 %v5667_v10, %v4454_v23  ;;  %v4482_v58 = vsel %vm118_vm0, %v8123_v54, 0.0 }
 0xf45   :  { %v8128_v17 = vadd.f32 %v5667_v10, %v4452_v19  ;;  %v4476_v31 = vsel %vm118_vm0, %v8118_v11, 0.0 }
 0xf46   :  { %4477 = vadd.xlane.f32.xlu0 %v4476_v31  ;;  %v4485_v32 = vsel %vm118_vm0, %v8134_v51, 0.0 }
 0xf47   :  { %v6356_v43 = vpop.f32.mrb[132].mxu0  ;;  %v4479_v18 = vsel %vm118_vm0, %v8128_v17, 0.0 }
 0xf48   :  { %4480 = vadd.xlane.f32.xlu1 %v4479_v18  ;;  %v4436_v55 = vpop.f32.mrb[133].mxu0  ;;  %v4457_v20 = vadd.f32 %v6767_v26, %v6356_v43 }
 0xf49   :  { %v4455_v15 = vadd.f32 %v6764_v41, %v4436_v55  ;;  %v6357_v35 = vpop.f32.mrb[134].mxu0 }
 0xf4a   :  { %4483 = vadd.xlane.f32.xlu0 %v4482_v58  ;;  %v4439_v61 = vpop.f32.mrb[135].mxu0  ;;  %v4458_v24 = vadd.f32 %v6765_v36, %v6357_v35  ;;  %v8160_v12 = vadd.f32 %v5667_v10, %v4457_v20  ;;  %v8229_v35 = vld [vmem:[%s8418_s10] ss:$0 sm:$0xff] }
 0xf4b   :  { %v4456_v3 = vadd.f32 %v6766_v46, %v4439_v61  ;;  %v8150_v44 = vadd.f32 %v5667_v10, %v4455_v15 }
 0xf4c   :  { %v8156_v33 = vadd.f32 %v5667_v10, %v4458_v24  ;;  %v4494_v21 = vsel %vm118_vm0, %v8160_v12, 0.0 }
 0xf4d   :  { %v8152_v1 = vadd.f32 %v5667_v10, %v4456_v3  ;;  %v4488_v40 = vsel %vm118_vm0, %v8150_v44, 0.0 }
 0xf4e   :  { %4486 = vadd.xlane.f32.xlu0 %v4485_v32  ;;  %v4497_v47 = vsel %vm118_vm0, %v8156_v33, 0.0 }
 0xf4f   :  { %v4491_v63 = vsel %vm118_vm0, %v8152_v1, 0.0 }
 0xf50   :  { %4492 = vadd.xlane.f32.xlu1 %v4491_v63 }
 0xf52   :  { %4489 = vadd.xlane.f32.xlu0 %v4488_v40 }
 0xf54   :  { %4498 = vadd.xlane.f32.xlu1 %v4497_v47 }
 0xf56   :  { %4495 = vadd.xlane.f32.xlu0 %v4494_v21 }
 0xfd3   :  { %v4478_v22 = vpop.xlane.xlu0 %4477 }
 0xfd4   :  { %v4500_v34 = vmul.f32 0.03125, %v4478_v22 }
 0xfd5   :  { %v4481_v56 = vpop.xlane.xlu1 %4480 }
 0xfd6   :  { %v8175_v42 = vsub.f32 %v8118_v11, %v4500_v34  ;;  %v4501_v29 = vmul.f32 0.03125, %v4481_v56  ;;  %v5668_v56 = vld [vmem:[#allocation9] ss:$0 sm:$0xff] }
 0xfd7   :  { %v4484_v45 = vpop.xlane.xlu0 %4483 }
 0xfd8   :  { %v8178_v7 = vsub.f32 %v8128_v17, %v4501_v29  ;;  %v4502_v50 = vmul.f32 0.03125, %v4484_v45  ;;  %v4516_v38 = vmul.f32 %v8175_v42, %v8175_v42 }
 0xfda   :  { %v8183_v48 = vsub.f32 %v8123_v54, %v4502_v50  ;;  %v4524_v59 = vsel %vm118_vm0, %v4516_v38, 0.0  ;;  %v4517_v2 = vmul.f32 %v8178_v7, %v8178_v7 }
 0xfdb   :  { %v4487_v5 = vpop.xlane.xlu0 %4486  ;;  %4525 = vadd.xlane.f32.xlu0 %v4524_v59 }
 0xfdc   :  { %v4503_v49 = vmul.f32 0.03125, %v4487_v5  ;;  %v4527_v25 = vsel %vm118_vm0, %v4517_v2, 0.0  ;;  %v4518_v28 = vmul.f32 %v8183_v48, %v8183_v48 }
 0xfdd   :  { %4528 = vadd.xlane.f32.xlu1 %v4527_v25  ;;  %v4493_v13 = vpop.xlane.xlu1 %4492 }
 0xfde   :  { %v8192_v57 = vsub.f32 %v8134_v51, %v4503_v49  ;;  %v4505_v60 = vmul.f32 0.03125, %v4493_v13  ;;  %v4530_v14 = vsel %vm118_vm0, %v4518_v28, 0.0 }
 0xfdf   :  { %4531 = vadd.xlane.f32.xlu0 %v4530_v14  ;;  %v4490_v52 = vpop.xlane.xlu0 %4489 }
 0xfe0   :  { %v8196_v9 = vsub.f32 %v8152_v1, %v4505_v60  ;;  %v4504_v10 = vmul.f32 0.03125, %v4490_v52  ;;  %v4519_v53 = vmul.f32 %v8192_v57, %v8192_v57  ;;  %v5669_v52 = vld [vmem:[#allocation11] ss:$0 sm:$0xff] }
 0xfe1   :  { %v4499_v37 = vpop.xlane.xlu1 %4498 }
 0xfe2   :  { %v8201_v6 = vsub.f32 %v8150_v44, %v4504_v10  ;;  %v4507_v4 = vmul.f32 0.03125, %v4499_v37  ;;  %v4533_v27 = vsel %vm118_vm0, %v4519_v53, 0.0  ;;  %v4521_v8 = vmul.f32 %v8196_v9, %v8196_v9 }
 0xfe3   :  { %v4496_v30 = vpop.xlane.xlu0 %4495  ;;  %4534 = vadd.xlane.f32.xlu1 %v4533_v27 }
 0xfe4   :  { %v8207_v0 = vsub.f32 %v8156_v33, %v4507_v4  ;;  %v4506_v19 = vmul.f32 0.03125, %v4496_v30  ;;  %v4520_v62 = vmul.f32 %v8201_v6, %v8201_v6  ;;  %v4539_v43 = vsel %vm118_vm0, %v4521_v8, 0.0 }
 0xfe6   :  { %v8212_v23 = vsub.f32 %v8160_v12, %v4506_v19  ;;  %v4536_v31 = vsel %vm118_vm0, %v4520_v62, 0.0  ;;  %v4523_v18 = vmul.f32 %v8207_v0, %v8207_v0 }
 0xfe7   :  { %4537 = vadd.xlane.f32.xlu0 %v4536_v31  ;;  %4540 = vadd.xlane.f32.xlu1 %v4539_v43 }
 0xfe8   :  { %v4522_v55 = vmul.f32 %v8212_v23, %v8212_v23  ;;  %v4545_v15 = vsel %vm118_vm0, %v4523_v18, 0.0 }
 0xfea   :  { %v4542_v41 = vsel %vm118_vm0, %v4522_v55, 0.0 }
 0xfeb   :  { %4543 = vadd.xlane.f32.xlu0 %v4542_v41  ;;  %4546 = vadd.xlane.f32.xlu1 %v4545_v15 }
 0xffc   :  { %4870 = vrot.lane.b32.xlu1 %v6527_v39, %s6920_s1 }
0x1000   :  { %5083 = vrot.lane.b32.xlu1 %v6526_v16, %s6909_s18 }
0x1001   :  { %4868 = vrot.lane.b32.xlu0 %v6526_v16, %s6920_s1 }
0x1004   :  { %5085 = vrot.lane.b32.xlu1 %v6527_v39, %s6909_s18 }
0x1005   :  { %5298 = vrot.lane.b32.xlu0 %v6526_v16, %s6933_s9 }
0x1008   :  { %5300 = vrot.lane.b32.xlu1 %v6527_v39, %s6933_s9 }
0x1009   :  { %4874 = vrot.lane.b32.xlu0 %v8229_v35, %s6920_s1 }
0x100c   :  { %5089 = vrot.lane.b32.xlu1 %v8229_v35, %s6909_s18 }
0x100d   :  { %5304 = vrot.lane.b32.xlu0 %v8229_v35, %s6933_s9 }
0x1068   :  { %v4526_v58 = vpop.xlane.xlu0 %4525 }
0x1069   :  { %v4548_v61 = vmul.f32 0.03125, %v4526_v58 }
0x106a   :  { %v4529_v36 = vpop.xlane.xlu1 %4528 }
0x106b   :  { %v4556_v24 = vadd.f32 1e-05, %v4548_v61  ;;  %v4549_v46 = vmul.f32 0.03125, %v4529_v36 }
0x106c   :  { %v4532_v3 = vpop.xlane.xlu0 %4531 }
0x106d   :  { %6680 = vrsqrt.f32 %v4556_v24  ;;  %v4557_v26 = vadd.f32 1e-05, %v4549_v46  ;;  %v4550_v20 = vmul.f32 0.03125, %v4532_v3 }
0x106f   :  { %6682 = vrsqrt.f32 %v4557_v26  ;;  %v4558_v32 = vadd.f32 1e-05, %v4550_v20 }
0x1070   :  { %v4535_v63 = vpop.xlane.xlu1 %4534 }
0x1071   :  { %6684 = vrsqrt.f32 %v4558_v32  ;;  %v4551_v40 = vmul.f32 0.03125, %v4535_v63 }
0x1073   :  { %v4559_v47 = vadd.f32 1e-05, %v4551_v40 }
0x1074   :  { %v4538_v21 = vpop.xlane.xlu0 %4537  ;;  %v4541_v16 = vpop.xlane.xlu1 %4540 }
0x1075   :  { %6686 = vrsqrt.f32 %v4559_v47  ;;  %v4552_v39 = vmul.f32 0.03125, %v4538_v21  ;;  %v4553_v22 = vmul.f32 0.03125, %v4541_v16  ;;  %v6528_v16 = vld [vmem:[%s8419_s11] sm:$0xff]  }
0x1076   :  { %6370 = vmatprep.subr.bf16.mxu0 %v6528_v16 }
0x1077   :  { %v6681_v34 = vpop.eup %6680  ;;  %v4560_v29 = vadd.f32 1e-05, %v4552_v39  ;;  %v4561_v45 = vadd.f32 1e-05, %v4553_v22  ;;  %6371 = vmatpush3.bf16.msra.mxu0 %v6528_v16  ;;  %v6529_v39 = vld [vmem:[%s8419_s11 + $0x8] sm:$0xff]   ;;  %v8269_v22 = vld [vmem:[%s8419_s11 + $0x10] sm:$0xff]  }
0x1078   :  { %v4572_v50 = vmul.f32 %v6681_v34, %v8175_v42  ;;  %v4544_v38 = vpop.xlane.xlu0 %4543  ;;  %v4547_v59 = vpop.xlane.xlu1 %4546  ;;  %6372 = vmatprep.subr.bf16.mxu0 %v6529_v39 }
0x1079   :  { %v6683_v2 = vpop.eup %6682  ;;  %6688 = vrsqrt.f32 %v4560_v29  ;;  %v4554_v5 = vmul.f32 0.03125, %v4544_v38  ;;  %v4555_v49 = vmul.f32 0.03125, %v4547_v59 }
0x107a   :  { %v4573_v25 = vmul.f32 %v6683_v2, %v8178_v7  ;;  %6690 = vrsqrt.f32 %v4561_v45  ;;  %v4586_v28 = vmul.f32 %v5668_v56, %v4572_v50 }
0x107b   :  { %v6685_v13 = vpop.eup %6684  ;;  %v4562_v60 = vadd.f32 1e-05, %v4554_v5  ;;  %v4563_v14 = vadd.f32 1e-05, %v4555_v49  ;;  %6373 = vmatpush3.bf16.msra.mxu0 %v6529_v39 }
0x107c   :  { %v4574_v10 = vmul.f32 %v6685_v13, %v8183_v48  ;;  %v4587_v53 = vmul.f32 %v5668_v56, %v4573_v25  ;;  %v4869_v37 = vpop.permute.xlu0 %4868  ;;  %v4600_v42 = vadd.f32 %v5669_v52, %v4586_v28  ;;  %v4871_v36 = vpop.permute.xlu1 %4870  ;;  %6394 = vmatprep.subr.bf16.mxu0 %v8269_v22 }
0x107d   :  { %6692 = vrsqrt.f32 %v4562_v60  ;;  %6382 = vmatprep.subr.bf16.mxu1 %v4869_v37 }
0x107e   :  { %6694 = vrsqrt.f32 %v4563_v14  ;;  %v4601_v4 = vadd.f32 %v5669_v52, %v4587_v53  ;;  %v4588_v8 = vmul.f32 %v5668_v56, %v4574_v10 }
0x107f   :  { %v6687_v27 = vpop.eup %6686 }
0x1080   :  { %v4575_v30 = vmul.f32 %v6687_v27, %v8192_v57  ;;  %v4608_v7 = vpack.c.bf16 %v4601_v4, %v4600_v42  ;;  %v4602_v48 = vadd.f32 %v5669_v52, %v4588_v8 }
0x1082   :  { %v4589_v19 = vmul.f32 %v5668_v56, %v4575_v30  ;;  %6362 = vmatprep.mubr.msk.bf16.mxu1 %vm118_vm0, %v4608_v7 }
0x1083   :  { %v6689_v62 = vpop.eup %6688 }
0x1084   :  { %v6691_v31 = vpop.eup %6690  ;;  %v4576_v43 = vmul.f32 %v6689_v62, %v8201_v6  ;;  %v4603_v18 = vadd.f32 %v5669_v52, %v4589_v19 }
0x1085   :  { %v4577_v55 = vmul.f32 %v6691_v31, %v8196_v9  ;;  %v5084_v9 = vpop.permute.xlu1 %5083 }
0x1086   :  { %v4609_v41 = vpack.c.bf16 %v4603_v18, %v4602_v48  ;;  %v4590_v15 = vmul.f32 %v5668_v56, %v4576_v43 }
0x1087   :  { %v6693_v58 = vpop.eup %6692  ;;  %v4591_v61 = vmul.f32 %v5668_v56, %v4577_v55 }
0x1088   :  { %v6695_v24 = vpop.eup %6694  ;;  %v4578_v57 = vmul.f32 %v6693_v58, %v8212_v23  ;;  %6363 = vmatmul.mubr.msk.bf16.vlgmr.msra.gmra.mrb[136].mxu1 %vm118_vm0, %v4609_v41  ;;  %v4604_v46 = vadd.f32 %v5669_v52, %v4590_v15 }
0x1089   :  { %v4579_v3 = vmul.f32 %v6695_v24, %v8207_v0  ;;  %6383 = vmatpush3.bf16.msra.mxu1 %v4869_v37  ;;  %v4605_v26 = vadd.f32 %v5669_v52, %v4591_v61  ;;  %v5086_v23 = vpop.permute.xlu1 %5085  ;;  %v5299_v0 = vpop.permute.xlu0 %5298 }
0x108a   :  { %6384 = vmatprep.subr.bf16.mxu1 %v4871_v36  ;;  %v4592_v6 = vmul.f32 %v5668_v56, %v4578_v57 }
0x108b   :  { %v4610_v20 = vpack.c.bf16 %v4605_v26, %v4604_v46  ;;  %v4593_v32 = vmul.f32 %v5668_v56, %v4579_v3 }
0x108c   :  { %v4606_v63 = vadd.f32 %v5669_v52, %v4592_v6 }
0x108d   :  { %6366 = vmatprep.mubr.msk.bf16.mxu1 %vm118_vm0, %v4610_v20  ;;  %v4607_v40 = vadd.f32 %v5669_v52, %v4593_v32  ;;  %6385 = vmatpush3.bf16.msra.mxu1 %v4871_v36  ;;  %v5301_v21 = vpop.permute.xlu1 %5300  ;;  %v4875_v62 = vpop.permute.xlu0 %4874 }
0x108e   :  { %6406 = vmatprep.subr.bf16.mxu1 %v5084_v9 }
0x108f   :  { %v4611_v47 = vpack.c.bf16 %v4607_v40, %v4606_v63 }
0x1091   :  { %6367 = vmatmul.mubr.msk.bf16.gmra.mrb[140].mxu1 %vm118_vm0, %v4611_v47 }
0x1092   :  { %6386 = vmatprep.mubr.msk.bf16.mxu1 %vm118_vm0, %v4608_v7 }
0x1099   :  { %6387 = vmatmul.mubr.msk.bf16.vlgmr.msra.gmra.mrb[144].mxu1 %vm118_vm0, %v4609_v41 }
0x109a   :  { %6407 = vmatpush3.bf16.msra.mxu1 %v5084_v9  ;;  %6390 = vmatprep.mubr.msk.bf16.mxu1 %vm118_vm0, %v4610_v20 }
0x109b   :  { %6408 = vmatprep.subr.bf16.mxu1 %v5086_v23 }
0x109e   :  { %6409 = vmatpush3.bf16.msra.mxu1 %v5086_v23 }
0x109f   :  { %6430 = vmatprep.subr.bf16.mxu1 %v5299_v0 }
0x10a1   :  { %6391 = vmatmul.mubr.msk.bf16.gmra.mrb[148].mxu1 %vm118_vm0, %v4611_v47 }
0x10a2   :  { %6410 = vmatprep.mubr.msk.bf16.mxu1 %vm118_vm0, %v4608_v7 }
0x10a9   :  { %6411 = vmatmul.mubr.msk.bf16.vlgmr.msra.gmra.mrb[152].mxu1 %vm118_vm0, %v4609_v41 }
0x10aa   :  { %6431 = vmatpush3.bf16.msra.mxu1 %v5299_v0  ;;  %6414 = vmatprep.mubr.msk.bf16.mxu1 %vm118_vm0, %v4610_v20 }
0x10ab   :  { %6432 = vmatprep.subr.bf16.mxu1 %v5301_v21 }
0x10ae   :  { %6433 = vmatpush3.bf16.msra.mxu1 %v5301_v21 }
0x10b1   :  { %6415 = vmatmul.mubr.msk.bf16.gmra.mrb[156].mxu1 %vm118_vm0, %v4611_v47 }
0x10b2   :  { %6434 = vmatprep.mubr.msk.bf16.mxu1 %vm118_vm0, %v4608_v7 }
0x10b9   :  { %6435 = vmatmul.mubr.msk.bf16.vlgmr.msra.gmra.mrb[160].mxu1 %vm118_vm0, %v4609_v41 }
0x10ba   :  { %6438 = vmatprep.mubr.msk.bf16.mxu1 %vm118_vm0, %v4610_v20 }
0x10c1   :  { %6439 = vmatmul.mubr.msk.bf16.gmra.mrb[164].mxu1 %vm118_vm0, %v4611_v47 }
0x115b   :  { %v6364_v34 = vpop.f32.mrb[136].mxu1 }
0x115c   :  { %v4696_v56 = vpop.f32.mrb[137].mxu1  ;;  %v4705_v45 = vadd.f32 %v6364_v34, %v8229_v35 }
0x115d   :  { %v6365_v29 = vpop.f32.mrb[138].mxu1  ;;  %v4697_v59 = vadd.f32 %v8229_v35, %v4696_v56 }
0x115e   :  { %v4708_v50 = vadd.f32 %v6365_v29, %v8229_v35  ;;  %v4699_v38 = vpop.f32.mrb[139].mxu1 }
0x115f   :  { %v4700_v2 = vadd.f32 %v8229_v35, %v4699_v38 }
0x1160   :  { %v8276_v5 = vpack.c.bf16 %v4708_v50, %v4705_v45 }
0x1161   :  { %v8278_v49 = vpack.c.bf16 %v4700_v2, %v4697_v59 }
0x1162   :  { %v5679_v25 = vmul.bf16 3218784218, %v8276_v5 }
0x1163   :  { %v5678_v28 = vmul.bf16 3218784218, %v8278_v49 }
0x1164   :  { %v4743_v13 = vmul.bf16 1069105081, %v5679_v25  ;;  %v6368_v60 = vpop.f32.mrb[140].mxu1 }
0x1165   :  { %v4740_v14 = vmul.bf16 1069105081, %v5678_v28  ;;  %v4712_v52 = vpop.f32.mrb[141].mxu1  ;;  %v4721_v53 = vadd.f32 %v6368_v60, %v8229_v35  ;;  %v5090_v28 = vpop.permute.xlu1 %5089 }
0x1166   :  { %6696 = vpow.bf16 %v4743_v13  ;;  %v6369_v10 = vpop.f32.mrb[142].mxu1  ;;  %v4713_v4 = vadd.f32 %v8229_v35, %v4712_v52 }
0x1167   :  { %6698 = vpow.bf16 %v4740_v14  ;;  %v4724_v37 = vadd.f32 %v6369_v10, %v8229_v35  ;;  %v4715_v42 = vpop.f32.mrb[143].mxu1 }
0x1168   :  { %v4716_v27 = vadd.f32 %v8229_v35, %v4715_v42 }
0x1169   :  { %v8286_v8 = vpack.c.bf16 %v4724_v37, %v4721_v53 }
0x116a   :  { %v8288_v30 = vpack.c.bf16 %v4716_v27, %v4713_v4 }
0x116b   :  { %v5681_v7 = vmul.bf16 3218784218, %v8286_v8 }
0x116c   :  { %v5680_v19 = vmul.bf16 3218784218, %v8288_v30  ;;  %v6388_v31 = vpop.f32.mrb[144].mxu1 }
0x116d   :  { %v4749_v43 = vmul.bf16 1069105081, %v5681_v7  ;;  %v4911_v48 = vpop.f32.mrb[145].mxu1  ;;  %v4920_v41 = vadd.f32 %v6388_v31, %v4875_v62 }
0x116e   :  { %v4746_v18 = vmul.bf16 1069105081, %v5680_v19  ;;  %v6389_v55 = vpop.f32.mrb[146].mxu1  ;;  %v4912_v35 = vadd.f32 %v4911_v48, %v4875_v62 }
0x116f   :  { %6700 = vpow.bf16 %v4749_v43  ;;  %v4923_v15 = vadd.f32 %v6389_v55, %v4875_v62  ;;  %v4914_v58 = vpop.f32.mrb[147].mxu1 }
0x1170   :  { %6702 = vpow.bf16 %v4746_v18  ;;  %v4915_v61 = vadd.f32 %v4914_v58, %v4875_v62 }
0x1171   :  { %v6697_v36 = vpop.eup %6696  ;;  %v8292_v24 = vpack.c.bf16 %v4923_v15, %v4920_v41 }
0x1172   :  { %v6699_v57 = vpop.eup %6698  ;;  %v4752_v46 = vadd.bf16 1065369472, %v6697_v36  ;;  %v8294_v3 = vpack.c.bf16 %v4915_v61, %v4912_v35 }
0x1173   :  { %v4751_v26 = vadd.bf16 1065369472, %v6699_v57  ;;  %v5693_v6 = vmul.bf16 3218784218, %v8292_v24  ;;  %v6531_v57 = vld [vmem:[%s8419_s11 + $0x18] sm:$0xff]  }
0x1174   :  { %6704 = vrcp.bf16 %v4752_v46  ;;  %v5692_v20 = vmul.bf16 3218784218, %v8294_v3  ;;  %v6392_v32 = vpop.f32.mrb[148].mxu1 }
0x1175   :  { %6706 = vrcp.bf16 %v4751_v26  ;;  %v4958_v9 = vmul.bf16 1069105081, %v5693_v6  ;;  %v4927_v63 = vpop.f32.mrb[149].mxu1  ;;  %v4936_v23 = vadd.f32 %v6392_v32, %v4875_v62 }
0x1176   :  { %v4955_v40 = vmul.bf16 1069105081, %v5692_v20  ;;  %v6393_v47 = vpop.f32.mrb[150].mxu1  ;;  %v4928_v16 = vadd.f32 %v4927_v63, %v4875_v62 }
0x1177   :  { %6708 = vpow.bf16 %v4958_v9  ;;  %v4939_v0 = vadd.f32 %v6393_v47, %v4875_v62  ;;  %v4930_v21 = vpop.f32.mrb[151].mxu1  ;;  %v8321_v47 = vld [vmem:[%s8419_s11 + $0x20] sm:$0xff]  }
0x1178   :  { %6710 = vpow.bf16 %v4955_v40  ;;  %v4931_v39 = vadd.f32 %v4930_v21, %v4875_v62 }
0x1179   :  { %v8298_v34 = vpack.c.bf16 %v4939_v0, %v4936_v23 }
0x117a   :  { %v6701_v56 = vpop.eup %6700  ;;  %v8300_v29 = vpack.c.bf16 %v4931_v39, %v4928_v16 }
0x117b   :  { %v6703_v45 = vpop.eup %6702  ;;  %v4754_v50 = vadd.bf16 1065369472, %v6701_v56  ;;  %v5695_v38 = vmul.bf16 3218784218, %v8298_v34 }
0x117c   :  { %v4753_v59 = vadd.bf16 1065369472, %v6703_v45  ;;  %v5694_v2 = vmul.bf16 3218784218, %v8300_v29  ;;  %v6412_v25 = vpop.f32.mrb[152].mxu1 }
0x117d   :  { %6712 = vrcp.bf16 %v4754_v50  ;;  %v4964_v13 = vmul.bf16 1069105081, %v5695_v38  ;;  %v5126_v60 = vpop.f32.mrb[153].mxu1  ;;  %v5135_v53 = vadd.f32 %v6412_v25, %v5090_v28  ;;  %v5305_v25 = vpop.permute.xlu0 %5304 }
0x117e   :  { %6714 = vrcp.bf16 %v4753_v59  ;;  %v4961_v14 = vmul.bf16 1069105081, %v5694_v2  ;;  %v6413_v52 = vpop.f32.mrb[154].mxu1  ;;  %v5127_v7 = vadd.f32 %v5126_v60, %v5090_v28 }
0x117f   :  { %v6705_v10 = vpop.eup %6704  ;;  %6716 = vpow.bf16 %v4964_v13  ;;  %v5138_v37 = vadd.f32 %v6413_v52, %v5090_v28  ;;  %v5129_v42 = vpop.f32.mrb[155].mxu1 }
0x1180   :  { %v6707_v4 = vpop.eup %6706  ;;  %v4758_v27 = vmul.bf16 1065369472, %v6705_v10  ;;  %6718 = vpow.bf16 %v4961_v14  ;;  %v5130_v19 = vadd.f32 %v5129_v42, %v5090_v28 }
0x1181   :  { %v4756_v62 = vmul.bf16 1065369472, %v6707_v4  ;;  %v8304_v31 = vpack.c.bf16 %v5138_v37, %v5135_v53 }
0x1182   :  { %v6709_v43 = vpop.eup %6708  ;;  %v8306_v48 = vpack.c.bf16 %v5130_v19, %v5127_v7  ;;  %v4764_v58 = vmul.bf16 %v4758_v27, %v8276_v5 }
0x1183   :  { %v6711_v18 = vpop.eup %6710  ;;  %v4763_v55 = vmul.bf16 %v4756_v62, %v8278_v49  ;;  %v4967_v41 = vadd.bf16 1065369472, %v6709_v43  ;;  %v5707_v15 = vmul.bf16 3218784218, %v8304_v31 }
0x1184   :  { %v4966_v35 = vadd.bf16 1065369472, %v6711_v18  ;;  %v5706_v61 = vmul.bf16 3218784218, %v8306_v48  ;;  %v6416_v36 = vpop.f32.mrb[156].mxu1 }
0x1185   :  { %6720 = vrcp.bf16 %v4967_v41  ;;  %v5173_v46 = vmul.bf16 1069105081, %v5707_v15  ;;  %v5142_v26 = vpop.f32.mrb[157].mxu1  ;;  %6374 = vmatprep.mubr.msk.bf16.mxu0 %vm118_vm0, %v4763_v55  ;;  %v5151_v5 = vadd.f32 %v6416_v36, %v5090_v28 }
0x1186   :  { %6722 = vrcp.bf16 %v4966_v35  ;;  %v5170_v49 = vmul.bf16 1069105081, %v5706_v61  ;;  %v6417_v6 = vpop.f32.mrb[158].mxu1  ;;  %6375 = vmatmul.mubr.msk.bf16.vlgmr.msra.gmra.mrb[136].mxu0 %vm118_vm0, %v4764_v58  ;;  %v5143_v63 = vadd.f32 %v5142_v26, %v5090_v28 }
0x1187   :  { %6724 = vpow.bf16 %v5173_v46  ;;  %v5154_v20 = vadd.f32 %v6417_v6, %v5090_v28  ;;  %v5145_v32 = vpop.f32.mrb[159].mxu1  ;;  %6395 = vmatpush3.bf16.msra.mxu0 %v8269_v22 }
0x1188   :  { %v6713_v9 = vpop.eup %6712  ;;  %6726 = vpow.bf16 %v5170_v49  ;;  %v5146_v40 = vadd.f32 %v5145_v32, %v5090_v28  ;;  %6396 = vmatprep.subr.bf16.mxu0 %v6531_v57  ;;  %v6533_v49 = vld [vmem:[%s8419_s11 + $0x28] sm:$0xff]  }
0x1189   :  { %v6715_v23 = vpop.eup %6714  ;;  %v4762_v0 = vmul.bf16 1065369472, %v6713_v9  ;;  %v8323_v21 = vpack.c.bf16 %v5154_v20, %v5151_v5 }
0x118a   :  { %v6717_v16 = vpop.eup %6716  ;;  %v4760_v39 = vmul.bf16 1065369472, %v6715_v23  ;;  %v8325_v56 = vpack.c.bf16 %v5146_v40, %v5143_v63 }
0x118b   :  { %v6719_v45 = vpop.eup %6718  ;;  %v4969_v22 = vadd.bf16 1065369472, %v6717_v16  ;;  %v5709_v50 = vmul.bf16 3218784218, %v8323_v21  ;;  %6397 = vmatpush3.bf16.msra.mxu0 %v6531_v57  ;;  %v4766_v13 = vmul.bf16 %v4762_v0, %v8286_v8  ;;  %v6534_v16 = vld [vmem:[%s8419_s11 + $0x30] sm:$0xff]  }
0x118c   :  { %v4765_v38 = vmul.bf16 %v4760_v39, %v8288_v30  ;;  %v4968_v59 = vadd.bf16 1065369472, %v6719_v45  ;;  %v5708_v2 = vmul.bf16 3218784218, %v8325_v56  ;;  %v6436_v28 = vpop.f32.mrb[160].mxu1  ;;  %6418 = vmatprep.subr.bf16.mxu0 %v8321_v47 }
0x118d   :  { %6728 = vrcp.bf16 %v4969_v22  ;;  %v5179_v60 = vmul.bf16 1069105081, %v5709_v50  ;;  %v5341_v14 = vpop.f32.mrb[161].mxu1  ;;  %v5350_v53 = vadd.f32 %v6436_v28, %v5305_v25 }
0x118e   :  { %6730 = vrcp.bf16 %v4968_v59  ;;  %v5176_v52 = vmul.bf16 1069105081, %v5708_v2  ;;  %6378 = vmatprep.mubr.msk.bf16.mxu0 %vm118_vm0, %v4765_v38  ;;  %v6437_v10 = vpop.f32.mrb[162].mxu1  ;;  %v5342_v4 = vadd.f32 %v5341_v14, %v5305_v25 }
0x118f   :  { %6732 = vpow.bf16 %v5179_v60  ;;  %v5353_v30 = vadd.f32 %v6437_v10, %v5305_v25  ;;  %6379 = vmatmul.mubr.msk.bf16.gmra.mrb[140].mxu0 %vm118_vm0, %v4766_v13  ;;  %v5344_v37 = vpop.f32.mrb[163].mxu1 }
0x1190   :  { %v6721_v42 = vpop.eup %6720  ;;  %6734 = vpow.bf16 %v5176_v52  ;;  %v5345_v27 = vadd.f32 %v5344_v37, %v5305_v25 }
0x1191   :  { %v6723_v7 = vpop.eup %6722  ;;  %v4973_v8 = vmul.bf16 1065369472, %v6721_v42  ;;  %v8334_v19 = vpack.c.bf16 %v5353_v30, %v5350_v53 }
0x1192   :  { %v6725_v62 = vpop.eup %6724  ;;  %v4971_v43 = vmul.bf16 1065369472, %v6723_v7  ;;  %v8336_v18 = vpack.c.bf16 %v5345_v27, %v5342_v4  ;;  %v6535_v27 = vld [vmem:[%s8419_s11 + $0x38] sm:$0xff]  }
0x1193   :  { %v6727_v55 = vpop.eup %6726  ;;  %v5182_v41 = vadd.bf16 1065369472, %v6725_v62  ;;  %v5721_v15 = vmul.bf16 3218784218, %v8334_v19  ;;  %v4979_v57 = vmul.bf16 %v4973_v8, %v8292_v24 }
0x1194   :  { %v4978_v58 = vmul.bf16 %v4971_v43, %v8294_v3  ;;  %v5181_v35 = vadd.bf16 1065369472, %v6727_v55  ;;  %v5720_v61 = vmul.bf16 3218784218, %v8336_v18  ;;  %v6440_v36 = vpop.f32.mrb[164].mxu1 }
0x1195   :  { %6736 = vrcp.bf16 %v5182_v41  ;;  %v5388_v46 = vmul.bf16 1069105081, %v5721_v15  ;;  %v5357_v26 = vpop.f32.mrb[165].mxu1  ;;  %v5366_v3 = vadd.f32 %v6440_v36, %v5305_v25 }
0x1196   :  { %6738 = vrcp.bf16 %v5181_v35  ;;  %v5385_v6 = vmul.bf16 1069105081, %v5720_v61  ;;  %6398 = vmatprep.mubr.msk.bf16.mxu0 %vm118_vm0, %v4978_v58  ;;  %v6441_v5 = vpop.f32.mrb[166].mxu1  ;;  %v5358_v24 = vadd.f32 %v5357_v26, %v5305_v25 }
0x1197   :  { %6740 = vpow.bf16 %v5388_v46  ;;  %v5369_v20 = vadd.f32 %v6441_v5, %v5305_v25  ;;  %6399 = vmatmul.mubr.msk.bf16.vlgmr.msra.gmra.mrb[136].mxu0 %vm118_vm0, %v4979_v57  ;;  %v5360_v32 = vpop.f32.mrb[167].mxu1 }
0x1198   :  { %v6729_v9 = vpop.eup %6728  ;;  %6742 = vpow.bf16 %v5385_v6  ;;  %v5361_v63 = vadd.f32 %v5360_v32, %v5305_v25  ;;  %6419 = vmatpush3.bf16.msra.mxu0 %v8321_v47 }
0x1199   :  { %v6731_v40 = vpop.eup %6730  ;;  %v4977_v23 = vmul.bf16 1065369472, %v6729_v9  ;;  %v8348_v0 = vpack.c.bf16 %v5369_v20, %v5366_v3  ;;  %6420 = vmatprep.subr.bf16.mxu0 %v6533_v49 }
0x119a   :  { %v6733_v39 = vpop.eup %6732  ;;  %v4975_v45 = vmul.bf16 1065369472, %v6731_v40  ;;  %v5374_v22 = vpack.c.bf16 %v5361_v63, %v5358_v24 }
0x119b   :  { %v6735_v50 = vpop.eup %6734  ;;  %v5184_v38 = vadd.bf16 1065369472, %v6733_v39  ;;  %v5723_v59 = vmul.bf16 3218784218, %v8348_v0  ;;  %v4981_v28 = vmul.bf16 %v4977_v23, %v8298_v34 }
0x119c   :  { %v4980_v2 = vmul.bf16 %v4975_v45, %v8300_v29  ;;  %v5183_v25 = vadd.bf16 1065369472, %v6735_v50  ;;  %v5722_v47 = vmul.bf16 3218784218, %v5374_v22  ;;  %6421 = vmatpush3.bf16.msra.mxu0 %v6533_v49 }
0x119d   :  { %6744 = vrcp.bf16 %v5184_v38  ;;  %v5394_v13 = vmul.bf16 1069105081, %v5723_v59  ;;  %6442 = vmatprep.subr.bf16.mxu0 %v6534_v16 }
0x119e   :  { %6746 = vrcp.bf16 %v5183_v25  ;;  %v5391_v60 = vmul.bf16 1069105081, %v5722_v47  ;;  %6402 = vmatprep.mubr.msk.bf16.mxu0 %vm118_vm0, %v4980_v2 }
0x119f   :  { %6748 = vpow.bf16 %v5394_v13  ;;  %6403 = vmatmul.mubr.msk.bf16.gmra.mrb[140].mxu0 %vm118_vm0, %v4981_v28 }
0x11a0   :  { %v6737_v14 = vpop.eup %6736  ;;  %6750 = vpow.bf16 %v5391_v60 }
0x11a1   :  { %v6739_v52 = vpop.eup %6738  ;;  %v5188_v10 = vmul.bf16 1065369472, %v6737_v14 }
0x11a2   :  { %v6741_v29 = vpop.eup %6740  ;;  %v5186_v53 = vmul.bf16 1065369472, %v6739_v52 }
0x11a3   :  { %v6743_v30 = vpop.eup %6742  ;;  %v5397_v37 = vadd.bf16 1065369472, %v6741_v29  ;;  %v5194_v4 = vmul.bf16 %v5188_v10, %v8304_v31 }
0x11a4   :  { %v5193_v34 = vmul.bf16 %v5186_v53, %v8306_v48  ;;  %v5396_v42 = vadd.bf16 1065369472, %v6743_v30 }
0x11a5   :  { %6752 = vrcp.bf16 %v5397_v37 }
0x11a6   :  { %6754 = vrcp.bf16 %v5396_v42  ;;  %6422 = vmatprep.mubr.msk.bf16.mxu0 %vm118_vm0, %v5193_v34 }
0x11a7   :  { %6423 = vmatmul.mubr.msk.bf16.vlgmr.msra.gmra.mrb[136].mxu0 %vm118_vm0, %v5194_v4 }
0x11a8   :  { %v6745_v7 = vpop.eup %6744  ;;  %6443 = vmatpush3.bf16.msra.mxu0 %v6534_v16 }
0x11a9   :  { %v6747_v8 = vpop.eup %6746  ;;  %v5192_v62 = vmul.bf16 1065369472, %v6745_v7  ;;  %6444 = vmatprep.subr.bf16.mxu0 %v6535_v27 }
0x11aa   :  { %v6749_v43 = vpop.eup %6748  ;;  %v5190_v48 = vmul.bf16 1065369472, %v6747_v8 }
0x11ab   :  { %v6751_v55 = vpop.eup %6750  ;;  %v5399_v41 = vadd.bf16 1065369472, %v6749_v43  ;;  %v5196_v58 = vmul.bf16 %v5192_v62, %v8323_v21 }
0x11ac   :  { %v5195_v31 = vmul.bf16 %v5190_v48, %v8325_v56  ;;  %v5398_v15 = vadd.bf16 1065369472, %v6751_v55  ;;  %6445 = vmatpush3.bf16.msra.mxu0 %v6535_v27 }
0x11ad   :  { %6756 = vrcp.bf16 %v5399_v41 }
0x11ae   :  { %6758 = vrcp.bf16 %v5398_v15  ;;  %6426 = vmatprep.mubr.msk.bf16.mxu0 %vm118_vm0, %v5195_v31 }
0x11af   :  { %6427 = vmatmul.mubr.msk.bf16.gmra.mrb[140].mxu0 %vm118_vm0, %v5196_v58 }
0x11b0   :  { %v6753_v35 = vpop.eup %6752 }
0x11b1   :  { %v6755_v61 = vpop.eup %6754  ;;  %v5403_v36 = vmul.bf16 1065369472, %v6753_v35 }
0x11b2   :  { %v5401_v57 = vmul.bf16 1065369472, %v6755_v61 }
0x11b3   :  { %v5409_v26 = vmul.bf16 %v5403_v36, %v8334_v19 }
0x11b4   :  { %v5408_v46 = vmul.bf16 %v5401_v57, %v8336_v18  ;;  %v5670_v18 = vld [vmem:[%s8420_s12] ss:$0 sm:$0xff]  ;;  %s6934_s12 = smov [#allocation12]  }
0x11b5   :  { %v4621_v19 = vadd.f32 %v5670_v18, %v8123_v54  ;;  %v4619_v32 = vadd.f32 %v5670_v18, %v8118_v11  ;;  %v4622_v63 = vadd.f32 %v5670_v18, %v8134_v51  ;;  %v4625_v11 = vadd.f32 %v5670_v18, %v8160_v12  ;;  %s5526_s27 = sshll.u32 %s6934_s12, 4  ;;  %s5527_s27 = int_to_ptr.vmem [resolvable:$true] %s5526_s27 }
0x11b6   :  { %6446 = vmatprep.mubr.msk.bf16.mxu0 %vm118_vm0, %v5408_v46  ;;  %v4623_v51 = vadd.f32 %v5670_v18, %v8150_v44  ;;  %v4624_v2 = vadd.f32 %v5670_v18, %v8152_v1  ;;  %s6878_s4 = scalar_lea.vmem %s5527_s27, 1024  ;;  %p6883_p13 = scmp.lt.s32.totalorder %s5527_s27, %s5527_s27 }
0x11b7   :  { %6447 = vmatmul.mubr.msk.bf16.vlgmr.msra.gmra.mrb[136].mxu0 %vm118_vm0, %v5409_v26  ;;  %p6879_p12 = scmp.ne.s32.totalorder %s5527_s27, %s6878_s4  ;;  %p6884_p0 = scmp.lt.s32.totalorder %s6878_s4, %s6878_s4 }
0x11b8   :  { %v6757_v56 = vpop.eup %6756 }
0x11b9   :  { %v6759_v21 = vpop.eup %6758  ;;  %v5407_v49 = vmul.bf16 1065369472, %v6757_v56  ;;  %p6885_p1 = por %p6884_p0, %p6883_p13 }
0x11ba   :  { %v5405_v6 = vmul.bf16 1065369472, %v6759_v21 }
0x11bb   :  { %v5411_v3 = vmul.bf16 %v5407_v49, %v8348_v0  ;;  %v4620_v0 = vadd.f32 %v5670_v18, %v8128_v17  ;;  %v4626_v17 = vadd.f32 %v5670_v18, %v8156_v33  ;;  %p6886_p2 = pnand %p6885_p1, %p6879_p12 }
0x11bc   :  { %v5410_v5 = vmul.bf16 %v5405_v6, %v5374_v22 }
0x11be   :  { %6450 = vmatprep.mubr.msk.bf16.mxu0 %vm118_vm0, %v5410_v5 }
0x11bf   :  { %6451 = vmatmul.mubr.msk.bf16.gmra.mrb[140].mxu0 %vm118_vm0, %v5411_v3 }
0x128a   :  { %v6448_v20 = vpop.f32.mrb[136].mxu0 }
0x128b   :  { %v6458_v9 = vadd.f32 %v6448_v20, %v4621_v19  ;;  %v5474_v24 = vpop.f32.mrb[137].mxu0 }
0x128c   :  { %v6459_v40 = vadd.f32 %v5474_v24, %v4619_v32  ;;  %v6449_v23 = vpop.f32.mrb[138].mxu0 }
0x128d   :  { %5515 = vst.msk [vmem:[#allocation12 + $0x10] sm:$0xff] %vm118_vm0, %v6458_v9  ;;  %v6460_v16 = vadd.f32 %v6449_v23, %v4622_v63  ;;  %v5477_v39 = vpop.f32.mrb[139].mxu0 }
0x128e   :  { %5513 = vst.msk [vmem:[#allocation12] sm:$0xff] %vm118_vm0, %v6459_v40  ;;  %v6461_v45 = vadd.f32 %v5477_v39, %v4620_v0 }
0x128f   :  { %5516 = vst.msk [vmem:[#allocation12 + $0x18] sm:$0xff] %vm118_vm0, %v6460_v16 }
0x1290   :  { %5514 = vst.msk [vmem:[#allocation12 + $0x8] sm:$0xff] %vm118_vm0, %v6461_v45 }
0x1292   :  { %v6452_v54 = vpop.f32.mrb[140].mxu0 }
0x1293   :  { %v6462_v22 = vadd.f32 %v6452_v54, %v4625_v11  ;;  %v5490_v50 = vpop.f32.mrb[141].mxu0 }
0x1294   :  { %v6463_v38 = vadd.f32 %v5490_v50, %v4623_v51  ;;  %v6453_v59 = vpop.f32.mrb[142].mxu0 }
0x1295   :  { %5519 = vst.msk [vmem:[#allocation12 + $0x30] sm:$0xff] %vm118_vm0, %v6462_v22  ;;  %v6464_v25 = vadd.f32 %v6453_v59, %v4626_v17  ;;  %v5493_v47 = vpop.f32.mrb[143].mxu0 }
0x1296   :  { %5517 = vst.msk [vmem:[#allocation12 + $0x20] sm:$0xff] %vm118_vm0, %v6463_v38  ;;  %v6465_v12 = vadd.f32 %v5493_v47, %v4624_v2 }
0x1297   :  { %5520 = vst.msk [vmem:[#allocation12 + $0x38] sm:$0xff] %vm118_vm0, %v6464_v25 }
0x1298   :  { %5518 = vst.msk [vmem:[#allocation12 + $0x28] sm:$0xff] %vm118_vm0, %v6465_v12 }
0x1299   :  { %6889 = shalt.err (!%p6886_p2)
}
0x129a   :  { %s6890_s8 = scalar_lea.hbm %s8421_s13, 1024 }
0x129b   :  { %p6891_p3 = scmp.ne.s32.totalorder %s8421_s13, %s6890_s8  ;;  %p6894_p4 = scmp.lt.u32.totalorder %s6890_s8, %s8421_s13 }
0x129d   :  { %p6896_p5 = pnand %p6894_p4, %p6891_p3 }
0x129f   :  { %6899 = shalt.err (!%p6896_p5)
}
0x12a0   :  { %s6935_s14 = smov 128  }
0x12a1   :  { %5532 = dma.vmem_to_hbm [thread:$0]  %s5527_s27, 1024, %s8421_s13, [#allocation5], %s6935_s14, %s6935_s14, %s6930_s30  }
0x12a2   :  { %6906 = dma.done.wait [#allocation5], 1024  }
0x12a3   :  { %6907 = vsyncadd [#allocation5], 4294966272 }
0x12a4   :  { %5536 = vsyncpa [#allocation4], 1 }
0x12a5   :  { %5537 = vsyncpa [#allocation7], 1 }
0x12a6   :  { %5538 = vsyncpa [#allocation10], 1 }
0x12a7   :  { %5539 = vsyncpa [#allocation5], 1 }

</bundles_post_ra>
